<compile_context>
chip_gen: v6e
topology: v6e:2x2x1
jax: 0.10.0
libtpu: 0.0.40
codegen_flags: <defaults>
</compile_context>

<pallas_src>
import functools

import jax
import jax.numpy as jnp
from jax import lax
from jax.experimental import pallas as pl
from jax.experimental.pallas import tpu as pltpu


def _round_up(x, m):
    return (x + m - 1) // m * m


def _vmem_limit_bytes():
    # Per-generation scoped-VMEM limit: ~3/4 of physical (v5e/v6e 128 MiB ->
    # 96 MiB, v7x 64 MiB -> 48 MiB); safe fallback if the query is unavailable.
    try:
        cap = pltpu.get_tpu_info().vmem_capacity_bytes
        return int(max(min(cap * 3 // 4, 100 * 1024 * 1024), 32 * 1024 * 1024))
    except Exception:
        return 48 * 1024 * 1024


def _ca_block_kernel(x_ref, w_ref, eca_ref, mask_ref, feat_ref, wts_ref,
                     chunk_ref, acc_ref, *, H, W, Wp, C, Cp, K, Ncolp):
    """One batch element.

    x_ref    : (1, C, L)         bf16  flat zero-padded image, L = Hp*Wp
    w_ref    : (K, C, K*Cp)      bf16  merged 7x7 weight, [kh][cout, kw*Cp+cin]
    eca_ref  : (C, C)            f32   banded ECA matrix
    mask_ref : (1, Ncolp)        f32   1/(H*W) on valid cols, 0 on pad cols
    feat_ref : (1, C, Ncolp)     f32   features * channel weights (padded cols)
    wts_ref  : (1, C, 1)         f32   channel-attention weights
    chunk_ref: (2, K*Cp, Ncolp)  bf16  double-buffered per-kh im2col slab
    acc_ref  : (C, Ncolp)        f32   conv accumulator
    """
    # Zero the never-written cin-padding rows of both chunk buffers once per
    # step (their weight columns are zero, but stale VMEM could be NaN bits).
    cpad = Cp - C
    if cpad > 0:
        zpad = jnp.zeros((cpad, Ncolp), jnp.bfloat16)
        for slot in range(2):
            for kw in range(K):
                chunk_ref[slot, pl.ds(kw * Cp + C, cpad), :] = zpad

    # kh-chunked im2col + matmul: chunk kh+1's copies (vld/vst) can overlap
    # chunk kh's vmatmul pushes because the slab is double-buffered.
    for kh in range(K):
        slot = kh % 2
        base = kh * Wp
        for kw in range(K):
            # Tap (kh, kw) is a contiguous lane-shifted window of the flat
            # padded image; destination rows start on a 16-sublane boundary
            # and destination lanes are a full multiple of 128 (unmasked vst).
            chunk_ref[slot, pl.ds(kw * Cp, C), :] = (
                x_ref[0, :, base + kw:base + kw + Ncolp])
        part = jnp.dot(w_ref[kh], chunk_ref[slot],
                       preferred_element_type=jnp.float32)   # (C, Ncolp) f32
        if kh == 0:
            acc_ref[...] = part
        else:
            acc_ref[...] += part

    acc = acc_ref[...]                                        # (C, Ncolp) f32
    # dropout(p=0.1) is identity in eval mode.
    # TODO(synk): training-mode dropout mask (pltpu.prng_*) not implemented.

    # AdaptiveAvgPool2d(1): masked lane reduction; the mask folds in 1/(H*W)
    # and zeroes both the width-pad and the lane-pad columns.
    y = jnp.sum(acc * mask_ref[...], axis=1, keepdims=True)           # (C, 1)

    # ECA Conv1d(1,1,k) over channels as a banded matmul, then exact sigmoid
    # (parity with torch.sigmoid; negligible cost on a (C,1) vector).
    eca = jnp.dot(eca_ref[...], y, preferred_element_type=jnp.float32)
    wts = 1.0 / (1.0 + jnp.exp(-eca))                                  # (C, 1)

    # NOTE: feat stays f32 to match the PyTorch module; switch the out_shape to
    # bf16 if the downstream consumer tolerates it (halves output HBM traffic).
    feat_ref[...] = (acc * wts).reshape(1, C, Ncolp)
    wts_ref[...] = wts.reshape(1, C, 1)


def ca_block_forward(x_nchw, w3, w5, w7, w_eca):
    """x_nchw: (B, C, H, W). w3/w5/w7: OIHW conv weights. w_eca: (1, 1, k)."""
    B, C, H, W = x_nchw.shape
    K, P = 7, 3
    Wp = W + 2 * P                     # width incl. SAME padding
    Ncol = H * Wp                      # real output columns (row pitch Wp)
    Ncolp = _round_up(Ncol, 128)       # lane-dense column count
    Cp = _round_up(C, 16)              # per-tap row pitch (bf16 sublane pack)

    # Flat padded-image length: every tap window [s, s+Ncolp) must stay in
    # bounds (s_max = (K-1)*Wp + K-1); this always leaves >= P+1 bottom rows.
    L = _round_up((K - 1) * Wp + (K - 1) + Ncolp, Wp)
    Hp = L // Wp

    # Merge the three same-padded convs into one 7x7 conv (linearity); layout
    # (kh, cout, kw*Cp + cin) so chunk kh is a full leading-axis slab; pad cin
    # to the Cp pitch with zero columns; bf16 MXU operands (f32 accumulate).
    wc = (w7
          + jnp.pad(w5, ((0, 0), (0, 0), (1, 1), (1, 1)))
          + jnp.pad(w3, ((0, 0), (0, 0), (2, 2), (2, 2))))          # (C,C,7,7)
    w_mat = jnp.transpose(wc, (2, 0, 3, 1))                         # (K,C,K,Ci)
    w_mat = jnp.pad(w_mat, ((0, 0), (0, 0), (0, 0), (0, Cp - C)))
    w_mat = w_mat.reshape(K, C, K * Cp).astype(jnp.bfloat16)

    # Banded ECA matrix: eca[c] = sum_j M[c, j] * y[j], M[c, j] = w[j - c + pe].
    ke = w_eca.shape[-1]
    pe = (ke - 1) // 2
    rr = jnp.arange(C)[:, None]
    cc = jnp.arange(C)[None, :]
    idx = cc - rr + pe
    valid = (idx >= 0) & (idx < ke)
    eca_flat = w_eca.reshape(-1)
    eca_mat = jnp.where(valid, eca_flat[jnp.clip(idx, 0, ke - 1)],
                        0.0).astype(jnp.float32)

    # Pooling mask: 1/(H*W) on real pixels, 0 on width-pad and lane-pad cols.
    col = jnp.arange(Ncolp)
    mask = jnp.where((col < Ncol) & ((col % Wp) < W), 1.0 / (H * W), 0.0)
    mask = mask.astype(jnp.float32).reshape(1, Ncolp)

    # NCHW stays NCHW: zero-pad spatially, contiguous flatten, cast to bf16
    # (halves input HBM traffic; the conv runs in bf16 on the MXU anyway).
    # TODO(synk): move the zero-pad in-kernel (pre-zeroed VMEM scratch +
    # interior copy) to drop this extra HBM pass over the input.
    x_pad = jnp.pad(x_nchw, ((0, 0), (0, 0), (P, Hp - H - P), (P, P)))
    x_flat = x_pad.reshape(B, C, Hp * Wp).astype(jnp.bfloat16)

    kernel = functools.partial(_ca_block_kernel, H=H, W=W, Wp=Wp, C=C, Cp=Cp,
                               K=K, Ncolp=Ncolp)
    vmem_limit = _vmem_limit_bytes()

    def _call(single_buffer_invariants):
        # Grid-invariant operands are fetched once; single-buffering them
        # returns their second pipeline buffer's VMEM.
        inv = (dict(pipeline_mode=pl.Buffered(1))
               if single_buffer_invariants else {})
        return pl.pallas_call(
            kernel,
            out_shape=(jax.ShapeDtypeStruct((B, C, Ncolp), jnp.float32),
                       jax.ShapeDtypeStruct((B, C, 1), jnp.float32)),
            grid=(B,),
            in_specs=[
                pl.BlockSpec((1, C, Hp * Wp), lambda b: (b, 0, 0)),
                pl.BlockSpec((K, C, K * Cp), lambda b: (0, 0, 0), **inv),
                pl.BlockSpec((C, C), lambda b: (0, 0), **inv),
                pl.BlockSpec((1, Ncolp), lambda b: (0, 0), **inv),
            ],
            out_specs=(
                pl.BlockSpec((1, C, Ncolp), lambda b: (b, 0, 0)),  # lane-dense
                pl.BlockSpec((1, C, 1), lambda b: (b, 0, 0)),
            ),
            scratch_shapes=[pltpu.VMEM((2, K * Cp, Ncolp), jnp.bfloat16),
                            pltpu.VMEM((C, Ncolp), jnp.float32)],
            compiler_params=pltpu.CompilerParams(
                dimension_semantics=("parallel",),
                vmem_limit_bytes=vmem_limit,
            ),
        )(x_flat, w_mat, eca_mat, mask)

    try:
        feat, wts = _call(True)
    except Exception:
        # Fallback for jax builds where pipeline_mode=pl.Buffered(1) is rejected.
        feat, wts = _call(False)

    # TODO(synk): when B == 1 on v7x (2 TCs/chip), add a second "parallel" grid
    # axis (channel groups / spatial tiles) so both TensorCores have work.
    # TODO(synk): for production H*W, tile Ncolp with an extra "arbitrary" grid
    # axis (>=512-lane tiles), accumulate the pooled sum in a scratch under
    # pl.when, and apply the wts scale in a second cheap pass.

    # Cheap wrapper-side slices drop the lane-pad and width-pad columns; keep
    # the padded (B, C, Ncolp) layout instead if the consumer tolerates it.
    feat_nchw = feat[:, :, :Ncol].reshape(B, C, H, Wp)[:, :, :, :W]
    weights = wts.reshape(B, C, 1, 1)
    return feat_nchw, weights


def ref_forward(x, w3, w5, w7, w_eca):
    """Pure-JAX reference mirroring the PyTorch forward (eval mode)."""
    dn = ("NCHW", "OIHW", "NCHW")
    f = (lax.conv_general_dilated(x, w3, (1, 1), "SAME", dimension_numbers=dn)
         + lax.conv_general_dilated(x, w5, (1, 1), "SAME", dimension_numbers=dn)
         + lax.conv_general_dilated(x, w7, (1, 1), "SAME", dimension_numbers=dn))
    y = jnp.mean(f, axis=(2, 3))                                    # (B, C)
    ke = w_eca.shape[-1]
    pe = (ke - 1) // 2
    ypad = jnp.pad(y, ((0, 0), (pe, pe)))
    eca = sum(w_eca[0, 0, k] * ypad[:, k:k + y.shape[1]] for k in range(ke))
    wts = jax.nn.sigmoid(eca)                                       # (B, C)
    return f * wts[:, :, None, None], wts[:, :, None, None]


if __name__ == "__main__":
    B, C, H, W = 2, 4, 16, 16
    key = jax.random.PRNGKey(0)
    kx, k3, k5, k7, kec = jax.random.split(key, 5)

    x = jax.random.normal(kx, (B, C, H, W), jnp.float32)
    # Deterministic synthetic parameters (shapes from CABlock.__init__; convs bias=False).
    w3 = jax.random.normal(k3, (C, C, 3, 3), jnp.float32) * 0.10
    w5 = jax.random.normal(k5, (C, C, 5, 5), jnp.float32) * 0.05
    w7 = jax.random.normal(k7, (C, C, 7, 7), jnp.float32) * 0.02
    w_eca = jax.random.normal(kec, (1, 1, 3), jnp.float32) * 0.50

    feat, wts = jax.block_until_ready(ca_block_forward(x, w3, w5, w7, w_eca))

    rf, rw = ref_forward(x, w3, w5, w7, w_eca)
    assert feat.shape == (B, C, H, W) and wts.shape == (B, C, 1, 1)
    # bf16 MXU operands -> slightly looser tolerance than the f32 reference.
    assert jnp.allclose(feat, rf, atol=2e-2, rtol=2e-2), float(jnp.max(jnp.abs(feat - rf)))
    assert jnp.allclose(wts, rw, atol=2e-2, rtol=2e-2), float(jnp.max(jnp.abs(wts - rw)))
    print("KERNEL_OK")
</pallas_src>

<mosaic_0001>
module attributes {stable_mosaic.version = 11 : i64} {
  func.func @_ca_block_kernel(%arg0: i32, %arg1: memref<1x4x528xbf16, #tpu.memory_space<vmem>>, %arg2: memref<7x4x112xbf16, #tpu.memory_space<vmem>>, %arg3: memref<4x4xf32, #tpu.memory_space<vmem>>, %arg4: memref<1x384xf32, #tpu.memory_space<vmem>>, %arg5: memref<1x4x384xf32, #tpu.memory_space<vmem>>, %arg6: memref<1x4x1xf32, #tpu.memory_space<vmem>>, %arg7: memref<2x112x384xbf16, #tpu.memory_space<vmem>>, %arg8: memref<4x384xf32, #tpu.memory_space<vmem>>) attributes {dimension_semantics = [#tpu.dimension_semantics<parallel>], iteration_bounds = array<i64: 2>, scalar_prefetch = 0 : i64, scratch_operands = 2 : i64, tpu.core_type = #tpu.core_type<tc>, window_params = [{transform_indices = @transform_0, window_bounds = array<i64: 1, 4, 528>}, {pipeline_mode = #tpu.pipeline_mode<synchronous>, transform_indices = @transform_1, window_bounds = array<i64: 7, 4, 112>}, {pipeline_mode = #tpu.pipeline_mode<synchronous>, transform_indices = @transform_2, window_bounds = array<i64: 4, 4>}, {pipeline_mode = #tpu.pipeline_mode<synchronous>, transform_indices = @transform_3, window_bounds = array<i64: 1, 384>}, {transform_indices = @transform_4, window_bounds = array<i64: 1, 4, 384>}, {transform_indices = @transform_5, window_bounds = array<i64: 1, 4, 1>}]} {
    %cst = arith.constant 0.000000e+00 : bf16
    %0 = vector.broadcast %cst : bf16 to vector<12x384xbf16>
    %c0 = arith.constant 0 : index
    %c4 = arith.constant 4 : index
    %c0_0 = arith.constant 0 : index
    %1 = vector.load %arg7[%c0, %c4, %c0_0] : memref<2x112x384xbf16, #tpu.memory_space<vmem>>, vector<1x12x384xbf16>
    %2 = vector.shape_cast %1 : vector<1x12x384xbf16> to vector<12x384xbf16>
    %3 = vector.shape_cast %0 : vector<12x384xbf16> to vector<1x12x384xbf16>
    tpu.vector_store %arg7[%c0, %c4, %c0_0], %3 {strides = array<i32>} : memref<2x112x384xbf16, #tpu.memory_space<vmem>>, vector<1x12x384xbf16>,
    %c0_1 = arith.constant 0 : index
    %c20 = arith.constant 20 : index
    %c0_2 = arith.constant 0 : index
    %4 = vector.load %arg7[%c0_1, %c20, %c0_2] : memref<2x112x384xbf16, #tpu.memory_space<vmem>>, vector<1x12x384xbf16>
    %5 = vector.shape_cast %4 : vector<1x12x384xbf16> to vector<12x384xbf16>
    %6 = vector.shape_cast %0 : vector<12x384xbf16> to vector<1x12x384xbf16>
    tpu.vector_store %arg7[%c0_1, %c20, %c0_2], %6 {strides = array<i32>} : memref<2x112x384xbf16, #tpu.memory_space<vmem>>, vector<1x12x384xbf16>,
    %c0_3 = arith.constant 0 : index
    %c36 = arith.constant 36 : index
    %c0_4 = arith.constant 0 : index
    %7 = vector.load %arg7[%c0_3, %c36, %c0_4] : memref<2x112x384xbf16, #tpu.memory_space<vmem>>, vector<1x12x384xbf16>
    %8 = vector.shape_cast %7 : vector<1x12x384xbf16> to vector<12x384xbf16>
    %9 = vector.shape_cast %0 : vector<12x384xbf16> to vector<1x12x384xbf16>
    tpu.vector_store %arg7[%c0_3, %c36, %c0_4], %9 {strides = array<i32>} : memref<2x112x384xbf16, #tpu.memory_space<vmem>>, vector<1x12x384xbf16>,
    %c0_5 = arith.constant 0 : index
    %c52 = arith.constant 52 : index
    %c0_6 = arith.constant 0 : index
    %10 = vector.load %arg7[%c0_5, %c52, %c0_6] : memref<2x112x384xbf16, #tpu.memory_space<vmem>>, vector<1x12x384xbf16>
    %11 = vector.shape_cast %10 : vector<1x12x384xbf16> to vector<12x384xbf16>
    %12 = vector.shape_cast %0 : vector<12x384xbf16> to vector<1x12x384xbf16>
    tpu.vector_store %arg7[%c0_5, %c52, %c0_6], %12 {strides = array<i32>} : memref<2x112x384xbf16, #tpu.memory_space<vmem>>, vector<1x12x384xbf16>,
    %c0_7 = arith.constant 0 : index
    %c68 = arith.constant 68 : index
    %c0_8 = arith.constant 0 : index
    %13 = vector.load %arg7[%c0_7, %c68, %c0_8] : memref<2x112x384xbf16, #tpu.memory_space<vmem>>, vector<1x12x384xbf16>
    %14 = vector.shape_cast %13 : vector<1x12x384xbf16> to vector<12x384xbf16>
    %15 = vector.shape_cast %0 : vector<12x384xbf16> to vector<1x12x384xbf16>
    tpu.vector_store %arg7[%c0_7, %c68, %c0_8], %15 {strides = array<i32>} : memref<2x112x384xbf16, #tpu.memory_space<vmem>>, vector<1x12x384xbf16>,
    %c0_9 = arith.constant 0 : index
    %c84 = arith.constant 84 : index
    %c0_10 = arith.constant 0 : index
    %16 = vector.load %arg7[%c0_9, %c84, %c0_10] : memref<2x112x384xbf16, #tpu.memory_space<vmem>>, vector<1x12x384xbf16>
    %17 = vector.shape_cast %16 : vector<1x12x384xbf16> to vector<12x384xbf16>
    %18 = vector.shape_cast %0 : vector<12x384xbf16> to vector<1x12x384xbf16>
    tpu.vector_store %arg7[%c0_9, %c84, %c0_10], %18 {strides = array<i32>} : memref<2x112x384xbf16, #tpu.memory_space<vmem>>, vector<1x12x384xbf16>,
    %c0_11 = arith.constant 0 : index
    %c100 = arith.constant 100 : index
    %c0_12 = arith.constant 0 : index
    %19 = vector.load %arg7[%c0_11, %c100, %c0_12] : memref<2x112x384xbf16, #tpu.memory_space<vmem>>, vector<1x12x384xbf16>
    %20 = vector.shape_cast %19 : vector<1x12x384xbf16> to vector<12x384xbf16>
    %21 = vector.shape_cast %0 : vector<12x384xbf16> to vector<1x12x384xbf16>
    tpu.vector_store %arg7[%c0_11, %c100, %c0_12], %21 {strides = array<i32>} : memref<2x112x384xbf16, #tpu.memory_space<vmem>>, vector<1x12x384xbf16>,
    %c1 = arith.constant 1 : index
    %c4_13 = arith.constant 4 : index
    %c0_14 = arith.constant 0 : index
    %22 = vector.load %arg7[%c1, %c4_13, %c0_14] : memref<2x112x384xbf16, #tpu.memory_space<vmem>>, vector<1x12x384xbf16>
    %23 = vector.shape_cast %22 : vector<1x12x384xbf16> to vector<12x384xbf16>
    %24 = vector.shape_cast %0 : vector<12x384xbf16> to vector<1x12x384xbf16>
    tpu.vector_store %arg7[%c1, %c4_13, %c0_14], %24 {strides = array<i32>} : memref<2x112x384xbf16, #tpu.memory_space<vmem>>, vector<1x12x384xbf16>,
    %c1_15 = arith.constant 1 : index
    %c20_16 = arith.constant 20 : index
    %c0_17 = arith.constant 0 : index
    %25 = vector.load %arg7[%c1_15, %c20_16, %c0_17] : memref<2x112x384xbf16, #tpu.memory_space<vmem>>, vector<1x12x384xbf16>
    %26 = vector.shape_cast %25 : vector<1x12x384xbf16> to vector<12x384xbf16>
    %27 = vector.shape_cast %0 : vector<12x384xbf16> to vector<1x12x384xbf16>
    tpu.vector_store %arg7[%c1_15, %c20_16, %c0_17], %27 {strides = array<i32>} : memref<2x112x384xbf16, #tpu.memory_space<vmem>>, vector<1x12x384xbf16>,
    %c1_18 = arith.constant 1 : index
    %c36_19 = arith.constant 36 : index
    %c0_20 = arith.constant 0 : index
    %28 = vector.load %arg7[%c1_18, %c36_19, %c0_20] : memref<2x112x384xbf16, #tpu.memory_space<vmem>>, vector<1x12x384xbf16>
    %29 = vector.shape_cast %28 : vector<1x12x384xbf16> to vector<12x384xbf16>
    %30 = vector.shape_cast %0 : vector<12x384xbf16> to vector<1x12x384xbf16>
    tpu.vector_store %arg7[%c1_18, %c36_19, %c0_20], %30 {strides = array<i32>} : memref<2x112x384xbf16, #tpu.memory_space<vmem>>, vector<1x12x384xbf16>,
    %c1_21 = arith.constant 1 : index
    %c52_22 = arith.constant 52 : index
    %c0_23 = arith.constant 0 : index
    %31 = vector.load %arg7[%c1_21, %c52_22, %c0_23] : memref<2x112x384xbf16, #tpu.memory_space<vmem>>, vector<1x12x384xbf16>
    %32 = vector.shape_cast %31 : vector<1x12x384xbf16> to vector<12x384xbf16>
    %33 = vector.shape_cast %0 : vector<12x384xbf16> to vector<1x12x384xbf16>
    tpu.vector_store %arg7[%c1_21, %c52_22, %c0_23], %33 {strides = array<i32>} : memref<2x112x384xbf16, #tpu.memory_space<vmem>>, vector<1x12x384xbf16>,
    %c1_24 = arith.constant 1 : index
    %c68_25 = arith.constant 68 : index
    %c0_26 = arith.constant 0 : index
    %34 = vector.load %arg7[%c1_24, %c68_25, %c0_26] : memref<2x112x384xbf16, #tpu.memory_space<vmem>>, vector<1x12x384xbf16>
    %35 = vector.shape_cast %34 : vector<1x12x384xbf16> to vector<12x384xbf16>
    %36 = vector.shape_cast %0 : vector<12x384xbf16> to vector<1x12x384xbf16>
    tpu.vector_store %arg7[%c1_24, %c68_25, %c0_26], %36 {strides = array<i32>} : memref<2x112x384xbf16, #tpu.memory_space<vmem>>, vector<1x12x384xbf16>,
    %c1_27 = arith.constant 1 : index
    %c84_28 = arith.constant 84 : index
    %c0_29 = arith.constant 0 : index
    %37 = vector.load %arg7[%c1_27, %c84_28, %c0_29] : memref<2x112x384xbf16, #tpu.memory_space<vmem>>, vector<1x12x384xbf16>
    %38 = vector.shape_cast %37 : vector<1x12x384xbf16> to vector<12x384xbf16>
    %39 = vector.shape_cast %0 : vector<12x384xbf16> to vector<1x12x384xbf16>
    tpu.vector_store %arg7[%c1_27, %c84_28, %c0_29], %39 {strides = array<i32>} : memref<2x112x384xbf16, #tpu.memory_space<vmem>>, vector<1x12x384xbf16>,
    %c1_30 = arith.constant 1 : index
    %c100_31 = arith.constant 100 : index
    %c0_32 = arith.constant 0 : index
    %40 = vector.load %arg7[%c1_30, %c100_31, %c0_32] : memref<2x112x384xbf16, #tpu.memory_space<vmem>>, vector<1x12x384xbf16>
    %41 = vector.shape_cast %40 : vector<1x12x384xbf16> to vector<12x384xbf16>
    %42 = vector.shape_cast %0 : vector<12x384xbf16> to vector<1x12x384xbf16>
    tpu.vector_store %arg7[%c1_30, %c100_31, %c0_32], %42 {strides = array<i32>} : memref<2x112x384xbf16, #tpu.memory_space<vmem>>, vector<1x12x384xbf16>,
    %c0_33 = arith.constant 0 : index
    %c0_34 = arith.constant 0 : index
    %c0_35 = arith.constant 0 : index
    %43 = vector.load %arg1[%c0_33, %c0_34, %c0_35] : memref<1x4x528xbf16, #tpu.memory_space<vmem>>, vector<1x4x384xbf16>
    %44 = vector.shape_cast %43 : vector<1x4x384xbf16> to vector<4x384xbf16>
    %c0_36 = arith.constant 0 : index
    %c0_37 = arith.constant 0 : index
    %c0_38 = arith.constant 0 : index
    %45 = vector.load %arg7[%c0_36, %c0_37, %c0_38] : memref<2x112x384xbf16, #tpu.memory_space<vmem>>, vector<1x4x384xbf16>
    %46 = vector.shape_cast %45 : vector<1x4x384xbf16> to vector<4x384xbf16>
    %47 = vector.shape_cast %44 : vector<4x384xbf16> to vector<1x4x384xbf16>
    tpu.vector_store %arg7[%c0_36, %c0_37, %c0_38], %47 {strides = array<i32>} : memref<2x112x384xbf16, #tpu.memory_space<vmem>>, vector<1x4x384xbf16>,
    %c0_39 = arith.constant 0 : index
    %c0_40 = arith.constant 0 : index
    %c1_41 = arith.constant 1 : index
    %48 = vector.load %arg1[%c0_39, %c0_40, %c1_41] : memref<1x4x528xbf16, #tpu.memory_space<vmem>>, vector<1x4x384xbf16>
    %49 = vector.shape_cast %48 : vector<1x4x384xbf16> to vector<4x384xbf16>
    %c0_42 = arith.constant 0 : index
    %c16 = arith.constant 16 : index
    %c0_43 = arith.constant 0 : index
    %50 = vector.load %arg7[%c0_42, %c16, %c0_43] : memref<2x112x384xbf16, #tpu.memory_space<vmem>>, vector<1x4x384xbf16>
    %51 = vector.shape_cast %50 : vector<1x4x384xbf16> to vector<4x384xbf16>
    %52 = vector.shape_cast %49 : vector<4x384xbf16> to vector<1x4x384xbf16>
    tpu.vector_store %arg7[%c0_42, %c16, %c0_43], %52 {strides = array<i32>} : memref<2x112x384xbf16, #tpu.memory_space<vmem>>, vector<1x4x384xbf16>,
    %c0_44 = arith.constant 0 : index
    %c0_45 = arith.constant 0 : index
    %c2 = arith.constant 2 : index
    %53 = vector.load %arg1[%c0_44, %c0_45, %c2] : memref<1x4x528xbf16, #tpu.memory_space<vmem>>, vector<1x4x384xbf16>
    %54 = vector.shape_cast %53 : vector<1x4x384xbf16> to vector<4x384xbf16>
    %c0_46 = arith.constant 0 : index
    %c32 = arith.constant 32 : index
    %c0_47 = arith.constant 0 : index
    %55 = vector.load %arg7[%c0_46, %c32, %c0_47] : memref<2x112x384xbf16, #tpu.memory_space<vmem>>, vector<1x4x384xbf16>
    %56 = vector.shape_cast %55 : vector<1x4x384xbf16> to vector<4x384xbf16>
    %57 = vector.shape_cast %54 : vector<4x384xbf16> to vector<1x4x384xbf16>
    tpu.vector_store %arg7[%c0_46, %c32, %c0_47], %57 {strides = array<i32>} : memref<2x112x384xbf16, #tpu.memory_space<vmem>>, vector<1x4x384xbf16>,
    %c0_48 = arith.constant 0 : index
    %c0_49 = arith.constant 0 : index
    %c3 = arith.constant 3 : index
    %58 = vector.load %arg1[%c0_48, %c0_49, %c3] : memref<1x4x528xbf16, #tpu.memory_space<vmem>>, vector<1x4x384xbf16>
    %59 = vector.shape_cast %58 : vector<1x4x384xbf16> to vector<4x384xbf16>
    %c0_50 = arith.constant 0 : index
    %c48 = arith.constant 48 : index
    %c0_51 = arith.constant 0 : index
    %60 = vector.load %arg7[%c0_50, %c48, %c0_51] : memref<2x112x384xbf16, #tpu.memory_space<vmem>>, vector<1x4x384xbf16>
    %61 = vector.shape_cast %60 : vector<1x4x384xbf16> to vector<4x384xbf16>
    %62 = vector.shape_cast %59 : vector<4x384xbf16> to vector<1x4x384xbf16>
    tpu.vector_store %arg7[%c0_50, %c48, %c0_51], %62 {strides = array<i32>} : memref<2x112x384xbf16, #tpu.memory_space<vmem>>, vector<1x4x384xbf16>,
    %c0_52 = arith.constant 0 : index
    %c0_53 = arith.constant 0 : index
    %c4_54 = arith.constant 4 : index
    %63 = vector.load %arg1[%c0_52, %c0_53, %c4_54] : memref<1x4x528xbf16, #tpu.memory_space<vmem>>, vector<1x4x384xbf16>
    %64 = vector.shape_cast %63 : vector<1x4x384xbf16> to vector<4x384xbf16>
    %c0_55 = arith.constant 0 : index
    %c64 = arith.constant 64 : index
    %c0_56 = arith.constant 0 : index
    %65 = vector.load %arg7[%c0_55, %c64, %c0_56] : memref<2x112x384xbf16, #tpu.memory_space<vmem>>, vector<1x4x384xbf16>
    %66 = vector.shape_cast %65 : vector<1x4x384xbf16> to vector<4x384xbf16>
    %67 = vector.shape_cast %64 : vector<4x384xbf16> to vector<1x4x384xbf16>
    tpu.vector_store %arg7[%c0_55, %c64, %c0_56], %67 {strides = array<i32>} : memref<2x112x384xbf16, #tpu.memory_space<vmem>>, vector<1x4x384xbf16>,
    %c0_57 = arith.constant 0 : index
    %c0_58 = arith.constant 0 : index
    %c5 = arith.constant 5 : index
    %68 = vector.load %arg1[%c0_57, %c0_58, %c5] : memref<1x4x528xbf16, #tpu.memory_space<vmem>>, vector<1x4x384xbf16>
    %69 = vector.shape_cast %68 : vector<1x4x384xbf16> to vector<4x384xbf16>
    %c0_59 = arith.constant 0 : index
    %c80 = arith.constant 80 : index
    %c0_60 = arith.constant 0 : index
    %70 = vector.load %arg7[%c0_59, %c80, %c0_60] : memref<2x112x384xbf16, #tpu.memory_space<vmem>>, vector<1x4x384xbf16>
    %71 = vector.shape_cast %70 : vector<1x4x384xbf16> to vector<4x384xbf16>
    %72 = vector.shape_cast %69 : vector<4x384xbf16> to vector<1x4x384xbf16>
    tpu.vector_store %arg7[%c0_59, %c80, %c0_60], %72 {strides = array<i32>} : memref<2x112x384xbf16, #tpu.memory_space<vmem>>, vector<1x4x384xbf16>,
    %c0_61 = arith.constant 0 : index
    %c0_62 = arith.constant 0 : index
    %c6 = arith.constant 6 : index
    %73 = vector.load %arg1[%c0_61, %c0_62, %c6] : memref<1x4x528xbf16, #tpu.memory_space<vmem>>, vector<1x4x384xbf16>
    %74 = vector.shape_cast %73 : vector<1x4x384xbf16> to vector<4x384xbf16>
    %c0_63 = arith.constant 0 : index
    %c96 = arith.constant 96 : index
    %c0_64 = arith.constant 0 : index
    %75 = vector.load %arg7[%c0_63, %c96, %c0_64] : memref<2x112x384xbf16, #tpu.memory_space<vmem>>, vector<1x4x384xbf16>
    %76 = vector.shape_cast %75 : vector<1x4x384xbf16> to vector<4x384xbf16>
    %77 = vector.shape_cast %74 : vector<4x384xbf16> to vector<1x4x384xbf16>
    tpu.vector_store %arg7[%c0_63, %c96, %c0_64], %77 {strides = array<i32>} : memref<2x112x384xbf16, #tpu.memory_space<vmem>>, vector<1x4x384xbf16>,
    %c0_65 = arith.constant 0 : index
    %c0_66 = arith.constant 0 : index
    %c0_67 = arith.constant 0 : index
    %78 = vector.load %arg2[%c0_65, %c0_66, %c0_67] : memref<7x4x112xbf16, #tpu.memory_space<vmem>>, vector<1x4x112xbf16>
    %79 = vector.shape_cast %78 : vector<1x4x112xbf16> to vector<4x112xbf16>
    %c0_68 = arith.constant 0 : index
    %c0_69 = arith.constant 0 : index
    %c0_70 = arith.constant 0 : index
    %80 = vector.load %arg7[%c0_68, %c0_69, %c0_70] : memref<2x112x384xbf16, #tpu.memory_space<vmem>>, vector<1x112x384xbf16>
    %81 = vector.shape_cast %80 : vector<1x112x384xbf16> to vector<112x384xbf16>
    %cst_71 = arith.constant dense<0.000000e+00> : vector<4x384xf32>
    %82 = tpu.matmul %79, %81, %cst_71 {dimension_numbers = #tpu.dot_dimension_numbers<[1], [0], [0], [1], [0, 0, 1, 1], [], []>} : vector<4x112xbf16>, vector<112x384xbf16>, vector<4x384xf32> -> vector<4x384xf32>
    %c0_72 = arith.constant 0 : index
    %c0_73 = arith.constant 0 : index
    %83 = vector.load %arg8[%c0_72, %c0_73] : memref<4x384xf32, #tpu.memory_space<vmem>>, vector<4x384xf32>
    tpu.vector_store %arg8[%c0_72, %c0_73], %82 {strides = array<i32>} : memref<4x384xf32, #tpu.memory_space<vmem>>, vector<4x384xf32>,
    %c0_74 = arith.constant 0 : index
    %c0_75 = arith.constant 0 : index
    %c22 = arith.constant 22 : index
    %84 = vector.load %arg1[%c0_74, %c0_75, %c22] : memref<1x4x528xbf16, #tpu.memory_space<vmem>>, vector<1x4x384xbf16>
    %85 = vector.shape_cast %84 : vector<1x4x384xbf16> to vector<4x384xbf16>
    %c1_76 = arith.constant 1 : index
    %c0_77 = arith.constant 0 : index
    %c0_78 = arith.constant 0 : index
    %86 = vector.load %arg7[%c1_76, %c0_77, %c0_78] : memref<2x112x384xbf16, #tpu.memory_space<vmem>>, vector<1x4x384xbf16>
    %87 = vector.shape_cast %86 : vector<1x4x384xbf16> to vector<4x384xbf16>
    %88 = vector.shape_cast %85 : vector<4x384xbf16> to vector<1x4x384xbf16>
    tpu.vector_store %arg7[%c1_76, %c0_77, %c0_78], %88 {strides = array<i32>} : memref<2x112x384xbf16, #tpu.memory_space<vmem>>, vector<1x4x384xbf16>,
    %c0_79 = arith.constant 0 : index
    %c0_80 = arith.constant 0 : index
    %c23 = arith.constant 23 : index
    %89 = vector.load %arg1[%c0_79, %c0_80, %c23] : memref<1x4x528xbf16, #tpu.memory_space<vmem>>, vector<1x4x384xbf16>
    %90 = vector.shape_cast %89 : vector<1x4x384xbf16> to vector<4x384xbf16>
    %c1_81 = arith.constant 1 : index
    %c16_82 = arith.constant 16 : index
    %c0_83 = arith.constant 0 : index
    %91 = vector.load %arg7[%c1_81, %c16_82, %c0_83] : memref<2x112x384xbf16, #tpu.memory_space<vmem>>, vector<1x4x384xbf16>
    %92 = vector.shape_cast %91 : vector<1x4x384xbf16> to vector<4x384xbf16>
    %93 = vector.shape_cast %90 : vector<4x384xbf16> to vector<1x4x384xbf16>
    tpu.vector_store %arg7[%c1_81, %c16_82, %c0_83], %93 {strides = array<i32>} : memref<2x112x384xbf16, #tpu.memory_space<vmem>>, vector<1x4x384xbf16>,
    %c0_84 = arith.constant 0 : index
    %c0_85 = arith.constant 0 : index
    %c24 = arith.constant 24 : index
    %94 = vector.load %arg1[%c0_84, %c0_85, %c24] : memref<1x4x528xbf16, #tpu.memory_space<vmem>>, vector<1x4x384xbf16>
    %95 = vector.shape_cast %94 : vector<1x4x384xbf16> to vector<4x384xbf16>
    %c1_86 = arith.constant 1 : index
    %c32_87 = arith.constant 32 : index
    %c0_88 = arith.constant 0 : index
    %96 = vector.load %arg7[%c1_86, %c32_87, %c0_88] : memref<2x112x384xbf16, #tpu.memory_space<vmem>>, vector<1x4x384xbf16>
    %97 = vector.shape_cast %96 : vector<1x4x384xbf16> to vector<4x384xbf16>
    %98 = vector.shape_cast %95 : vector<4x384xbf16> to vector<1x4x384xbf16>
    tpu.vector_store %arg7[%c1_86, %c32_87, %c0_88], %98 {strides = array<i32>} : memref<2x112x384xbf16, #tpu.memory_space<vmem>>, vector<1x4x384xbf16>,
    %c0_89 = arith.constant 0 : index
    %c0_90 = arith.constant 0 : index
    %c25 = arith.constant 25 : index
    %99 = vector.load %arg1[%c0_89, %c0_90, %c25] : memref<1x4x528xbf16, #tpu.memory_space<vmem>>, vector<1x4x384xbf16>
    %100 = vector.shape_cast %99 : vector<1x4x384xbf16> to vector<4x384xbf16>
    %c1_91 = arith.constant 1 : index
    %c48_92 = arith.constant 48 : index
    %c0_93 = arith.constant 0 : index
    %101 = vector.load %arg7[%c1_91, %c48_92, %c0_93] : memref<2x112x384xbf16, #tpu.memory_space<vmem>>, vector<1x4x384xbf16>
    %102 = vector.shape_cast %101 : vector<1x4x384xbf16> to vector<4x384xbf16>
    %103 = vector.shape_cast %100 : vector<4x384xbf16> to vector<1x4x384xbf16>
    tpu.vector_store %arg7[%c1_91, %c48_92, %c0_93], %103 {strides = array<i32>} : memref<2x112x384xbf16, #tpu.memory_space<vmem>>, vector<1x4x384xbf16>,
    %c0_94 = arith.constant 0 : index
    %c0_95 = arith.constant 0 : index
    %c26 = arith.constant 26 : index
    %104 = vector.load %arg1[%c0_94, %c0_95, %c26] : memref<1x4x528xbf16, #tpu.memory_space<vmem>>, vector<1x4x384xbf16>
    %105 = vector.shape_cast %104 : vector<1x4x384xbf16> to vector<4x384xbf16>
    %c1_96 = arith.constant 1 : index
    %c64_97 = arith.constant 64 : index
    %c0_98 = arith.constant 0 : index
    %106 = vector.load %arg7[%c1_96, %c64_97, %c0_98] : memref<2x112x384xbf16, #tpu.memory_space<vmem>>, vector<1x4x384xbf16>
    %107 = vector.shape_cast %106 : vector<1x4x384xbf16> to vector<4x384xbf16>
    %108 = vector.shape_cast %105 : vector<4x384xbf16> to vector<1x4x384xbf16>
    tpu.vector_store %arg7[%c1_96, %c64_97, %c0_98], %108 {strides = array<i32>} : memref<2x112x384xbf16, #tpu.memory_space<vmem>>, vector<1x4x384xbf16>,
    %c0_99 = arith.constant 0 : index
    %c0_100 = arith.constant 0 : index
    %c27 = arith.constant 27 : index
    %109 = vector.load %arg1[%c0_99, %c0_100, %c27] : memref<1x4x528xbf16, #tpu.memory_space<vmem>>, vector<1x4x384xbf16>
    %110 = vector.shape_cast %109 : vector<1x4x384xbf16> to vector<4x384xbf16>
    %c1_101 = arith.constant 1 : index
    %c80_102 = arith.constant 80 : index
    %c0_103 = arith.constant 0 : index
    %111 = vector.load %arg7[%c1_101, %c80_102, %c0_103] : memref<2x112x384xbf16, #tpu.memory_space<vmem>>, vector<1x4x384xbf16>
    %112 = vector.shape_cast %111 : vector<1x4x384xbf16> to vector<4x384xbf16>
    %113 = vector.shape_cast %110 : vector<4x384xbf16> to vector<1x4x384xbf16>
    tpu.vector_store %arg7[%c1_101, %c80_102, %c0_103], %113 {strides = array<i32>} : memref<2x112x384xbf16, #tpu.memory_space<vmem>>, vector<1x4x384xbf16>,
    %c0_104 = arith.constant 0 : index
    %c0_105 = arith.constant 0 : index
    %c28 = arith.constant 28 : index
    %114 = vector.load %arg1[%c0_104, %c0_105, %c28] : memref<1x4x528xbf16, #tpu.memory_space<vmem>>, vector<1x4x384xbf16>
    %115 = vector.shape_cast %114 : vector<1x4x384xbf16> to vector<4x384xbf16>
    %c1_106 = arith.constant 1 : index
    %c96_107 = arith.constant 96 : index
    %c0_108 = arith.constant 0 : index
    %116 = vector.load %arg7[%c1_106, %c96_107, %c0_108] : memref<2x112x384xbf16, #tpu.memory_space<vmem>>, vector<1x4x384xbf16>
    %117 = vector.shape_cast %116 : vector<1x4x384xbf16> to vector<4x384xbf16>
    %118 = vector.shape_cast %115 : vector<4x384xbf16> to vector<1x4x384xbf16>
    tpu.vector_store %arg7[%c1_106, %c96_107, %c0_108], %118 {strides = array<i32>} : memref<2x112x384xbf16, #tpu.memory_space<vmem>>, vector<1x4x384xbf16>,
    %c1_109 = arith.constant 1 : index
    %c0_110 = arith.constant 0 : index
    %c0_111 = arith.constant 0 : index
    %119 = vector.load %arg2[%c1_109, %c0_110, %c0_111] : memref<7x4x112xbf16, #tpu.memory_space<vmem>>, vector<1x4x112xbf16>
    %120 = vector.shape_cast %119 : vector<1x4x112xbf16> to vector<4x112xbf16>
    %c1_112 = arith.constant 1 : index
    %c0_113 = arith.constant 0 : index
    %c0_114 = arith.constant 0 : index
    %121 = vector.load %arg7[%c1_112, %c0_113, %c0_114] : memref<2x112x384xbf16, #tpu.memory_space<vmem>>, vector<1x112x384xbf16>
    %122 = vector.shape_cast %121 : vector<1x112x384xbf16> to vector<112x384xbf16>
    %cst_115 = arith.constant dense<0.000000e+00> : vector<4x384xf32>
    %123 = tpu.matmul %120, %122, %cst_115 {dimension_numbers = #tpu.dot_dimension_numbers<[1], [0], [0], [1], [0, 0, 1, 1], [], []>} : vector<4x112xbf16>, vector<112x384xbf16>, vector<4x384xf32> -> vector<4x384xf32>
    %c0_116 = arith.constant 0 : index
    %c0_117 = arith.constant 0 : index
    %124 = vector.load %arg8[%c0_116, %c0_117] : memref<4x384xf32, #tpu.memory_space<vmem>>, vector<4x384xf32>
    %125 = arith.addf %124, %123 : vector<4x384xf32>
    %c0_118 = arith.constant 0 : index
    %c0_119 = arith.constant 0 : index
    %126 = vector.load %arg8[%c0_118, %c0_119] : memref<4x384xf32, #tpu.memory_space<vmem>>, vector<4x384xf32>
    tpu.vector_store %arg8[%c0_118, %c0_119], %125 {strides = array<i32>} : memref<4x384xf32, #tpu.memory_space<vmem>>, vector<4x384xf32>,
    %c0_120 = arith.constant 0 : index
    %c0_121 = arith.constant 0 : index
    %c44 = arith.constant 44 : index
    %127 = vector.load %arg1[%c0_120, %c0_121, %c44] : memref<1x4x528xbf16, #tpu.memory_space<vmem>>, vector<1x4x384xbf16>
    %128 = vector.shape_cast %127 : vector<1x4x384xbf16> to vector<4x384xbf16>
    %c0_122 = arith.constant 0 : index
    %c0_123 = arith.constant 0 : index
    %c0_124 = arith.constant 0 : index
    %129 = vector.load %arg7[%c0_122, %c0_123, %c0_124] : memref<2x112x384xbf16, #tpu.memory_space<vmem>>, vector<1x4x384xbf16>
    %130 = vector.shape_cast %129 : vector<1x4x384xbf16> to vector<4x384xbf16>
    %131 = vector.shape_cast %128 : vector<4x384xbf16> to vector<1x4x384xbf16>
    tpu.vector_store %arg7[%c0_122, %c0_123, %c0_124], %131 {strides = array<i32>} : memref<2x112x384xbf16, #tpu.memory_space<vmem>>, vector<1x4x384xbf16>,
    %c0_125 = arith.constant 0 : index
    %c0_126 = arith.constant 0 : index
    %c45 = arith.constant 45 : index
    %132 = vector.load %arg1[%c0_125, %c0_126, %c45] : memref<1x4x528xbf16, #tpu.memory_space<vmem>>, vector<1x4x384xbf16>
    %133 = vector.shape_cast %132 : vector<1x4x384xbf16> to vector<4x384xbf16>
    %c0_127 = arith.constant 0 : index
    %c16_128 = arith.constant 16 : index
    %c0_129 = arith.constant 0 : index
    %134 = vector.load %arg7[%c0_127, %c16_128, %c0_129] : memref<2x112x384xbf16, #tpu.memory_space<vmem>>, vector<1x4x384xbf16>
    %135 = vector.shape_cast %134 : vector<1x4x384xbf16> to vector<4x384xbf16>
    %136 = vector.shape_cast %133 : vector<4x384xbf16> to vector<1x4x384xbf16>
    tpu.vector_store %arg7[%c0_127, %c16_128, %c0_129], %136 {strides = array<i32>} : memref<2x112x384xbf16, #tpu.memory_space<vmem>>, vector<1x4x384xbf16>,
    %c0_130 = arith.constant 0 : index
    %c0_131 = arith.constant 0 : index
    %c46 = arith.constant 46 : index
    %137 = vector.load %arg1[%c0_130, %c0_131, %c46] : memref<1x4x528xbf16, #tpu.memory_space<vmem>>, vector<1x4x384xbf16>
    %138 = vector.shape_cast %137 : vector<1x4x384xbf16> to vector<4x384xbf16>
    %c0_132 = arith.constant 0 : index
    %c32_133 = arith.constant 32 : index
    %c0_134 = arith.constant 0 : index
    %139 = vector.load %arg7[%c0_132, %c32_133, %c0_134] : memref<2x112x384xbf16, #tpu.memory_space<vmem>>, vector<1x4x384xbf16>
    %140 = vector.shape_cast %139 : vector<1x4x384xbf16> to vector<4x384xbf16>
    %141 = vector.shape_cast %138 : vector<4x384xbf16> to vector<1x4x384xbf16>
    tpu.vector_store %arg7[%c0_132, %c32_133, %c0_134], %141 {strides = array<i32>} : memref<2x112x384xbf16, #tpu.memory_space<vmem>>, vector<1x4x384xbf16>,
    %c0_135 = arith.constant 0 : index
    %c0_136 = arith.constant 0 : index
    %c47 = arith.constant 47 : index
    %142 = vector.load %arg1[%c0_135, %c0_136, %c47] : memref<1x4x528xbf16, #tpu.memory_space<vmem>>, vector<1x4x384xbf16>
    %143 = vector.shape_cast %142 : vector<1x4x384xbf16> to vector<4x384xbf16>
    %c0_137 = arith.constant 0 : index
    %c48_138 = arith.constant 48 : index
    %c0_139 = arith.constant 0 : index
    %144 = vector.load %arg7[%c0_137, %c48_138, %c0_139] : memref<2x112x384xbf16, #tpu.memory_space<vmem>>, vector<1x4x384xbf16>
    %145 = vector.shape_cast %144 : vector<1x4x384xbf16> to vector<4x384xbf16>
    %146 = vector.shape_cast %143 : vector<4x384xbf16> to vector<1x4x384xbf16>
    tpu.vector_store %arg7[%c0_137, %c48_138, %c0_139], %146 {strides = array<i32>} : memref<2x112x384xbf16, #tpu.memory_space<vmem>>, vector<1x4x384xbf16>,
    %c0_140 = arith.constant 0 : index
    %c0_141 = arith.constant 0 : index
    %c48_142 = arith.constant 48 : index
    %147 = vector.load %arg1[%c0_140, %c0_141, %c48_142] : memref<1x4x528xbf16, #tpu.memory_space<vmem>>, vector<1x4x384xbf16>
    %148 = vector.shape_cast %147 : vector<1x4x384xbf16> to vector<4x384xbf16>
    %c0_143 = arith.constant 0 : index
    %c64_144 = arith.constant 64 : index
    %c0_145 = arith.constant 0 : index
    %149 = vector.load %arg7[%c0_143, %c64_144, %c0_145] : memref<2x112x384xbf16, #tpu.memory_space<vmem>>, vector<1x4x384xbf16>
    %150 = vector.shape_cast %149 : vector<1x4x384xbf16> to vector<4x384xbf16>
    %151 = vector.shape_cast %148 : vector<4x384xbf16> to vector<1x4x384xbf16>
    tpu.vector_store %arg7[%c0_143, %c64_144, %c0_145], %151 {strides = array<i32>} : memref<2x112x384xbf16, #tpu.memory_space<vmem>>, vector<1x4x384xbf16>,
    %c0_146 = arith.constant 0 : index
    %c0_147 = arith.constant 0 : index
    %c49 = arith.constant 49 : index
    %152 = vector.load %arg1[%c0_146, %c0_147, %c49] : memref<1x4x528xbf16, #tpu.memory_space<vmem>>, vector<1x4x384xbf16>
    %153 = vector.shape_cast %152 : vector<1x4x384xbf16> to vector<4x384xbf16>
    %c0_148 = arith.constant 0 : index
    %c80_149 = arith.constant 80 : index
    %c0_150 = arith.constant 0 : index
    %154 = vector.load %arg7[%c0_148, %c80_149, %c0_150] : memref<2x112x384xbf16, #tpu.memory_space<vmem>>, vector<1x4x384xbf16>
    %155 = vector.shape_cast %154 : vector<1x4x384xbf16> to vector<4x384xbf16>
    %156 = vector.shape_cast %153 : vector<4x384xbf16> to vector<1x4x384xbf16>
    tpu.vector_store %arg7[%c0_148, %c80_149, %c0_150], %156 {strides = array<i32>} : memref<2x112x384xbf16, #tpu.memory_space<vmem>>, vector<1x4x384xbf16>,
    %c0_151 = arith.constant 0 : index
    %c0_152 = arith.constant 0 : index
    %c50 = arith.constant 50 : index
    %157 = vector.load %arg1[%c0_151, %c0_152, %c50] : memref<1x4x528xbf16, #tpu.memory_space<vmem>>, vector<1x4x384xbf16>
    %158 = vector.shape_cast %157 : vector<1x4x384xbf16> to vector<4x384xbf16>
    %c0_153 = arith.constant 0 : index
    %c96_154 = arith.constant 96 : index
    %c0_155 = arith.constant 0 : index
    %159 = vector.load %arg7[%c0_153, %c96_154, %c0_155] : memref<2x112x384xbf16, #tpu.memory_space<vmem>>, vector<1x4x384xbf16>
    %160 = vector.shape_cast %159 : vector<1x4x384xbf16> to vector<4x384xbf16>
    %161 = vector.shape_cast %158 : vector<4x384xbf16> to vector<1x4x384xbf16>
    tpu.vector_store %arg7[%c0_153, %c96_154, %c0_155], %161 {strides = array<i32>} : memref<2x112x384xbf16, #tpu.memory_space<vmem>>, vector<1x4x384xbf16>,
    %c2_156 = arith.constant 2 : index
    %c0_157 = arith.constant 0 : index
    %c0_158 = arith.constant 0 : index
    %162 = vector.load %arg2[%c2_156, %c0_157, %c0_158] : memref<7x4x112xbf16, #tpu.memory_space<vmem>>, vector<1x4x112xbf16>
    %163 = vector.shape_cast %162 : vector<1x4x112xbf16> to vector<4x112xbf16>
    %c0_159 = arith.constant 0 : index
    %c0_160 = arith.constant 0 : index
    %c0_161 = arith.constant 0 : index
    %164 = vector.load %arg7[%c0_159, %c0_160, %c0_161] : memref<2x112x384xbf16, #tpu.memory_space<vmem>>, vector<1x112x384xbf16>
    %165 = vector.shape_cast %164 : vector<1x112x384xbf16> to vector<112x384xbf16>
    %cst_162 = arith.constant dense<0.000000e+00> : vector<4x384xf32>
    %166 = tpu.matmul %163, %165, %cst_162 {dimension_numbers = #tpu.dot_dimension_numbers<[1], [0], [0], [1], [0, 0, 1, 1], [], []>} : vector<4x112xbf16>, vector<112x384xbf16>, vector<4x384xf32> -> vector<4x384xf32>
    %c0_163 = arith.constant 0 : index
    %c0_164 = arith.constant 0 : index
    %167 = vector.load %arg8[%c0_163, %c0_164] : memref<4x384xf32, #tpu.memory_space<vmem>>, vector<4x384xf32>
    %168 = arith.addf %167, %166 : vector<4x384xf32>
    %c0_165 = arith.constant 0 : index
    %c0_166 = arith.constant 0 : index
    %169 = vector.load %arg8[%c0_165, %c0_166] : memref<4x384xf32, #tpu.memory_space<vmem>>, vector<4x384xf32>
    tpu.vector_store %arg8[%c0_165, %c0_166], %168 {strides = array<i32>} : memref<4x384xf32, #tpu.memory_space<vmem>>, vector<4x384xf32>,
    %c0_167 = arith.constant 0 : index
    %c0_168 = arith.constant 0 : index
    %c66 = arith.constant 66 : index
    %170 = vector.load %arg1[%c0_167, %c0_168, %c66] : memref<1x4x528xbf16, #tpu.memory_space<vmem>>, vector<1x4x384xbf16>
    %171 = vector.shape_cast %170 : vector<1x4x384xbf16> to vector<4x384xbf16>
    %c1_169 = arith.constant 1 : index
    %c0_170 = arith.constant 0 : index
    %c0_171 = arith.constant 0 : index
    %172 = vector.load %arg7[%c1_169, %c0_170, %c0_171] : memref<2x112x384xbf16, #tpu.memory_space<vmem>>, vector<1x4x384xbf16>
    %173 = vector.shape_cast %172 : vector<1x4x384xbf16> to vector<4x384xbf16>
    %174 = vector.shape_cast %171 : vector<4x384xbf16> to vector<1x4x384xbf16>
    tpu.vector_store %arg7[%c1_169, %c0_170, %c0_171], %174 {strides = array<i32>} : memref<2x112x384xbf16, #tpu.memory_space<vmem>>, vector<1x4x384xbf16>,
    %c0_172 = arith.constant 0 : index
    %c0_173 = arith.constant 0 : index
    %c67 = arith.constant 67 : index
    %175 = vector.load %arg1[%c0_172, %c0_173, %c67] : memref<1x4x528xbf16, #tpu.memory_space<vmem>>, vector<1x4x384xbf16>
    %176 = vector.shape_cast %175 : vector<1x4x384xbf16> to vector<4x384xbf16>
    %c1_174 = arith.constant 1 : index
    %c16_175 = arith.constant 16 : index
    %c0_176 = arith.constant 0 : index
    %177 = vector.load %arg7[%c1_174, %c16_175, %c0_176] : memref<2x112x384xbf16, #tpu.memory_space<vmem>>, vector<1x4x384xbf16>
    %178 = vector.shape_cast %177 : vector<1x4x384xbf16> to vector<4x384xbf16>
    %179 = vector.shape_cast %176 : vector<4x384xbf16> to vector<1x4x384xbf16>
    tpu.vector_store %arg7[%c1_174, %c16_175, %c0_176], %179 {strides = array<i32>} : memref<2x112x384xbf16, #tpu.memory_space<vmem>>, vector<1x4x384xbf16>,
    %c0_177 = arith.constant 0 : index
    %c0_178 = arith.constant 0 : index
    %c68_179 = arith.constant 68 : index
    %180 = vector.load %arg1[%c0_177, %c0_178, %c68_179] : memref<1x4x528xbf16, #tpu.memory_space<vmem>>, vector<1x4x384xbf16>
    %181 = vector.shape_cast %180 : vector<1x4x384xbf16> to vector<4x384xbf16>
    %c1_180 = arith.constant 1 : index
    %c32_181 = arith.constant 32 : index
    %c0_182 = arith.constant 0 : index
    %182 = vector.load %arg7[%c1_180, %c32_181, %c0_182] : memref<2x112x384xbf16, #tpu.memory_space<vmem>>, vector<1x4x384xbf16>
    %183 = vector.shape_cast %182 : vector<1x4x384xbf16> to vector<4x384xbf16>
    %184 = vector.shape_cast %181 : vector<4x384xbf16> to vector<1x4x384xbf16>
    tpu.vector_store %arg7[%c1_180, %c32_181, %c0_182], %184 {strides = array<i32>} : memref<2x112x384xbf16, #tpu.memory_space<vmem>>, vector<1x4x384xbf16>,
    %c0_183 = arith.constant 0 : index
    %c0_184 = arith.constant 0 : index
    %c69 = arith.constant 69 : index
    %185 = vector.load %arg1[%c0_183, %c0_184, %c69] : memref<1x4x528xbf16, #tpu.memory_space<vmem>>, vector<1x4x384xbf16>
    %186 = vector.shape_cast %185 : vector<1x4x384xbf16> to vector<4x384xbf16>
    %c1_185 = arith.constant 1 : index
    %c48_186 = arith.constant 48 : index
    %c0_187 = arith.constant 0 : index
    %187 = vector.load %arg7[%c1_185, %c48_186, %c0_187] : memref<2x112x384xbf16, #tpu.memory_space<vmem>>, vector<1x4x384xbf16>
    %188 = vector.shape_cast %187 : vector<1x4x384xbf16> to vector<4x384xbf16>
    %189 = vector.shape_cast %186 : vector<4x384xbf16> to vector<1x4x384xbf16>
    tpu.vector_store %arg7[%c1_185, %c48_186, %c0_187], %189 {strides = array<i32>} : memref<2x112x384xbf16, #tpu.memory_space<vmem>>, vector<1x4x384xbf16>,
    %c0_188 = arith.constant 0 : index
    %c0_189 = arith.constant 0 : index
    %c70 = arith.constant 70 : index
    %190 = vector.load %arg1[%c0_188, %c0_189, %c70] : memref<1x4x528xbf16, #tpu.memory_space<vmem>>, vector<1x4x384xbf16>
    %191 = vector.shape_cast %190 : vector<1x4x384xbf16> to vector<4x384xbf16>
    %c1_190 = arith.constant 1 : index
    %c64_191 = arith.constant 64 : index
    %c0_192 = arith.constant 0 : index
    %192 = vector.load %arg7[%c1_190, %c64_191, %c0_192] : memref<2x112x384xbf16, #tpu.memory_space<vmem>>, vector<1x4x384xbf16>
    %193 = vector.shape_cast %192 : vector<1x4x384xbf16> to vector<4x384xbf16>
    %194 = vector.shape_cast %191 : vector<4x384xbf16> to vector<1x4x384xbf16>
    tpu.vector_store %arg7[%c1_190, %c64_191, %c0_192], %194 {strides = array<i32>} : memref<2x112x384xbf16, #tpu.memory_space<vmem>>, vector<1x4x384xbf16>,
    %c0_193 = arith.constant 0 : index
    %c0_194 = arith.constant 0 : index
    %c71 = arith.constant 71 : index
    %195 = vector.load %arg1[%c0_193, %c0_194, %c71] : memref<1x4x528xbf16, #tpu.memory_space<vmem>>, vector<1x4x384xbf16>
    %196 = vector.shape_cast %195 : vector<1x4x384xbf16> to vector<4x384xbf16>
    %c1_195 = arith.constant 1 : index
    %c80_196 = arith.constant 80 : index
    %c0_197 = arith.constant 0 : index
    %197 = vector.load %arg7[%c1_195, %c80_196, %c0_197] : memref<2x112x384xbf16, #tpu.memory_space<vmem>>, vector<1x4x384xbf16>
    %198 = vector.shape_cast %197 : vector<1x4x384xbf16> to vector<4x384xbf16>
    %199 = vector.shape_cast %196 : vector<4x384xbf16> to vector<1x4x384xbf16>
    tpu.vector_store %arg7[%c1_195, %c80_196, %c0_197], %199 {strides = array<i32>} : memref<2x112x384xbf16, #tpu.memory_space<vmem>>, vector<1x4x384xbf16>,
    %c0_198 = arith.constant 0 : index
    %c0_199 = arith.constant 0 : index
    %c72 = arith.constant 72 : index
    %200 = vector.load %arg1[%c0_198, %c0_199, %c72] : memref<1x4x528xbf16, #tpu.memory_space<vmem>>, vector<1x4x384xbf16>
    %201 = vector.shape_cast %200 : vector<1x4x384xbf16> to vector<4x384xbf16>
    %c1_200 = arith.constant 1 : index
    %c96_201 = arith.constant 96 : index
    %c0_202 = arith.constant 0 : index
    %202 = vector.load %arg7[%c1_200, %c96_201, %c0_202] : memref<2x112x384xbf16, #tpu.memory_space<vmem>>, vector<1x4x384xbf16>
    %203 = vector.shape_cast %202 : vector<1x4x384xbf16> to vector<4x384xbf16>
    %204 = vector.shape_cast %201 : vector<4x384xbf16> to vector<1x4x384xbf16>
    tpu.vector_store %arg7[%c1_200, %c96_201, %c0_202], %204 {strides = array<i32>} : memref<2x112x384xbf16, #tpu.memory_space<vmem>>, vector<1x4x384xbf16>,
    %c3_203 = arith.constant 3 : index
    %c0_204 = arith.constant 0 : index
    %c0_205 = arith.constant 0 : index
    %205 = vector.load %arg2[%c3_203, %c0_204, %c0_205] : memref<7x4x112xbf16, #tpu.memory_space<vmem>>, vector<1x4x112xbf16>
    %206 = vector.shape_cast %205 : vector<1x4x112xbf16> to vector<4x112xbf16>
    %c1_206 = arith.constant 1 : index
    %c0_207 = arith.constant 0 : index
    %c0_208 = arith.constant 0 : index
    %207 = vector.load %arg7[%c1_206, %c0_207, %c0_208] : memref<2x112x384xbf16, #tpu.memory_space<vmem>>, vector<1x112x384xbf16>
    %208 = vector.shape_cast %207 : vector<1x112x384xbf16> to vector<112x384xbf16>
    %cst_209 = arith.constant dense<0.000000e+00> : vector<4x384xf32>
    %209 = tpu.matmul %206, %208, %cst_209 {dimension_numbers = #tpu.dot_dimension_numbers<[1], [0], [0], [1], [0, 0, 1, 1], [], []>} : vector<4x112xbf16>, vector<112x384xbf16>, vector<4x384xf32> -> vector<4x384xf32>
    %c0_210 = arith.constant 0 : index
    %c0_211 = arith.constant 0 : index
    %210 = vector.load %arg8[%c0_210, %c0_211] : memref<4x384xf32, #tpu.memory_space<vmem>>, vector<4x384xf32>
    %211 = arith.addf %210, %209 : vector<4x384xf32>
    %c0_212 = arith.constant 0 : index
    %c0_213 = arith.constant 0 : index
    %212 = vector.load %arg8[%c0_212, %c0_213] : memref<4x384xf32, #tpu.memory_space<vmem>>, vector<4x384xf32>
    tpu.vector_store %arg8[%c0_212, %c0_213], %211 {strides = array<i32>} : memref<4x384xf32, #tpu.memory_space<vmem>>, vector<4x384xf32>,
    %c0_214 = arith.constant 0 : index
    %c0_215 = arith.constant 0 : index
    %c88 = arith.constant 88 : index
    %213 = vector.load %arg1[%c0_214, %c0_215, %c88] : memref<1x4x528xbf16, #tpu.memory_space<vmem>>, vector<1x4x384xbf16>
    %214 = vector.shape_cast %213 : vector<1x4x384xbf16> to vector<4x384xbf16>
    %c0_216 = arith.constant 0 : index
    %c0_217 = arith.constant 0 : index
    %c0_218 = arith.constant 0 : index
    %215 = vector.load %arg7[%c0_216, %c0_217, %c0_218] : memref<2x112x384xbf16, #tpu.memory_space<vmem>>, vector<1x4x384xbf16>
    %216 = vector.shape_cast %215 : vector<1x4x384xbf16> to vector<4x384xbf16>
    %217 = vector.shape_cast %214 : vector<4x384xbf16> to vector<1x4x384xbf16>
    tpu.vector_store %arg7[%c0_216, %c0_217, %c0_218], %217 {strides = array<i32>} : memref<2x112x384xbf16, #tpu.memory_space<vmem>>, vector<1x4x384xbf16>,
    %c0_219 = arith.constant 0 : index
    %c0_220 = arith.constant 0 : index
    %c89 = arith.constant 89 : index
    %218 = vector.load %arg1[%c0_219, %c0_220, %c89] : memref<1x4x528xbf16, #tpu.memory_space<vmem>>, vector<1x4x384xbf16>
    %219 = vector.shape_cast %218 : vector<1x4x384xbf16> to vector<4x384xbf16>
    %c0_221 = arith.constant 0 : index
    %c16_222 = arith.constant 16 : index
    %c0_223 = arith.constant 0 : index
    %220 = vector.load %arg7[%c0_221, %c16_222, %c0_223] : memref<2x112x384xbf16, #tpu.memory_space<vmem>>, vector<1x4x384xbf16>
    %221 = vector.shape_cast %220 : vector<1x4x384xbf16> to vector<4x384xbf16>
    %222 = vector.shape_cast %219 : vector<4x384xbf16> to vector<1x4x384xbf16>
    tpu.vector_store %arg7[%c0_221, %c16_222, %c0_223], %222 {strides = array<i32>} : memref<2x112x384xbf16, #tpu.memory_space<vmem>>, vector<1x4x384xbf16>,
    %c0_224 = arith.constant 0 : index
    %c0_225 = arith.constant 0 : index
    %c90 = arith.constant 90 : index
    %223 = vector.load %arg1[%c0_224, %c0_225, %c90] : memref<1x4x528xbf16, #tpu.memory_space<vmem>>, vector<1x4x384xbf16>
    %224 = vector.shape_cast %223 : vector<1x4x384xbf16> to vector<4x384xbf16>
    %c0_226 = arith.constant 0 : index
    %c32_227 = arith.constant 32 : index
    %c0_228 = arith.constant 0 : index
    %225 = vector.load %arg7[%c0_226, %c32_227, %c0_228] : memref<2x112x384xbf16, #tpu.memory_space<vmem>>, vector<1x4x384xbf16>
    %226 = vector.shape_cast %225 : vector<1x4x384xbf16> to vector<4x384xbf16>
    %227 = vector.shape_cast %224 : vector<4x384xbf16> to vector<1x4x384xbf16>
    tpu.vector_store %arg7[%c0_226, %c32_227, %c0_228], %227 {strides = array<i32>} : memref<2x112x384xbf16, #tpu.memory_space<vmem>>, vector<1x4x384xbf16>,
    %c0_229 = arith.constant 0 : index
    %c0_230 = arith.constant 0 : index
    %c91 = arith.constant 91 : index
    %228 = vector.load %arg1[%c0_229, %c0_230, %c91] : memref<1x4x528xbf16, #tpu.memory_space<vmem>>, vector<1x4x384xbf16>
    %229 = vector.shape_cast %228 : vector<1x4x384xbf16> to vector<4x384xbf16>
    %c0_231 = arith.constant 0 : index
    %c48_232 = arith.constant 48 : index
    %c0_233 = arith.constant 0 : index
    %230 = vector.load %arg7[%c0_231, %c48_232, %c0_233] : memref<2x112x384xbf16, #tpu.memory_space<vmem>>, vector<1x4x384xbf16>
    %231 = vector.shape_cast %230 : vector<1x4x384xbf16> to vector<4x384xbf16>
    %232 = vector.shape_cast %229 : vector<4x384xbf16> to vector<1x4x384xbf16>
    tpu.vector_store %arg7[%c0_231, %c48_232, %c0_233], %232 {strides = array<i32>} : memref<2x112x384xbf16, #tpu.memory_space<vmem>>, vector<1x4x384xbf16>,
    %c0_234 = arith.constant 0 : index
    %c0_235 = arith.constant 0 : index
    %c92 = arith.constant 92 : index
    %233 = vector.load %arg1[%c0_234, %c0_235, %c92] : memref<1x4x528xbf16, #tpu.memory_space<vmem>>, vector<1x4x384xbf16>
    %234 = vector.shape_cast %233 : vector<1x4x384xbf16> to vector<4x384xbf16>
    %c0_236 = arith.constant 0 : index
    %c64_237 = arith.constant 64 : index
    %c0_238 = arith.constant 0 : index
    %235 = vector.load %arg7[%c0_236, %c64_237, %c0_238] : memref<2x112x384xbf16, #tpu.memory_space<vmem>>, vector<1x4x384xbf16>
    %236 = vector.shape_cast %235 : vector<1x4x384xbf16> to vector<4x384xbf16>
    %237 = vector.shape_cast %234 : vector<4x384xbf16> to vector<1x4x384xbf16>
    tpu.vector_store %arg7[%c0_236, %c64_237, %c0_238], %237 {strides = array<i32>} : memref<2x112x384xbf16, #tpu.memory_space<vmem>>, vector<1x4x384xbf16>,
    %c0_239 = arith.constant 0 : index
    %c0_240 = arith.constant 0 : index
    %c93 = arith.constant 93 : index
    %238 = vector.load %arg1[%c0_239, %c0_240, %c93] : memref<1x4x528xbf16, #tpu.memory_space<vmem>>, vector<1x4x384xbf16>
    %239 = vector.shape_cast %238 : vector<1x4x384xbf16> to vector<4x384xbf16>
    %c0_241 = arith.constant 0 : index
    %c80_242 = arith.constant 80 : index
    %c0_243 = arith.constant 0 : index
    %240 = vector.load %arg7[%c0_241, %c80_242, %c0_243] : memref<2x112x384xbf16, #tpu.memory_space<vmem>>, vector<1x4x384xbf16>
    %241 = vector.shape_cast %240 : vector<1x4x384xbf16> to vector<4x384xbf16>
    %242 = vector.shape_cast %239 : vector<4x384xbf16> to vector<1x4x384xbf16>
    tpu.vector_store %arg7[%c0_241, %c80_242, %c0_243], %242 {strides = array<i32>} : memref<2x112x384xbf16, #tpu.memory_space<vmem>>, vector<1x4x384xbf16>,
    %c0_244 = arith.constant 0 : index
    %c0_245 = arith.constant 0 : index
    %c94 = arith.constant 94 : index
    %243 = vector.load %arg1[%c0_244, %c0_245, %c94] : memref<1x4x528xbf16, #tpu.memory_space<vmem>>, vector<1x4x384xbf16>
    %244 = vector.shape_cast %243 : vector<1x4x384xbf16> to vector<4x384xbf16>
    %c0_246 = arith.constant 0 : index
    %c96_247 = arith.constant 96 : index
    %c0_248 = arith.constant 0 : index
    %245 = vector.load %arg7[%c0_246, %c96_247, %c0_248] : memref<2x112x384xbf16, #tpu.memory_space<vmem>>, vector<1x4x384xbf16>
    %246 = vector.shape_cast %245 : vector<1x4x384xbf16> to vector<4x384xbf16>
    %247 = vector.shape_cast %244 : vector<4x384xbf16> to vector<1x4x384xbf16>
    tpu.vector_store %arg7[%c0_246, %c96_247, %c0_248], %247 {strides = array<i32>} : memref<2x112x384xbf16, #tpu.memory_space<vmem>>, vector<1x4x384xbf16>,
    %c4_249 = arith.constant 4 : index
    %c0_250 = arith.constant 0 : index
    %c0_251 = arith.constant 0 : index
    %248 = vector.load %arg2[%c4_249, %c0_250, %c0_251] : memref<7x4x112xbf16, #tpu.memory_space<vmem>>, vector<1x4x112xbf16>
    %249 = vector.shape_cast %248 : vector<1x4x112xbf16> to vector<4x112xbf16>
    %c0_252 = arith.constant 0 : index
    %c0_253 = arith.constant 0 : index
    %c0_254 = arith.constant 0 : index
    %250 = vector.load %arg7[%c0_252, %c0_253, %c0_254] : memref<2x112x384xbf16, #tpu.memory_space<vmem>>, vector<1x112x384xbf16>
    %251 = vector.shape_cast %250 : vector<1x112x384xbf16> to vector<112x384xbf16>
    %cst_255 = arith.constant dense<0.000000e+00> : vector<4x384xf32>
    %252 = tpu.matmul %249, %251, %cst_255 {dimension_numbers = #tpu.dot_dimension_numbers<[1], [0], [0], [1], [0, 0, 1, 1], [], []>} : vector<4x112xbf16>, vector<112x384xbf16>, vector<4x384xf32> -> vector<4x384xf32>
    %c0_256 = arith.constant 0 : index
    %c0_257 = arith.constant 0 : index
    %253 = vector.load %arg8[%c0_256, %c0_257] : memref<4x384xf32, #tpu.memory_space<vmem>>, vector<4x384xf32>
    %254 = arith.addf %253, %252 : vector<4x384xf32>
    %c0_258 = arith.constant 0 : index
    %c0_259 = arith.constant 0 : index
    %255 = vector.load %arg8[%c0_258, %c0_259] : memref<4x384xf32, #tpu.memory_space<vmem>>, vector<4x384xf32>
    tpu.vector_store %arg8[%c0_258, %c0_259], %254 {strides = array<i32>} : memref<4x384xf32, #tpu.memory_space<vmem>>, vector<4x384xf32>,
    %c0_260 = arith.constant 0 : index
    %c0_261 = arith.constant 0 : index
    %c110 = arith.constant 110 : index
    %256 = vector.load %arg1[%c0_260, %c0_261, %c110] : memref<1x4x528xbf16, #tpu.memory_space<vmem>>, vector<1x4x384xbf16>
    %257 = vector.shape_cast %256 : vector<1x4x384xbf16> to vector<4x384xbf16>
    %c1_262 = arith.constant 1 : index
    %c0_263 = arith.constant 0 : index
    %c0_264 = arith.constant 0 : index
    %258 = vector.load %arg7[%c1_262, %c0_263, %c0_264] : memref<2x112x384xbf16, #tpu.memory_space<vmem>>, vector<1x4x384xbf16>
    %259 = vector.shape_cast %258 : vector<1x4x384xbf16> to vector<4x384xbf16>
    %260 = vector.shape_cast %257 : vector<4x384xbf16> to vector<1x4x384xbf16>
    tpu.vector_store %arg7[%c1_262, %c0_263, %c0_264], %260 {strides = array<i32>} : memref<2x112x384xbf16, #tpu.memory_space<vmem>>, vector<1x4x384xbf16>,
    %c0_265 = arith.constant 0 : index
    %c0_266 = arith.constant 0 : index
    %c111 = arith.constant 111 : index
    %261 = vector.load %arg1[%c0_265, %c0_266, %c111] : memref<1x4x528xbf16, #tpu.memory_space<vmem>>, vector<1x4x384xbf16>
    %262 = vector.shape_cast %261 : vector<1x4x384xbf16> to vector<4x384xbf16>
    %c1_267 = arith.constant 1 : index
    %c16_268 = arith.constant 16 : index
    %c0_269 = arith.constant 0 : index
    %263 = vector.load %arg7[%c1_267, %c16_268, %c0_269] : memref<2x112x384xbf16, #tpu.memory_space<vmem>>, vector<1x4x384xbf16>
    %264 = vector.shape_cast %263 : vector<1x4x384xbf16> to vector<4x384xbf16>
    %265 = vector.shape_cast %262 : vector<4x384xbf16> to vector<1x4x384xbf16>
    tpu.vector_store %arg7[%c1_267, %c16_268, %c0_269], %265 {strides = array<i32>} : memref<2x112x384xbf16, #tpu.memory_space<vmem>>, vector<1x4x384xbf16>,
    %c0_270 = arith.constant 0 : index
    %c0_271 = arith.constant 0 : index
    %c112 = arith.constant 112 : index
    %266 = vector.load %arg1[%c0_270, %c0_271, %c112] : memref<1x4x528xbf16, #tpu.memory_space<vmem>>, vector<1x4x384xbf16>
    %267 = vector.shape_cast %266 : vector<1x4x384xbf16> to vector<4x384xbf16>
    %c1_272 = arith.constant 1 : index
    %c32_273 = arith.constant 32 : index
    %c0_274 = arith.constant 0 : index
    %268 = vector.load %arg7[%c1_272, %c32_273, %c0_274] : memref<2x112x384xbf16, #tpu.memory_space<vmem>>, vector<1x4x384xbf16>
    %269 = vector.shape_cast %268 : vector<1x4x384xbf16> to vector<4x384xbf16>
    %270 = vector.shape_cast %267 : vector<4x384xbf16> to vector<1x4x384xbf16>
    tpu.vector_store %arg7[%c1_272, %c32_273, %c0_274], %270 {strides = array<i32>} : memref<2x112x384xbf16, #tpu.memory_space<vmem>>, vector<1x4x384xbf16>,
    %c0_275 = arith.constant 0 : index
    %c0_276 = arith.constant 0 : index
    %c113 = arith.constant 113 : index
    %271 = vector.load %arg1[%c0_275, %c0_276, %c113] : memref<1x4x528xbf16, #tpu.memory_space<vmem>>, vector<1x4x384xbf16>
    %272 = vector.shape_cast %271 : vector<1x4x384xbf16> to vector<4x384xbf16>
    %c1_277 = arith.constant 1 : index
    %c48_278 = arith.constant 48 : index
    %c0_279 = arith.constant 0 : index
    %273 = vector.load %arg7[%c1_277, %c48_278, %c0_279] : memref<2x112x384xbf16, #tpu.memory_space<vmem>>, vector<1x4x384xbf16>
    %274 = vector.shape_cast %273 : vector<1x4x384xbf16> to vector<4x384xbf16>
    %275 = vector.shape_cast %272 : vector<4x384xbf16> to vector<1x4x384xbf16>
    tpu.vector_store %arg7[%c1_277, %c48_278, %c0_279], %275 {strides = array<i32>} : memref<2x112x384xbf16, #tpu.memory_space<vmem>>, vector<1x4x384xbf16>,
    %c0_280 = arith.constant 0 : index
    %c0_281 = arith.constant 0 : index
    %c114 = arith.constant 114 : index
    %276 = vector.load %arg1[%c0_280, %c0_281, %c114] : memref<1x4x528xbf16, #tpu.memory_space<vmem>>, vector<1x4x384xbf16>
    %277 = vector.shape_cast %276 : vector<1x4x384xbf16> to vector<4x384xbf16>
    %c1_282 = arith.constant 1 : index
    %c64_283 = arith.constant 64 : index
    %c0_284 = arith.constant 0 : index
    %278 = vector.load %arg7[%c1_282, %c64_283, %c0_284] : memref<2x112x384xbf16, #tpu.memory_space<vmem>>, vector<1x4x384xbf16>
    %279 = vector.shape_cast %278 : vector<1x4x384xbf16> to vector<4x384xbf16>
    %280 = vector.shape_cast %277 : vector<4x384xbf16> to vector<1x4x384xbf16>
    tpu.vector_store %arg7[%c1_282, %c64_283, %c0_284], %280 {strides = array<i32>} : memref<2x112x384xbf16, #tpu.memory_space<vmem>>, vector<1x4x384xbf16>,
    %c0_285 = arith.constant 0 : index
    %c0_286 = arith.constant 0 : index
    %c115 = arith.constant 115 : index
    %281 = vector.load %arg1[%c0_285, %c0_286, %c115] : memref<1x4x528xbf16, #tpu.memory_space<vmem>>, vector<1x4x384xbf16>
    %282 = vector.shape_cast %281 : vector<1x4x384xbf16> to vector<4x384xbf16>
    %c1_287 = arith.constant 1 : index
    %c80_288 = arith.constant 80 : index
    %c0_289 = arith.constant 0 : index
    %283 = vector.load %arg7[%c1_287, %c80_288, %c0_289] : memref<2x112x384xbf16, #tpu.memory_space<vmem>>, vector<1x4x384xbf16>
    %284 = vector.shape_cast %283 : vector<1x4x384xbf16> to vector<4x384xbf16>
    %285 = vector.shape_cast %282 : vector<4x384xbf16> to vector<1x4x384xbf16>
    tpu.vector_store %arg7[%c1_287, %c80_288, %c0_289], %285 {strides = array<i32>} : memref<2x112x384xbf16, #tpu.memory_space<vmem>>, vector<1x4x384xbf16>,
    %c0_290 = arith.constant 0 : index
    %c0_291 = arith.constant 0 : index
    %c116 = arith.constant 116 : index
    %286 = vector.load %arg1[%c0_290, %c0_291, %c116] : memref<1x4x528xbf16, #tpu.memory_space<vmem>>, vector<1x4x384xbf16>
    %287 = vector.shape_cast %286 : vector<1x4x384xbf16> to vector<4x384xbf16>
    %c1_292 = arith.constant 1 : index
    %c96_293 = arith.constant 96 : index
    %c0_294 = arith.constant 0 : index
    %288 = vector.load %arg7[%c1_292, %c96_293, %c0_294] : memref<2x112x384xbf16, #tpu.memory_space<vmem>>, vector<1x4x384xbf16>
    %289 = vector.shape_cast %288 : vector<1x4x384xbf16> to vector<4x384xbf16>
    %290 = vector.shape_cast %287 : vector<4x384xbf16> to vector<1x4x384xbf16>
    tpu.vector_store %arg7[%c1_292, %c96_293, %c0_294], %290 {strides = array<i32>} : memref<2x112x384xbf16, #tpu.memory_space<vmem>>, vector<1x4x384xbf16>,
    %c5_295 = arith.constant 5 : index
    %c0_296 = arith.constant 0 : index
    %c0_297 = arith.constant 0 : index
    %291 = vector.load %arg2[%c5_295, %c0_296, %c0_297] : memref<7x4x112xbf16, #tpu.memory_space<vmem>>, vector<1x4x112xbf16>
    %292 = vector.shape_cast %291 : vector<1x4x112xbf16> to vector<4x112xbf16>
    %c1_298 = arith.constant 1 : index
    %c0_299 = arith.constant 0 : index
    %c0_300 = arith.constant 0 : index
    %293 = vector.load %arg7[%c1_298, %c0_299, %c0_300] : memref<2x112x384xbf16, #tpu.memory_space<vmem>>, vector<1x112x384xbf16>
    %294 = vector.shape_cast %293 : vector<1x112x384xbf16> to vector<112x384xbf16>
    %cst_301 = arith.constant dense<0.000000e+00> : vector<4x384xf32>
    %295 = tpu.matmul %292, %294, %cst_301 {dimension_numbers = #tpu.dot_dimension_numbers<[1], [0], [0], [1], [0, 0, 1, 1], [], []>} : vector<4x112xbf16>, vector<112x384xbf16>, vector<4x384xf32> -> vector<4x384xf32>
    %c0_302 = arith.constant 0 : index
    %c0_303 = arith.constant 0 : index
    %296 = vector.load %arg8[%c0_302, %c0_303] : memref<4x384xf32, #tpu.memory_space<vmem>>, vector<4x384xf32>
    %297 = arith.addf %296, %295 : vector<4x384xf32>
    %c0_304 = arith.constant 0 : index
    %c0_305 = arith.constant 0 : index
    %298 = vector.load %arg8[%c0_304, %c0_305] : memref<4x384xf32, #tpu.memory_space<vmem>>, vector<4x384xf32>
    tpu.vector_store %arg8[%c0_304, %c0_305], %297 {strides = array<i32>} : memref<4x384xf32, #tpu.memory_space<vmem>>, vector<4x384xf32>,
    %c0_306 = arith.constant 0 : index
    %c0_307 = arith.constant 0 : index
    %c132 = arith.constant 132 : index
    %299 = vector.load %arg1[%c0_306, %c0_307, %c132] : memref<1x4x528xbf16, #tpu.memory_space<vmem>>, vector<1x4x384xbf16>
    %300 = vector.shape_cast %299 : vector<1x4x384xbf16> to vector<4x384xbf16>
    %c0_308 = arith.constant 0 : index
    %c0_309 = arith.constant 0 : index
    %c0_310 = arith.constant 0 : index
    %301 = vector.load %arg7[%c0_308, %c0_309, %c0_310] : memref<2x112x384xbf16, #tpu.memory_space<vmem>>, vector<1x4x384xbf16>
    %302 = vector.shape_cast %301 : vector<1x4x384xbf16> to vector<4x384xbf16>
    %303 = vector.shape_cast %300 : vector<4x384xbf16> to vector<1x4x384xbf16>
    tpu.vector_store %arg7[%c0_308, %c0_309, %c0_310], %303 {strides = array<i32>} : memref<2x112x384xbf16, #tpu.memory_space<vmem>>, vector<1x4x384xbf16>,
    %c0_311 = arith.constant 0 : index
    %c0_312 = arith.constant 0 : index
    %c133 = arith.constant 133 : index
    %304 = vector.load %arg1[%c0_311, %c0_312, %c133] : memref<1x4x528xbf16, #tpu.memory_space<vmem>>, vector<1x4x384xbf16>
    %305 = vector.shape_cast %304 : vector<1x4x384xbf16> to vector<4x384xbf16>
    %c0_313 = arith.constant 0 : index
    %c16_314 = arith.constant 16 : index
    %c0_315 = arith.constant 0 : index
    %306 = vector.load %arg7[%c0_313, %c16_314, %c0_315] : memref<2x112x384xbf16, #tpu.memory_space<vmem>>, vector<1x4x384xbf16>
    %307 = vector.shape_cast %306 : vector<1x4x384xbf16> to vector<4x384xbf16>
    %308 = vector.shape_cast %305 : vector<4x384xbf16> to vector<1x4x384xbf16>
    tpu.vector_store %arg7[%c0_313, %c16_314, %c0_315], %308 {strides = array<i32>} : memref<2x112x384xbf16, #tpu.memory_space<vmem>>, vector<1x4x384xbf16>,
    %c0_316 = arith.constant 0 : index
    %c0_317 = arith.constant 0 : index
    %c134 = arith.constant 134 : index
    %309 = vector.load %arg1[%c0_316, %c0_317, %c134] : memref<1x4x528xbf16, #tpu.memory_space<vmem>>, vector<1x4x384xbf16>
    %310 = vector.shape_cast %309 : vector<1x4x384xbf16> to vector<4x384xbf16>
    %c0_318 = arith.constant 0 : index
    %c32_319 = arith.constant 32 : index
    %c0_320 = arith.constant 0 : index
    %311 = vector.load %arg7[%c0_318, %c32_319, %c0_320] : memref<2x112x384xbf16, #tpu.memory_space<vmem>>, vector<1x4x384xbf16>
    %312 = vector.shape_cast %311 : vector<1x4x384xbf16> to vector<4x384xbf16>
    %313 = vector.shape_cast %310 : vector<4x384xbf16> to vector<1x4x384xbf16>
    tpu.vector_store %arg7[%c0_318, %c32_319, %c0_320], %313 {strides = array<i32>} : memref<2x112x384xbf16, #tpu.memory_space<vmem>>, vector<1x4x384xbf16>,
    %c0_321 = arith.constant 0 : index
    %c0_322 = arith.constant 0 : index
    %c135 = arith.constant 135 : index
    %314 = vector.load %arg1[%c0_321, %c0_322, %c135] : memref<1x4x528xbf16, #tpu.memory_space<vmem>>, vector<1x4x384xbf16>
    %315 = vector.shape_cast %314 : vector<1x4x384xbf16> to vector<4x384xbf16>
    %c0_323 = arith.constant 0 : index
    %c48_324 = arith.constant 48 : index
    %c0_325 = arith.constant 0 : index
    %316 = vector.load %arg7[%c0_323, %c48_324, %c0_325] : memref<2x112x384xbf16, #tpu.memory_space<vmem>>, vector<1x4x384xbf16>
    %317 = vector.shape_cast %316 : vector<1x4x384xbf16> to vector<4x384xbf16>
    %318 = vector.shape_cast %315 : vector<4x384xbf16> to vector<1x4x384xbf16>
    tpu.vector_store %arg7[%c0_323, %c48_324, %c0_325], %318 {strides = array<i32>} : memref<2x112x384xbf16, #tpu.memory_space<vmem>>, vector<1x4x384xbf16>,
    %c0_326 = arith.constant 0 : index
    %c0_327 = arith.constant 0 : index
    %c136 = arith.constant 136 : index
    %319 = vector.load %arg1[%c0_326, %c0_327, %c136] : memref<1x4x528xbf16, #tpu.memory_space<vmem>>, vector<1x4x384xbf16>
    %320 = vector.shape_cast %319 : vector<1x4x384xbf16> to vector<4x384xbf16>
    %c0_328 = arith.constant 0 : index
    %c64_329 = arith.constant 64 : index
    %c0_330 = arith.constant 0 : index
    %321 = vector.load %arg7[%c0_328, %c64_329, %c0_330] : memref<2x112x384xbf16, #tpu.memory_space<vmem>>, vector<1x4x384xbf16>
    %322 = vector.shape_cast %321 : vector<1x4x384xbf16> to vector<4x384xbf16>
    %323 = vector.shape_cast %320 : vector<4x384xbf16> to vector<1x4x384xbf16>
    tpu.vector_store %arg7[%c0_328, %c64_329, %c0_330], %323 {strides = array<i32>} : memref<2x112x384xbf16, #tpu.memory_space<vmem>>, vector<1x4x384xbf16>,
    %c0_331 = arith.constant 0 : index
    %c0_332 = arith.constant 0 : index
    %c137 = arith.constant 137 : index
    %324 = vector.load %arg1[%c0_331, %c0_332, %c137] : memref<1x4x528xbf16, #tpu.memory_space<vmem>>, vector<1x4x384xbf16>
    %325 = vector.shape_cast %324 : vector<1x4x384xbf16> to vector<4x384xbf16>
    %c0_333 = arith.constant 0 : index
    %c80_334 = arith.constant 80 : index
    %c0_335 = arith.constant 0 : index
    %326 = vector.load %arg7[%c0_333, %c80_334, %c0_335] : memref<2x112x384xbf16, #tpu.memory_space<vmem>>, vector<1x4x384xbf16>
    %327 = vector.shape_cast %326 : vector<1x4x384xbf16> to vector<4x384xbf16>
    %328 = vector.shape_cast %325 : vector<4x384xbf16> to vector<1x4x384xbf16>
    tpu.vector_store %arg7[%c0_333, %c80_334, %c0_335], %328 {strides = array<i32>} : memref<2x112x384xbf16, #tpu.memory_space<vmem>>, vector<1x4x384xbf16>,
    %c0_336 = arith.constant 0 : index
    %c0_337 = arith.constant 0 : index
    %c138 = arith.constant 138 : index
    %329 = vector.load %arg1[%c0_336, %c0_337, %c138] : memref<1x4x528xbf16, #tpu.memory_space<vmem>>, vector<1x4x384xbf16>
    %330 = vector.shape_cast %329 : vector<1x4x384xbf16> to vector<4x384xbf16>
    %c0_338 = arith.constant 0 : index
    %c96_339 = arith.constant 96 : index
    %c0_340 = arith.constant 0 : index
    %331 = vector.load %arg7[%c0_338, %c96_339, %c0_340] : memref<2x112x384xbf16, #tpu.memory_space<vmem>>, vector<1x4x384xbf16>
    %332 = vector.shape_cast %331 : vector<1x4x384xbf16> to vector<4x384xbf16>
    %333 = vector.shape_cast %330 : vector<4x384xbf16> to vector<1x4x384xbf16>
    tpu.vector_store %arg7[%c0_338, %c96_339, %c0_340], %333 {strides = array<i32>} : memref<2x112x384xbf16, #tpu.memory_space<vmem>>, vector<1x4x384xbf16>,
    %c6_341 = arith.constant 6 : index
    %c0_342 = arith.constant 0 : index
    %c0_343 = arith.constant 0 : index
    %334 = vector.load %arg2[%c6_341, %c0_342, %c0_343] : memref<7x4x112xbf16, #tpu.memory_space<vmem>>, vector<1x4x112xbf16>
    %335 = vector.shape_cast %334 : vector<1x4x112xbf16> to vector<4x112xbf16>
    %c0_344 = arith.constant 0 : index
    %c0_345 = arith.constant 0 : index
    %c0_346 = arith.constant 0 : index
    %336 = vector.load %arg7[%c0_344, %c0_345, %c0_346] : memref<2x112x384xbf16, #tpu.memory_space<vmem>>, vector<1x112x384xbf16>
    %337 = vector.shape_cast %336 : vector<1x112x384xbf16> to vector<112x384xbf16>
    %cst_347 = arith.constant dense<0.000000e+00> : vector<4x384xf32>
    %338 = tpu.matmul %335, %337, %cst_347 {dimension_numbers = #tpu.dot_dimension_numbers<[1], [0], [0], [1], [0, 0, 1, 1], [], []>} : vector<4x112xbf16>, vector<112x384xbf16>, vector<4x384xf32> -> vector<4x384xf32>
    %c0_348 = arith.constant 0 : index
    %c0_349 = arith.constant 0 : index
    %339 = vector.load %arg8[%c0_348, %c0_349] : memref<4x384xf32, #tpu.memory_space<vmem>>, vector<4x384xf32>
    %340 = arith.addf %339, %338 : vector<4x384xf32>
    %c0_350 = arith.constant 0 : index
    %c0_351 = arith.constant 0 : index
    %341 = vector.load %arg8[%c0_350, %c0_351] : memref<4x384xf32, #tpu.memory_space<vmem>>, vector<4x384xf32>
    tpu.vector_store %arg8[%c0_350, %c0_351], %340 {strides = array<i32>} : memref<4x384xf32, #tpu.memory_space<vmem>>, vector<4x384xf32>,
    %c0_352 = arith.constant 0 : index
    %c0_353 = arith.constant 0 : index
    %342 = vector.load %arg8[%c0_352, %c0_353] : memref<4x384xf32, #tpu.memory_space<vmem>>, vector<4x384xf32>
    %c0_354 = arith.constant 0 : index
    %c0_355 = arith.constant 0 : index
    %343 = vector.load %arg4[%c0_354, %c0_355] : memref<1x384xf32, #tpu.memory_space<vmem>>, vector<1x384xf32>
    %344 = vector.broadcast %343 : vector<1x384xf32> to vector<4x384xf32>
    %345 = arith.mulf %342, %344 : vector<4x384xf32>
    %cst_356 = arith.constant dense<0.000000e+00> : vector<4xf32>
    %346 = vector.multi_reduction <add>, %345, %cst_356 [1] : vector<4x384xf32> to vector<4xf32>
    %347 = vector.shape_cast %346 : vector<4xf32> to vector<4x1xf32>
    %c0_357 = arith.constant 0 : index
    %c0_358 = arith.constant 0 : index
    %348 = vector.load %arg3[%c0_357, %c0_358] : memref<4x4xf32, #tpu.memory_space<vmem>>, vector<4x4xf32>
    %cst_359 = arith.constant dense<0.000000e+00> : vector<4x1xf32>
    %349 = tpu.matmul %348, %347, %cst_359 {dimension_numbers = #tpu.dot_dimension_numbers<[1], [0], [0], [1], [0, 0, 1, 1], [], []>} : vector<4x4xf32>, vector<4x1xf32>, vector<4x1xf32> -> vector<4x1xf32>
    %cst_360 = arith.constant 0.000000e+00 : f32
    %350 = vector.broadcast %cst_360 : f32 to vector<4x1xf32>
    %351 = arith.subf %350, %349 : vector<4x1xf32>
    %352 = math.exp %351 : vector<4x1xf32>
    %cst_361 = arith.constant 1.000000e+00 : f32
    %353 = vector.broadcast %cst_361 : f32 to vector<4x1xf32>
    %354 = arith.addf %353, %352 : vector<4x1xf32>
    %cst_362 = arith.constant 1.000000e+00 : f32
    %355 = vector.broadcast %cst_362 : f32 to vector<4x1xf32>
    %356 = arith.divf %355, %354 : vector<4x1xf32>
    %357 = vector.broadcast %356 : vector<4x1xf32> to vector<4x384xf32>
    %358 = arith.mulf %342, %357 : vector<4x384xf32>
    %359 = vector.shape_cast %358 : vector<4x384xf32> to vector<1x4x384xf32>
    %c0_363 = arith.constant 0 : index
    %c0_364 = arith.constant 0 : index
    %c0_365 = arith.constant 0 : index
    %360 = vector.load %arg5[%c0_363, %c0_364, %c0_365] : memref<1x4x384xf32, #tpu.memory_space<vmem>>, vector<1x4x384xf32>
    tpu.vector_store %arg5[%c0_363, %c0_364, %c0_365], %359 {strides = array<i32>} : memref<1x4x384xf32, #tpu.memory_space<vmem>>, vector<1x4x384xf32>,
    %361 = vector.shape_cast %356 : vector<4x1xf32> to vector<1x4x1xf32>
    %c0_366 = arith.constant 0 : index
    %c0_367 = arith.constant 0 : index
    %c0_368 = arith.constant 0 : index
    %362 = vector.load %arg6[%c0_366, %c0_367, %c0_368] : memref<1x4x1xf32, #tpu.memory_space<vmem>>, vector<1x4x1xf32>
    tpu.vector_store %arg6[%c0_366, %c0_367, %c0_368], %361 {strides = array<i32>} : memref<1x4x1xf32, #tpu.memory_space<vmem>>, vector<1x4x1xf32>,
    return
  }
  func.func @transform_0(%arg0: i32) -> (i32, i32, i32) {
    %c0_i32 = arith.constant 0 : i32
    %c0_i32_0 = arith.constant 0 : i32
    %c0_i32_1 = arith.constant 0 : i32
    return %arg0, %c0_i32, %c0_i32_0 : i32, i32, i32
  }
  func.func @transform_1(%arg0: i32) -> (i32, i32, i32) {
    %c0_i32 = arith.constant 0 : i32
    %c0_i32_0 = arith.constant 0 : i32
    %c0_i32_1 = arith.constant 0 : i32
    %c0_i32_2 = arith.constant 0 : i32
    return %c0_i32, %c0_i32_0, %c0_i32_1 : i32, i32, i32
  }
  func.func @transform_2(%arg0: i32) -> (i32, i32) {
    %c0_i32 = arith.constant 0 : i32
    %c0_i32_0 = arith.constant 0 : i32
    %c0_i32_1 = arith.constant 0 : i32
    return %c0_i32, %c0_i32_0 : i32, i32
  }
  func.func @transform_3(%arg0: i32) -> (i32, i32) {
    %c0_i32 = arith.constant 0 : i32
    %c0_i32_0 = arith.constant 0 : i32
    %c0_i32_1 = arith.constant 0 : i32
    return %c0_i32, %c0_i32_0 : i32, i32
  }
  func.func @transform_4(%arg0: i32) -> (i32, i32, i32) {
    %c0_i32 = arith.constant 0 : i32
    %c0_i32_0 = arith.constant 0 : i32
    %c0_i32_1 = arith.constant 0 : i32
    return %arg0, %c0_i32, %c0_i32_0 : i32, i32, i32
  }
  func.func @transform_5(%arg0: i32) -> (i32, i32, i32) {
    %c0_i32 = arith.constant 0 : i32
    %c0_i32_0 = arith.constant 0 : i32
    %c0_i32_1 = arith.constant 0 : i32
    return %arg0, %c0_i32, %c0_i32_0 : i32, i32, i32
  }
}

module attributes {stable_mosaic.version = 11 : i64} {
  func.func @_ca_block_kernel(%arg0: i32, %arg1: memref<1x4x528xbf16, #tpu.memory_space<vmem>>, %arg2: memref<7x4x112xbf16, #tpu.memory_space<vmem>>, %arg3: memref<4x4xf32, #tpu.memory_space<vmem>>, %arg4: memref<1x384xf32, #tpu.memory_space<vmem>>, %arg5: memref<1x4x384xf32, #tpu.memory_space<vmem>>, %arg6: memref<1x4x1xf32, #tpu.memory_space<vmem>>, %arg7: memref<2x112x384xbf16, #tpu.memory_space<vmem>>, %arg8: memref<4x384xf32, #tpu.memory_space<vmem>>) attributes {dimension_semantics = [#tpu.dimension_semantics<parallel>], iteration_bounds = array<i64: 2>, scalar_prefetch = 0 : i64, scratch_operands = 2 : i64, tpu.core_type = #tpu.core_type<tc>, window_params = [{transform_indices = @transform_0, window_bounds = array<i64: 1, 4, 528>}, {pipeline_mode = #tpu.pipeline_mode<synchronous>, transform_indices = @transform_1, window_bounds = array<i64: 7, 4, 112>}, {pipeline_mode = #tpu.pipeline_mode<synchronous>, transform_indices = @transform_2, window_bounds = array<i64: 4, 4>}, {pipeline_mode = #tpu.pipeline_mode<synchronous>, transform_indices = @transform_3, window_bounds = array<i64: 1, 384>}, {transform_indices = @transform_4, window_bounds = array<i64: 1, 4, 384>}, {transform_indices = @transform_5, window_bounds = array<i64: 1, 4, 1>}]} {
    %cst = arith.constant 0.000000e+00 : bf16
    %0 = vector.broadcast %cst : bf16 to vector<12x384xbf16>
    %c0 = arith.constant 0 : index
    %c4 = arith.constant 4 : index
    %c0_0 = arith.constant 0 : index
    %1 = vector.load %arg7[%c0, %c4, %c0_0] : memref<2x112x384xbf16, #tpu.memory_space<vmem>>, vector<1x12x384xbf16>
    %2 = vector.shape_cast %1 : vector<1x12x384xbf16> to vector<12x384xbf16>
    %3 = vector.shape_cast %0 : vector<12x384xbf16> to vector<1x12x384xbf16>
    tpu.vector_store %arg7[%c0, %c4, %c0_0], %3 {strides = array<i32>} : memref<2x112x384xbf16, #tpu.memory_space<vmem>>, vector<1x12x384xbf16>,
    %c0_1 = arith.constant 0 : index
    %c20 = arith.constant 20 : index
    %c0_2 = arith.constant 0 : index
    %4 = vector.load %arg7[%c0_1, %c20, %c0_2] : memref<2x112x384xbf16, #tpu.memory_space<vmem>>, vector<1x12x384xbf16>
    %5 = vector.shape_cast %4 : vector<1x12x384xbf16> to vector<12x384xbf16>
    %6 = vector.shape_cast %0 : vector<12x384xbf16> to vector<1x12x384xbf16>
    tpu.vector_store %arg7[%c0_1, %c20, %c0_2], %6 {strides = array<i32>} : memref<2x112x384xbf16, #tpu.memory_space<vmem>>, vector<1x12x384xbf16>,
    %c0_3 = arith.constant 0 : index
    %c36 = arith.constant 36 : index
    %c0_4 = arith.constant 0 : index
    %7 = vector.load %arg7[%c0_3, %c36, %c0_4] : memref<2x112x384xbf16, #tpu.memory_space<vmem>>, vector<1x12x384xbf16>
    %8 = vector.shape_cast %7 : vector<1x12x384xbf16> to vector<12x384xbf16>
    %9 = vector.shape_cast %0 : vector<12x384xbf16> to vector<1x12x384xbf16>
    tpu.vector_store %arg7[%c0_3, %c36, %c0_4], %9 {strides = array<i32>} : memref<2x112x384xbf16, #tpu.memory_space<vmem>>, vector<1x12x384xbf16>,
    %c0_5 = arith.constant 0 : index
    %c52 = arith.constant 52 : index
    %c0_6 = arith.constant 0 : index
    %10 = vector.load %arg7[%c0_5, %c52, %c0_6] : memref<2x112x384xbf16, #tpu.memory_space<vmem>>, vector<1x12x384xbf16>
    %11 = vector.shape_cast %10 : vector<1x12x384xbf16> to vector<12x384xbf16>
    %12 = vector.shape_cast %0 : vector<12x384xbf16> to vector<1x12x384xbf16>
    tpu.vector_store %arg7[%c0_5, %c52, %c0_6], %12 {strides = array<i32>} : memref<2x112x384xbf16, #tpu.memory_space<vmem>>, vector<1x12x384xbf16>,
    %c0_7 = arith.constant 0 : index
    %c68 = arith.constant 68 : index
    %c0_8 = arith.constant 0 : index
    %13 = vector.load %arg7[%c0_7, %c68, %c0_8] : memref<2x112x384xbf16, #tpu.memory_space<vmem>>, vector<1x12x384xbf16>
    %14 = vector.shape_cast %13 : vector<1x12x384xbf16> to vector<12x384xbf16>
    %15 = vector.shape_cast %0 : vector<12x384xbf16> to vector<1x12x384xbf16>
    tpu.vector_store %arg7[%c0_7, %c68, %c0_8], %15 {strides = array<i32>} : memref<2x112x384xbf16, #tpu.memory_space<vmem>>, vector<1x12x384xbf16>,
    %c0_9 = arith.constant 0 : index
    %c84 = arith.constant 84 : index
    %c0_10 = arith.constant 0 : index
    %16 = vector.load %arg7[%c0_9, %c84, %c0_10] : memref<2x112x384xbf16, #tpu.memory_space<vmem>>, vector<1x12x384xbf16>
    %17 = vector.shape_cast %16 : vector<1x12x384xbf16> to vector<12x384xbf16>
    %18 = vector.shape_cast %0 : vector<12x384xbf16> to vector<1x12x384xbf16>
    tpu.vector_store %arg7[%c0_9, %c84, %c0_10], %18 {strides = array<i32>} : memref<2x112x384xbf16, #tpu.memory_space<vmem>>, vector<1x12x384xbf16>,
    %c0_11 = arith.constant 0 : index
    %c100 = arith.constant 100 : index
    %c0_12 = arith.constant 0 : index
    %19 = vector.load %arg7[%c0_11, %c100, %c0_12] : memref<2x112x384xbf16, #tpu.memory_space<vmem>>, vector<1x12x384xbf16>
    %20 = vector.shape_cast %19 : vector<1x12x384xbf16> to vector<12x384xbf16>
    %21 = vector.shape_cast %0 : vector<12x384xbf16> to vector<1x12x384xbf16>
    tpu.vector_store %arg7[%c0_11, %c100, %c0_12], %21 {strides = array<i32>} : memref<2x112x384xbf16, #tpu.memory_space<vmem>>, vector<1x12x384xbf16>,
    %c1 = arith.constant 1 : index
    %c4_13 = arith.constant 4 : index
    %c0_14 = arith.constant 0 : index
    %22 = vector.load %arg7[%c1, %c4_13, %c0_14] : memref<2x112x384xbf16, #tpu.memory_space<vmem>>, vector<1x12x384xbf16>
    %23 = vector.shape_cast %22 : vector<1x12x384xbf16> to vector<12x384xbf16>
    %24 = vector.shape_cast %0 : vector<12x384xbf16> to vector<1x12x384xbf16>
    tpu.vector_store %arg7[%c1, %c4_13, %c0_14], %24 {strides = array<i32>} : memref<2x112x384xbf16, #tpu.memory_space<vmem>>, vector<1x12x384xbf16>,
    %c1_15 = arith.constant 1 : index
    %c20_16 = arith.constant 20 : index
    %c0_17 = arith.constant 0 : index
    %25 = vector.load %arg7[%c1_15, %c20_16, %c0_17] : memref<2x112x384xbf16, #tpu.memory_space<vmem>>, vector<1x12x384xbf16>
    %26 = vector.shape_cast %25 : vector<1x12x384xbf16> to vector<12x384xbf16>
    %27 = vector.shape_cast %0 : vector<12x384xbf16> to vector<1x12x384xbf16>
    tpu.vector_store %arg7[%c1_15, %c20_16, %c0_17], %27 {strides = array<i32>} : memref<2x112x384xbf16, #tpu.memory_space<vmem>>, vector<1x12x384xbf16>,
    %c1_18 = arith.constant 1 : index
    %c36_19 = arith.constant 36 : index
    %c0_20 = arith.constant 0 : index
    %28 = vector.load %arg7[%c1_18, %c36_19, %c0_20] : memref<2x112x384xbf16, #tpu.memory_space<vmem>>, vector<1x12x384xbf16>
    %29 = vector.shape_cast %28 : vector<1x12x384xbf16> to vector<12x384xbf16>
    %30 = vector.shape_cast %0 : vector<12x384xbf16> to vector<1x12x384xbf16>
    tpu.vector_store %arg7[%c1_18, %c36_19, %c0_20], %30 {strides = array<i32>} : memref<2x112x384xbf16, #tpu.memory_space<vmem>>, vector<1x12x384xbf16>,
    %c1_21 = arith.constant 1 : index
    %c52_22 = arith.constant 52 : index
    %c0_23 = arith.constant 0 : index
    %31 = vector.load %arg7[%c1_21, %c52_22, %c0_23] : memref<2x112x384xbf16, #tpu.memory_space<vmem>>, vector<1x12x384xbf16>
    %32 = vector.shape_cast %31 : vector<1x12x384xbf16> to vector<12x384xbf16>
    %33 = vector.shape_cast %0 : vector<12x384xbf16> to vector<1x12x384xbf16>
    tpu.vector_store %arg7[%c1_21, %c52_22, %c0_23], %33 {strides = array<i32>} : memref<2x112x384xbf16, #tpu.memory_space<vmem>>, vector<1x12x384xbf16>,
    %c1_24 = arith.constant 1 : index
    %c68_25 = arith.constant 68 : index
    %c0_26 = arith.constant 0 : index
    %34 = vector.load %arg7[%c1_24, %c68_25, %c0_26] : memref<2x112x384xbf16, #tpu.memory_space<vmem>>, vector<1x12x384xbf16>
    %35 = vector.shape_cast %34 : vector<1x12x384xbf16> to vector<12x384xbf16>
    %36 = vector.shape_cast %0 : vector<12x384xbf16> to vector<1x12x384xbf16>
    tpu.vector_store %arg7[%c1_24, %c68_25, %c0_26], %36 {strides = array<i32>} : memref<2x112x384xbf16, #tpu.memory_space<vmem>>, vector<1x12x384xbf16>,
    %c1_27 = arith.constant 1 : index
    %c84_28 = arith.constant 84 : index
    %c0_29 = arith.constant 0 : index
    %37 = vector.load %arg7[%c1_27, %c84_28, %c0_29] : memref<2x112x384xbf16, #tpu.memory_space<vmem>>, vector<1x12x384xbf16>
    %38 = vector.shape_cast %37 : vector<1x12x384xbf16> to vector<12x384xbf16>
    %39 = vector.shape_cast %0 : vector<12x384xbf16> to vector<1x12x384xbf16>
    tpu.vector_store %arg7[%c1_27, %c84_28, %c0_29], %39 {strides = array<i32>} : memref<2x112x384xbf16, #tpu.memory_space<vmem>>, vector<1x12x384xbf16>,
    %c1_30 = arith.constant 1 : index
    %c100_31 = arith.constant 100 : index
    %c0_32 = arith.constant 0 : index
    %40 = vector.load %arg7[%c1_30, %c100_31, %c0_32] : memref<2x112x384xbf16, #tpu.memory_space<vmem>>, vector<1x12x384xbf16>
    %41 = vector.shape_cast %40 : vector<1x12x384xbf16> to vector<12x384xbf16>
    %42 = vector.shape_cast %0 : vector<12x384xbf16> to vector<1x12x384xbf16>
    tpu.vector_store %arg7[%c1_30, %c100_31, %c0_32], %42 {strides = array<i32>} : memref<2x112x384xbf16, #tpu.memory_space<vmem>>, vector<1x12x384xbf16>,
    %c0_33 = arith.constant 0 : index
    %c0_34 = arith.constant 0 : index
    %c0_35 = arith.constant 0 : index
    %43 = vector.load %arg1[%c0_33, %c0_34, %c0_35] : memref<1x4x528xbf16, #tpu.memory_space<vmem>>, vector<1x4x384xbf16>
    %44 = vector.shape_cast %43 : vector<1x4x384xbf16> to vector<4x384xbf16>
    %c0_36 = arith.constant 0 : index
    %c0_37 = arith.constant 0 : index
    %c0_38 = arith.constant 0 : index
    %45 = vector.load %arg7[%c0_36, %c0_37, %c0_38] : memref<2x112x384xbf16, #tpu.memory_space<vmem>>, vector<1x4x384xbf16>
    %46 = vector.shape_cast %45 : vector<1x4x384xbf16> to vector<4x384xbf16>
    %47 = vector.shape_cast %44 : vector<4x384xbf16> to vector<1x4x384xbf16>
    tpu.vector_store %arg7[%c0_36, %c0_37, %c0_38], %47 {strides = array<i32>} : memref<2x112x384xbf16, #tpu.memory_space<vmem>>, vector<1x4x384xbf16>,
    %c0_39 = arith.constant 0 : index
    %c0_40 = arith.constant 0 : index
    %c1_41 = arith.constant 1 : index
    %48 = vector.load %arg1[%c0_39, %c0_40, %c1_41] : memref<1x4x528xbf16, #tpu.memory_space<vmem>>, vector<1x4x384xbf16>
    %49 = vector.shape_cast %48 : vector<1x4x384xbf16> to vector<4x384xbf16>
    %c0_42 = arith.constant 0 : index
    %c16 = arith.constant 16 : index
    %c0_43 = arith.constant 0 : index
    %50 = vector.load %arg7[%c0_42, %c16, %c0_43] : memref<2x112x384xbf16, #tpu.memory_space<vmem>>, vector<1x4x384xbf16>
    %51 = vector.shape_cast %50 : vector<1x4x384xbf16> to vector<4x384xbf16>
    %52 = vector.shape_cast %49 : vector<4x384xbf16> to vector<1x4x384xbf16>
    tpu.vector_store %arg7[%c0_42, %c16, %c0_43], %52 {strides = array<i32>} : memref<2x112x384xbf16, #tpu.memory_space<vmem>>, vector<1x4x384xbf16>,
    %c0_44 = arith.constant 0 : index
    %c0_45 = arith.constant 0 : index
    %c2 = arith.constant 2 : index
    %53 = vector.load %arg1[%c0_44, %c0_45, %c2] : memref<1x4x528xbf16, #tpu.memory_space<vmem>>, vector<1x4x384xbf16>
    %54 = vector.shape_cast %53 : vector<1x4x384xbf16> to vector<4x384xbf16>
    %c0_46 = arith.constant 0 : index
    %c32 = arith.constant 32 : index
    %c0_47 = arith.constant 0 : index
    %55 = vector.load %arg7[%c0_46, %c32, %c0_47] : memref<2x112x384xbf16, #tpu.memory_space<vmem>>, vector<1x4x384xbf16>
    %56 = vector.shape_cast %55 : vector<1x4x384xbf16> to vector<4x384xbf16>
    %57 = vector.shape_cast %54 : vector<4x384xbf16> to vector<1x4x384xbf16>
    tpu.vector_store %arg7[%c0_46, %c32, %c0_47], %57 {strides = array<i32>} : memref<2x112x384xbf16, #tpu.memory_space<vmem>>, vector<1x4x384xbf16>,
    %c0_48 = arith.constant 0 : index
    %c0_49 = arith.constant 0 : index
    %c3 = arith.constant 3 : index
    %58 = vector.load %arg1[%c0_48, %c0_49, %c3] : memref<1x4x528xbf16, #tpu.memory_space<vmem>>, vector<1x4x384xbf16>
    %59 = vector.shape_cast %58 : vector<1x4x384xbf16> to vector<4x384xbf16>
    %c0_50 = arith.constant 0 : index
    %c48 = arith.constant 48 : index
    %c0_51 = arith.constant 0 : index
    %60 = vector.load %arg7[%c0_50, %c48, %c0_51] : memref<2x112x384xbf16, #tpu.memory_space<vmem>>, vector<1x4x384xbf16>
    %61 = vector.shape_cast %60 : vector<1x4x384xbf16> to vector<4x384xbf16>
    %62 = vector.shape_cast %59 : vector<4x384xbf16> to vector<1x4x384xbf16>
    tpu.vector_store %arg7[%c0_50, %c48, %c0_51], %62 {strides = array<i32>} : memref<2x112x384xbf16, #tpu.memory_space<vmem>>, vector<1x4x384xbf16>,
    %c0_52 = arith.constant 0 : index
    %c0_53 = arith.constant 0 : index
    %c4_54 = arith.constant 4 : index
    %63 = vector.load %arg1[%c0_52, %c0_53, %c4_54] : memref<1x4x528xbf16, #tpu.memory_space<vmem>>, vector<1x4x384xbf16>
    %64 = vector.shape_cast %63 : vector<1x4x384xbf16> to vector<4x384xbf16>
    %c0_55 = arith.constant 0 : index
    %c64 = arith.constant 64 : index
    %c0_56 = arith.constant 0 : index
    %65 = vector.load %arg7[%c0_55, %c64, %c0_56] : memref<2x112x384xbf16, #tpu.memory_space<vmem>>, vector<1x4x384xbf16>
    %66 = vector.shape_cast %65 : vector<1x4x384xbf16> to vector<4x384xbf16>
    %67 = vector.shape_cast %64 : vector<4x384xbf16> to vector<1x4x384xbf16>
    tpu.vector_store %arg7[%c0_55, %c64, %c0_56], %67 {strides = array<i32>} : memref<2x112x384xbf16, #tpu.memory_space<vmem>>, vector<1x4x384xbf16>,
    %c0_57 = arith.constant 0 : index
    %c0_58 = arith.constant 0 : index
    %c5 = arith.constant 5 : index
    %68 = vector.load %arg1[%c0_57, %c0_58, %c5] : memref<1x4x528xbf16, #tpu.memory_space<vmem>>, vector<1x4x384xbf16>
    %69 = vector.shape_cast %68 : vector<1x4x384xbf16> to vector<4x384xbf16>
    %c0_59 = arith.constant 0 : index
    %c80 = arith.constant 80 : index
    %c0_60 = arith.constant 0 : index
    %70 = vector.load %arg7[%c0_59, %c80, %c0_60] : memref<2x112x384xbf16, #tpu.memory_space<vmem>>, vector<1x4x384xbf16>
    %71 = vector.shape_cast %70 : vector<1x4x384xbf16> to vector<4x384xbf16>
    %72 = vector.shape_cast %69 : vector<4x384xbf16> to vector<1x4x384xbf16>
    tpu.vector_store %arg7[%c0_59, %c80, %c0_60], %72 {strides = array<i32>} : memref<2x112x384xbf16, #tpu.memory_space<vmem>>, vector<1x4x384xbf16>,
    %c0_61 = arith.constant 0 : index
    %c0_62 = arith.constant 0 : index
    %c6 = arith.constant 6 : index
    %73 = vector.load %arg1[%c0_61, %c0_62, %c6] : memref<1x4x528xbf16, #tpu.memory_space<vmem>>, vector<1x4x384xbf16>
    %74 = vector.shape_cast %73 : vector<1x4x384xbf16> to vector<4x384xbf16>
    %c0_63 = arith.constant 0 : index
    %c96 = arith.constant 96 : index
    %c0_64 = arith.constant 0 : index
    %75 = vector.load %arg7[%c0_63, %c96, %c0_64] : memref<2x112x384xbf16, #tpu.memory_space<vmem>>, vector<1x4x384xbf16>
    %76 = vector.shape_cast %75 : vector<1x4x384xbf16> to vector<4x384xbf16>
    %77 = vector.shape_cast %74 : vector<4x384xbf16> to vector<1x4x384xbf16>
    tpu.vector_store %arg7[%c0_63, %c96, %c0_64], %77 {strides = array<i32>} : memref<2x112x384xbf16, #tpu.memory_space<vmem>>, vector<1x4x384xbf16>,
    %c0_65 = arith.constant 0 : index
    %c0_66 = arith.constant 0 : index
    %c0_67 = arith.constant 0 : index
    %78 = vector.load %arg2[%c0_65, %c0_66, %c0_67] : memref<7x4x112xbf16, #tpu.memory_space<vmem>>, vector<1x4x112xbf16>
    %79 = vector.shape_cast %78 : vector<1x4x112xbf16> to vector<4x112xbf16>
    %c0_68 = arith.constant 0 : index
    %c0_69 = arith.constant 0 : index
    %c0_70 = arith.constant 0 : index
    %80 = vector.load %arg7[%c0_68, %c0_69, %c0_70] : memref<2x112x384xbf16, #tpu.memory_space<vmem>>, vector<1x112x384xbf16>
    %81 = vector.shape_cast %80 : vector<1x112x384xbf16> to vector<112x384xbf16>
    %cst_71 = arith.constant dense<0.000000e+00> : vector<4x384xf32>
    %82 = tpu.matmul %79, %81, %cst_71 {dimension_numbers = #tpu.dot_dimension_numbers<[1], [0], [0], [1], [0, 0, 1, 1], [], []>} : vector<4x112xbf16>, vector<112x384xbf16>, vector<4x384xf32> -> vector<4x384xf32>
    %c0_72 = arith.constant 0 : index
    %c0_73 = arith.constant 0 : index
    %83 = vector.load %arg8[%c0_72, %c0_73] : memref<4x384xf32, #tpu.memory_space<vmem>>, vector<4x384xf32>
    tpu.vector_store %arg8[%c0_72, %c0_73], %82 {strides = array<i32>} : memref<4x384xf32, #tpu.memory_space<vmem>>, vector<4x384xf32>,
    %c0_74 = arith.constant 0 : index
    %c0_75 = arith.constant 0 : index
    %c22 = arith.constant 22 : index
    %84 = vector.load %arg1[%c0_74, %c0_75, %c22] : memref<1x4x528xbf16, #tpu.memory_space<vmem>>, vector<1x4x384xbf16>
    %85 = vector.shape_cast %84 : vector<1x4x384xbf16> to vector<4x384xbf16>
    %c1_76 = arith.constant 1 : index
    %c0_77 = arith.constant 0 : index
    %c0_78 = arith.constant 0 : index
    %86 = vector.load %arg7[%c1_76, %c0_77, %c0_78] : memref<2x112x384xbf16, #tpu.memory_space<vmem>>, vector<1x4x384xbf16>
    %87 = vector.shape_cast %86 : vector<1x4x384xbf16> to vector<4x384xbf16>
    %88 = vector.shape_cast %85 : vector<4x384xbf16> to vector<1x4x384xbf16>
    tpu.vector_store %arg7[%c1_76, %c0_77, %c0_78], %88 {strides = array<i32>} : memref<2x112x384xbf16, #tpu.memory_space<vmem>>, vector<1x4x384xbf16>,
    %c0_79 = arith.constant 0 : index
    %c0_80 = arith.constant 0 : index
    %c23 = arith.constant 23 : index
    %89 = vector.load %arg1[%c0_79, %c0_80, %c23] : memref<1x4x528xbf16, #tpu.memory_space<vmem>>, vector<1x4x384xbf16>
    %90 = vector.shape_cast %89 : vector<1x4x384xbf16> to vector<4x384xbf16>
    %c1_81 = arith.constant 1 : index
    %c16_82 = arith.constant 16 : index
    %c0_83 = arith.constant 0 : index
    %91 = vector.load %arg7[%c1_81, %c16_82, %c0_83] : memref<2x112x384xbf16, #tpu.memory_space<vmem>>, vector<1x4x384xbf16>
    %92 = vector.shape_cast %91 : vector<1x4x384xbf16> to vector<4x384xbf16>
    %93 = vector.shape_cast %90 : vector<4x384xbf16> to vector<1x4x384xbf16>
    tpu.vector_store %arg7[%c1_81, %c16_82, %c0_83], %93 {strides = array<i32>} : memref<2x112x384xbf16, #tpu.memory_space<vmem>>, vector<1x4x384xbf16>,
    %c0_84 = arith.constant 0 : index
    %c0_85 = arith.constant 0 : index
    %c24 = arith.constant 24 : index
    %94 = vector.load %arg1[%c0_84, %c0_85, %c24] : memref<1x4x528xbf16, #tpu.memory_space<vmem>>, vector<1x4x384xbf16>
    %95 = vector.shape_cast %94 : vector<1x4x384xbf16> to vector<4x384xbf16>
    %c1_86 = arith.constant 1 : index
    %c32_87 = arith.constant 32 : index
    %c0_88 = arith.constant 0 : index
    %96 = vector.load %arg7[%c1_86, %c32_87, %c0_88] : memref<2x112x384xbf16, #tpu.memory_space<vmem>>, vector<1x4x384xbf16>
    %97 = vector.shape_cast %96 : vector<1x4x384xbf16> to vector<4x384xbf16>
    %98 = vector.shape_cast %95 : vector<4x384xbf16> to vector<1x4x384xbf16>
    tpu.vector_store %arg7[%c1_86, %c32_87, %c0_88], %98 {strides = array<i32>} : memref<2x112x384xbf16, #tpu.memory_space<vmem>>, vector<1x4x384xbf16>,
    %c0_89 = arith.constant 0 : index
    %c0_90 = arith.constant 0 : index
    %c25 = arith.constant 25 : index
    %99 = vector.load %arg1[%c0_89, %c0_90, %c25] : memref<1x4x528xbf16, #tpu.memory_space<vmem>>, vector<1x4x384xbf16>
    %100 = vector.shape_cast %99 : vector<1x4x384xbf16> to vector<4x384xbf16>
    %c1_91 = arith.constant 1 : index
    %c48_92 = arith.constant 48 : index
    %c0_93 = arith.constant 0 : index
    %101 = vector.load %arg7[%c1_91, %c48_92, %c0_93] : memref<2x112x384xbf16, #tpu.memory_space<vmem>>, vector<1x4x384xbf16>
    %102 = vector.shape_cast %101 : vector<1x4x384xbf16> to vector<4x384xbf16>
    %103 = vector.shape_cast %100 : vector<4x384xbf16> to vector<1x4x384xbf16>
    tpu.vector_store %arg7[%c1_91, %c48_92, %c0_93], %103 {strides = array<i32>} : memref<2x112x384xbf16, #tpu.memory_space<vmem>>, vector<1x4x384xbf16>,
    %c0_94 = arith.constant 0 : index
    %c0_95 = arith.constant 0 : index
    %c26 = arith.constant 26 : index
    %104 = vector.load %arg1[%c0_94, %c0_95, %c26] : memref<1x4x528xbf16, #tpu.memory_space<vmem>>, vector<1x4x384xbf16>
    %105 = vector.shape_cast %104 : vector<1x4x384xbf16> to vector<4x384xbf16>
    %c1_96 = arith.constant 1 : index
    %c64_97 = arith.constant 64 : index
    %c0_98 = arith.constant 0 : index
    %106 = vector.load %arg7[%c1_96, %c64_97, %c0_98] : memref<2x112x384xbf16, #tpu.memory_space<vmem>>, vector<1x4x384xbf16>
    %107 = vector.shape_cast %106 : vector<1x4x384xbf16> to vector<4x384xbf16>
    %108 = vector.shape_cast %105 : vector<4x384xbf16> to vector<1x4x384xbf16>
    tpu.vector_store %arg7[%c1_96, %c64_97, %c0_98], %108 {strides = array<i32>} : memref<2x112x384xbf16, #tpu.memory_space<vmem>>, vector<1x4x384xbf16>,
    %c0_99 = arith.constant 0 : index
    %c0_100 = arith.constant 0 : index
    %c27 = arith.constant 27 : index
    %109 = vector.load %arg1[%c0_99, %c0_100, %c27] : memref<1x4x528xbf16, #tpu.memory_space<vmem>>, vector<1x4x384xbf16>
    %110 = vector.shape_cast %109 : vector<1x4x384xbf16> to vector<4x384xbf16>
    %c1_101 = arith.constant 1 : index
    %c80_102 = arith.constant 80 : index
    %c0_103 = arith.constant 0 : index
    %111 = vector.load %arg7[%c1_101, %c80_102, %c0_103] : memref<2x112x384xbf16, #tpu.memory_space<vmem>>, vector<1x4x384xbf16>
    %112 = vector.shape_cast %111 : vector<1x4x384xbf16> to vector<4x384xbf16>
    %113 = vector.shape_cast %110 : vector<4x384xbf16> to vector<1x4x384xbf16>
    tpu.vector_store %arg7[%c1_101, %c80_102, %c0_103], %113 {strides = array<i32>} : memref<2x112x384xbf16, #tpu.memory_space<vmem>>, vector<1x4x384xbf16>,
    %c0_104 = arith.constant 0 : index
    %c0_105 = arith.constant 0 : index
    %c28 = arith.constant 28 : index
    %114 = vector.load %arg1[%c0_104, %c0_105, %c28] : memref<1x4x528xbf16, #tpu.memory_space<vmem>>, vector<1x4x384xbf16>
    %115 = vector.shape_cast %114 : vector<1x4x384xbf16> to vector<4x384xbf16>
    %c1_106 = arith.constant 1 : index
    %c96_107 = arith.constant 96 : index
    %c0_108 = arith.constant 0 : index
    %116 = vector.load %arg7[%c1_106, %c96_107, %c0_108] : memref<2x112x384xbf16, #tpu.memory_space<vmem>>, vector<1x4x384xbf16>
    %117 = vector.shape_cast %116 : vector<1x4x384xbf16> to vector<4x384xbf16>
    %118 = vector.shape_cast %115 : vector<4x384xbf16> to vector<1x4x384xbf16>
    tpu.vector_store %arg7[%c1_106, %c96_107, %c0_108], %118 {strides = array<i32>} : memref<2x112x384xbf16, #tpu.memory_space<vmem>>, vector<1x4x384xbf16>,
    %c1_109 = arith.constant 1 : index
    %c0_110 = arith.constant 0 : index
    %c0_111 = arith.constant 0 : index
    %119 = vector.load %arg2[%c1_109, %c0_110, %c0_111] : memref<7x4x112xbf16, #tpu.memory_space<vmem>>, vector<1x4x112xbf16>
    %120 = vector.shape_cast %119 : vector<1x4x112xbf16> to vector<4x112xbf16>
    %c1_112 = arith.constant 1 : index
    %c0_113 = arith.constant 0 : index
    %c0_114 = arith.constant 0 : index
    %121 = vector.load %arg7[%c1_112, %c0_113, %c0_114] : memref<2x112x384xbf16, #tpu.memory_space<vmem>>, vector<1x112x384xbf16>
    %122 = vector.shape_cast %121 : vector<1x112x384xbf16> to vector<112x384xbf16>
    %cst_115 = arith.constant dense<0.000000e+00> : vector<4x384xf32>
    %123 = tpu.matmul %120, %122, %cst_115 {dimension_numbers = #tpu.dot_dimension_numbers<[1], [0], [0], [1], [0, 0, 1, 1], [], []>} : vector<4x112xbf16>, vector<112x384xbf16>, vector<4x384xf32> -> vector<4x384xf32>
    %c0_116 = arith.constant 0 : index
    %c0_117 = arith.constant 0 : index
    %124 = vector.load %arg8[%c0_116, %c0_117] : memref<4x384xf32, #tpu.memory_space<vmem>>, vector<4x384xf32>
    %125 = arith.addf %124, %123 : vector<4x384xf32>
    %c0_118 = arith.constant 0 : index
    %c0_119 = arith.constant 0 : index
    %126 = vector.load %arg8[%c0_118, %c0_119] : memref<4x384xf32, #tpu.memory_space<vmem>>, vector<4x384xf32>
    tpu.vector_store %arg8[%c0_118, %c0_119], %125 {strides = array<i32>} : memref<4x384xf32, #tpu.memory_space<vmem>>, vector<4x384xf32>,
    %c0_120 = arith.constant 0 : index
    %c0_121 = arith.constant 0 : index
    %c44 = arith.constant 44 : index
    %127 = vector.load %arg1[%c0_120, %c0_121, %c44] : memref<1x4x528xbf16, #tpu.memory_space<vmem>>, vector<1x4x384xbf16>
    %128 = vector.shape_cast %127 : vector<1x4x384xbf16> to vector<4x384xbf16>
    %c0_122 = arith.constant 0 : index
    %c0_123 = arith.constant 0 : index
    %c0_124 = arith.constant 0 : index
    %129 = vector.load %arg7[%c0_122, %c0_123, %c0_124] : memref<2x112x384xbf16, #tpu.memory_space<vmem>>, vector<1x4x384xbf16>
    %130 = vector.shape_cast %129 : vector<1x4x384xbf16> to vector<4x384xbf16>
    %131 = vector.shape_cast %128 : vector<4x384xbf16> to vector<1x4x384xbf16>
    tpu.vector_store %arg7[%c0_122, %c0_123, %c0_124], %131 {strides = array<i32>} : memref<2x112x384xbf16, #tpu.memory_space<vmem>>, vector<1x4x384xbf16>,
    %c0_125 = arith.constant 0 : index
    %c0_126 = arith.constant 0 : index
    %c45 = arith.constant 45 : index
    %132 = vector.load %arg1[%c0_125, %c0_126, %c45] : memref<1x4x528xbf16, #tpu.memory_space<vmem>>, vector<1x4x384xbf16>
    %133 = vector.shape_cast %132 : vector<1x4x384xbf16> to vector<4x384xbf16>
    %c0_127 = arith.constant 0 : index
    %c16_128 = arith.constant 16 : index
    %c0_129 = arith.constant 0 : index
    %134 = vector.load %arg7[%c0_127, %c16_128, %c0_129] : memref<2x112x384xbf16, #tpu.memory_space<vmem>>, vector<1x4x384xbf16>
    %135 = vector.shape_cast %134 : vector<1x4x384xbf16> to vector<4x384xbf16>
    %136 = vector.shape_cast %133 : vector<4x384xbf16> to vector<1x4x384xbf16>
    tpu.vector_store %arg7[%c0_127, %c16_128, %c0_129], %136 {strides = array<i32>} : memref<2x112x384xbf16, #tpu.memory_space<vmem>>, vector<1x4x384xbf16>,
    %c0_130 = arith.constant 0 : index
    %c0_131 = arith.constant 0 : index
    %c46 = arith.constant 46 : index
    %137 = vector.load %arg1[%c0_130, %c0_131, %c46] : memref<1x4x528xbf16, #tpu.memory_space<vmem>>, vector<1x4x384xbf16>
    %138 = vector.shape_cast %137 : vector<1x4x384xbf16> to vector<4x384xbf16>
    %c0_132 = arith.constant 0 : index
    %c32_133 = arith.constant 32 : index
    %c0_134 = arith.constant 0 : index
    %139 = vector.load %arg7[%c0_132, %c32_133, %c0_134] : memref<2x112x384xbf16, #tpu.memory_space<vmem>>, vector<1x4x384xbf16>
    %140 = vector.shape_cast %139 : vector<1x4x384xbf16> to vector<4x384xbf16>
    %141 = vector.shape_cast %138 : vector<4x384xbf16> to vector<1x4x384xbf16>
    tpu.vector_store %arg7[%c0_132, %c32_133, %c0_134], %141 {strides = array<i32>} : memref<2x112x384xbf16, #tpu.memory_space<vmem>>, vector<1x4x384xbf16>,
    %c0_135 = arith.constant 0 : index
    %c0_136 = arith.constant 0 : index
    %c47 = arith.constant 47 : index
    %142 = vector.load %arg1[%c0_135, %c0_136, %c47] : memref<1x4x528xbf16, #tpu.memory_space<vmem>>, vector<1x4x384xbf16>
    %143 = vector.shape_cast %142 : vector<1x4x384xbf16> to vector<4x384xbf16>
    %c0_137 = arith.constant 0 : index
    %c48_138 = arith.constant 48 : index
    %c0_139 = arith.constant 0 : index
    %144 = vector.load %arg7[%c0_137, %c48_138, %c0_139] : memref<2x112x384xbf16, #tpu.memory_space<vmem>>, vector<1x4x384xbf16>
    %145 = vector.shape_cast %144 : vector<1x4x384xbf16> to vector<4x384xbf16>
    %146 = vector.shape_cast %143 : vector<4x384xbf16> to vector<1x4x384xbf16>
    tpu.vector_store %arg7[%c0_137, %c48_138, %c0_139], %146 {strides = array<i32>} : memref<2x112x384xbf16, #tpu.memory_space<vmem>>, vector<1x4x384xbf16>,
    %c0_140 = arith.constant 0 : index
    %c0_141 = arith.constant 0 : index
    %c48_142 = arith.constant 48 : index
    %147 = vector.load %arg1[%c0_140, %c0_141, %c48_142] : memref<1x4x528xbf16, #tpu.memory_space<vmem>>, vector<1x4x384xbf16>
    %148 = vector.shape_cast %147 : vector<1x4x384xbf16> to vector<4x384xbf16>
    %c0_143 = arith.constant 0 : index
    %c64_144 = arith.constant 64 : index
    %c0_145 = arith.constant 0 : index
    %149 = vector.load %arg7[%c0_143, %c64_144, %c0_145] : memref<2x112x384xbf16, #tpu.memory_space<vmem>>, vector<1x4x384xbf16>
    %150 = vector.shape_cast %149 : vector<1x4x384xbf16> to vector<4x384xbf16>
    %151 = vector.shape_cast %148 : vector<4x384xbf16> to vector<1x4x384xbf16>
    tpu.vector_store %arg7[%c0_143, %c64_144, %c0_145], %151 {strides = array<i32>} : memref<2x112x384xbf16, #tpu.memory_space<vmem>>, vector<1x4x384xbf16>,
    %c0_146 = arith.constant 0 : index
    %c0_147 = arith.constant 0 : index
    %c49 = arith.constant 49 : index
    %152 = vector.load %arg1[%c0_146, %c0_147, %c49] : memref<1x4x528xbf16, #tpu.memory_space<vmem>>, vector<1x4x384xbf16>
    %153 = vector.shape_cast %152 : vector<1x4x384xbf16> to vector<4x384xbf16>
    %c0_148 = arith.constant 0 : index
    %c80_149 = arith.constant 80 : index
    %c0_150 = arith.constant 0 : index
    %154 = vector.load %arg7[%c0_148, %c80_149, %c0_150] : memref<2x112x384xbf16, #tpu.memory_space<vmem>>, vector<1x4x384xbf16>
    %155 = vector.shape_cast %154 : vector<1x4x384xbf16> to vector<4x384xbf16>
    %156 = vector.shape_cast %153 : vector<4x384xbf16> to vector<1x4x384xbf16>
    tpu.vector_store %arg7[%c0_148, %c80_149, %c0_150], %156 {strides = array<i32>} : memref<2x112x384xbf16, #tpu.memory_space<vmem>>, vector<1x4x384xbf16>,
    %c0_151 = arith.constant 0 : index
    %c0_152 = arith.constant 0 : index
    %c50 = arith.constant 50 : index
    %157 = vector.load %arg1[%c0_151, %c0_152, %c50] : memref<1x4x528xbf16, #tpu.memory_space<vmem>>, vector<1x4x384xbf16>
    %158 = vector.shape_cast %157 : vector<1x4x384xbf16> to vector<4x384xbf16>
    %c0_153 = arith.constant 0 : index
    %c96_154 = arith.constant 96 : index
    %c0_155 = arith.constant 0 : index
    %159 = vector.load %arg7[%c0_153, %c96_154, %c0_155] : memref<2x112x384xbf16, #tpu.memory_space<vmem>>, vector<1x4x384xbf16>
    %160 = vector.shape_cast %159 : vector<1x4x384xbf16> to vector<4x384xbf16>
    %161 = vector.shape_cast %158 : vector<4x384xbf16> to vector<1x4x384xbf16>
    tpu.vector_store %arg7[%c0_153, %c96_154, %c0_155], %161 {strides = array<i32>} : memref<2x112x384xbf16, #tpu.memory_space<vmem>>, vector<1x4x384xbf16>,
    %c2_156 = arith.constant 2 : index
    %c0_157 = arith.constant 0 : index
    %c0_158 = arith.constant 0 : index
    %162 = vector.load %arg2[%c2_156, %c0_157, %c0_158] : memref<7x4x112xbf16, #tpu.memory_space<vmem>>, vector<1x4x112xbf16>
    %163 = vector.shape_cast %162 : vector<1x4x112xbf16> to vector<4x112xbf16>
    %c0_159 = arith.constant 0 : index
    %c0_160 = arith.constant 0 : index
    %c0_161 = arith.constant 0 : index
    %164 = vector.load %arg7[%c0_159, %c0_160, %c0_161] : memref<2x112x384xbf16, #tpu.memory_space<vmem>>, vector<1x112x384xbf16>
    %165 = vector.shape_cast %164 : vector<1x112x384xbf16> to vector<112x384xbf16>
    %cst_162 = arith.constant dense<0.000000e+00> : vector<4x384xf32>
    %166 = tpu.matmul %163, %165, %cst_162 {dimension_numbers = #tpu.dot_dimension_numbers<[1], [0], [0], [1], [0, 0, 1, 1], [], []>} : vector<4x112xbf16>, vector<112x384xbf16>, vector<4x384xf32> -> vector<4x384xf32>
    %c0_163 = arith.constant 0 : index
    %c0_164 = arith.constant 0 : index
    %167 = vector.load %arg8[%c0_163, %c0_164] : memref<4x384xf32, #tpu.memory_space<vmem>>, vector<4x384xf32>
    %168 = arith.addf %167, %166 : vector<4x384xf32>
    %c0_165 = arith.constant 0 : index
    %c0_166 = arith.constant 0 : index
    %169 = vector.load %arg8[%c0_165, %c0_166] : memref<4x384xf32, #tpu.memory_space<vmem>>, vector<4x384xf32>
    tpu.vector_store %arg8[%c0_165, %c0_166], %168 {strides = array<i32>} : memref<4x384xf32, #tpu.memory_space<vmem>>, vector<4x384xf32>,
    %c0_167 = arith.constant 0 : index
    %c0_168 = arith.constant 0 : index
    %c66 = arith.constant 66 : index
    %170 = vector.load %arg1[%c0_167, %c0_168, %c66] : memref<1x4x528xbf16, #tpu.memory_space<vmem>>, vector<1x4x384xbf16>
    %171 = vector.shape_cast %170 : vector<1x4x384xbf16> to vector<4x384xbf16>
    %c1_169 = arith.constant 1 : index
    %c0_170 = arith.constant 0 : index
    %c0_171 = arith.constant 0 : index
    %172 = vector.load %arg7[%c1_169, %c0_170, %c0_171] : memref<2x112x384xbf16, #tpu.memory_space<vmem>>, vector<1x4x384xbf16>
    %173 = vector.shape_cast %172 : vector<1x4x384xbf16> to vector<4x384xbf16>
    %174 = vector.shape_cast %171 : vector<4x384xbf16> to vector<1x4x384xbf16>
    tpu.vector_store %arg7[%c1_169, %c0_170, %c0_171], %174 {strides = array<i32>} : memref<2x112x384xbf16, #tpu.memory_space<vmem>>, vector<1x4x384xbf16>,
    %c0_172 = arith.constant 0 : index
    %c0_173 = arith.constant 0 : index
    %c67 = arith.constant 67 : index
    %175 = vector.load %arg1[%c0_172, %c0_173, %c67] : memref<1x4x528xbf16, #tpu.memory_space<vmem>>, vector<1x4x384xbf16>
    %176 = vector.shape_cast %175 : vector<1x4x384xbf16> to vector<4x384xbf16>
    %c1_174 = arith.constant 1 : index
    %c16_175 = arith.constant 16 : index
    %c0_176 = arith.constant 0 : index
    %177 = vector.load %arg7[%c1_174, %c16_175, %c0_176] : memref<2x112x384xbf16, #tpu.memory_space<vmem>>, vector<1x4x384xbf16>
    %178 = vector.shape_cast %177 : vector<1x4x384xbf16> to vector<4x384xbf16>
    %179 = vector.shape_cast %176 : vector<4x384xbf16> to vector<1x4x384xbf16>
    tpu.vector_store %arg7[%c1_174, %c16_175, %c0_176], %179 {strides = array<i32>} : memref<2x112x384xbf16, #tpu.memory_space<vmem>>, vector<1x4x384xbf16>,
    %c0_177 = arith.constant 0 : index
    %c0_178 = arith.constant 0 : index
    %c68_179 = arith.constant 68 : index
    %180 = vector.load %arg1[%c0_177, %c0_178, %c68_179] : memref<1x4x528xbf16, #tpu.memory_space<vmem>>, vector<1x4x384xbf16>
    %181 = vector.shape_cast %180 : vector<1x4x384xbf16> to vector<4x384xbf16>
    %c1_180 = arith.constant 1 : index
    %c32_181 = arith.constant 32 : index
    %c0_182 = arith.constant 0 : index
    %182 = vector.load %arg7[%c1_180, %c32_181, %c0_182] : memref<2x112x384xbf16, #tpu.memory_space<vmem>>, vector<1x4x384xbf16>
    %183 = vector.shape_cast %182 : vector<1x4x384xbf16> to vector<4x384xbf16>
    %184 = vector.shape_cast %181 : vector<4x384xbf16> to vector<1x4x384xbf16>
    tpu.vector_store %arg7[%c1_180, %c32_181, %c0_182], %184 {strides = array<i32>} : memref<2x112x384xbf16, #tpu.memory_space<vmem>>, vector<1x4x384xbf16>,
    %c0_183 = arith.constant 0 : index
    %c0_184 = arith.constant 0 : index
    %c69 = arith.constant 69 : index
    %185 = vector.load %arg1[%c0_183, %c0_184, %c69] : memref<1x4x528xbf16, #tpu.memory_space<vmem>>, vector<1x4x384xbf16>
    %186 = vector.shape_cast %185 : vector<1x4x384xbf16> to vector<4x384xbf16>
    %c1_185 = arith.constant 1 : index
    %c48_186 = arith.constant 48 : index
    %c0_187 = arith.constant 0 : index
    %187 = vector.load %arg7[%c1_185, %c48_186, %c0_187] : memref<2x112x384xbf16, #tpu.memory_space<vmem>>, vector<1x4x384xbf16>
    %188 = vector.shape_cast %187 : vector<1x4x384xbf16> to vector<4x384xbf16>
    %189 = vector.shape_cast %186 : vector<4x384xbf16> to vector<1x4x384xbf16>
    tpu.vector_store %arg7[%c1_185, %c48_186, %c0_187], %189 {strides = array<i32>} : memref<2x112x384xbf16, #tpu.memory_space<vmem>>, vector<1x4x384xbf16>,
    %c0_188 = arith.constant 0 : index
    %c0_189 = arith.constant 0 : index
    %c70 = arith.constant 70 : index
    %190 = vector.load %arg1[%c0_188, %c0_189, %c70] : memref<1x4x528xbf16, #tpu.memory_space<vmem>>, vector<1x4x384xbf16>
    %191 = vector.shape_cast %190 : vector<1x4x384xbf16> to vector<4x384xbf16>
    %c1_190 = arith.constant 1 : index
    %c64_191 = arith.constant 64 : index
    %c0_192 = arith.constant 0 : index
    %192 = vector.load %arg7[%c1_190, %c64_191, %c0_192] : memref<2x112x384xbf16, #tpu.memory_space<vmem>>, vector<1x4x384xbf16>
    %193 = vector.shape_cast %192 : vector<1x4x384xbf16> to vector<4x384xbf16>
    %194 = vector.shape_cast %191 : vector<4x384xbf16> to vector<1x4x384xbf16>
    tpu.vector_store %arg7[%c1_190, %c64_191, %c0_192], %194 {strides = array<i32>} : memref<2x112x384xbf16, #tpu.memory_space<vmem>>, vector<1x4x384xbf16>,
    %c0_193 = arith.constant 0 : index
    %c0_194 = arith.constant 0 : index
    %c71 = arith.constant 71 : index
    %195 = vector.load %arg1[%c0_193, %c0_194, %c71] : memref<1x4x528xbf16, #tpu.memory_space<vmem>>, vector<1x4x384xbf16>
    %196 = vector.shape_cast %195 : vector<1x4x384xbf16> to vector<4x384xbf16>
    %c1_195 = arith.constant 1 : index
    %c80_196 = arith.constant 80 : index
    %c0_197 = arith.constant 0 : index
    %197 = vector.load %arg7[%c1_195, %c80_196, %c0_197] : memref<2x112x384xbf16, #tpu.memory_space<vmem>>, vector<1x4x384xbf16>
    %198 = vector.shape_cast %197 : vector<1x4x384xbf16> to vector<4x384xbf16>
    %199 = vector.shape_cast %196 : vector<4x384xbf16> to vector<1x4x384xbf16>
    tpu.vector_store %arg7[%c1_195, %c80_196, %c0_197], %199 {strides = array<i32>} : memref<2x112x384xbf16, #tpu.memory_space<vmem>>, vector<1x4x384xbf16>,
    %c0_198 = arith.constant 0 : index
    %c0_199 = arith.constant 0 : index
    %c72 = arith.constant 72 : index
    %200 = vector.load %arg1[%c0_198, %c0_199, %c72] : memref<1x4x528xbf16, #tpu.memory_space<vmem>>, vector<1x4x384xbf16>
    %201 = vector.shape_cast %200 : vector<1x4x384xbf16> to vector<4x384xbf16>
    %c1_200 = arith.constant 1 : index
    %c96_201 = arith.constant 96 : index
    %c0_202 = arith.constant 0 : index
    %202 = vector.load %arg7[%c1_200, %c96_201, %c0_202] : memref<2x112x384xbf16, #tpu.memory_space<vmem>>, vector<1x4x384xbf16>
    %203 = vector.shape_cast %202 : vector<1x4x384xbf16> to vector<4x384xbf16>
    %204 = vector.shape_cast %201 : vector<4x384xbf16> to vector<1x4x384xbf16>
    tpu.vector_store %arg7[%c1_200, %c96_201, %c0_202], %204 {strides = array<i32>} : memref<2x112x384xbf16, #tpu.memory_space<vmem>>, vector<1x4x384xbf16>,
    %c3_203 = arith.constant 3 : index
    %c0_204 = arith.constant 0 : index
    %c0_205 = arith.constant 0 : index
    %205 = vector.load %arg2[%c3_203, %c0_204, %c0_205] : memref<7x4x112xbf16, #tpu.memory_space<vmem>>, vector<1x4x112xbf16>
    %206 = vector.shape_cast %205 : vector<1x4x112xbf16> to vector<4x112xbf16>
    %c1_206 = arith.constant 1 : index
    %c0_207 = arith.constant 0 : index
    %c0_208 = arith.constant 0 : index
    %207 = vector.load %arg7[%c1_206, %c0_207, %c0_208] : memref<2x112x384xbf16, #tpu.memory_space<vmem>>, vector<1x112x384xbf16>
    %208 = vector.shape_cast %207 : vector<1x112x384xbf16> to vector<112x384xbf16>
    %cst_209 = arith.constant dense<0.000000e+00> : vector<4x384xf32>
    %209 = tpu.matmul %206, %208, %cst_209 {dimension_numbers = #tpu.dot_dimension_numbers<[1], [0], [0], [1], [0, 0, 1, 1], [], []>} : vector<4x112xbf16>, vector<112x384xbf16>, vector<4x384xf32> -> vector<4x384xf32>
    %c0_210 = arith.constant 0 : index
    %c0_211 = arith.constant 0 : index
    %210 = vector.load %arg8[%c0_210, %c0_211] : memref<4x384xf32, #tpu.memory_space<vmem>>, vector<4x384xf32>
    %211 = arith.addf %210, %209 : vector<4x384xf32>
    %c0_212 = arith.constant 0 : index
    %c0_213 = arith.constant 0 : index
    %212 = vector.load %arg8[%c0_212, %c0_213] : memref<4x384xf32, #tpu.memory_space<vmem>>, vector<4x384xf32>
    tpu.vector_store %arg8[%c0_212, %c0_213], %211 {strides = array<i32>} : memref<4x384xf32, #tpu.memory_space<vmem>>, vector<4x384xf32>,
    %c0_214 = arith.constant 0 : index
    %c0_215 = arith.constant 0 : index
    %c88 = arith.constant 88 : index
    %213 = vector.load %arg1[%c0_214, %c0_215, %c88] : memref<1x4x528xbf16, #tpu.memory_space<vmem>>, vector<1x4x384xbf16>
    %214 = vector.shape_cast %213 : vector<1x4x384xbf16> to vector<4x384xbf16>
    %c0_216 = arith.constant 0 : index
    %c0_217 = arith.constant 0 : index
    %c0_218 = arith.constant 0 : index
    %215 = vector.load %arg7[%c0_216, %c0_217, %c0_218] : memref<2x112x384xbf16, #tpu.memory_space<vmem>>, vector<1x4x384xbf16>
    %216 = vector.shape_cast %215 : vector<1x4x384xbf16> to vector<4x384xbf16>
    %217 = vector.shape_cast %214 : vector<4x384xbf16> to vector<1x4x384xbf16>
    tpu.vector_store %arg7[%c0_216, %c0_217, %c0_218], %217 {strides = array<i32>} : memref<2x112x384xbf16, #tpu.memory_space<vmem>>, vector<1x4x384xbf16>,
    %c0_219 = arith.constant 0 : index
    %c0_220 = arith.constant 0 : index
    %c89 = arith.constant 89 : index
    %218 = vector.load %arg1[%c0_219, %c0_220, %c89] : memref<1x4x528xbf16, #tpu.memory_space<vmem>>, vector<1x4x384xbf16>
    %219 = vector.shape_cast %218 : vector<1x4x384xbf16> to vector<4x384xbf16>
    %c0_221 = arith.constant 0 : index
    %c16_222 = arith.constant 16 : index
    %c0_223 = arith.constant 0 : index
    %220 = vector.load %arg7[%c0_221, %c16_222, %c0_223] : memref<2x112x384xbf16, #tpu.memory_space<vmem>>, vector<1x4x384xbf16>
    %221 = vector.shape_cast %220 : vector<1x4x384xbf16> to vector<4x384xbf16>
    %222 = vector.shape_cast %219 : vector<4x384xbf16> to vector<1x4x384xbf16>
    tpu.vector_store %arg7[%c0_221, %c16_222, %c0_223], %222 {strides = array<i32>} : memref<2x112x384xbf16, #tpu.memory_space<vmem>>, vector<1x4x384xbf16>,
    %c0_224 = arith.constant 0 : index
    %c0_225 = arith.constant 0 : index
    %c90 = arith.constant 90 : index
    %223 = vector.load %arg1[%c0_224, %c0_225, %c90] : memref<1x4x528xbf16, #tpu.memory_space<vmem>>, vector<1x4x384xbf16>
    %224 = vector.shape_cast %223 : vector<1x4x384xbf16> to vector<4x384xbf16>
    %c0_226 = arith.constant 0 : index
    %c32_227 = arith.constant 32 : index
    %c0_228 = arith.constant 0 : index
    %225 = vector.load %arg7[%c0_226, %c32_227, %c0_228] : memref<2x112x384xbf16, #tpu.memory_space<vmem>>, vector<1x4x384xbf16>
    %226 = vector.shape_cast %225 : vector<1x4x384xbf16> to vector<4x384xbf16>
    %227 = vector.shape_cast %224 : vector<4x384xbf16> to vector<1x4x384xbf16>
    tpu.vector_store %arg7[%c0_226, %c32_227, %c0_228], %227 {strides = array<i32>} : memref<2x112x384xbf16, #tpu.memory_space<vmem>>, vector<1x4x384xbf16>,
    %c0_229 = arith.constant 0 : index
    %c0_230 = arith.constant 0 : index
    %c91 = arith.constant 91 : index
    %228 = vector.load %arg1[%c0_229, %c0_230, %c91] : memref<1x4x528xbf16, #tpu.memory_space<vmem>>, vector<1x4x384xbf16>
    %229 = vector.shape_cast %228 : vector<1x4x384xbf16> to vector<4x384xbf16>
    %c0_231 = arith.constant 0 : index
    %c48_232 = arith.constant 48 : index
    %c0_233 = arith.constant 0 : index
    %230 = vector.load %arg7[%c0_231, %c48_232, %c0_233] : memref<2x112x384xbf16, #tpu.memory_space<vmem>>, vector<1x4x384xbf16>
    %231 = vector.shape_cast %230 : vector<1x4x384xbf16> to vector<4x384xbf16>
    %232 = vector.shape_cast %229 : vector<4x384xbf16> to vector<1x4x384xbf16>
    tpu.vector_store %arg7[%c0_231, %c48_232, %c0_233], %232 {strides = array<i32>} : memref<2x112x384xbf16, #tpu.memory_space<vmem>>, vector<1x4x384xbf16>,
    %c0_234 = arith.constant 0 : index
    %c0_235 = arith.constant 0 : index
    %c92 = arith.constant 92 : index
    %233 = vector.load %arg1[%c0_234, %c0_235, %c92] : memref<1x4x528xbf16, #tpu.memory_space<vmem>>, vector<1x4x384xbf16>
    %234 = vector.shape_cast %233 : vector<1x4x384xbf16> to vector<4x384xbf16>
    %c0_236 = arith.constant 0 : index
    %c64_237 = arith.constant 64 : index
    %c0_238 = arith.constant 0 : index
    %235 = vector.load %arg7[%c0_236, %c64_237, %c0_238] : memref<2x112x384xbf16, #tpu.memory_space<vmem>>, vector<1x4x384xbf16>
    %236 = vector.shape_cast %235 : vector<1x4x384xbf16> to vector<4x384xbf16>
    %237 = vector.shape_cast %234 : vector<4x384xbf16> to vector<1x4x384xbf16>
    tpu.vector_store %arg7[%c0_236, %c64_237, %c0_238], %237 {strides = array<i32>} : memref<2x112x384xbf16, #tpu.memory_space<vmem>>, vector<1x4x384xbf16>,
    %c0_239 = arith.constant 0 : index
    %c0_240 = arith.constant 0 : index
    %c93 = arith.constant 93 : index
    %238 = vector.load %arg1[%c0_239, %c0_240, %c93] : memref<1x4x528xbf16, #tpu.memory_space<vmem>>, vector<1x4x384xbf16>
    %239 = vector.shape_cast %238 : vector<1x4x384xbf16> to vector<4x384xbf16>
    %c0_241 = arith.constant 0 : index
    %c80_242 = arith.constant 80 : index
    %c0_243 = arith.constant 0 : index
    %240 = vector.load %arg7[%c0_241, %c80_242, %c0_243] : memref<2x112x384xbf16, #tpu.memory_space<vmem>>, vector<1x4x384xbf16>
    %241 = vector.shape_cast %240 : vector<1x4x384xbf16> to vector<4x384xbf16>
    %242 = vector.shape_cast %239 : vector<4x384xbf16> to vector<1x4x384xbf16>
    tpu.vector_store %arg7[%c0_241, %c80_242, %c0_243], %242 {strides = array<i32>} : memref<2x112x384xbf16, #tpu.memory_space<vmem>>, vector<1x4x384xbf16>,
    %c0_244 = arith.constant 0 : index
    %c0_245 = arith.constant 0 : index
    %c94 = arith.constant 94 : index
    %243 = vector.load %arg1[%c0_244, %c0_245, %c94] : memref<1x4x528xbf16, #tpu.memory_space<vmem>>, vector<1x4x384xbf16>
    %244 = vector.shape_cast %243 : vector<1x4x384xbf16> to vector<4x384xbf16>
    %c0_246 = arith.constant 0 : index
    %c96_247 = arith.constant 96 : index
    %c0_248 = arith.constant 0 : index
    %245 = vector.load %arg7[%c0_246, %c96_247, %c0_248] : memref<2x112x384xbf16, #tpu.memory_space<vmem>>, vector<1x4x384xbf16>
    %246 = vector.shape_cast %245 : vector<1x4x384xbf16> to vector<4x384xbf16>
    %247 = vector.shape_cast %244 : vector<4x384xbf16> to vector<1x4x384xbf16>
    tpu.vector_store %arg7[%c0_246, %c96_247, %c0_248], %247 {strides = array<i32>} : memref<2x112x384xbf16, #tpu.memory_space<vmem>>, vector<1x4x384xbf16>,
    %c4_249 = arith.constant 4 : index
    %c0_250 = arith.constant 0 : index
    %c0_251 = arith.constant 0 : index
    %248 = vector.load %arg2[%c4_249, %c0_250, %c0_251] : memref<7x4x112xbf16, #tpu.memory_space<vmem>>, vector<1x4x112xbf16>
    %249 = vector.shape_cast %248 : vector<1x4x112xbf16> to vector<4x112xbf16>
    %c0_252 = arith.constant 0 : index
    %c0_253 = arith.constant 0 : index
    %c0_254 = arith.constant 0 : index
    %250 = vector.load %arg7[%c0_252, %c0_253, %c0_254] : memref<2x112x384xbf16, #tpu.memory_space<vmem>>, vector<1x112x384xbf16>
    %251 = vector.shape_cast %250 : vector<1x112x384xbf16> to vector<112x384xbf16>
    %cst_255 = arith.constant dense<0.000000e+00> : vector<4x384xf32>
    %252 = tpu.matmul %249, %251, %cst_255 {dimension_numbers = #tpu.dot_dimension_numbers<[1], [0], [0], [1], [0, 0, 1, 1], [], []>} : vector<4x112xbf16>, vector<112x384xbf16>, vector<4x384xf32> -> vector<4x384xf32>
    %c0_256 = arith.constant 0 : index
    %c0_257 = arith.constant 0 : index
    %253 = vector.load %arg8[%c0_256, %c0_257] : memref<4x384xf32, #tpu.memory_space<vmem>>, vector<4x384xf32>
    %254 = arith.addf %253, %252 : vector<4x384xf32>
    %c0_258 = arith.constant 0 : index
    %c0_259 = arith.constant 0 : index
    %255 = vector.load %arg8[%c0_258, %c0_259] : memref<4x384xf32, #tpu.memory_space<vmem>>, vector<4x384xf32>
    tpu.vector_store %arg8[%c0_258, %c0_259], %254 {strides = array<i32>} : memref<4x384xf32, #tpu.memory_space<vmem>>, vector<4x384xf32>,
    %c0_260 = arith.constant 0 : index
    %c0_261 = arith.constant 0 : index
    %c110 = arith.constant 110 : index
    %256 = vector.load %arg1[%c0_260, %c0_261, %c110] : memref<1x4x528xbf16, #tpu.memory_space<vmem>>, vector<1x4x384xbf16>
    %257 = vector.shape_cast %256 : vector<1x4x384xbf16> to vector<4x384xbf16>
    %c1_262 = arith.constant 1 : index
    %c0_263 = arith.constant 0 : index
    %c0_264 = arith.constant 0 : index
    %258 = vector.load %arg7[%c1_262, %c0_263, %c0_264] : memref<2x112x384xbf16, #tpu.memory_space<vmem>>, vector<1x4x384xbf16>
    %259 = vector.shape_cast %258 : vector<1x4x384xbf16> to vector<4x384xbf16>
    %260 = vector.shape_cast %257 : vector<4x384xbf16> to vector<1x4x384xbf16>
    tpu.vector_store %arg7[%c1_262, %c0_263, %c0_264], %260 {strides = array<i32>} : memref<2x112x384xbf16, #tpu.memory_space<vmem>>, vector<1x4x384xbf16>,
    %c0_265 = arith.constant 0 : index
    %c0_266 = arith.constant 0 : index
    %c111 = arith.constant 111 : index
    %261 = vector.load %arg1[%c0_265, %c0_266, %c111] : memref<1x4x528xbf16, #tpu.memory_space<vmem>>, vector<1x4x384xbf16>
    %262 = vector.shape_cast %261 : vector<1x4x384xbf16> to vector<4x384xbf16>
    %c1_267 = arith.constant 1 : index
    %c16_268 = arith.constant 16 : index
    %c0_269 = arith.constant 0 : index
    %263 = vector.load %arg7[%c1_267, %c16_268, %c0_269] : memref<2x112x384xbf16, #tpu.memory_space<vmem>>, vector<1x4x384xbf16>
    %264 = vector.shape_cast %263 : vector<1x4x384xbf16> to vector<4x384xbf16>
    %265 = vector.shape_cast %262 : vector<4x384xbf16> to vector<1x4x384xbf16>
    tpu.vector_store %arg7[%c1_267, %c16_268, %c0_269], %265 {strides = array<i32>} : memref<2x112x384xbf16, #tpu.memory_space<vmem>>, vector<1x4x384xbf16>,
    %c0_270 = arith.constant 0 : index
    %c0_271 = arith.constant 0 : index
    %c112 = arith.constant 112 : index
    %266 = vector.load %arg1[%c0_270, %c0_271, %c112] : memref<1x4x528xbf16, #tpu.memory_space<vmem>>, vector<1x4x384xbf16>
    %267 = vector.shape_cast %266 : vector<1x4x384xbf16> to vector<4x384xbf16>
    %c1_272 = arith.constant 1 : index
    %c32_273 = arith.constant 32 : index
    %c0_274 = arith.constant 0 : index
    %268 = vector.load %arg7[%c1_272, %c32_273, %c0_274] : memref<2x112x384xbf16, #tpu.memory_space<vmem>>, vector<1x4x384xbf16>
    %269 = vector.shape_cast %268 : vector<1x4x384xbf16> to vector<4x384xbf16>
    %270 = vector.shape_cast %267 : vector<4x384xbf16> to vector<1x4x384xbf16>
    tpu.vector_store %arg7[%c1_272, %c32_273, %c0_274], %270 {strides = array<i32>} : memref<2x112x384xbf16, #tpu.memory_space<vmem>>, vector<1x4x384xbf16>,
    %c0_275 = arith.constant 0 : index
    %c0_276 = arith.constant 0 : index
    %c113 = arith.constant 113 : index
    %271 = vector.load %arg1[%c0_275, %c0_276, %c113] : memref<1x4x528xbf16, #tpu.memory_space<vmem>>, vector<1x4x384xbf16>
    %272 = vector.shape_cast %271 : vector<1x4x384xbf16> to vector<4x384xbf16>
    %c1_277 = arith.constant 1 : index
    %c48_278 = arith.constant 48 : index
    %c0_279 = arith.constant 0 : index
    %273 = vector.load %arg7[%c1_277, %c48_278, %c0_279] : memref<2x112x384xbf16, #tpu.memory_space<vmem>>, vector<1x4x384xbf16>
    %274 = vector.shape_cast %273 : vector<1x4x384xbf16> to vector<4x384xbf16>
    %275 = vector.shape_cast %272 : vector<4x384xbf16> to vector<1x4x384xbf16>
    tpu.vector_store %arg7[%c1_277, %c48_278, %c0_279], %275 {strides = array<i32>} : memref<2x112x384xbf16, #tpu.memory_space<vmem>>, vector<1x4x384xbf16>,
    %c0_280 = arith.constant 0 : index
    %c0_281 = arith.constant 0 : index
    %c114 = arith.constant 114 : index
    %276 = vector.load %arg1[%c0_280, %c0_281, %c114] : memref<1x4x528xbf16, #tpu.memory_space<vmem>>, vector<1x4x384xbf16>
    %277 = vector.shape_cast %276 : vector<1x4x384xbf16> to vector<4x384xbf16>
    %c1_282 = arith.constant 1 : index
    %c64_283 = arith.constant 64 : index
    %c0_284 = arith.constant 0 : index
    %278 = vector.load %arg7[%c1_282, %c64_283, %c0_284] : memref<2x112x384xbf16, #tpu.memory_space<vmem>>, vector<1x4x384xbf16>
    %279 = vector.shape_cast %278 : vector<1x4x384xbf16> to vector<4x384xbf16>
    %280 = vector.shape_cast %277 : vector<4x384xbf16> to vector<1x4x384xbf16>
    tpu.vector_store %arg7[%c1_282, %c64_283, %c0_284], %280 {strides = array<i32>} : memref<2x112x384xbf16, #tpu.memory_space<vmem>>, vector<1x4x384xbf16>,
    %c0_285 = arith.constant 0 : index
    %c0_286 = arith.constant 0 : index
    %c115 = arith.constant 115 : index
    %281 = vector.load %arg1[%c0_285, %c0_286, %c115] : memref<1x4x528xbf16, #tpu.memory_space<vmem>>, vector<1x4x384xbf16>
    %282 = vector.shape_cast %281 : vector<1x4x384xbf16> to vector<4x384xbf16>
    %c1_287 = arith.constant 1 : index
    %c80_288 = arith.constant 80 : index
    %c0_289 = arith.constant 0 : index
    %283 = vector.load %arg7[%c1_287, %c80_288, %c0_289] : memref<2x112x384xbf16, #tpu.memory_space<vmem>>, vector<1x4x384xbf16>
    %284 = vector.shape_cast %283 : vector<1x4x384xbf16> to vector<4x384xbf16>
    %285 = vector.shape_cast %282 : vector<4x384xbf16> to vector<1x4x384xbf16>
    tpu.vector_store %arg7[%c1_287, %c80_288, %c0_289], %285 {strides = array<i32>} : memref<2x112x384xbf16, #tpu.memory_space<vmem>>, vector<1x4x384xbf16>,
    %c0_290 = arith.constant 0 : index
    %c0_291 = arith.constant 0 : index
    %c116 = arith.constant 116 : index
    %286 = vector.load %arg1[%c0_290, %c0_291, %c116] : memref<1x4x528xbf16, #tpu.memory_space<vmem>>, vector<1x4x384xbf16>
    %287 = vector.shape_cast %286 : vector<1x4x384xbf16> to vector<4x384xbf16>
    %c1_292 = arith.constant 1 : index
    %c96_293 = arith.constant 96 : index
    %c0_294 = arith.constant 0 : index
    %288 = vector.load %arg7[%c1_292, %c96_293, %c0_294] : memref<2x112x384xbf16, #tpu.memory_space<vmem>>, vector<1x4x384xbf16>
    %289 = vector.shape_cast %288 : vector<1x4x384xbf16> to vector<4x384xbf16>
    %290 = vector.shape_cast %287 : vector<4x384xbf16> to vector<1x4x384xbf16>
    tpu.vector_store %arg7[%c1_292, %c96_293, %c0_294], %290 {strides = array<i32>} : memref<2x112x384xbf16, #tpu.memory_space<vmem>>, vector<1x4x384xbf16>,
    %c5_295 = arith.constant 5 : index
    %c0_296 = arith.constant 0 : index
    %c0_297 = arith.constant 0 : index
    %291 = vector.load %arg2[%c5_295, %c0_296, %c0_297] : memref<7x4x112xbf16, #tpu.memory_space<vmem>>, vector<1x4x112xbf16>
    %292 = vector.shape_cast %291 : vector<1x4x112xbf16> to vector<4x112xbf16>
    %c1_298 = arith.constant 1 : index
    %c0_299 = arith.constant 0 : index
    %c0_300 = arith.constant 0 : index
    %293 = vector.load %arg7[%c1_298, %c0_299, %c0_300] : memref<2x112x384xbf16, #tpu.memory_space<vmem>>, vector<1x112x384xbf16>
    %294 = vector.shape_cast %293 : vector<1x112x384xbf16> to vector<112x384xbf16>
    %cst_301 = arith.constant dense<0.000000e+00> : vector<4x384xf32>
    %295 = tpu.matmul %292, %294, %cst_301 {dimension_numbers = #tpu.dot_dimension_numbers<[1], [0], [0], [1], [0, 0, 1, 1], [], []>} : vector<4x112xbf16>, vector<112x384xbf16>, vector<4x384xf32> -> vector<4x384xf32>
    %c0_302 = arith.constant 0 : index
    %c0_303 = arith.constant 0 : index
    %296 = vector.load %arg8[%c0_302, %c0_303] : memref<4x384xf32, #tpu.memory_space<vmem>>, vector<4x384xf32>
    %297 = arith.addf %296, %295 : vector<4x384xf32>
    %c0_304 = arith.constant 0 : index
    %c0_305 = arith.constant 0 : index
    %298 = vector.load %arg8[%c0_304, %c0_305] : memref<4x384xf32, #tpu.memory_space<vmem>>, vector<4x384xf32>
    tpu.vector_store %arg8[%c0_304, %c0_305], %297 {strides = array<i32>} : memref<4x384xf32, #tpu.memory_space<vmem>>, vector<4x384xf32>,
    %c0_306 = arith.constant 0 : index
    %c0_307 = arith.constant 0 : index
    %c132 = arith.constant 132 : index
    %299 = vector.load %arg1[%c0_306, %c0_307, %c132] : memref<1x4x528xbf16, #tpu.memory_space<vmem>>, vector<1x4x384xbf16>
    %300 = vector.shape_cast %299 : vector<1x4x384xbf16> to vector<4x384xbf16>
    %c0_308 = arith.constant 0 : index
    %c0_309 = arith.constant 0 : index
    %c0_310 = arith.constant 0 : index
    %301 = vector.load %arg7[%c0_308, %c0_309, %c0_310] : memref<2x112x384xbf16, #tpu.memory_space<vmem>>, vector<1x4x384xbf16>
    %302 = vector.shape_cast %301 : vector<1x4x384xbf16> to vector<4x384xbf16>
    %303 = vector.shape_cast %300 : vector<4x384xbf16> to vector<1x4x384xbf16>
    tpu.vector_store %arg7[%c0_308, %c0_309, %c0_310], %303 {strides = array<i32>} : memref<2x112x384xbf16, #tpu.memory_space<vmem>>, vector<1x4x384xbf16>,
    %c0_311 = arith.constant 0 : index
    %c0_312 = arith.constant 0 : index
    %c133 = arith.constant 133 : index
    %304 = vector.load %arg1[%c0_311, %c0_312, %c133] : memref<1x4x528xbf16, #tpu.memory_space<vmem>>, vector<1x4x384xbf16>
    %305 = vector.shape_cast %304 : vector<1x4x384xbf16> to vector<4x384xbf16>
    %c0_313 = arith.constant 0 : index
    %c16_314 = arith.constant 16 : index
    %c0_315 = arith.constant 0 : index
    %306 = vector.load %arg7[%c0_313, %c16_314, %c0_315] : memref<2x112x384xbf16, #tpu.memory_space<vmem>>, vector<1x4x384xbf16>
    %307 = vector.shape_cast %306 : vector<1x4x384xbf16> to vector<4x384xbf16>
    %308 = vector.shape_cast %305 : vector<4x384xbf16> to vector<1x4x384xbf16>
    tpu.vector_store %arg7[%c0_313, %c16_314, %c0_315], %308 {strides = array<i32>} : memref<2x112x384xbf16, #tpu.memory_space<vmem>>, vector<1x4x384xbf16>,
    %c0_316 = arith.constant 0 : index
    %c0_317 = arith.constant 0 : index
    %c134 = arith.constant 134 : index
    %309 = vector.load %arg1[%c0_316, %c0_317, %c134] : memref<1x4x528xbf16, #tpu.memory_space<vmem>>, vector<1x4x384xbf16>
    %310 = vector.shape_cast %309 : vector<1x4x384xbf16> to vector<4x384xbf16>
    %c0_318 = arith.constant 0 : index
    %c32_319 = arith.constant 32 : index
    %c0_320 = arith.constant 0 : index
    %311 = vector.load %arg7[%c0_318, %c32_319, %c0_320] : memref<2x112x384xbf16, #tpu.memory_space<vmem>>, vector<1x4x384xbf16>
    %312 = vector.shape_cast %311 : vector<1x4x384xbf16> to vector<4x384xbf16>
    %313 = vector.shape_cast %310 : vector<4x384xbf16> to vector<1x4x384xbf16>
    tpu.vector_store %arg7[%c0_318, %c32_319, %c0_320], %313 {strides = array<i32>} : memref<2x112x384xbf16, #tpu.memory_space<vmem>>, vector<1x4x384xbf16>,
    %c0_321 = arith.constant 0 : index
    %c0_322 = arith.constant 0 : index
    %c135 = arith.constant 135 : index
    %314 = vector.load %arg1[%c0_321, %c0_322, %c135] : memref<1x4x528xbf16, #tpu.memory_space<vmem>>, vector<1x4x384xbf16>
    %315 = vector.shape_cast %314 : vector<1x4x384xbf16> to vector<4x384xbf16>
    %c0_323 = arith.constant 0 : index
    %c48_324 = arith.constant 48 : index
    %c0_325 = arith.constant 0 : index
    %316 = vector.load %arg7[%c0_323, %c48_324, %c0_325] : memref<2x112x384xbf16, #tpu.memory_space<vmem>>, vector<1x4x384xbf16>
    %317 = vector.shape_cast %316 : vector<1x4x384xbf16> to vector<4x384xbf16>
    %318 = vector.shape_cast %315 : vector<4x384xbf16> to vector<1x4x384xbf16>
    tpu.vector_store %arg7[%c0_323, %c48_324, %c0_325], %318 {strides = array<i32>} : memref<2x112x384xbf16, #tpu.memory_space<vmem>>, vector<1x4x384xbf16>,
    %c0_326 = arith.constant 0 : index
    %c0_327 = arith.constant 0 : index
    %c136 = arith.constant 136 : index
    %319 = vector.load %arg1[%c0_326, %c0_327, %c136] : memref<1x4x528xbf16, #tpu.memory_space<vmem>>, vector<1x4x384xbf16>
    %320 = vector.shape_cast %319 : vector<1x4x384xbf16> to vector<4x384xbf16>
    %c0_328 = arith.constant 0 : index
    %c64_329 = arith.constant 64 : index
    %c0_330 = arith.constant 0 : index
    %321 = vector.load %arg7[%c0_328, %c64_329, %c0_330] : memref<2x112x384xbf16, #tpu.memory_space<vmem>>, vector<1x4x384xbf16>
    %322 = vector.shape_cast %321 : vector<1x4x384xbf16> to vector<4x384xbf16>
    %323 = vector.shape_cast %320 : vector<4x384xbf16> to vector<1x4x384xbf16>
    tpu.vector_store %arg7[%c0_328, %c64_329, %c0_330], %323 {strides = array<i32>} : memref<2x112x384xbf16, #tpu.memory_space<vmem>>, vector<1x4x384xbf16>,
    %c0_331 = arith.constant 0 : index
    %c0_332 = arith.constant 0 : index
    %c137 = arith.constant 137 : index
    %324 = vector.load %arg1[%c0_331, %c0_332, %c137] : memref<1x4x528xbf16, #tpu.memory_space<vmem>>, vector<1x4x384xbf16>
    %325 = vector.shape_cast %324 : vector<1x4x384xbf16> to vector<4x384xbf16>
    %c0_333 = arith.constant 0 : index
    %c80_334 = arith.constant 80 : index
    %c0_335 = arith.constant 0 : index
    %326 = vector.load %arg7[%c0_333, %c80_334, %c0_335] : memref<2x112x384xbf16, #tpu.memory_space<vmem>>, vector<1x4x384xbf16>
    %327 = vector.shape_cast %326 : vector<1x4x384xbf16> to vector<4x384xbf16>
    %328 = vector.shape_cast %325 : vector<4x384xbf16> to vector<1x4x384xbf16>
    tpu.vector_store %arg7[%c0_333, %c80_334, %c0_335], %328 {strides = array<i32>} : memref<2x112x384xbf16, #tpu.memory_space<vmem>>, vector<1x4x384xbf16>,
    %c0_336 = arith.constant 0 : index
    %c0_337 = arith.constant 0 : index
    %c138 = arith.constant 138 : index
    %329 = vector.load %arg1[%c0_336, %c0_337, %c138] : memref<1x4x528xbf16, #tpu.memory_space<vmem>>, vector<1x4x384xbf16>
    %330 = vector.shape_cast %329 : vector<1x4x384xbf16> to vector<4x384xbf16>
    %c0_338 = arith.constant 0 : index
    %c96_339 = arith.constant 96 : index
    %c0_340 = arith.constant 0 : index
    %331 = vector.load %arg7[%c0_338, %c96_339, %c0_340] : memref<2x112x384xbf16, #tpu.memory_space<vmem>>, vector<1x4x384xbf16>
    %332 = vector.shape_cast %331 : vector<1x4x384xbf16> to vector<4x384xbf16>
    %333 = vector.shape_cast %330 : vector<4x384xbf16> to vector<1x4x384xbf16>
    tpu.vector_store %arg7[%c0_338, %c96_339, %c0_340], %333 {strides = array<i32>} : memref<2x112x384xbf16, #tpu.memory_space<vmem>>, vector<1x4x384xbf16>,
    %c6_341 = arith.constant 6 : index
    %c0_342 = arith.constant 0 : index
    %c0_343 = arith.constant 0 : index
    %334 = vector.load %arg2[%c6_341, %c0_342, %c0_343] : memref<7x4x112xbf16, #tpu.memory_space<vmem>>, vector<1x4x112xbf16>
    %335 = vector.shape_cast %334 : vector<1x4x112xbf16> to vector<4x112xbf16>
    %c0_344 = arith.constant 0 : index
    %c0_345 = arith.constant 0 : index
    %c0_346 = arith.constant 0 : index
    %336 = vector.load %arg7[%c0_344, %c0_345, %c0_346] : memref<2x112x384xbf16, #tpu.memory_space<vmem>>, vector<1x112x384xbf16>
    %337 = vector.shape_cast %336 : vector<1x112x384xbf16> to vector<112x384xbf16>
    %cst_347 = arith.constant dense<0.000000e+00> : vector<4x384xf32>
    %338 = tpu.matmul %335, %337, %cst_347 {dimension_numbers = #tpu.dot_dimension_numbers<[1], [0], [0], [1], [0, 0, 1, 1], [], []>} : vector<4x112xbf16>, vector<112x384xbf16>, vector<4x384xf32> -> vector<4x384xf32>
    %c0_348 = arith.constant 0 : index
    %c0_349 = arith.constant 0 : index
    %339 = vector.load %arg8[%c0_348, %c0_349] : memref<4x384xf32, #tpu.memory_space<vmem>>, vector<4x384xf32>
    %340 = arith.addf %339, %338 : vector<4x384xf32>
    %c0_350 = arith.constant 0 : index
    %c0_351 = arith.constant 0 : index
    %341 = vector.load %arg8[%c0_350, %c0_351] : memref<4x384xf32, #tpu.memory_space<vmem>>, vector<4x384xf32>
    tpu.vector_store %arg8[%c0_350, %c0_351], %340 {strides = array<i32>} : memref<4x384xf32, #tpu.memory_space<vmem>>, vector<4x384xf32>,
    %c0_352 = arith.constant 0 : index
    %c0_353 = arith.constant 0 : index
    %342 = vector.load %arg8[%c0_352, %c0_353] : memref<4x384xf32, #tpu.memory_space<vmem>>, vector<4x384xf32>
    %c0_354 = arith.constant 0 : index
    %c0_355 = arith.constant 0 : index
    %343 = vector.load %arg4[%c0_354, %c0_355] : memref<1x384xf32, #tpu.memory_space<vmem>>, vector<1x384xf32>
    %344 = vector.broadcast %343 : vector<1x384xf32> to vector<4x384xf32>
    %345 = arith.mulf %342, %344 : vector<4x384xf32>
    %cst_356 = arith.constant dense<0.000000e+00> : vector<4xf32>
    %346 = vector.multi_reduction <add>, %345, %cst_356 [1] : vector<4x384xf32> to vector<4xf32>
    %347 = vector.shape_cast %346 : vector<4xf32> to vector<4x1xf32>
    %c0_357 = arith.constant 0 : index
    %c0_358 = arith.constant 0 : index
    %348 = vector.load %arg3[%c0_357, %c0_358] : memref<4x4xf32, #tpu.memory_space<vmem>>, vector<4x4xf32>
    %cst_359 = arith.constant dense<0.000000e+00> : vector<4x1xf32>
    %349 = tpu.matmul %348, %347, %cst_359 {dimension_numbers = #tpu.dot_dimension_numbers<[1], [0], [0], [1], [0, 0, 1, 1], [], []>} : vector<4x4xf32>, vector<4x1xf32>, vector<4x1xf32> -> vector<4x1xf32>
    %cst_360 = arith.constant 0.000000e+00 : f32
    %350 = vector.broadcast %cst_360 : f32 to vector<4x1xf32>
    %351 = arith.subf %350, %349 : vector<4x1xf32>
    %352 = math.exp %351 : vector<4x1xf32>
    %cst_361 = arith.constant 1.000000e+00 : f32
    %353 = vector.broadcast %cst_361 : f32 to vector<4x1xf32>
    %354 = arith.addf %353, %352 : vector<4x1xf32>
    %cst_362 = arith.constant 1.000000e+00 : f32
    %355 = vector.broadcast %cst_362 : f32 to vector<4x1xf32>
    %356 = arith.divf %355, %354 : vector<4x1xf32>
    %357 = vector.broadcast %356 : vector<4x1xf32> to vector<4x384xf32>
    %358 = arith.mulf %342, %357 : vector<4x384xf32>
    %359 = vector.shape_cast %358 : vector<4x384xf32> to vector<1x4x384xf32>
    %c0_363 = arith.constant 0 : index
    %c0_364 = arith.constant 0 : index
    %c0_365 = arith.constant 0 : index
    %360 = vector.load %arg5[%c0_363, %c0_364, %c0_365] : memref<1x4x384xf32, #tpu.memory_space<vmem>>, vector<1x4x384xf32>
    tpu.vector_store %arg5[%c0_363, %c0_364, %c0_365], %359 {strides = array<i32>} : memref<1x4x384xf32, #tpu.memory_space<vmem>>, vector<1x4x384xf32>,
    %361 = vector.shape_cast %356 : vector<4x1xf32> to vector<1x4x1xf32>
    %c0_366 = arith.constant 0 : index
    %c0_367 = arith.constant 0 : index
    %c0_368 = arith.constant 0 : index
    %362 = vector.load %arg6[%c0_366, %c0_367, %c0_368] : memref<1x4x1xf32, #tpu.memory_space<vmem>>, vector<1x4x1xf32>
    tpu.vector_store %arg6[%c0_366, %c0_367, %c0_368], %361 {strides = array<i32>} : memref<1x4x1xf32, #tpu.memory_space<vmem>>, vector<1x4x1xf32>,
    return
  }
  func.func @transform_0(%arg0: i32) -> (i32, i32, i32) {
    %c0_i32 = arith.constant 0 : i32
    %c0_i32_0 = arith.constant 0 : i32
    %c0_i32_1 = arith.constant 0 : i32
    return %arg0, %c0_i32, %c0_i32_0 : i32, i32, i32
  }
  func.func @transform_1(%arg0: i32) -> (i32, i32, i32) {
    %c0_i32 = arith.constant 0 : i32
    %c0_i32_0 = arith.constant 0 : i32
    %c0_i32_1 = arith.constant 0 : i32
    %c0_i32_2 = arith.constant 0 : i32
    return %c0_i32, %c0_i32_0, %c0_i32_1 : i32, i32, i32
  }
  func.func @transform_2(%arg0: i32) -> (i32, i32) {
    %c0_i32 = arith.constant 0 : i32
    %c0_i32_0 = arith.constant 0 : i32
    %c0_i32_1 = arith.constant 0 : i32
    return %c0_i32, %c0_i32_0 : i32, i32
  }
  func.func @transform_3(%arg0: i32) -> (i32, i32) {
    %c0_i32 = arith.constant 0 : i32
    %c0_i32_0 = arith.constant 0 : i32
    %c0_i32_1 = arith.constant 0 : i32
    return %c0_i32, %c0_i32_0 : i32, i32
  }
  func.func @transform_4(%arg0: i32) -> (i32, i32, i32) {
    %c0_i32 = arith.constant 0 : i32
    %c0_i32_0 = arith.constant 0 : i32
    %c0_i32_1 = arith.constant 0 : i32
    return %arg0, %c0_i32, %c0_i32_0 : i32, i32, i32
  }
  func.func @transform_5(%arg0: i32) -> (i32, i32, i32) {
    %c0_i32 = arith.constant 0 : i32
    %c0_i32_0 = arith.constant 0 : i32
    %c0_i32_1 = arith.constant 0 : i32
    return %arg0, %c0_i32, %c0_i32_0 : i32, i32, i32
  }
}

</mosaic_0001>

<bundles_post_ra>
// kernel: tpu_custom_call.1
= control target key start
LH: loop header
LB: loop body
LE: loop exit
PB: predicated region body
PF: predicated region fallthrough
CT: control target
= control target key end

     0   :  { %11 = vsyncpa [#allocation5], 0  ;;  %s5204_s0 = inlined_call_operand.hbm [shape: bf16[2,4,528], index: 0, kind: input, shape index: {}]   ;;  %s5205_s1 = inlined_call_operand.hbm [shape: bf16[7,4,112], index: 1, kind: input, shape index: {}]   ;;  %s5206_s2 = inlined_call_operand.hbm [shape: f32[4,4], index: 2, kind: input, shape index: {}]   ;;  %s5207_s3 = inlined_call_operand.vmem [shape: f32[1,384], index: 3, kind: input, shape index: {}]   ;;  %s5208_s4 = inlined_call_operand.hbm [shape: f32[2,4,384], index: 4, kind: output, shape index: {0}]   ;;  %s5209_s5 = inlined_call_operand.vmem [shape: f32[2,4,1], index: 5, kind: output, shape index: {1}]  }
   0x1   :  { %13 = vsyncpa [#allocation5 + $0x1], 0 }
   0x2   :  { %14 = vsyncpa [#allocation8], 0 }
   0x3   :  { %15 = vsyncpa [#allocation6], 0 }
   0x4   :  { %17 = vsyncpa [#allocation6 + $0x1], 0  ;;  %s4549_s18 = smov 0   ;;  %s4551_s19 = smov 0  }
   0x5   :  { %s4553_s20 = smov 0   ;;  %s4555_s21 = smov 0  }
   0x6 LB: > { %s4570_s22 = sadd.s32 4294967295, %s4461_s21   ;;  %s3761_s23 = sadd.s32 4294967294, %s4461_s21   ;;  %s4461_s21 = sphi %s4555_s21, %s5231_s21   ;;  %s4457_s20 = sphi %s4553_s20, %s5230_s20   ;;  %s4453_s19 = sphi %s4551_s19, %s5229_s19   ;;  %s4449_s18 = sphi %s4549_s18, %s5228_s18  }
   0x7   : > { %p43_p0 = scmp.ne.s32.totalorder %s4453_s19, %s4449_s18  ;;  %p5210_p1 = scmp.eq.s32.totalorder %s4570_s22, 0 }
   0x8   : > { %p136_p3 = scmp.eq.s32.totalorder %s3761_s23, 1  ;;  %p3762_p5 = scmp.ge.s32.totalorder %s4461_s21, 1 }
   0x9   : > { %p4579_p4 = por %p5210_p1, %p43_p0  ;;  %p169_p7 = scmp.lt.s32.totalorder %s4461_s21, 3 }
   0xa   : > { %p4584_p6 = por %p136_p3, %p43_p0  ;;  %s4463_s27 = smov [#allocation7]  }
   0xb   : > { %s5214_s24 = scalar_select %p4579_p4, 1, 0 }
   0xc   : > { %s5215_s25 = scalar_select %p4584_p6, 1, 0 }
   0xd   : > { %p4589_p8 = pnand %p3762_p5, %p169_p7  ;;  %s181_s28 = sshll.u32 %s4463_s27, 4  ;;  %s182_s28 = int_to_ptr.vmem [resolvable:$true] %s181_s28 }
   0xe   : > { %s4464_s30 = smov [#allocation9]   ;;  %s4324_s7 = scalar_lea.vmem %s182_s28, 224 }
   0xf   : > { %s5216_s26 = scalar_select %p4589_p8, 1, 0 }
  0x10   : > { %p4145_p9 = pneg %p4589_p8  ;;  %s195_s6 = sshll.u32 %s4464_s30, 4  ;;  %s196_s6 = int_to_ptr.vmem [resolvable:$true] %s195_s6 }
  0x11   : > { %p4325_p13 = scmp.ne.s32.totalorder %s182_s28, %s4324_s7  ;;  %p4332_p5 = scmp.lt.s32.totalorder %s182_s28, %s182_s28 }
  0x12   : > { %p4598_p11 = pnand %p4145_p9, %p5210_p1  ;;  %p4333_p7 = scmp.lt.s32.totalorder %s4324_s7, %s4324_s7 }
  0x14   : > { %p4315_p12 = pneg %p4598_p11  ;;  %p4334_p10 = por %p4333_p7, %p4332_p5 }
  0x16   : > { %p4327_p0 = pnand %p4325_p13, %p4315_p12 }
  0x18   : > { %p4328_p3 = pneg %p4327_p0 }
  0x1a   : > { %p4335_p9 = pnand %p4334_p10, %p4328_p3 }
  0x1c   : > { %4338 = shalt.err (!%p4335_p9)
}
  0x1d   : > { %s4465_s8 = smov 32   ;;  %s4466_s9 = smov 2  }
  0x1e   : > { %4148 = dma.hbm_to_vmem [thread:$0]  (!%p4598_p11), %s5205_s1, 224, %s182_s28, [#allocation8], %s4465_s8, %s4465_s8, %s4466_s9  }
  0x1f   : > { %s4350_s12 = scalar_lea.vmem %s196_s6, 64  ;;  %p4358_p2 = scmp.lt.s32.totalorder %s196_s6, %s196_s6 }
  0x20   : > { %p4351_p1 = scmp.ne.s32.totalorder %s196_s6, %s4350_s12  ;;  %p4359_p6 = scmp.lt.s32.totalorder %s4350_s12, %s4350_s12 }
  0x22   : > { %p4353_p13 = pnand %p4351_p1, %p4315_p12  ;;  %p4360_p5 = por %p4359_p6, %p4358_p2 }
  0x24   : > { %p4354_p0 = pneg %p4353_p13 }
  0x26   : > { %p4361_p10 = pnand %p4360_p5, %p4354_p0 }
  0x28   : > { %4364 = shalt.err (!%p4361_p10)
}
  0x29   : > { %4151 = dma.hbm_to_vmem [thread:$0]  (!%p4598_p11), %s5206_s2, 64, %s196_s6, [#allocation8]  }
  0x2a   : > { %s4621_s15 = sadd.s32 1, %s4461_s21   ;;  %s30_s16 = sadd.s32 1, %s4457_s20 }
  0x2b   : > { %s27_s17 = ssub.s32 %s4461_s21, %s4621_s15  ;;  %p37_p1 = scmp.ne.s32.totalorder %s4457_s20, %s4453_s19 }
  0x2c   : > { %p28_p2 = scmp.eq.s32.totalorder %s27_s17, 0  ;;  %p38_p6 = scmp.eq.s32.totalorder %s4461_s21, 0 }
  0x2d   : > { %p5218_p12 = scmp.eq.s32.totalorder %s4570_s22, 1  ;;  %p4162_p7 = scmp.lt.s32.totalorder %s4461_s21, 2 }
  0x2e   : > { %s4637_s27 = scalar_select %p28_p2, %s4457_s20, %s30_s16  }
  0x2f   : > { %p4631_p3 = por %p5218_p12, %p37_p1  ;;  %p39_p9 = por %p38_p6, %p37_p1 }
  0x30   : > { %s209_s28 = sand.u32 1, %s4457_s20   ;;  %s4129_s30 = smul.u32 160, %s4461_s21 }
  0x31   : > { %s5219_s23 = scalar_select %p4631_p3, 1, 0 }
  0x32   : > { %s4128_s29 = smul.u32 10, %s209_s28  ;;  %p4641_p11 = pnand %p4162_p7, %p39_p9 }
  0x33   : > { %s4648_s9 = scalar_lea.hbm %s5204_s0, %s4129_s30  ;;  %s210_s12 = scalar_lea.sflag [#allocation5], %s209_s28 }
  0x34   : > { %s213_s10 = scalar_lea.vmem [#allocation4], %s4128_s29  ;;  %s4365_s13 = scalar_lea.hbm %s4648_s9, 160 }
  0x35   : > { %s221_s11 = sshll.u32 %s213_s10, 4  ;;  %p4366_p13 = scmp.ne.s32.totalorder %s4648_s9, %s4365_s13  ;;  %s222_s11 = int_to_ptr.vmem [resolvable:$true] %s221_s11 }
  0x36   : > { %p4367_p0 = pneg %p4641_p11  ;;  %s4370_s17 = scalar_lea.hbm %s5204_s0, 320 }
  0x37   : > { %p4371_p1 = scmp.lt.s32.totalorder %s4648_s9, %s5204_s0  ;;  %p4372_p2 = scmp.lt.s32.totalorder %s4370_s17, %s4365_s13 }
  0x38   : > { %p4368_p5 = pnand %p4367_p0, %p4366_p13 }
  0x39   : > { %p4373_p6 = por %p4372_p2, %p4371_p1 }
  0x3a   : > { %p4369_p10 = pneg %p4368_p5 }
  0x3c   : > { %p4374_p12 = pnand %p4373_p6, %p4369_p10 }
  0x3e   : > { %4377 = shalt.err (!%p4374_p12)
}
  0x3f   : > { %s4378_s29 = scalar_lea.vmem %s222_s11, 160  ;;  %s4467_s28 = smov [#allocation4]  }
  0x40   : > { %p4379_p7 = scmp.ne.s32.totalorder %s222_s11, %s4378_s29  ;;  %s4383_s8 = sshll.u32 %s4467_s28, 4  ;;  %s4384_s8 = int_to_ptr.vmem [resolvable:$false] %s4383_s8 }
  0x41   : > { %s4385_s10 = scalar_lea.vmem %s4384_s8, 320  ;;  %p4386_p13 = scmp.lt.s32.totalorder %s222_s11, %s4384_s8 }
  0x42   : > { %p4381_p9 = pnand %p4379_p7, %p4367_p0  ;;  %p4387_p5 = scmp.lt.s32.totalorder %s4385_s10, %s4378_s29 }
  0x44   : > { %p4382_p3 = pneg %p4381_p9  ;;  %p4388_p4 = por %p4387_p5, %p4386_p13 }
  0x46   : > { %p4389_p8 = pnand %p4388_p4, %p4382_p3 }
  0x48   : > { %4392 = shalt.err (!%p4389_p8)
}
  0x49   : > { %4155 = dma.hbm_to_vmem [thread:$0]  (!%p4641_p11), %s4648_s9, 160, %s222_s11, %s210_s12  }
  0x4a   : > { %p5221_p10 = scmp.ne.s32.totalorder %s5216_s26, 0 }
  0x4b   : > { %s4667_s13 = sand.u32 (!%p5221_p10), 1, %s4453_s19   ;;  %p5222_p0 = scmp.ne.s32.totalorder (!%p5221_p10), %s5214_s24, 0 }
  0x4c   : > { %230 = sbr.rel (%p5221_p10) target bundleno = 1138 (0x472), region = 36  ;;  %s233_s16 = scalar_lea.sflag (!%p5221_p10), [#allocation5], %s4667_s13 }
  0x4d   : > { %s4130_s14 = smul.u32 (!%p5221_p10), 10, %s4667_s13 }
  0x4f   : > { %s4671_s17 = scalar_lea.vmem (!%p5221_p10), [#allocation4], %s4130_s14 }
  0x51   : > { %4436 = dma.done.wait (%p5222_p0), %s233_s16, 160  }
  0x52   : > { %4438 = vsyncadd (%p5222_p0), %s233_s16, 4294967136  ;;  %p5223_p4 = scmp.eq.s32.totalorder %s4570_s22, 0 }
  0x54   : > { %4440 = dma.done.wait (%p5223_p4), [#allocation8], 288   ;;  %p5224_p8 = pmov %p5223_p4 }
  0x55   : > { %v364_v0 = vlaneseq  ;;  %v4468_v1 = vmov 1983009808   ;;  %v4469_v5 = vmov 0   ;;  %v514_v7 = vld [vmem:[%s4671_s17] sm:$0xff]  ;;  %s4470_s24 = smov 122   ;;  %s4471_s26 = smov 123  }
  0x56   : > { %4442 = vsyncadd (%p5224_p8), [#allocation8], 4294967008  ;;  %v362_v2 = vunpack.c.l.s4 %v4468_v1  ;;  %305 = vst [vmem:[#allocation2 + $0x98] sm:$0xc] %v4469_v5  ;;  %722 = vmatprep.mubr.bf16.mxu0 %v4469_v5  ;;  %4252 = vset.pattern.permute.xlu1 %v4469_v5  ;;  %v516_v9 = vcombine.high %v514_v7, %v514_v7  ;;  %v4472_v11 = vmov 0.0   ;;  %s4473_s6 = smov 124  }
  0x57   : > { %v4681_v3 = vshrl.u32 %v364_v0, 7  ;;  %307 = vst [vmem:[#allocation2 + $0xa4] sm:$0xf] %v4469_v5  ;;  %280 = vst [vmem:[#allocation2] sm:$0xcc] %v4469_v5  ;;  %4253 = vset.pattern.permute.xlu0 %v4469_v5  ;;  %3997 = vmatprep.subr.bf16.mxu1 %v4472_v11  ;;  %s4474_s9 = smov 125  }
  0x58   : > { %v363_v4 = vunpack.c.0.s8 %v362_v2  ;;  %281 = vst [vmem:[#allocation2 + $0x8] sm:$0xc] %v4469_v5  ;;  %282 = vst [vmem:[#allocation2 + $0xc] sm:$0xff] %v4469_v5  ;;  %s4475_s11 = smov 126   ;;  %v337_v12 = vld [vmem:[%s4671_s17] sm:$0x3f] }
  0x59   : > { %283 = vst [vmem:[#allocation2 + $0x14] sm:$0xf] %v4469_v5  ;;  %284 = vst [vmem:[#allocation2 + $0x18] sm:$0xcc] %v4469_v5  ;;  %v339_v13 = vcombine.high %v337_v12, %v337_v12  ;;  %s4476_s12 = smov 127   ;;  %s4477_s7 = smov 100  }
  0x5a   : > { %285 = vst [vmem:[#allocation2 + $0x20] sm:$0xc] %v4469_v5  ;;  %287 = vst [vmem:[#allocation2 + $0x2c] sm:$0xf] %v4469_v5  ;;  %v4729_v6 = vsub.s32 %v363_v4, %v4681_v3  ;;  %s4478_s30 = smov 101   ;;  %vm4479_vm0 = vmmov 0  }
  0x5b   : > { %288 = vst [vmem:[#allocation2 + $0x30] sm:$0xcc] %v4469_v5  ;;  %289 = vst [vmem:[#allocation2 + $0x38] sm:$0xc] %v4469_v5  ;;  %4011 = vmatprep.mubr.msk.bf16.mxu1 %vm4479_vm0, %v4472_v11  ;;  %s4480_s29 = smov 102   ;;  %s4481_s28 = smov 103  }
  0x5c   : > { %291 = vst [vmem:[#allocation2 + $0x44] sm:$0xf] %v4469_v5  ;;  %292 = vst [vmem:[#allocation2 + $0x48] sm:$0xcc] %v4469_v5  ;;  %v4734_v8 = vrot.slane %v514_v7, %v4729_v6  ;;  %v4741_v10 = vrot.slane %v516_v9, %v4729_v6  ;;  %s4482_s8 = smov 104   ;;  %s4483_s10 = smov 105  }
  0x5d   : > { %293 = vst [vmem:[#allocation2 + $0x50] sm:$0xc] %v4469_v5  ;;  %295 = vst [vmem:[#allocation2 + $0x5c] sm:$0xf] %v4469_v5  ;;  %s4484_s14 = smov 106   ;;  %s4485_s16 = smov 78  }
  0x5e   : > { %296 = vst [vmem:[#allocation2 + $0x60] sm:$0xcc] %v4469_v5  ;;  %297 = vst [vmem:[#allocation2 + $0x68] sm:$0xc] %v4469_v5  ;;  %531 = vrot.lane.b32.xlu0 %v4734_v8, %s4470_s24  ;;  %500 = vrot.lane.b32.xlu1 %v4734_v8, %s4471_s26  ;;  %vm381_vm1 = vcmask 1043456   ;;  %vm538_vm2 = vcmask 998400  }
  0x5f   : > { %299 = vst [vmem:[#allocation2 + $0x74] sm:$0xf] %v4469_v5  ;;  %300 = vst [vmem:[#allocation2 + $0x78] sm:$0xcc] %v4469_v5  ;;  %vm507_vm3 = vcmask 1006592   ;;  %vm476_vm4 = vcmask 1014784  }
  0x60   : > { %301 = vst [vmem:[#allocation2 + $0x80] sm:$0xc] %v4469_v5  ;;  %303 = vst [vmem:[#allocation2 + $0x8c] sm:$0xf] %v4469_v5  ;;  %vm445_vm5 = vcmask 1022976   ;;  %vm414_vm6 = vcmask 1031168  }
  0x61   : > { %304 = vst [vmem:[#allocation2 + $0x90] sm:$0xcc] %v4469_v5  ;;  %309 = vst [vmem:[#allocation2 + $0xa8] sm:$0xcc] %v4469_v5  ;;  %vm383_vm7 = vcmask 1039360   ;;  %vm987_vm8 = vcmask 818176  }
  0x62   : > { %310 = vst [vmem:[#allocation2 + $0xb0] sm:$0xc] %v4469_v5  ;;  %312 = vst [vmem:[#allocation2 + $0xbc] sm:$0xf] %v4469_v5  ;;  %533 = vrot.lane.b32.xlu0 %v4741_v10, %s4470_s24  ;;  %502 = vrot.lane.b32.xlu1 %v4741_v10, %s4471_s26  ;;  %vm956_vm9 = vcmask 826368   ;;  %vm925_vm10 = vcmask 834560  }
  0x63   : > { %313 = vst [vmem:[#allocation2 + $0xc0] sm:$0xcc] %v4469_v5  ;;  %314 = vst [vmem:[#allocation2 + $0xc8] sm:$0xc] %v4469_v5  ;;  %vm894_vm11 = vcmask 842752   ;;  %vm863_vm12 = vcmask 850944  }
  0x64   : > { %316 = vst [vmem:[#allocation2 + $0xd4] sm:$0xf] %v4469_v5  ;;  %317 = vst [vmem:[#allocation2 + $0xd8] sm:$0xcc] %v4469_v5  ;;  %vm686_vm13 = vcmask 916480   ;;  %vm832_vm14 = vcmask 859136  }
  0x65   : > { %318 = vst [vmem:[#allocation2 + $0xe0] sm:$0xc] %v4469_v5  ;;  %320 = vst [vmem:[#allocation2 + $0xec] sm:$0xf] %v4469_v5  ;;  %vm801_vm15 = vcmask 867328   ;;  %p275_p3 = scmp.lt.s32.totalorder %s4570_s22, 1 }
  0x66   : > { %321 = vst [vmem:[#allocation2 + $0xf0] sm:$0xcc] %v4469_v5  ;;  %322 = vst [vmem:[#allocation2 + $0xf8] sm:$0xc] %v4469_v5  ;;  %469 = vrot.lane.b32.xlu0 %v4734_v8, %s4473_s6  ;;  %471 = vrot.lane.b32.xlu1 %v4741_v10, %s4473_s6  ;;  %p5225_p1 = scmp.ne.s32.totalorder %s5219_s23, 0 }
  0x67   : > { %324 = vst [vmem:[#allocation2 + $0x104] sm:$0xf] %v4469_v5  ;;  %325 = vst [vmem:[#allocation2 + $0x108] sm:$0xcc] %v4469_v5 }
  0x68   : > { %326 = vst [vmem:[#allocation2 + $0x110] sm:$0xc] %v4469_v5  ;;  %328 = vst [vmem:[#allocation2 + $0x11c] sm:$0xf] %v4469_v5 }
  0x69   : > { %329 = vst [vmem:[#allocation2 + $0x120] sm:$0xcc] %v4469_v5  ;;  %330 = vst [vmem:[#allocation2 + $0x128] sm:$0xc] %v4469_v5 }
  0x6a   : > { %332 = vst [vmem:[#allocation2 + $0x134] sm:$0xf] %v4469_v5  ;;  %333 = vst [vmem:[#allocation2 + $0x138] sm:$0xcc] %v4469_v5  ;;  %438 = vrot.lane.b32.xlu0 %v4734_v8, %s4474_s9  ;;  %440 = vrot.lane.b32.xlu1 %v4741_v10, %s4474_s9  ;;  %s4486_s9 = smov 79  }
  0x6b   : > { %334 = vst [vmem:[#allocation2 + $0x140] sm:$0xc] %v4469_v5  ;;  %336 = vst [vmem:[#allocation2 + $0x14c] sm:$0xf] %v4469_v5 }
  0x6c   : > { %3771 = vst.sshfl [vmem:[#allocation2] sm:$0xf pattern:$0x76325410] %v337_v12 }
  0x6d   : > { %3772 = vst.sshfl [vmem:[#allocation2 + $0x8] sm:$0x3 pattern:$0x76325410] %v339_v13 }
  0x6e   : > { %407 = vrot.lane.b32.xlu0 %v4734_v8, %s4475_s11  ;;  %409 = vrot.lane.b32.xlu1 %v4741_v10, %s4475_s11  ;;  %s4487_s11 = smov 80  }
  0x72   : > { %375 = vrot.lane.b32.xlu0 %v4734_v8, %s4476_s12  ;;  %377 = vrot.lane.b32.xlu1 %v4741_v10, %s4476_s12  ;;  %s4488_s12 = smov 81  }
  0x76   : > { %980 = vrot.lane.b32.xlu0 %v4734_v8, %s4477_s7  ;;  %982 = vrot.lane.b32.xlu1 %v4741_v10, %s4477_s7  ;;  %s4489_s7 = smov 82  }
  0x7a   : > { %949 = vrot.lane.b32.xlu0 %v4734_v8, %s4478_s30  ;;  %951 = vrot.lane.b32.xlu1 %v4741_v10, %s4478_s30  ;;  %s4490_s30 = smov 83  }
  0x7e   : > { %918 = vrot.lane.b32.xlu0 %v4734_v8, %s4480_s29  ;;  %920 = vrot.lane.b32.xlu1 %v4741_v10, %s4480_s29  ;;  %s4491_s29 = smov 84  }
  0x82   : > { %887 = vrot.lane.b32.xlu0 %v4734_v8, %s4481_s28  ;;  %889 = vrot.lane.b32.xlu1 %v4741_v10, %s4481_s28  ;;  %s4492_s28 = smov 56  }
  0x86   : > { %856 = vrot.lane.b32.xlu0 %v4734_v8, %s4482_s8  ;;  %858 = vrot.lane.b32.xlu1 %v4741_v10, %s4482_s8  ;;  %s4493_s8 = smov 57  }
  0x8a   : > { %825 = vrot.lane.b32.xlu0 %v4734_v8, %s4483_s10  ;;  %827 = vrot.lane.b32.xlu1 %v4741_v10, %s4483_s10  ;;  %s4494_s10 = smov 58  }
  0x8e   : > { %794 = vrot.lane.b32.xlu0 %v4734_v8, %s4484_s14  ;;  %796 = vrot.lane.b32.xlu1 %v4741_v10, %s4484_s14  ;;  %s4495_s14 = smov 59  }
  0x92   : > { %1433 = vrot.lane.b32.xlu0 %v4734_v8, %s4485_s16  ;;  %1435 = vrot.lane.b32.xlu1 %v4741_v10, %s4485_s16  ;;  %s4496_s16 = smov 60  }
  0x96   : > { %1402 = vrot.lane.b32.xlu0 %v4734_v8, %s4486_s9  ;;  %1404 = vrot.lane.b32.xlu1 %v4741_v10, %s4486_s9  ;;  %s4497_s9 = smov 61  }
  0x9a   : > { %1371 = vrot.lane.b32.xlu0 %v4734_v8, %s4487_s11  ;;  %1373 = vrot.lane.b32.xlu1 %v4741_v10, %s4487_s11  ;;  %s4498_s11 = smov 62  }
  0x9e   : > { %1340 = vrot.lane.b32.xlu0 %v4734_v8, %s4488_s12  ;;  %1342 = vrot.lane.b32.xlu1 %v4741_v10, %s4488_s12  ;;  %s4499_s12 = smov 34  }
  0xa2   : > { %1309 = vrot.lane.b32.xlu0 %v4734_v8, %s4489_s7  ;;  %1311 = vrot.lane.b32.xlu1 %v4741_v10, %s4489_s7  ;;  %s4500_s7 = smov 35  }
  0xa6   : > { %1278 = vrot.lane.b32.xlu0 %v4734_v8, %s4490_s30  ;;  %1280 = vrot.lane.b32.xlu1 %v4741_v10, %s4490_s30  ;;  %s4501_s30 = smov 36  }
  0xaa   : > { %1247 = vrot.lane.b32.xlu0 %v4734_v8, %s4491_s29  ;;  %1249 = vrot.lane.b32.xlu1 %v4741_v10, %s4491_s29  ;;  %s4502_s29 = smov 37  }
  0xae   : > { %1886 = vrot.lane.b32.xlu0 %v4734_v8, %s4492_s28  ;;  %1888 = vrot.lane.b32.xlu1 %v4741_v10, %s4492_s28  ;;  %s4503_s28 = smov 38  }
  0xb2   : > { %1855 = vrot.lane.b32.xlu0 %v4734_v8, %s4493_s8  ;;  %1857 = vrot.lane.b32.xlu1 %v4741_v10, %s4493_s8  ;;  %s4504_s8 = smov 39  }
  0xb6   : > { %1824 = vrot.lane.b32.xlu0 %v4734_v8, %s4494_s10  ;;  %1826 = vrot.lane.b32.xlu1 %v4741_v10, %s4494_s10  ;;  %s4505_s10 = smov 40  }
  0xba   : > { %1793 = vrot.lane.b32.xlu0 %v4734_v8, %s4495_s14  ;;  %1795 = vrot.lane.b32.xlu1 %v4741_v10, %s4495_s14  ;;  %s4506_s14 = smov 12  }
  0xbe   : > { %1762 = vrot.lane.b32.xlu0 %v4734_v8, %s4496_s16  ;;  %1764 = vrot.lane.b32.xlu1 %v4741_v10, %s4496_s16  ;;  %s4507_s16 = smov 13  }
  0xc2   : > { %1731 = vrot.lane.b32.xlu0 %v4734_v8, %s4497_s9  ;;  %1733 = vrot.lane.b32.xlu1 %v4741_v10, %s4497_s9  ;;  %s4508_s9 = smov 14  }
  0xc6   : > { %1700 = vrot.lane.b32.xlu0 %v4734_v8, %s4498_s11  ;;  %1702 = vrot.lane.b32.xlu1 %v4741_v10, %s4498_s11  ;;  %s4509_s11 = smov 15  }
  0xca   : > { %2339 = vrot.lane.b32.xlu0 %v4734_v8, %s4499_s12  ;;  %2341 = vrot.lane.b32.xlu1 %v4741_v10, %s4499_s12  ;;  %s4510_s12 = smov 16  }
  0xce   : > { %2308 = vrot.lane.b32.xlu0 %v4734_v8, %s4500_s7  ;;  %2310 = vrot.lane.b32.xlu1 %v4741_v10, %s4500_s7  ;;  %s4511_s7 = smov 17  }
  0xd0   : > { %v532_v14 = vpop.permute.xlu0 %531  ;;  %v501_v15 = vpop.permute.xlu1 %500 }
  0xd1   : > { %v504_v16 = vrot.slane %v501_v15, 4  ;;  %v535_v19 = vrot.slane %v532_v14, 4 }
  0xd2   : > { %2277 = vrot.lane.b32.xlu0 %v4734_v8, %s4501_s30  ;;  %2279 = vrot.lane.b32.xlu1 %v4741_v10, %s4501_s30  ;;  %s4513_s30 = smov 118  }
  0xd4   : > { %v534_v17 = vpop.permute.xlu0 %533  ;;  %v503_v18 = vpop.permute.xlu1 %502 }
  0xd5   : > { %v536_v20 = vrot.slane %v534_v17, 4  ;;  %v505_v21 = vrot.slane %v503_v18, 4 }
  0xd6   : > { %2246 = vrot.lane.b32.xlu0 %v4734_v8, %s4502_s29  ;;  %2248 = vrot.lane.b32.xlu1 %v4741_v10, %s4502_s29  ;;  %s4514_s29 = smov 119  }
  0xd7   : > { %v537_v22 = vsel %vm381_vm1, %v535_v19, %v536_v20  ;;  %v540_v23 = vsel %vm538_vm2, %v534_v17, %v536_v20  ;;  %v506_v24 = vsel %vm381_vm1, %v504_v16, %v505_v21  ;;  %v509_v25 = vsel %vm507_vm3, %v503_v18, %v505_v21 }
  0xd8   : > { %v539_v26 = vsel %vm538_vm2, %v532_v14, %v537_v22  ;;  %544 = vst [vmem:[#allocation2 + $0x98] sm:$0x3] %v540_v23  ;;  %v508_v27 = vsel %vm507_vm3, %v501_v15, %v506_v24  ;;  %513 = vst [vmem:[#allocation2 + $0x80] sm:$0x3] %v509_v25  ;;  %v470_v28 = vpop.permute.xlu0 %469  ;;  %v472_v29 = vpop.permute.xlu1 %471 }
  0xd9   : > { %543 = vst [vmem:[#allocation2 + $0x90] sm:$0x33] %v539_v26  ;;  %512 = vst [vmem:[#allocation2 + $0x78] sm:$0x33] %v508_v27  ;;  %v473_v30 = vrot.slane %v470_v28, 4  ;;  %v474_v31 = vrot.slane %v472_v29, 4 }
  0xda   : > { %2215 = vrot.lane.b32.xlu0 %v4734_v8, %s4503_s28  ;;  %2217 = vrot.lane.b32.xlu1 %v4741_v10, %s4503_s28  ;;  %s4515_s28 = smov 120  }
  0xdb   : > { %v475_v32 = vsel %vm381_vm1, %v473_v30, %v474_v31  ;;  %v478_v33 = vsel %vm476_vm4, %v472_v29, %v474_v31 }
  0xdc   : > { %v477_v34 = vsel %vm476_vm4, %v470_v28, %v475_v32  ;;  %482 = vst [vmem:[#allocation2 + $0x68] sm:$0x3] %v478_v33  ;;  %v439_v35 = vpop.permute.xlu0 %438  ;;  %v441_v36 = vpop.permute.xlu1 %440 }
  0xdd   : > { %481 = vst [vmem:[#allocation2 + $0x60] sm:$0x33] %v477_v34  ;;  %v442_v37 = vrot.slane %v439_v35, 4  ;;  %v443_v38 = vrot.slane %v441_v36, 4  ;;  %v2620_v34 = vld [vmem:[%s4671_s17] sm:$0xff] }
  0xde   : > { %2184 = vrot.lane.b32.xlu0 %v4734_v8, %s4504_s8  ;;  %2186 = vrot.lane.b32.xlu1 %v4741_v10, %s4504_s8  ;;  %s4516_s8 = smov 121  }
  0xdf   : > { %v444_v39 = vsel %vm381_vm1, %v442_v37, %v443_v38  ;;  %v447_v40 = vsel %vm445_vm5, %v441_v36, %v443_v38  ;;  %v4255_v41 = vld [vmem:[#allocation2 + $0x98] ss:$12 sps:$4 sm:$0xff]   ;;  %v4256_v54 = vld [vmem:[#allocation2 + $0x80] ss:$12 sps:$4 sm:$0xff]  }
  0xe0   : > { %v446_v42 = vsel %vm445_vm5, %v439_v35, %v444_v39  ;;  %451 = vst [vmem:[#allocation2 + $0x50] sm:$0x3] %v447_v40  ;;  %v408_v43 = vpop.permute.xlu0 %407  ;;  %v410_v44 = vpop.permute.xlu1 %409  ;;  %v570_v45 = vld [vmem:[#allocation2 + $0x90] sm:$0xff]  ;;  %v566_v46 = vld [vmem:[#allocation2 + $0x78] sm:$0xff]  ;;  %3998 = vmatpush3.bf16.msra.mxu1 %v4255_v41  ;;  %v546_v39 = vld [vmem:[#allocation2] sm:$0xff]  ;;  %vm1440_vm5 = vcmask 637952  }
  0xe1   : > { %450 = vst [vmem:[#allocation2 + $0x48] sm:$0x33] %v446_v42  ;;  %v411_v47 = vrot.slane %v408_v43, 4  ;;  %v412_v48 = vrot.slane %v410_v44, 4  ;;  %v3792_v49 = vcombine.high %v570_v45, %v4469_v5  ;;  %v3791_v50 = vcombine.low %v570_v45, %v4469_v5  ;;  %3999 = vmatprep.subr.bf16.mxu1 %v4472_v11 }
  0xe2   : > { %2153 = vrot.lane.b32.xlu0 %v4734_v8, %s4505_s10  ;;  %v3789_v53 = vcombine.high %v566_v46, %v4469_v5  ;;  %2155 = vrot.lane.b32.xlu1 %v4741_v10, %s4505_s10  ;;  %v3788_v62 = vcombine.low %v566_v46, %v4469_v5 }
  0xe3   : > { %v413_v51 = vsel %vm381_vm1, %v411_v47, %v412_v48  ;;  %v416_v52 = vsel %vm414_vm6, %v410_v44, %v412_v48  ;;  %692 = vmatprep.subr.bf16.mxu0 %v3792_v49  ;;  %v4257_v1 = vld [vmem:[#allocation2 + $0x68] ss:$12 sps:$4 sm:$0xff]  }
  0xe4   : > { %v415_v55 = vsel %vm414_vm6, %v408_v43, %v413_v51  ;;  %420 = vst [vmem:[#allocation2 + $0x38] sm:$0x3] %v416_v52  ;;  %693 = vmatpush1.bf16.msra.mxu0 %v3791_v50  ;;  %v376_v56 = vpop.permute.xlu0 %375  ;;  %v378_v57 = vpop.permute.xlu1 %377  ;;  %v562_v58 = vld [vmem:[#allocation2 + $0x60] sm:$0xff]  ;;  %4000 = vmatpush3.bf16.msra.mxu1 %v4256_v54  ;;  %v2622_v43 = vcombine.high %v2620_v34, %v2620_v34  ;;  %v4262_v49 = vld [vmem:[#allocation2 + $0x8] ss:$12 sps:$4 sm:$0xff]   ;;  %vm1409_vm6 = vcmask 646144  }
  0xe5   : > { %419 = vst [vmem:[#allocation2 + $0x30] sm:$0x33] %v415_v55  ;;  %v379_v59 = vrot.slane %v376_v56, 4  ;;  %v380_v60 = vrot.slane %v378_v57, 4  ;;  %694 = vmatprep.subr.bf16.mxu0 %v3789_v53  ;;  %v3786_v61 = vcombine.high %v562_v58, %v4469_v5  ;;  %4001 = vmatprep.subr.bf16.mxu1 %v4472_v11  ;;  %v3785_v15 = vcombine.low %v562_v58, %v4469_v5 }
  0xe6   : > { %2792 = vrot.lane.b32.xlu0 %v4734_v8, %s4506_s14  ;;  %2794 = vrot.lane.b32.xlu1 %v4741_v10, %s4506_s14  ;;  %v3774_v50 = vcombine.high %v546_v39, %v4469_v5  ;;  %v2629_v53 = vrot.slane %v2620_v34, %v4729_v6  ;;  %v3773_v58 = vcombine.low %v546_v39, %v4469_v5 }
  0xe7   : > { %v382_v63 = vsel %vm381_vm1, %v379_v59, %v380_v60  ;;  %v385_v0 = vsel %vm383_vm7, %v378_v57, %v380_v60  ;;  %v4258_v18 = vld [vmem:[#allocation2 + $0x50] ss:$12 sps:$4 sm:$0xff]  }
  0xe8   : > { %v384_v2 = vsel %vm383_vm7, %v376_v56, %v382_v63  ;;  %389 = vst [vmem:[#allocation2 + $0x20] sm:$0x3] %v385_v0  ;;  %695 = vmatpush1.bf16.msra.mxu0 %v3788_v62  ;;  %v981_v4 = vpop.permute.xlu0 %980  ;;  %v983_v7 = vpop.permute.xlu1 %982  ;;  %v558_v9 = vld [vmem:[#allocation2 + $0x48] sm:$0xff]  ;;  %4002 = vmatpush3.bf16.msra.mxu1 %v4257_v1  ;;  %v2636_v56 = vrot.slane %v2622_v43, %v4729_v6  ;;  %vm1378_vm7 = vcmask 654336  }
  0xe9   : > { %388 = vst [vmem:[#allocation2 + $0x18] sm:$0x33] %v384_v2  ;;  %696 = vmatprep.subr.bf16.mxu0 %v3786_v61  ;;  %v984_v12 = vrot.slane %v981_v4, 4  ;;  %v985_v13 = vrot.slane %v983_v7, 4  ;;  %v3783_v14 = vcombine.high %v558_v9, %v4469_v5  ;;  %4003 = vmatprep.subr.bf16.mxu1 %v4472_v11  ;;  %v3782_v26 = vcombine.low %v558_v9, %v4469_v5  ;;  %v3225_v60 = vld [vmem:[%s4671_s17 + $0x2] sm:$0xff]  ;;  %s4512_s17 = smov 18  }
  0xea   : > { %2761 = vrot.lane.b32.xlu0 %v4734_v8, %s4507_s16  ;;  %2763 = vrot.lane.b32.xlu1 %v4741_v10, %s4507_s16 }
  0xeb   : > { %v986_v16 = vsel %vm381_vm1, %v984_v12, %v985_v13  ;;  %v989_v17 = vsel %vm987_vm8, %v983_v7, %v985_v13  ;;  %v4259_v29 = vld [vmem:[#allocation2 + $0x38] ss:$12 sps:$4 sm:$0xff]   ;;  %v3227_v7 = vcombine.high %v3225_v60, %v3225_v60 }
  0xec   : > { %697 = vmatpush1.bf16.msra.mxu0 %v3785_v15  ;;  %v988_v19 = vsel %vm987_vm8, %v981_v4, %v986_v16  ;;  %993 = vst [vmem:[#allocation2 + $0x140] sm:$0x3] %v989_v17  ;;  %v950_v20 = vpop.permute.xlu0 %949  ;;  %v952_v21 = vpop.permute.xlu1 %951  ;;  %v554_v22 = vld [vmem:[#allocation2 + $0x30] sm:$0xff]  ;;  %4004 = vmatpush3.bf16.msra.mxu1 %v4258_v18  ;;  %vm1347_vm8 = vcmask 662528  }
  0xed   : > { %992 = vst [vmem:[#allocation2 + $0x138] sm:$0x33] %v988_v19  ;;  %698 = vmatprep.subr.bf16.mxu0 %v3783_v14  ;;  %v953_v23 = vrot.slane %v950_v20, 4  ;;  %v954_v24 = vrot.slane %v952_v21, 4  ;;  %v3780_v25 = vcombine.high %v554_v22, %v4469_v5  ;;  %4005 = vmatprep.subr.bf16.mxu1 %v4472_v11  ;;  %v3779_v38 = vcombine.low %v554_v22, %v4469_v5 }
  0xee   : > { %2730 = vrot.lane.b32.xlu0 %v4734_v8, %s4508_s9  ;;  %2732 = vrot.lane.b32.xlu1 %v4741_v10, %s4508_s9  ;;  %v4889_v19 = vrot.slane %v3225_v60, %v4729_v6 }
  0xef   : > { %v955_v27 = vsel %vm381_vm1, %v953_v23, %v954_v24  ;;  %v958_v28 = vsel %vm956_vm9, %v952_v21, %v954_v24  ;;  %v4260_v42 = vld [vmem:[#allocation2 + $0x20] ss:$12 sps:$4 sm:$0xff]   ;;  %v4895_v23 = vrot.slane %v3227_v7, %v4729_v6 }
  0xf0   : > { %699 = vmatpush1.bf16.msra.mxu0 %v3782_v26  ;;  %v957_v30 = vsel %vm956_vm9, %v950_v20, %v955_v27  ;;  %962 = vst [vmem:[#allocation2 + $0x128] sm:$0x3] %v958_v28  ;;  %v919_v31 = vpop.permute.xlu0 %918  ;;  %v921_v32 = vpop.permute.xlu1 %920  ;;  %v550_v33 = vld [vmem:[#allocation2 + $0x18] sm:$0xff]  ;;  %4006 = vmatpush3.bf16.msra.mxu1 %v4259_v29  ;;  %vm1316_vm9 = vcmask 670720  }
  0xf1   : > { %961 = vst [vmem:[#allocation2 + $0x120] sm:$0x33] %v957_v30  ;;  %700 = vmatprep.subr.bf16.mxu0 %v3780_v25  ;;  %v922_v35 = vrot.slane %v919_v31, 4  ;;  %v923_v36 = vrot.slane %v921_v32, 4  ;;  %v3777_v37 = vcombine.high %v550_v33, %v4469_v5  ;;  %4007 = vmatprep.subr.bf16.mxu1 %v4472_v11  ;;  %v3776_v51 = vcombine.low %v550_v33, %v4469_v5 }
  0xf2   : > { %2699 = vrot.lane.b32.xlu0 %v4734_v8, %s4509_s11  ;;  %2701 = vrot.lane.b32.xlu1 %v4741_v10, %s4509_s11  ;;  %s4131_s11 = smul.u32 12, %s4667_s13 }
  0xf3   : > { %v924_v40 = vsel %vm381_vm1, %v922_v35, %v923_v36  ;;  %v927_v41 = vsel %vm925_vm10, %v921_v32, %v923_v36  ;;  %v4263_v4 = vld [vmem:[#allocation2 + $0x140] ss:$12 sps:$4 sm:$0xff]  }
  0xf4   : > { %701 = vmatpush1.bf16.msra.mxu0 %v3779_v38  ;;  %v926_v44 = vsel %vm925_vm10, %v919_v31, %v924_v40  ;;  %931 = vst [vmem:[#allocation2 + $0x110] sm:$0x3] %v927_v41  ;;  %v888_v45 = vpop.permute.xlu0 %887  ;;  %v890_v46 = vpop.permute.xlu1 %889  ;;  %4008 = vmatpush3.bf16.msra.mxu1 %v4260_v42  ;;  %v1020_v52 = vld [vmem:[#allocation2 + $0x138] sm:$0xff]  ;;  %vm1285_vm10 = vcmask 678912  }
  0xf5   : > { %930 = vst [vmem:[#allocation2 + $0x108] sm:$0x33] %v926_v44  ;;  %702 = vmatprep.subr.bf16.mxu0 %v3777_v37  ;;  %v891_v47 = vrot.slane %v888_v45, 4  ;;  %v892_v48 = vrot.slane %v890_v46, 4  ;;  %4009 = vmatprep.subr.bf16.mxu1 %v4472_v11  ;;  %v3815_v63 = vcombine.high %v1020_v52, %v4469_v5  ;;  %v3814_v17 = vcombine.low %v1020_v52, %v4469_v5 }
  0xf6   : > { %2668 = vrot.lane.b32.xlu0 %v4734_v8, %s4510_s12  ;;  %2670 = vrot.lane.b32.xlu1 %v4741_v10, %s4510_s12  ;;  %v545_v10 = vld [vmem:[#allocation7] sm:$0x3]  ;;  %s4132_s12 = smul.u32 192, %s4570_s22 }
  0xf7   : > { %v893_v54 = vsel %vm381_vm1, %v891_v47, %v892_v48  ;;  %v896_v55 = vsel %vm894_vm11, %v890_v46, %v892_v48  ;;  %v4265_v22 = vld [vmem:[#allocation2 + $0x128] ss:$12 sps:$4 sm:$0xff]  }
  0xf8   : > { %703 = vmatpush1.bf16.msra.mxu0 %v3776_v51  ;;  %v895_v57 = vsel %vm894_vm11, %v888_v45, %v893_v54  ;;  %900 = vst [vmem:[#allocation2 + $0xf8] sm:$0x3] %v896_v55  ;;  %v857_v59 = vpop.permute.xlu0 %856  ;;  %v859_v8 = vpop.permute.xlu1 %858  ;;  %4010 = vmatpush3.bf16.msra.mxu1 %v4262_v49  ;;  %v1016_v0 = vld [vmem:[#allocation2 + $0x120] sm:$0xff]  ;;  %vm1254_vm11 = vcmask 687104  }
  0xf9   : > { %899 = vst [vmem:[#allocation2 + $0xf0] sm:$0x33] %v895_v57  ;;  %704 = vmatprep.subr.bf16.mxu0 %v3774_v50  ;;  %v860_v61 = vrot.slane %v857_v59, 4  ;;  %v861_v62 = vrot.slane %v859_v8, 4  ;;  %4015 = vmatprep.subr.bf16.mxu1 %v4472_v11  ;;  %v3812_v16 = vcombine.high %v1016_v0, %v4469_v5  ;;  %v3811_v6 = vcombine.low %v1016_v0, %v4469_v5 }
  0xfa   : > { %2637 = vrot.lane.b32.xlu0 %v2629_v53, %s4511_s7  ;;  %2639 = vrot.lane.b32.xlu1 %v2636_v56, %s4511_s7  ;;  %s268_s7 = scalar_lea.vmem [#allocation10], %s4131_s11 }
  0xfb   : > { %v862_v1 = vsel %vm381_vm1, %v860_v61, %v861_v62  ;;  %v865_v2 = vsel %vm863_vm12, %v859_v8, %v861_v62  ;;  %4012 = vmatmul.mubr.msk.bf16.vlgmr.msra.gmra.mxu1 %vm686_vm13, %v545_v10  ;;  %v4266_v33 = vld [vmem:[#allocation2 + $0x110] ss:$12 sps:$4 sm:$0xff]  }
  0xfc   : > { %705 = vmatpush1.bf16.msra.mxu0 %v3773_v58  ;;  %v864_v9 = vsel %vm863_vm12, %v857_v59, %v862_v1  ;;  %869 = vst [vmem:[#allocation2 + $0xe0] sm:$0x3] %v865_v2  ;;  %v826_v12 = vpop.permute.xlu0 %825  ;;  %v828_v13 = vpop.permute.xlu1 %827  ;;  %4016 = vmatpush3.bf16.msra.mxu1 %v4263_v4  ;;  %v1012_v18 = vld [vmem:[#allocation2 + $0x108] sm:$0xff]  ;;  %vm1893_vm12 = vcmask 457728  }
  0xfd   : > { %868 = vst [vmem:[#allocation2 + $0xd8] sm:$0x33] %v864_v9  ;;  %1141 = vmatprep.subr.bf16.mxu0 %v3815_v63  ;;  %v829_v14 = vrot.slane %v826_v12, 4  ;;  %v830_v15 = vrot.slane %v828_v13, 4  ;;  %4017 = vmatprep.subr.bf16.mxu1 %v4472_v11  ;;  %v3809_v29 = vcombine.high %v1012_v18, %v4469_v5  ;;  %v3808_v40 = vcombine.low %v1012_v18, %v4469_v5  ;;  %v4925_v8 = vld [vmem:[#allocation2 + $0xc] sm:$0xff] }
  0xfe   : > { %2606 = vrot.lane.b32.xlu0 %v2629_v53, %s4512_s17  ;;  %2608 = vrot.lane.b32.xlu1 %v2636_v56, %s4512_s17  ;;  %s3645_s17 = sshll.u32 %s268_s7, 4  ;;  %s3646_s17 = int_to_ptr.vmem [resolvable:$true] %s3645_s17 }
  0xff   : > { %3794 = vmatmul.mubr.msk.bf16.vlgmr.msra.gmra.mxu0 %vm686_vm13, %v545_v10  ;;  %v831_v20 = vsel %vm381_vm1, %v829_v14, %v830_v15  ;;  %v834_v21 = vsel %vm832_vm14, %v828_v13, %v830_v15  ;;  %4029 = vmatprep.mubr.msk.bf16.mxu1 %vm4479_vm0, %v4472_v11  ;;  %v4268_v44 = vld [vmem:[#allocation2 + $0xf8] ss:$12 sps:$4 sm:$0xff]  }
 0x100   : > { %1142 = vmatpush1.bf16.msra.mxu0 %v3814_v17  ;;  %v833_v24 = vsel %vm832_vm14, %v826_v12, %v831_v20  ;;  %838 = vst [vmem:[#allocation2 + $0xc8] sm:$0x3] %v834_v21  ;;  %v795_v25 = vpop.permute.xlu0 %794  ;;  %v797_v26 = vpop.permute.xlu1 %796  ;;  %4018 = vmatpush3.bf16.msra.mxu1 %v4265_v22  ;;  %v1008_v30 = vld [vmem:[#allocation2 + $0xf0] sm:$0xff]  ;;  %vm1862_vm14 = vcmask 465920  }
 0x101   : > { %837 = vst [vmem:[#allocation2 + $0xc0] sm:$0x33] %v833_v24  ;;  %1143 = vmatprep.subr.bf16.mxu0 %v3812_v16  ;;  %v798_v27 = vrot.slane %v795_v25, 4  ;;  %v799_v28 = vrot.slane %v797_v26, 4  ;;  %4019 = vmatprep.subr.bf16.mxu1 %v4472_v11  ;;  %v3806_v39 = vcombine.high %v1008_v30, %v4469_v5  ;;  %v3805_v51 = vcombine.low %v1008_v30, %v4469_v5 }
 0x102   : > { %3242 = vrot.lane.b32.xlu0 %v4889_v19, %s4513_s30  ;;  %3244 = vrot.lane.b32.xlu1 %v4895_v23, %s4513_s30 }
 0x103   : > { %v800_v31 = vsel %vm381_vm1, %v798_v27, %v799_v28  ;;  %v803_v32 = vsel %vm801_vm15, %v797_v26, %v799_v28  ;;  %1171 = vmatprep.mubr.bf16.mxu0 %v4469_v5  ;;  %v4269_v55 = vld [vmem:[#allocation2 + $0xe0] ss:$12 sps:$4 sm:$0xff]  }
 0x104   : > { %1144 = vmatpush1.bf16.msra.mxu0 %v3811_v6  ;;  %v802_v34 = vsel %vm801_vm15, %v795_v25, %v800_v31  ;;  %807 = vst [vmem:[#allocation2 + $0xb0] sm:$0x3] %v803_v32  ;;  %v1434_v35 = vpop.permute.xlu0 %1433  ;;  %v1436_v36 = vpop.permute.xlu1 %1435  ;;  %4020 = vmatpush3.bf16.msra.mxu1 %v4266_v33  ;;  %v1004_v41 = vld [vmem:[#allocation2 + $0xd8] sm:$0xff]  ;;  %v995_v25 = vld [vmem:[#allocation7 + $0x2] sm:$0x3]  ;;  %vm1831_vm15 = vcmask 474112  }
 0x105   : > { %806 = vst [vmem:[#allocation2 + $0xa8] sm:$0x33] %v802_v34  ;;  %1145 = vmatprep.subr.bf16.mxu0 %v3809_v29  ;;  %v1437_v37 = vrot.slane %v1434_v35, 4  ;;  %v1438_v38 = vrot.slane %v1436_v36, 4  ;;  %4021 = vmatprep.subr.bf16.mxu1 %v4472_v11  ;;  %v3803_v50 = vcombine.high %v1004_v41, %v4469_v5  ;;  %v3802_v61 = vcombine.low %v1004_v41, %v4925_v8 }
 0x106   : > { %3211 = vrot.lane.b32.xlu0 %v4889_v19, %s4514_s29  ;;  %3213 = vrot.lane.b32.xlu1 %v4895_v23, %s4514_s29 }
 0x107   : > { %v1439_v42 = vsel %vm381_vm1, %v1437_v37, %v1438_v38  ;;  %v1442_v43 = vsel %vm1440_vm5, %v1436_v36, %v1438_v38  ;;  %v4270_v0 = vld [vmem:[#allocation2 + $0xc8] ss:$12 sps:$4 sm:$0xff]  }
 0x108   : > { %1146 = vmatpush1.bf16.msra.mxu0 %v3808_v40  ;;  %v1441_v45 = vsel %vm1440_vm5, %v1434_v35, %v1439_v42  ;;  %1446 = vst [vmem:[#allocation2 + $0x98] sm:$0x3] %v1442_v43  ;;  %v1403_v46 = vpop.permute.xlu0 %1402  ;;  %v1405_v47 = vpop.permute.xlu1 %1404  ;;  %4022 = vmatpush3.bf16.msra.mxu1 %v4268_v44  ;;  %v1000_v52 = vld [vmem:[#allocation2 + $0xc0] sm:$0xff]  ;;  %vm1800_vm5 = vcmask 482304  }
 0x109   : > { %1445 = vst [vmem:[#allocation2 + $0x90] sm:$0x33] %v1441_v45  ;;  %1147 = vmatprep.subr.bf16.mxu0 %v3806_v39  ;;  %v1406_v48 = vrot.slane %v1403_v46, 4  ;;  %v1407_v49 = vrot.slane %v1405_v47, 4  ;;  %4023 = vmatprep.subr.bf16.mxu1 %v4472_v11  ;;  %v3800_v60 = vcombine.high %v1000_v52, %v4925_v8  ;;  %v3799_v13 = vcombine.low %v1000_v52, %v4925_v8 }
 0x10a   : > { %3180 = vrot.lane.b32.xlu0 %v4889_v19, %s4515_s28  ;;  %3182 = vrot.lane.b32.xlu1 %v4895_v23, %s4515_s28  ;;  %s5167_s28 = scalar_lea.hbm %s5208_s4, %s4132_s12 }
 0x10b   : > { %v1408_v53 = vsel %vm381_vm1, %v1406_v48, %v1407_v49  ;;  %v1411_v54 = vsel %vm1409_vm6, %v1405_v47, %v1407_v49  ;;  %v4271_v17 = vld [vmem:[#allocation2 + $0xb0] ss:$12 sps:$4 sm:$0xff]  }
 0x10c   : > { %1148 = vmatpush1.bf16.msra.mxu0 %v3805_v51  ;;  %v1410_v56 = vsel %vm1409_vm6, %v1403_v46, %v1408_v53  ;;  %1415 = vst [vmem:[#allocation2 + $0x80] sm:$0x3] %v1411_v54  ;;  %v1372_v57 = vpop.permute.xlu0 %1371  ;;  %v1374_v5 = vpop.permute.xlu1 %1373  ;;  %4024 = vmatpush3.bf16.msra.mxu1 %v4269_v55  ;;  %v996_v62 = vld [vmem:[#allocation2 + $0xa8] sm:$0xff]  ;;  %vm1769_vm6 = vcmask 490496  }
 0x10d   : > { %1414 = vst [vmem:[#allocation2 + $0x78] sm:$0x33] %v1410_v56  ;;  %1149 = vmatprep.subr.bf16.mxu0 %v3803_v50  ;;  %v1375_v58 = vrot.slane %v1372_v57, 4  ;;  %v1376_v59 = vrot.slane %v1374_v5, 4  ;;  %4025 = vmatprep.subr.bf16.mxu1 %v4472_v11  ;;  %v3797_v12 = vcombine.high %v996_v62, %v4925_v8  ;;  %v3796_v27 = vcombine.low %v996_v62, %v4925_v8 }
 0x10e   : > { %3149 = vrot.lane.b32.xlu0 %v4889_v19, %s4516_s8  ;;  %3151 = vrot.lane.b32.xlu1 %v4895_v23, %s4516_s8  ;;  %s3627_s8 = scalar_lea.sflag [#allocation6], %s4667_s13 }
 0x10f   : > { %v1377_v63 = vsel %vm381_vm1, %v1375_v58, %v1376_v59  ;;  %v1380_v10 = vsel %vm1378_vm7, %v1374_v5, %v1376_v59  ;;  %v4272_v30 = vld [vmem:[#allocation2 + $0x98] ss:$12 sps:$4 sm:$0xff]  }
 0x110   : > { %1150 = vmatpush1.bf16.msra.mxu0 %v3802_v61  ;;  %v1379_v1 = vsel %vm1378_vm7, %v1372_v57, %v1377_v63  ;;  %1384 = vst [vmem:[#allocation2 + $0x68] sm:$0x3] %v1380_v10  ;;  %v1341_v2 = vpop.permute.xlu0 %1340  ;;  %v1343_v4 = vpop.permute.xlu1 %1342  ;;  %4026 = vmatpush3.bf16.msra.mxu1 %v4270_v0  ;;  %v1473_v14 = vld [vmem:[#allocation2 + $0x90] sm:$0xff]  ;;  %vm1738_vm7 = vcmask 498688  }
 0x111   : > { %1383 = vst [vmem:[#allocation2 + $0x60] sm:$0x33] %v1379_v1  ;;  %1151 = vmatprep.subr.bf16.mxu0 %v3800_v60  ;;  %v1344_v7 = vrot.slane %v1341_v2, 4  ;;  %v1345_v9 = vrot.slane %v1343_v4, 4  ;;  %4027 = vmatprep.subr.bf16.mxu1 %v4472_v11  ;;  %v3838_v26 = vcombine.high %v1473_v14, %v4925_v8  ;;  %v3837_v37 = vcombine.low %v1473_v14, %v4925_v8 }
 0x112   : > { %3119 = vrot.lane.b32.xlu0 %v4889_v19, %s4470_s24  ;;  %3121 = vrot.lane.b32.xlu1 %v4895_v23, %s4470_s24  ;;  %s4393_s24 = scalar_lea.vmem %s3646_s17, 192 }
 0x113   : > { %v1346_v15 = vsel %vm381_vm1, %v1344_v7, %v1345_v9  ;;  %v1349_v16 = vsel %vm1347_vm8, %v1343_v4, %v1345_v9  ;;  %v4273_v41 = vld [vmem:[#allocation2 + $0x80] ss:$12 sps:$4 sm:$0xff]   ;;  %p4394_p11 = scmp.ne.s32.totalorder %s3646_s17, %s4393_s24 }
 0x114   : > { %1152 = vmatpush1.bf16.msra.mxu0 %v3799_v13  ;;  %v1348_v18 = vsel %vm1347_vm8, %v1341_v2, %v1346_v15  ;;  %1353 = vst [vmem:[#allocation2 + $0x50] sm:$0x3] %v1349_v16  ;;  %v1310_v20 = vpop.permute.xlu0 %1309  ;;  %v1312_v21 = vpop.permute.xlu1 %1311  ;;  %4028 = vmatpush3.bf16.msra.mxu1 %v4271_v17  ;;  %v1469_v28 = vld [vmem:[#allocation2 + $0x78] sm:$0xff]  ;;  %vm1707_vm8 = vcmask 506880  }
 0x115   : > { %1352 = vst [vmem:[#allocation2 + $0x48] sm:$0x33] %v1348_v18  ;;  %1153 = vmatprep.subr.bf16.mxu0 %v3797_v12  ;;  %v1313_v22 = vrot.slane %v1310_v20, 4  ;;  %v1314_v24 = vrot.slane %v1312_v21, 4  ;;  %4033 = vmatprep.subr.bf16.mxu1 %v4472_v11  ;;  %v3835_v36 = vcombine.high %v1469_v28, %v4925_v8  ;;  %v3834_v47 = vcombine.low %v1469_v28, %v4925_v8  ;;  %p4395_p2 = pnand %p4394_p11, %p5225_p1 }
 0x116   : > { %3089 = vrot.lane.b32.xlu0 %v4889_v19, %s4471_s26  ;;  %3091 = vrot.lane.b32.xlu1 %v4895_v23, %s4471_s26 }
 0x117   : > { %v1315_v29 = vsel %vm381_vm1, %v1313_v22, %v1314_v24  ;;  %v1318_v6 = vsel %vm1316_vm9, %v1312_v21, %v1314_v24  ;;  %4030 = vmatmul.mubr.msk.bf16.vlgmr.msra.gmra.mxu1 %vm686_vm13, %v995_v25  ;;  %v4274_v50 = vld [vmem:[#allocation2 + $0x68] ss:$12 sps:$4 sm:$0xff]   ;;  %p4396_p6 = pneg %p4395_p2 }
 0x118   : > { %1154 = vmatpush1.bf16.msra.mxu0 %v3796_v27  ;;  %v1317_v31 = vsel %vm1316_vm9, %v1310_v20, %v1315_v29  ;;  %1322 = vst [vmem:[#allocation2 + $0x38] sm:$0x3] %v1318_v6  ;;  %v1279_v32 = vpop.permute.xlu0 %1278  ;;  %v1281_v33 = vpop.permute.xlu1 %1280  ;;  %4034 = vmatpush3.bf16.msra.mxu1 %v4272_v30  ;;  %v1465_v38 = vld [vmem:[#allocation2 + $0x60] sm:$0xff]  ;;  %vm2346_vm9 = vcmask 277504  }
 0x119   : > { %1321 = vst [vmem:[#allocation2 + $0x30] sm:$0x33] %v1317_v31  ;;  %1594 = vmatprep.subr.bf16.mxu0 %v3838_v26  ;;  %v1282_v34 = vrot.slane %v1279_v32, 4  ;;  %v1283_v35 = vrot.slane %v1281_v33, 4  ;;  %4035 = vmatprep.subr.bf16.mxu1 %v4472_v11  ;;  %v3832_v46 = vcombine.high %v1465_v38, %v4925_v8  ;;  %v3831_v57 = vcombine.low %v1465_v38, %v4925_v8 }
 0x11a   : > { %3059 = vrot.lane.b32.xlu0 %v4889_v19, %s4473_s6  ;;  %3061 = vrot.lane.b32.xlu1 %v4895_v23, %s4473_s6  ;;  %s276_s6 = scalar_select %p275_p3, %s4570_s22, 1 }
 0x11b   : > { %3817 = vmatmul.mubr.msk.bf16.vlgmr.msra.gmra.mxu0 %vm686_vm13, %v995_v25  ;;  %v1284_v39 = vsel %vm381_vm1, %v1282_v34, %v1283_v35  ;;  %v1287_v40 = vsel %vm1285_vm10, %v1281_v33, %v1283_v35  ;;  %4047 = vmatprep.mubr.msk.bf16.mxu1 %vm4479_vm0, %v4472_v11  ;;  %v4275_v60 = vld [vmem:[#allocation2 + $0x50] ss:$12 sps:$4 sm:$0xff]   ;;  %s4518_s22 = smov [#allocation10]  }
 0x11c   : > { %1595 = vmatpush1.bf16.msra.mxu0 %v3837_v37  ;;  %v1286_v42 = vsel %vm1285_vm10, %v1279_v32, %v1284_v39  ;;  %1291 = vst [vmem:[#allocation2 + $0x20] sm:$0x3] %v1287_v40  ;;  %v1248_v43 = vpop.permute.xlu0 %1247  ;;  %v1250_v44 = vpop.permute.xlu1 %1249  ;;  %4036 = vmatpush3.bf16.msra.mxu1 %v4273_v41  ;;  %v1461_v23 = vld [vmem:[#allocation2 + $0x48] sm:$0xff]  ;;  %v1448_v41 = vld [vmem:[#allocation7 + $0x4] sm:$0x3]  ;;  %vm2315_vm10 = vcmask 285696  }
 0x11d   : > { %1290 = vst [vmem:[#allocation2 + $0x18] sm:$0x33] %v1286_v42  ;;  %1596 = vmatprep.subr.bf16.mxu0 %v3835_v36  ;;  %v1251_v19 = vrot.slane %v1248_v43, 4  ;;  %v1252_v45 = vrot.slane %v1250_v44, 4  ;;  %4037 = vmatprep.subr.bf16.mxu1 %v4472_v11  ;;  %v3829_v56 = vcombine.high %v1461_v23, %v4925_v8  ;;  %v3828_v2 = vcombine.low %v1461_v23, %v4925_v8  ;;  %s3770_s10 = sshll.u32 %s276_s6, 2  ;;  %s4397_s26 = sshll.u32 %s4518_s22, 4  ;;  %s4398_s26 = int_to_ptr.vmem [resolvable:$false] %s4397_s26 }
 0x11e   : > { %1624 = vmatprep.mubr.bf16.mxu0 %v4925_v8  ;;  %s278_s9 = scalar_lea.vmem %s5209_s5, %s3770_s10  ;;  %s4399_s6 = scalar_lea.vmem %s4398_s26, 384 }
 0x11f   : > { %v1253_v48 = vsel %vm381_vm1, %v1251_v19, %v1252_v45  ;;  %v1256_v49 = vsel %vm1254_vm11, %v1250_v44, %v1252_v45  ;;  %v4276_v12 = vld [vmem:[#allocation2 + $0x38] ss:$12 sps:$4 sm:$0xff]   ;;  %p4400_p12 = scmp.lt.s32.totalorder %s3646_s17, %s4398_s26  ;;  %p4401_p7 = scmp.lt.s32.totalorder %s4399_s6, %s4393_s24 }
 0x120   : > { %1597 = vmatpush1.bf16.msra.mxu0 %v3834_v47  ;;  %v1255_v51 = vsel %vm1254_vm11, %v1248_v43, %v1253_v48  ;;  %1260 = vst [vmem:[#allocation2 + $0x8] sm:$0x3] %v1256_v49  ;;  %v1887_v52 = vpop.permute.xlu0 %1886  ;;  %v1889_v53 = vpop.permute.xlu1 %1888  ;;  %4038 = vmatpush3.bf16.msra.mxu1 %v4274_v50  ;;  %v1457_v5 = vld [vmem:[#allocation2 + $0x30] sm:$0xff]  ;;  %vm2284_vm11 = vcmask 293888  }
 0x121   : > { %1259 = vst [vmem:[#allocation2] sm:$0x33] %v1255_v51  ;;  %1598 = vmatprep.subr.bf16.mxu0 %v3832_v46  ;;  %v1890_v54 = vrot.slane %v1887_v52, 4  ;;  %v1891_v55 = vrot.slane %v1889_v53, 4  ;;  %4039 = vmatprep.subr.bf16.mxu1 %v4472_v11  ;;  %v3826_v1 = vcombine.high %v1457_v5, %v4925_v8  ;;  %v3825_v20 = vcombine.low %v1457_v5, %v4925_v8  ;;  %p4402_p9 = por %p4401_p7, %p4400_p12 }
 0x123   : > { %v1892_v58 = vsel %vm381_vm1, %v1890_v54, %v1891_v55  ;;  %v1895_v59 = vsel %vm1893_vm12, %v1889_v53, %v1891_v55  ;;  %v4277_v25 = vld [vmem:[#allocation2 + $0x20] ss:$12 sps:$4 sm:$0xff]   ;;  %p4403_p13 = pnand %p4402_p9, %p4396_p6 }
 0x124   : > { %1599 = vmatpush1.bf16.msra.mxu0 %v3831_v57  ;;  %v1894_v61 = vsel %vm1893_vm12, %v1887_v52, %v1892_v58  ;;  %1899 = vst [vmem:[#allocation2 + $0x140] sm:$0x3] %v1895_v59  ;;  %v1856_v62 = vpop.permute.xlu0 %1855  ;;  %v1858_v63 = vpop.permute.xlu1 %1857  ;;  %4040 = vmatpush3.bf16.msra.mxu1 %v4275_v60  ;;  %v1453_v4 = vld [vmem:[#allocation2 + $0x18] sm:$0xff]  ;;  %vm2253_vm12 = vcmask 302080  }
 0x125   : > { %1898 = vst [vmem:[#allocation2 + $0x138] sm:$0x33] %v1894_v61  ;;  %1600 = vmatprep.subr.bf16.mxu0 %v3829_v56  ;;  %v1859_v10 = vrot.slane %v1856_v62, 4  ;;  %v1860_v0 = vrot.slane %v1858_v63, 4  ;;  %4041 = vmatprep.subr.bf16.mxu1 %v4472_v11  ;;  %v3823_v18 = vcombine.high %v1453_v4, %v4925_v8  ;;  %v3822_v31 = vcombine.low %v1453_v4, %v4925_v8 }
 0x127   : > { %v1861_v7 = vsel %vm381_vm1, %v1859_v10, %v1860_v0  ;;  %v1864_v9 = vsel %vm1862_vm14, %v1858_v63, %v1860_v0  ;;  %v4278_v35 = vld [vmem:[#allocation2 + $0x8] ss:$12 sps:$4 sm:$0xff]  }
 0x128   : > { %1601 = vmatpush1.bf16.msra.mxu0 %v3828_v2  ;;  %v1863_v13 = vsel %vm1862_vm14, %v1856_v62, %v1861_v7  ;;  %1868 = vst [vmem:[#allocation2 + $0x128] sm:$0x3] %v1864_v9  ;;  %v1825_v14 = vpop.permute.xlu0 %1824  ;;  %v1827_v15 = vpop.permute.xlu1 %1826  ;;  %4042 = vmatpush3.bf16.msra.mxu1 %v4276_v12  ;;  %v1449_v21 = vld [vmem:[#allocation2] sm:$0xff]  ;;  %vm2222_vm14 = vcmask 310272  }
 0x129   : > { %1867 = vst [vmem:[#allocation2 + $0x120] sm:$0x33] %v1863_v13  ;;  %1602 = vmatprep.subr.bf16.mxu0 %v3826_v1  ;;  %v1828_v16 = vrot.slane %v1825_v14, 4  ;;  %v1829_v17 = vrot.slane %v1827_v15, 4  ;;  %4043 = vmatprep.subr.bf16.mxu1 %v4472_v11  ;;  %v3820_v30 = vcombine.high %v1449_v21, %v4925_v8  ;;  %v3819_v43 = vcombine.low %v1449_v21, %v4925_v8 }
 0x12b   : > { %v1830_v22 = vsel %vm381_vm1, %v1828_v16, %v1829_v17  ;;  %v1833_v24 = vsel %vm1831_vm15, %v1827_v15, %v1829_v17  ;;  %v4279_v46 = vld [vmem:[#allocation2 + $0x140] ss:$12 sps:$4 sm:$0xff]  }
 0x12c   : > { %1603 = vmatpush1.bf16.msra.mxu0 %v3825_v20  ;;  %v1832_v26 = vsel %vm1831_vm15, %v1825_v14, %v1830_v22  ;;  %1837 = vst [vmem:[#allocation2 + $0x110] sm:$0x3] %v1833_v24  ;;  %v1794_v27 = vpop.permute.xlu0 %1793  ;;  %v1796_v28 = vpop.permute.xlu1 %1795  ;;  %4044 = vmatpush3.bf16.msra.mxu1 %v4277_v25  ;;  %v1926_v32 = vld [vmem:[#allocation2 + $0x138] sm:$0xff]  ;;  %vm2191_vm15 = vcmask 318464  }
 0x12d   : > { %1836 = vst [vmem:[#allocation2 + $0x108] sm:$0x33] %v1832_v26  ;;  %1604 = vmatprep.subr.bf16.mxu0 %v3823_v18  ;;  %v1797_v29 = vrot.slane %v1794_v27, 4  ;;  %v1798_v6 = vrot.slane %v1796_v28, 4  ;;  %4045 = vmatprep.subr.bf16.mxu1 %v4472_v11  ;;  %v3861_v42 = vcombine.high %v1926_v32, %v4925_v8  ;;  %v3860_v52 = vcombine.low %v1926_v32, %v4925_v8 }
 0x12f   : > { %v1799_v33 = vsel %vm381_vm1, %v1797_v29, %v1798_v6  ;;  %v1802_v34 = vsel %vm1800_vm5, %v1796_v28, %v1798_v6  ;;  %v4280_v56 = vld [vmem:[#allocation2 + $0x128] ss:$12 sps:$4 sm:$0xff]  }
 0x130   : > { %1605 = vmatpush1.bf16.msra.mxu0 %v3822_v31  ;;  %v1801_v36 = vsel %vm1800_vm5, %v1794_v27, %v1799_v33  ;;  %1806 = vst [vmem:[#allocation2 + $0xf8] sm:$0x3] %v1802_v34  ;;  %v1763_v37 = vpop.permute.xlu0 %1762  ;;  %v1765_v38 = vpop.permute.xlu1 %1764  ;;  %4046 = vmatpush3.bf16.msra.mxu1 %v4278_v35  ;;  %v1922_v44 = vld [vmem:[#allocation2 + $0x120] sm:$0xff]  ;;  %vm2160_vm5 = vcmask 326656  }
 0x131   : > { %1805 = vst [vmem:[#allocation2 + $0xf0] sm:$0x33] %v1801_v36  ;;  %1606 = vmatprep.subr.bf16.mxu0 %v3820_v30  ;;  %v1766_v39 = vrot.slane %v1763_v37, 4  ;;  %v1767_v40 = vrot.slane %v1765_v38, 4  ;;  %4051 = vmatprep.subr.bf16.mxu1 %v4472_v11  ;;  %v3858_v51 = vcombine.high %v1922_v44, %v4925_v8  ;;  %v3857_v62 = vcombine.low %v1922_v44, %v4925_v8 }
 0x133   : > { %v1768_v19 = vsel %vm381_vm1, %v1766_v39, %v1767_v40  ;;  %v1771_v45 = vsel %vm1769_vm6, %v1765_v38, %v1767_v40  ;;  %4048 = vmatmul.mubr.msk.bf16.vlgmr.msra.gmra.mxu1 %vm686_vm13, %v1448_v41  ;;  %v4281_v1 = vld [vmem:[#allocation2 + $0x110] ss:$12 sps:$4 sm:$0xff]  }
 0x134   : > { %1607 = vmatpush1.bf16.msra.mxu0 %v3819_v43  ;;  %v1770_v47 = vsel %vm1769_vm6, %v1763_v37, %v1768_v19  ;;  %1775 = vst [vmem:[#allocation2 + $0xe0] sm:$0x3] %v1771_v45  ;;  %v1732_v23 = vpop.permute.xlu0 %1731  ;;  %v1734_v48 = vpop.permute.xlu1 %1733  ;;  %4052 = vmatpush3.bf16.msra.mxu1 %v4279_v46  ;;  %v1918_v53 = vld [vmem:[#allocation2 + $0x108] sm:$0xff]  ;;  %vm2799_vm6 = vcmask 97280  }
 0x135   : > { %1774 = vst [vmem:[#allocation2 + $0xd8] sm:$0x33] %v1770_v47  ;;  %2047 = vmatprep.subr.bf16.mxu0 %v3861_v42  ;;  %v1735_v49 = vrot.slane %v1732_v23, 4  ;;  %v1736_v50 = vrot.slane %v1734_v48, 4  ;;  %4053 = vmatprep.subr.bf16.mxu1 %v4472_v11  ;;  %v3855_v61 = vcombine.high %v1918_v53, %v4925_v8  ;;  %v3854_v14 = vcombine.low %v1918_v53, %v4925_v8 }
 0x136   : > { %4065 = vmatprep.mubr.msk.bf16.mxu1 %vm4479_vm0, %v4472_v11 }
 0x137   : > { %3840 = vmatmul.mubr.msk.bf16.vlgmr.msra.gmra.mxu0 %vm686_vm13, %v1448_v41  ;;  %v1737_v54 = vsel %vm381_vm1, %v1735_v49, %v1736_v50  ;;  %v1740_v55 = vsel %vm1738_vm7, %v1734_v48, %v1736_v50  ;;  %v4282_v18 = vld [vmem:[#allocation2 + $0xf8] ss:$12 sps:$4 sm:$0xff]  }
 0x138   : > { %2048 = vmatpush1.bf16.msra.mxu0 %v3860_v52  ;;  %v1739_v57 = vsel %vm1738_vm7, %v1732_v23, %v1737_v54  ;;  %1744 = vst [vmem:[#allocation2 + $0xc8] sm:$0x3] %v1740_v55  ;;  %v1701_v5 = vpop.permute.xlu0 %1700  ;;  %v1703_v58 = vpop.permute.xlu1 %1702  ;;  %2077 = vmatprep.mubr.bf16.mxu0 %v4925_v8  ;;  %v1914_v63 = vld [vmem:[#allocation2 + $0xf0] sm:$0xff]  ;;  %vm2768_vm7 = vcmask 105472  }
 0x139   : > { %1743 = vst [vmem:[#allocation2 + $0xc0] sm:$0x33] %v1739_v57  ;;  %2049 = vmatprep.subr.bf16.mxu0 %v3858_v51  ;;  %4054 = vmatpush3.bf16.msra.mxu1 %v4280_v56  ;;  %v1704_v59 = vrot.slane %v1701_v5, 4  ;;  %v1705_v60 = vrot.slane %v1703_v58, 4  ;;  %v3852_v13 = vcombine.high %v1914_v63, %v4925_v8  ;;  %v3851_v27 = vcombine.low %v1914_v63, %v4925_v8  ;;  %v1901_v56 = vld [vmem:[#allocation7 + $0x6] sm:$0x3] }
 0x13a   : > { %4055 = vmatprep.subr.bf16.mxu1 %v4472_v11 }
 0x13b   : > { %v1706_v10 = vsel %vm381_vm1, %v1704_v59, %v1705_v60  ;;  %v1709_v0 = vsel %vm1707_vm8, %v1703_v58, %v1705_v60  ;;  %v4283_v30 = vld [vmem:[#allocation2 + $0xe0] ss:$12 sps:$4 sm:$0xff]  }
 0x13c   : > { %2050 = vmatpush1.bf16.msra.mxu0 %v3857_v62  ;;  %v1708_v2 = vsel %vm1707_vm8, %v1701_v5, %v1706_v10  ;;  %1713 = vst [vmem:[#allocation2 + $0xb0] sm:$0x3] %v1709_v0  ;;  %v2340_v4 = vpop.permute.xlu0 %2339  ;;  %v2342_v7 = vpop.permute.xlu1 %2341  ;;  %v1910_v15 = vld [vmem:[#allocation2 + $0xd8] sm:$0xff]  ;;  %vm2737_vm8 = vcmask 113664  }
 0x13d   : > { %1712 = vst [vmem:[#allocation2 + $0xa8] sm:$0x33] %v1708_v2  ;;  %2051 = vmatprep.subr.bf16.mxu0 %v3855_v61  ;;  %4056 = vmatpush3.bf16.msra.mxu1 %v4281_v1  ;;  %v2343_v9 = vrot.slane %v2340_v4, 4  ;;  %v2344_v12 = vrot.slane %v2342_v7, 4  ;;  %v3849_v26 = vcombine.high %v1910_v15, %v4925_v8  ;;  %v3848_v37 = vcombine.low %v1910_v15, %v4925_v8 }
 0x13e   : > { %4057 = vmatprep.subr.bf16.mxu1 %v4472_v11 }
 0x13f   : > { %v2345_v16 = vsel %vm381_vm1, %v2343_v9, %v2344_v12  ;;  %v2348_v17 = vsel %vm2346_vm9, %v2342_v7, %v2344_v12  ;;  %v4284_v41 = vld [vmem:[#allocation2 + $0xc8] ss:$12 sps:$4 sm:$0xff]  }
 0x140   : > { %2052 = vmatpush1.bf16.msra.mxu0 %v3854_v14  ;;  %v2347_v20 = vsel %vm2346_vm9, %v2340_v4, %v2345_v16  ;;  %2352 = vst [vmem:[#allocation2 + $0x98] sm:$0x3] %v2348_v17  ;;  %v2309_v21 = vpop.permute.xlu0 %2308  ;;  %v2311_v22 = vpop.permute.xlu1 %2310  ;;  %v1906_v28 = vld [vmem:[#allocation2 + $0xc0] sm:$0xff]  ;;  %vm2706_vm9 = vcmask 121856  }
 0x141   : > { %2351 = vst [vmem:[#allocation2 + $0x90] sm:$0x33] %v2347_v20  ;;  %2053 = vmatprep.subr.bf16.mxu0 %v3852_v13  ;;  %4058 = vmatpush3.bf16.msra.mxu1 %v4282_v18  ;;  %v2312_v24 = vrot.slane %v2309_v21, 4  ;;  %v2313_v25 = vrot.slane %v2311_v22, 4  ;;  %v3846_v36 = vcombine.high %v1906_v28, %v4925_v8  ;;  %v3845_v47 = vcombine.low %v1906_v28, %v4925_v8 }
 0x142   : > { %4059 = vmatprep.subr.bf16.mxu1 %v4472_v11 }
 0x143   : > { %v2314_v29 = vsel %vm381_vm1, %v2312_v24, %v2313_v25  ;;  %v2317_v6 = vsel %vm2315_vm10, %v2311_v22, %v2313_v25  ;;  %v4285_v50 = vld [vmem:[#allocation2 + $0xb0] ss:$12 sps:$4 sm:$0xff]  }
 0x144   : > { %2054 = vmatpush1.bf16.msra.mxu0 %v3851_v27  ;;  %v2316_v31 = vsel %vm2315_vm10, %v2309_v21, %v2314_v29  ;;  %2321 = vst [vmem:[#allocation2 + $0x80] sm:$0x3] %v2317_v6  ;;  %v2278_v32 = vpop.permute.xlu0 %2277  ;;  %v2280_v33 = vpop.permute.xlu1 %2279  ;;  %v1902_v38 = vld [vmem:[#allocation2 + $0xa8] sm:$0xff]  ;;  %vm2675_vm10 = vcmask 130048  }
 0x145   : > { %2320 = vst [vmem:[#allocation2 + $0x78] sm:$0x33] %v2316_v31  ;;  %2055 = vmatprep.subr.bf16.mxu0 %v3849_v26  ;;  %4060 = vmatpush3.bf16.msra.mxu1 %v4283_v30  ;;  %v2281_v34 = vrot.slane %v2278_v32, 4  ;;  %v2282_v35 = vrot.slane %v2280_v33, 4  ;;  %v3843_v46 = vcombine.high %v1902_v38, %v4925_v8  ;;  %v3842_v5 = vcombine.low %v1902_v38, %v4925_v8 }
 0x146   : > { %4061 = vmatprep.subr.bf16.mxu1 %v4472_v11 }
 0x147   : > { %v2283_v39 = vsel %vm381_vm1, %v2281_v34, %v2282_v35  ;;  %v2286_v40 = vsel %vm2284_vm11, %v2280_v33, %v2282_v35  ;;  %v4286_v61 = vld [vmem:[#allocation2 + $0x98] ss:$12 sps:$4 sm:$0xff]  }
 0x148   : > { %2056 = vmatpush1.bf16.msra.mxu0 %v3848_v37  ;;  %v2285_v42 = vsel %vm2284_vm11, %v2278_v32, %v2283_v39  ;;  %2290 = vst [vmem:[#allocation2 + $0x68] sm:$0x3] %v2286_v40  ;;  %v2247_v43 = vpop.permute.xlu0 %2246  ;;  %v2249_v44 = vpop.permute.xlu1 %2248  ;;  %v2379_v23 = vld [vmem:[#allocation2 + $0x90] sm:$0xff]  ;;  %vm2644_vm11 = vcmask 138240  }
 0x149   : > { %2289 = vst [vmem:[#allocation2 + $0x60] sm:$0x33] %v2285_v42  ;;  %2057 = vmatprep.subr.bf16.mxu0 %v3846_v36  ;;  %4062 = vmatpush3.bf16.msra.mxu1 %v4284_v41  ;;  %v2250_v19 = vrot.slane %v2247_v43, 4  ;;  %v2251_v45 = vrot.slane %v2249_v44, 4  ;;  %v3884_v57 = vcombine.high %v2379_v23, %v4925_v8  ;;  %v3883_v4 = vcombine.low %v2379_v23, %v4925_v8 }
 0x14a   : > { %4063 = vmatprep.subr.bf16.mxu1 %v4472_v11 }
 0x14b   : > { %v2252_v48 = vsel %vm381_vm1, %v2250_v19, %v2251_v45  ;;  %v2255_v49 = vsel %vm2253_vm12, %v2249_v44, %v2251_v45  ;;  %v4287_v13 = vld [vmem:[#allocation2 + $0x80] ss:$12 sps:$4 sm:$0xff]  }
 0x14c   : > { %2058 = vmatpush1.bf16.msra.mxu0 %v3845_v47  ;;  %v2254_v51 = vsel %vm2253_vm12, %v2247_v43, %v2252_v48  ;;  %2259 = vst [vmem:[#allocation2 + $0x50] sm:$0x3] %v2255_v49  ;;  %v2216_v52 = vpop.permute.xlu0 %2215  ;;  %v2218_v53 = vpop.permute.xlu1 %2217  ;;  %v2375_v58 = vld [vmem:[#allocation2 + $0x78] sm:$0xff]  ;;  %vm2613_vm12 = vcmask 146432  }
 0x14d   : > { %2258 = vst [vmem:[#allocation2 + $0x48] sm:$0x33] %v2254_v51  ;;  %2059 = vmatprep.subr.bf16.mxu0 %v3843_v46  ;;  %4064 = vmatpush3.bf16.msra.mxu1 %v4285_v50  ;;  %v2219_v54 = vrot.slane %v2216_v52, 4  ;;  %v2220_v55 = vrot.slane %v2218_v53, 4  ;;  %v3881_v2 = vcombine.high %v2375_v58, %v4925_v8  ;;  %v3880_v20 = vcombine.low %v2375_v58, %v4925_v8 }
 0x14e   : > { %4069 = vmatprep.subr.bf16.mxu1 %v4472_v11 }
 0x14f   : > { %v2221_v59 = vsel %vm381_vm1, %v2219_v54, %v2220_v55  ;;  %v2224_v60 = vsel %vm2222_vm14, %v2218_v53, %v2220_v55  ;;  %v4288_v24 = vld [vmem:[#allocation2 + $0x68] ss:$12 sps:$4 sm:$0xff]  }
 0x150   : > { %2060 = vmatpush1.bf16.msra.mxu0 %v3842_v5  ;;  %v2223_v62 = vsel %vm2222_vm14, %v2216_v52, %v2221_v59  ;;  %2228 = vst [vmem:[#allocation2 + $0x38] sm:$0x3] %v2224_v60  ;;  %4066 = vmatmul.mubr.msk.bf16.vlgmr.msra.gmra.mxu1 %vm686_vm13, %v1901_v56  ;;  %v2185_v63 = vpop.permute.xlu0 %2184  ;;  %v2187_v10 = vpop.permute.xlu1 %2186  ;;  %v2371_v7 = vld [vmem:[#allocation2 + $0x60] sm:$0xff]  ;;  %vm3249_vm14 = vcmask 965632  }
 0x151   : > { %2227 = vst [vmem:[#allocation2 + $0x30] sm:$0x33] %v2223_v62  ;;  %2500 = vmatprep.subr.bf16.mxu0 %v3884_v57  ;;  %4070 = vmatpush3.bf16.msra.mxu1 %v4286_v61  ;;  %v2188_v0 = vrot.slane %v2185_v63, 4  ;;  %v2189_v1 = vrot.slane %v2187_v10, 4  ;;  %v3878_v18 = vcombine.high %v2371_v7, %v4925_v8  ;;  %v3877_v31 = vcombine.low %v2371_v7, %v4925_v8 }
 0x152   : > { %4071 = vmatprep.subr.bf16.mxu1 %v4472_v11  ;;  %4083 = vmatprep.mubr.msk.bf16.mxu1 %vm4479_vm0, %v4472_v11 }
 0x153   : > { %3863 = vmatmul.mubr.msk.bf16.vlgmr.msra.gmra.mxu0 %vm686_vm13, %v1901_v56  ;;  %v2190_v9 = vsel %vm381_vm1, %v2188_v0, %v2189_v1  ;;  %v2193_v12 = vsel %vm2191_vm15, %v2187_v10, %v2189_v1  ;;  %v4289_v34 = vld [vmem:[#allocation2 + $0x50] ss:$12 sps:$4 sm:$0xff]  }
 0x154   : > { %2501 = vmatpush1.bf16.msra.mxu0 %v3883_v4  ;;  %v2192_v14 = vsel %vm2191_vm15, %v2185_v63, %v2190_v9  ;;  %2197 = vst [vmem:[#allocation2 + $0x20] sm:$0x3] %v2193_v12  ;;  %v2154_v15 = vpop.permute.xlu0 %2153  ;;  %2530 = vmatprep.mubr.bf16.mxu0 %v4925_v8  ;;  %v2156_v17 = vpop.permute.xlu1 %2155  ;;  %v2367_v22 = vld [vmem:[#allocation2 + $0x48] sm:$0xff]  ;;  %v2354_v12 = vld [vmem:[#allocation7 + $0x8] sm:$0x3]  ;;  %vm3218_vm15 = vcmask 973824  }
 0x155   : > { %2196 = vst [vmem:[#allocation2 + $0x18] sm:$0x33] %v2192_v14  ;;  %2502 = vmatprep.subr.bf16.mxu0 %v3881_v2  ;;  %4072 = vmatpush3.bf16.msra.mxu1 %v4287_v13  ;;  %v2157_v16 = vrot.slane %v2154_v15, 4  ;;  %v2158_v21 = vrot.slane %v2156_v17, 4  ;;  %v3875_v30 = vcombine.high %v2367_v22, %v4925_v8  ;;  %v3874_v42 = vcombine.low %v2367_v22, %v4925_v8 }
 0x156   : > { %4073 = vmatprep.subr.bf16.mxu1 %v4472_v11 }
 0x157   : > { %v2159_v25 = vsel %vm381_vm1, %v2157_v16, %v2158_v21  ;;  %v2162_v26 = vsel %vm2160_vm5, %v2156_v17, %v2158_v21  ;;  %v4290_v19 = vld [vmem:[#allocation2 + $0x38] ss:$12 sps:$4 sm:$0xff]  }
 0x158   : > { %2503 = vmatpush1.bf16.msra.mxu0 %v3880_v20  ;;  %v2793_v27 = vpop.permute.xlu0 %2792  ;;  %v2161_v28 = vsel %vm2160_vm5, %v2154_v15, %v2159_v25  ;;  %2166 = vst [vmem:[#allocation2 + $0x8] sm:$0x3] %v2162_v26  ;;  %v2795_v6 = vpop.permute.xlu1 %2794  ;;  %v2363_v33 = vld [vmem:[#allocation2 + $0x30] sm:$0xff]  ;;  %vm3187_vm5 = vcmask 982016  }
 0x159   : > { %2504 = vmatprep.subr.bf16.mxu0 %v3878_v18  ;;  %4074 = vmatpush3.bf16.msra.mxu1 %v4288_v24  ;;  %v2796_v29 = vrot.slane %v2793_v27, 4  ;;  %2165 = vst [vmem:[#allocation2] sm:$0x33] %v2161_v28  ;;  %v2797_v32 = vrot.slane %v2795_v6, 4  ;;  %v3872_v41 = vcombine.high %v2363_v33, %v4925_v8  ;;  %v3871_v51 = vcombine.low %v2363_v33, %v4925_v8 }
 0x15a   : > { %4075 = vmatprep.subr.bf16.mxu1 %v4472_v11 }
 0x15b   : > { %v2798_v35 = vsel %vm381_vm1, %v2796_v29, %v2797_v32  ;;  %v2801_v36 = vsel %vm2799_vm6, %v2795_v6, %v2797_v32  ;;  %v4291_v54 = vld [vmem:[#allocation2 + $0x20] ss:$12 sps:$4 sm:$0xff]  }
 0x15c   : > { %2505 = vmatpush1.bf16.msra.mxu0 %v3877_v31  ;;  %v2762_v37 = vpop.permute.xlu0 %2761  ;;  %v2800_v38 = vsel %vm2799_vm6, %v2793_v27, %v2798_v35  ;;  %2805 = vst [vmem:[#allocation2 + $0x140] sm:$0x3] %v2801_v36  ;;  %v2764_v40 = vpop.permute.xlu1 %2763  ;;  %v2359_v44 = vld [vmem:[#allocation2 + $0x18] sm:$0xff]  ;;  %vm3156_vm6 = vcmask 990208  }
 0x15d   : > { %2506 = vmatprep.subr.bf16.mxu0 %v3875_v30  ;;  %4076 = vmatpush3.bf16.msra.mxu1 %v4289_v34  ;;  %v2765_v39 = vrot.slane %v2762_v37, 4  ;;  %2804 = vst [vmem:[#allocation2 + $0x138] sm:$0x33] %v2800_v38  ;;  %v2766_v43 = vrot.slane %v2764_v40, 4  ;;  %v3869_v50 = vcombine.high %v2359_v44, %v4925_v8  ;;  %v3868_v61 = vcombine.low %v2359_v44, %v4925_v8 }
 0x15e   : > { %4077 = vmatprep.subr.bf16.mxu1 %v4472_v11 }
 0x15f   : > { %v2767_v45 = vsel %vm381_vm1, %v2765_v39, %v2766_v43  ;;  %v2770_v46 = vsel %vm2768_vm7, %v2764_v40, %v2766_v43  ;;  %v4292_v10 = vld [vmem:[#allocation2 + $0x8] ss:$12 sps:$4 sm:$0xff]  }
 0x160   : > { %2507 = vmatpush1.bf16.msra.mxu0 %v3874_v42  ;;  %v2731_v47 = vpop.permute.xlu0 %2730  ;;  %v2769_v23 = vsel %vm2768_vm7, %v2762_v37, %v2767_v45  ;;  %2774 = vst [vmem:[#allocation2 + $0x128] sm:$0x3] %v2770_v46  ;;  %v2733_v49 = vpop.permute.xlu1 %2732  ;;  %v2355_v53 = vld [vmem:[#allocation2] sm:$0xff]  ;;  %v5087_v46 = vld [vmem:[#allocation2 + $0xc] sm:$0xff] }
 0x161   : > { %2508 = vmatprep.subr.bf16.mxu0 %v3872_v41  ;;  %4078 = vmatpush3.bf16.msra.mxu1 %v4290_v19  ;;  %v2734_v48 = vrot.slane %v2731_v47, 4  ;;  %2773 = vst [vmem:[#allocation2 + $0x120] sm:$0x33] %v2769_v23  ;;  %v2735_v52 = vrot.slane %v2733_v49, 4  ;;  %v3866_v60 = vcombine.high %v2355_v53, %v4925_v8  ;;  %v3865_v14 = vcombine.low %v2355_v53, %v4925_v8 }
 0x162   : > { %4079 = vmatprep.subr.bf16.mxu1 %v4472_v11 }
 0x163   : > { %v2736_v55 = vsel %vm381_vm1, %v2734_v48, %v2735_v52  ;;  %v2739_v56 = vsel %vm2737_vm8, %v2733_v49, %v2735_v52  ;;  %v4293_v17 = vld [vmem:[#allocation2 + $0x140] ss:$12 sps:$4 sm:$0xff]  }
 0x164   : > { %2509 = vmatpush1.bf16.msra.mxu0 %v3871_v51  ;;  %v2700_v57 = vpop.permute.xlu0 %2699  ;;  %v2738_v5 = vsel %vm2737_vm8, %v2731_v47, %v2736_v55  ;;  %2743 = vst [vmem:[#allocation2 + $0x110] sm:$0x3] %v2739_v56  ;;  %v2702_v59 = vpop.permute.xlu1 %2701  ;;  %v2832_v63 = vld [vmem:[#allocation2 + $0x138] sm:$0xff] }
 0x165   : > { %2510 = vmatprep.subr.bf16.mxu0 %v3869_v50  ;;  %4080 = vmatpush3.bf16.msra.mxu1 %v4291_v54  ;;  %v2703_v58 = vrot.slane %v2700_v57, 4  ;;  %2742 = vst [vmem:[#allocation2 + $0x108] sm:$0x33] %v2738_v5  ;;  %v2704_v62 = vrot.slane %v2702_v59, 4  ;;  %v3907_v13 = vcombine.high %v2832_v63, %v4925_v8  ;;  %v3906_v27 = vcombine.low %v2832_v63, %v4925_v8 }
 0x166   : > { %4081 = vmatprep.subr.bf16.mxu1 %v4472_v11 }
 0x167   : > { %v2705_v0 = vsel %vm381_vm1, %v2703_v58, %v2704_v62  ;;  %v2708_v1 = vsel %vm2706_vm9, %v2702_v59, %v2704_v62  ;;  %v4294_v6 = vld [vmem:[#allocation2 + $0x128] ss:$12 sps:$4 sm:$0xff]  }
 0x168   : > { %2511 = vmatpush1.bf16.msra.mxu0 %v3868_v61  ;;  %v2669_v2 = vpop.permute.xlu0 %2668  ;;  %v2707_v4 = vsel %vm2706_vm9, %v2700_v57, %v2705_v0  ;;  %2712 = vst [vmem:[#allocation2 + $0xf8] sm:$0x3] %v2708_v1  ;;  %v2671_v9 = vpop.permute.xlu1 %2670  ;;  %v2828_v16 = vld [vmem:[#allocation2 + $0x120] sm:$0xff] }
 0x169   : > { %2512 = vmatprep.subr.bf16.mxu0 %v3866_v60  ;;  %4082 = vmatpush3.bf16.msra.mxu1 %v4292_v10  ;;  %v2672_v7 = vrot.slane %v2669_v2, 4  ;;  %2711 = vst [vmem:[#allocation2 + $0xf0] sm:$0x33] %v2707_v4  ;;  %v2673_v15 = vrot.slane %v2671_v9, 4  ;;  %v3904_v26 = vcombine.high %v2828_v16, %v4925_v8  ;;  %v3903_v37 = vcombine.low %v2828_v16, %v4925_v8 }
 0x16a   : > { %4087 = vmatprep.subr.bf16.mxu1 %v4472_v11 }
 0x16b   : > { %v2674_v18 = vsel %vm381_vm1, %v2672_v7, %v2673_v15  ;;  %v2677_v20 = vsel %vm2675_vm10, %v2671_v9, %v2673_v15  ;;  %v4295_v40 = vld [vmem:[#allocation2 + $0x110] ss:$12 sps:$4 sm:$0xff]  }
 0x16c   : > { %2513 = vmatpush1.bf16.msra.mxu0 %v3865_v14  ;;  %4084 = vmatmul.mubr.msk.bf16.vlgmr.msra.gmra.mxu1 %vm686_vm13, %v2354_v12  ;;  %v2638_v21 = vpop.permute.xlu0 %2637  ;;  %v2676_v22 = vsel %vm2675_vm10, %v2669_v2, %v2674_v18  ;;  %2681 = vst [vmem:[#allocation2 + $0xe0] sm:$0x3] %v2677_v20  ;;  %v2640_v25 = vpop.permute.xlu1 %2639  ;;  %v2824_v29 = vld [vmem:[#allocation2 + $0x108] sm:$0xff] }
 0x16d   : > { %2953 = vmatprep.subr.bf16.mxu0 %v3907_v13  ;;  %4088 = vmatpush3.bf16.msra.mxu1 %v4293_v17  ;;  %v2641_v24 = vrot.slane %v2638_v21, 4  ;;  %2680 = vst [vmem:[#allocation2 + $0xd8] sm:$0x33] %v2676_v22  ;;  %v2642_v28 = vrot.slane %v2640_v25, 4  ;;  %v3901_v36 = vcombine.high %v2824_v29, %v4925_v8  ;;  %v3900_v47 = vcombine.low %v2824_v29, %v5087_v46 }
 0x16e   : > { %4089 = vmatprep.subr.bf16.mxu1 %v4472_v11  ;;  %4101 = vmatprep.mubr.msk.bf16.mxu1 %vm4479_vm0, %v4472_v11 }
 0x16f   : > { %3886 = vmatmul.mubr.msk.bf16.vlgmr.msra.gmra.mxu0 %vm686_vm13, %v2354_v12  ;;  %v2643_v30 = vsel %vm381_vm1, %v2641_v24, %v2642_v28  ;;  %v2646_v31 = vsel %vm2644_vm11, %v2640_v25, %v2642_v28  ;;  %v4296_v49 = vld [vmem:[#allocation2 + $0xf8] ss:$12 sps:$4 sm:$0xff]  }
 0x170   : > { %2954 = vmatpush1.bf16.msra.mxu0 %v3906_v27  ;;  %v2607_v32 = vpop.permute.xlu0 %2606  ;;  %2983 = vmatprep.mubr.bf16.mxu0 %v4925_v8  ;;  %v2645_v33 = vsel %vm2644_vm11, %v2638_v21, %v2643_v30  ;;  %2650 = vst [vmem:[#allocation2 + $0xc8] sm:$0x3] %v2646_v31  ;;  %v2609_v35 = vpop.permute.xlu1 %2608  ;;  %v2820_v39 = vld [vmem:[#allocation2 + $0xf0] sm:$0xff]  ;;  %v2807_v30 = vld [vmem:[#allocation7 + $0xa] sm:$0x3] }
 0x171   : > { %2955 = vmatprep.subr.bf16.mxu0 %v3904_v26  ;;  %4090 = vmatpush3.bf16.msra.mxu1 %v4294_v6  ;;  %v2610_v34 = vrot.slane %v2607_v32, 4  ;;  %2649 = vst [vmem:[#allocation2 + $0xc0] sm:$0x33] %v2645_v33  ;;  %v2611_v38 = vrot.slane %v2609_v35, 4  ;;  %v3898_v8 = vcombine.high %v2820_v39, %v5087_v46  ;;  %v3897_v57 = vcombine.low %v2820_v39, %v5087_v46 }
 0x172   : > { %4091 = vmatprep.subr.bf16.mxu1 %v4472_v11 }
 0x173   : > { %v2612_v41 = vsel %vm381_vm1, %v2610_v34, %v2611_v38  ;;  %v2615_v42 = vsel %vm2613_vm12, %v2609_v35, %v2611_v38  ;;  %v4297_v59 = vld [vmem:[#allocation2 + $0xe0] ss:$12 sps:$4 sm:$0xff]  }
 0x174   : > { %2956 = vmatpush1.bf16.msra.mxu0 %v3903_v37  ;;  %v3243_v43 = vpop.permute.xlu0 %3242  ;;  %v2614_v44 = vsel %vm2613_vm12, %v2607_v32, %v2612_v41  ;;  %2619 = vst [vmem:[#allocation2 + $0xb0] sm:$0x3] %v2615_v42  ;;  %v3245_v45 = vpop.permute.xlu1 %3244  ;;  %v2816_v48 = vld [vmem:[#allocation2 + $0xd8] sm:$0xff] }
 0x175   : > { %2957 = vmatprep.subr.bf16.mxu0 %v3901_v36  ;;  %4092 = vmatpush3.bf16.msra.mxu1 %v4295_v40  ;;  %v3246_v19 = vrot.slane %v3243_v43, 4  ;;  %2618 = vst [vmem:[#allocation2 + $0xa8] sm:$0x33] %v2614_v44  ;;  %v3247_v23 = vrot.slane %v3245_v45, 4  ;;  %v3895_v56 = vcombine.high %v2816_v48, %v5087_v46  ;;  %v3894_v2 = vcombine.low %v2816_v48, %v5087_v46 }
 0x176   : > { %4093 = vmatprep.subr.bf16.mxu1 %v4472_v11 }
 0x177   : > { %v3248_v50 = vsel %vm381_vm1, %v3246_v19, %v3247_v23  ;;  %v3251_v51 = vsel %vm3249_vm14, %v3245_v45, %v3247_v23  ;;  %v4298_v9 = vld [vmem:[#allocation2 + $0xc8] ss:$12 sps:$4 sm:$0xff]  }
 0x178   : > { %2958 = vmatpush1.bf16.msra.mxu0 %v3900_v47  ;;  %v3212_v52 = vpop.permute.xlu0 %3211  ;;  %v3250_v53 = vsel %vm3249_vm14, %v3243_v43, %v3248_v50  ;;  %3255 = vst [vmem:[#allocation2 + $0x98] sm:$0x3] %v3251_v51  ;;  %v3214_v55 = vpop.permute.xlu1 %3213  ;;  %v2812_v58 = vld [vmem:[#allocation2 + $0xc0] sm:$0xff] }
 0x179   : > { %2959 = vmatprep.subr.bf16.mxu0 %v3898_v8  ;;  %4094 = vmatpush3.bf16.msra.mxu1 %v4296_v49  ;;  %v3215_v54 = vrot.slane %v3212_v52, 4  ;;  %3254 = vst [vmem:[#allocation2 + $0x90] sm:$0x33] %v3250_v53  ;;  %v3216_v5 = vrot.slane %v3214_v55, 4  ;;  %v3892_v1 = vcombine.high %v2812_v58, %v5087_v46  ;;  %v3891_v20 = vcombine.low %v2812_v58, %v5087_v46 }
 0x17a   : > { %4095 = vmatprep.subr.bf16.mxu1 %v4472_v11 }
 0x17b   : > { %v3217_v60 = vsel %vm381_vm1, %v3215_v54, %v3216_v5  ;;  %v3220_v61 = vsel %vm3218_vm15, %v3214_v55, %v3216_v5  ;;  %v4299_v24 = vld [vmem:[#allocation2 + $0xb0] ss:$12 sps:$4 sm:$0xff]  }
 0x17c   : > { %2960 = vmatpush1.bf16.msra.mxu0 %v3897_v57  ;;  %v3181_v62 = vpop.permute.xlu0 %3180  ;;  %v3219_v63 = vsel %vm3218_vm15, %v3212_v52, %v3217_v60  ;;  %3224 = vst [vmem:[#allocation2 + $0x80] sm:$0x3] %v3220_v61  ;;  %v3183_v0 = vpop.permute.xlu1 %3182  ;;  %v2808_v7 = vld [vmem:[#allocation2 + $0xa8] sm:$0xff] }
 0x17d   : > { %2961 = vmatprep.subr.bf16.mxu0 %v3895_v56  ;;  %4096 = vmatpush3.bf16.msra.mxu1 %v4297_v59  ;;  %v3184_v10 = vrot.slane %v3181_v62, 4  ;;  %3223 = vst [vmem:[#allocation2 + $0x78] sm:$0x33] %v3219_v63  ;;  %v3185_v4 = vrot.slane %v3183_v0, 4  ;;  %v3889_v18 = vcombine.high %v2808_v7, %v5087_v46  ;;  %v3888_v32 = vcombine.low %v2808_v7, %v5087_v46 }
 0x17e   : > { %4097 = vmatprep.subr.bf16.mxu1 %v4472_v11 }
 0x17f   : > { %v3186_v12 = vsel %vm381_vm1, %v3184_v10, %v3185_v4  ;;  %v3189_v13 = vsel %vm3187_vm5, %v3183_v0, %v3185_v4  ;;  %v4300_v35 = vld [vmem:[#allocation2 + $0x98] ss:$12 sps:$4 sm:$0xff]  }
 0x180   : > { %2962 = vmatpush1.bf16.msra.mxu0 %v3894_v2  ;;  %v3150_v14 = vpop.permute.xlu0 %3149  ;;  %v3188_v15 = vsel %vm3187_vm5, %v3181_v62, %v3186_v12  ;;  %3193 = vst [vmem:[#allocation2 + $0x68] sm:$0x3] %v3189_v13  ;;  %v3152_v17 = vpop.permute.xlu1 %3151  ;;  %v3282_v22 = vld [vmem:[#allocation2 + $0x90] sm:$0xff] }
 0x181   : > { %2963 = vmatprep.subr.bf16.mxu0 %v3892_v1  ;;  %4098 = vmatpush3.bf16.msra.mxu1 %v4298_v9  ;;  %v3153_v16 = vrot.slane %v3150_v14, 4  ;;  %3192 = vst [vmem:[#allocation2 + $0x60] sm:$0x33] %v3188_v15  ;;  %v3154_v21 = vrot.slane %v3152_v17, 4  ;;  %v3930_v31 = vcombine.high %v3282_v22, %v5087_v46  ;;  %v3929_v43 = vcombine.low %v3282_v22, %v5087_v46 }
 0x182   : > { %4099 = vmatprep.subr.bf16.mxu1 %v4472_v11 }
 0x183   : > { %v3155_v25 = vsel %vm381_vm1, %v3153_v16, %v3154_v21  ;;  %v3158_v26 = vsel %vm3156_vm6, %v3152_v17, %v3154_v21  ;;  %v4301_v45 = vld [vmem:[#allocation2 + $0x80] ss:$12 sps:$4 sm:$0xff]  }
 0x184   : > { %2964 = vmatpush1.bf16.msra.mxu0 %v3891_v20  ;;  %v3120_v27 = vpop.permute.xlu0 %3119  ;;  %v3157_v28 = vsel %vm3156_vm6, %v3150_v14, %v3155_v25  ;;  %3162 = vst [vmem:[#allocation2 + $0x50] sm:$0x3] %v3158_v26  ;;  %v3122_v6 = vpop.permute.xlu1 %3121  ;;  %v3278_v34 = vld [vmem:[#allocation2 + $0x78] sm:$0xff] }
 0x185   : > { %2965 = vmatprep.subr.bf16.mxu0 %v3889_v18  ;;  %4100 = vmatpush3.bf16.msra.mxu1 %v4299_v24  ;;  %v3123_v29 = vrot.slane %v3120_v27, 4  ;;  %3161 = vst [vmem:[#allocation2 + $0x48] sm:$0x33] %v3157_v28  ;;  %v3124_v33 = vrot.slane %v3122_v6, 4  ;;  %v3927_v42 = vcombine.high %v3278_v34, %v5087_v46  ;;  %v3926_v52 = vcombine.low %v3278_v34, %v5087_v46  ;;  %v3257_v14 = vld [vmem:[#allocation7 + $0xc] sm:$0x3] }
 0x186   : > { %4105 = vmatprep.subr.bf16.mxu1 %v4472_v11 }
 0x187   : > { %v3125_v36 = vsel %vm381_vm1, %v3123_v29, %v3124_v33  ;;  %v3127_v37 = vsel %vm538_vm2, %v3122_v6, %v3124_v33  ;;  %v4302_v55 = vld [vmem:[#allocation2 + $0x68] ss:$12 sps:$4 sm:$0xff]  }
 0x188   : > { %2966 = vmatpush1.bf16.msra.mxu0 %v3888_v32  ;;  %4102 = vmatmul.mubr.msk.bf16.vlgmr.msra.gmra.mxu1 %vm686_vm13, %v2807_v30  ;;  %v3090_v38 = vpop.permute.xlu0 %3089  ;;  %v3126_v39 = vsel %vm538_vm2, %v3120_v27, %v3125_v36  ;;  %3131 = vst [vmem:[#allocation2 + $0x38] sm:$0x3] %v3127_v37  ;;  %v3092_v41 = vpop.permute.xlu1 %3091  ;;  %v3274_v19 = vld [vmem:[#allocation2 + $0x60] sm:$0xff]  ;;  %vm3624_vm2 = vcmask 3072  }
 0x189   : > { %3403 = vmatprep.subr.bf16.mxu0 %v3930_v31  ;;  %4106 = vmatpush3.bf16.msra.mxu1 %v4300_v35  ;;  %v3093_v40 = vrot.slane %v3090_v38, 4  ;;  %3130 = vst [vmem:[#allocation2 + $0x30] sm:$0x33] %v3126_v39  ;;  %v3094_v44 = vrot.slane %v3092_v41, 4  ;;  %v3924_v51 = vcombine.high %v3274_v19, %v5087_v46  ;;  %v3923_v59 = vcombine.low %v3274_v19, %v5087_v46 }
 0x18a   : > { %4107 = vmatprep.subr.bf16.mxu1 %v4472_v11  ;;  %4119 = vmatprep.mubr.msk.bf16.mxu1 %vm4479_vm0, %v4472_v11 }
 0x18b   : > { %3909 = vmatmul.mubr.msk.bf16.vlgmr.msra.gmra.mxu0 %vm686_vm13, %v2807_v30  ;;  %v3095_v8 = vsel %vm381_vm1, %v3093_v40, %v3094_v44  ;;  %v3097_v47 = vsel %vm507_vm3, %v3092_v41, %v3094_v44  ;;  %v4303_v61 = vld [vmem:[#allocation2 + $0x50] ss:$12 sps:$4 sm:$0xff]  }
 0x18c   : > { %3404 = vmatpush1.bf16.msra.mxu0 %v3929_v43  ;;  %v3060_v23 = vpop.permute.xlu0 %3059  ;;  %3433 = vmatprep.mubr.bf16.mxu0 %v5087_v46  ;;  %v3096_v48 = vsel %vm507_vm3, %v3090_v38, %v3095_v8  ;;  %3101 = vst [vmem:[#allocation2 + $0x20] sm:$0x3] %v3097_v47  ;;  %v3062_v50 = vpop.permute.xlu1 %3061  ;;  %v3270_v54 = vld [vmem:[#allocation2 + $0x48] sm:$0xff] }
 0x18d   : > { %3405 = vmatprep.subr.bf16.mxu0 %v3927_v42  ;;  %4108 = vmatpush3.bf16.msra.mxu1 %v4301_v45  ;;  %v3063_v49 = vrot.slane %v3060_v23, 4  ;;  %3100 = vst [vmem:[#allocation2 + $0x18] sm:$0x33] %v3096_v48  ;;  %v3064_v53 = vrot.slane %v3062_v50, 4  ;;  %v3921_v58 = vcombine.high %v3270_v54, %v5087_v46  ;;  %v3920_v63 = vcombine.low %v3270_v54, %v5087_v46 }
 0x18e   : > { %4109 = vmatprep.subr.bf16.mxu1 %v4472_v11 }
 0x18f   : > { %v3065_v56 = vsel %vm381_vm1, %v3063_v49, %v3064_v53  ;;  %v3067_v57 = vsel %vm476_vm4, %v3062_v50, %v3064_v53  ;;  %v4304_v0 = vld [vmem:[#allocation2 + $0x38] ss:$12 sps:$4 sm:$0xff]  }
 0x190   : > { %3406 = vmatpush1.bf16.msra.mxu0 %v3926_v52  ;;  %v3066_v5 = vsel %vm476_vm4, %v3060_v23, %v3065_v56  ;;  %3071 = vst [vmem:[#allocation2 + $0x8] sm:$0x3] %v3067_v57  ;;  %v3266_v60 = vld [vmem:[#allocation2 + $0x30] sm:$0xff] }
 0x191   : > { %3407 = vmatprep.subr.bf16.mxu0 %v3924_v51  ;;  %4110 = vmatpush3.bf16.msra.mxu1 %v4302_v55  ;;  %3070 = vst [vmem:[#allocation2] sm:$0x33] %v3066_v5  ;;  %v3918_v62 = vcombine.high %v3266_v60, %v5087_v46  ;;  %v3917_v2 = vcombine.low %v3266_v60, %v5087_v46 }
 0x192   : > { %4111 = vmatprep.subr.bf16.mxu1 %v4472_v11 }
 0x193   : > { %v4305_v7 = vld [vmem:[#allocation2 + $0x20] ss:$12 sps:$4 sm:$0xff]  }
 0x194   : > { %3408 = vmatpush1.bf16.msra.mxu0 %v3923_v59  ;;  %v3262_v10 = vld [vmem:[#allocation2 + $0x18] sm:$0xff] }
 0x195   : > { %3409 = vmatprep.subr.bf16.mxu0 %v3921_v58  ;;  %4112 = vmatpush3.bf16.msra.mxu1 %v4303_v61  ;;  %v3915_v1 = vcombine.high %v3262_v10, %v5087_v46  ;;  %v3914_v12 = vcombine.low %v3262_v10, %v5087_v46 }
 0x196   : > { %4113 = vmatprep.subr.bf16.mxu1 %v4472_v11 }
 0x197   : > { %v4306_v13 = vld [vmem:[#allocation2 + $0x8] ss:$12 sps:$4 sm:$0xff]  }
 0x198   : > { %3410 = vmatpush1.bf16.msra.mxu0 %v3920_v63  ;;  %v3258_v4 = vld [vmem:[#allocation2] sm:$0xff] }
 0x199   : > { %3411 = vmatprep.subr.bf16.mxu0 %v3918_v62  ;;  %4114 = vmatpush3.bf16.msra.mxu1 %v4304_v0  ;;  %v3912_v9 = vcombine.high %v3258_v4, %v5087_v46  ;;  %v3911_v15 = vcombine.low %v3258_v4, %v5087_v46 }
 0x19a   : > { %4115 = vmatprep.subr.bf16.mxu1 %v4472_v11 }
 0x19c   : > { %3412 = vmatpush1.bf16.msra.mxu0 %v3917_v2 }
 0x19d   : > { %3413 = vmatprep.subr.bf16.mxu0 %v3915_v1  ;;  %4116 = vmatpush3.bf16.msra.mxu1 %v4305_v7 }
 0x19e   : > { %4117 = vmatprep.subr.bf16.mxu1 %v4472_v11 }
 0x1a0   : > { %3414 = vmatpush1.bf16.msra.mxu0 %v3914_v12 }
 0x1a1   : > { %3415 = vmatprep.subr.bf16.mxu0 %v3912_v9  ;;  %4118 = vmatpush3.bf16.msra.mxu1 %v4306_v13 }
 0x1a4   : > { %3416 = vmatpush1.bf16.msra.mxu0 %v3911_v15  ;;  %4120 = vmatmul.mubr.msk.bf16.vlgmr.msra.gmra.mxu1 %vm686_vm13, %v3257_v14 }
 0x1a5   : > { %4123 = vmatprep.subr.mxu0 %v4472_v11 }
 0x1a7   : > { %3932 = vmatmul.mubr.msk.bf16.vlgmr.msra.gmra.mxu0 %vm686_vm13, %v3257_v14 }
 0x1a8   : > { %4125 = vmatprep.mubr.msk.f32.mxu0 %vm4479_vm0, %v4472_v11  ;;  %vm3525_vm0 = vcmask 31744  }
 0x1bb   : > { %v765_v16 = vpop.f32.mrf.mxu1 }
 0x1bc   : > { %776 = vst [vmem:[#allocation3 + $0x8] sm:$0xf] %v765_v16 }
 0x1bd   : > { %v4013_v17 = vpop.f32.mrf.mxu1 }
 0x1bf   : > { %v724_v18 = vpop.f32.mrf.mxu0  ;;  %v768_v20 = vpop.f32.mrf.mxu1 }
 0x1c0   : > { %v3502_v20 = vsub.s32 1, %v4681_v3 }
 0x1c1   : > { %v726_v21 = vpop.f32.mrf.mxu0  ;;  %v4014_v24 = vpop.f32.mrf.mxu1 }
 0x1c2   : > { %v773_v22 = vcombine.low %v724_v18, %v726_v21  ;;  %v3498_v18 = vsub.s32 0, %v4681_v3  ;;  %v3494_v21 = vld [vmem:[%s5207_s3] sm:$0x7] }
 0x1c3   : > { %v728_v25 = vpop.f32.mrf.mxu0  ;;  %v1221_v27 = vld [vmem:[#allocation3 + $0x8] sm:$0xf] }
 0x1c5   : > { %v729_v46 = vpop.f32.mrf.mxu0 }
 0x1d7   : > { %v1214_v26 = vpop.f32.mrf.mxu1 }
 0x1d8   : > { %v1227_v28 = vadd.f32 %v1221_v27, %v1214_v26 }
 0x1d9   : > { %v4031_v29 = vpop.f32.mrf.mxu1 }
 0x1da   : > { %1229 = vst [vmem:[#allocation3 + $0x8] sm:$0xf] %v1227_v28  ;;  %v3499_v28 = vrot.slane %v3494_v21, %v3498_v18  ;;  %v3503_v29 = vrot.slane %v3494_v21, %v3502_v20 }
 0x1db   : > { %v1173_v6 = vpop.f32.mrf.mxu0  ;;  %v1217_v30 = vpop.f32.mrf.mxu1 }
 0x1dd   : > { %v1175_v31 = vpop.f32.mrf.mxu0  ;;  %v4032_v11 = vpop.f32.mrf.mxu1 }
 0x1de   : > { %v1224_v32 = vcombine.low %v1173_v6, %v1175_v31 }
 0x1df   : > { %v1177_v33 = vpop.f32.mrf.mxu0 }
 0x1e0   : > { %v1226_v34 = vadd.f32 %v1224_v32, %v773_v22  ;;  %v3506_v32 = vsub.s32 2, %v4681_v3 }
 0x1e1   : > { %v1178_v35 = vpop.f32.mrf.mxu0  ;;  %v1674_v37 = vld [vmem:[#allocation3 + $0x8] sm:$0xf] }
 0x1f3   : > { %v1667_v36 = vpop.f32.mrf.mxu1 }
 0x1f4   : > { %v1680_v38 = vadd.f32 %v1674_v37, %v1667_v36  ;;  %v3509_v36 = vcombine.low %v3499_v28, %v3503_v29 }
 0x1f5   : > { %v4049_v39 = vpop.f32.mrf.mxu1 }
 0x1f6   : > { %1682 = vst [vmem:[#allocation3 + $0x8] sm:$0xf] %v1680_v38  ;;  %v3507_v39 = vrot.slane %v3494_v21, %v3506_v32 }
 0x1f7   : > { %v1626_v40 = vpop.f32.mrf.mxu0  ;;  %v1670_v41 = vpop.f32.mrf.mxu1 }
 0x1f9   : > { %v1628_v42 = vpop.f32.mrf.mxu0  ;;  %v4050_v44 = vpop.f32.mrf.mxu1 }
 0x1fa   : > { %v1677_v43 = vcombine.low %v1626_v40, %v1628_v42 }
 0x1fb   : > { %v1630_v19 = vpop.f32.mrf.mxu0 }
 0x1fc   : > { %v1679_v45 = vadd.f32 %v1677_v43, %v1226_v34 }
 0x1fd   : > { %v1631_v8 = vpop.f32.mrf.mxu0  ;;  %v2127_v23 = vld [vmem:[#allocation3 + $0x8] sm:$0xf] }
 0x210   : > { %v2120_v47 = vpop.f32.mrf.mxu1 }
 0x211   : > { %v2133_v48 = vadd.f32 %v2127_v23, %v2120_v47 }
 0x212   : > { %v4067_v49 = vpop.f32.mrf.mxu1 }
 0x213   : > { %2135 = vst [vmem:[#allocation3 + $0x8] sm:$0xf] %v2133_v48  ;;  %v2079_v50 = vpop.f32.mrf.mxu0  ;;  %v3524_v48 = vld [vmem:[#allocation9] sm:$0xf] }
 0x214   : > { %v2123_v51 = vpop.f32.mrf.mxu1 }
 0x215   : > { %v2081_v52 = vpop.f32.mrf.mxu0 }
 0x216   : > { %v2130_v53 = vcombine.low %v2079_v50, %v2081_v52  ;;  %v4068_v54 = vpop.f32.mrf.mxu1 }
 0x217   : > { %v2083_v55 = vpop.f32.mrf.mxu0 }
 0x218   : > { %v2132_v56 = vadd.f32 %v2130_v53, %v1679_v45 }
 0x219   : > { %v2084_v57 = vpop.f32.mrf.mxu0 }
 0x21a   : > { %v2580_v58 = vld [vmem:[#allocation3 + $0x8] sm:$0xf]  ;;  %v4517_v57 = vmov 839922192  }
 0x22c   : > { %v2573_v5 = vpop.f32.mrf.mxu1 }
 0x22d   : > { %v2586_v59 = vadd.f32 %v2580_v58, %v2573_v5  ;;  %v3613_v5 = vunpack.c.l.s4 %v4517_v57 }
 0x22e   : > { %v4085_v60 = vpop.f32.mrf.mxu1 }
 0x22f   : > { %2588 = vst [vmem:[#allocation3 + $0x8] sm:$0xf] %v2586_v59  ;;  %v2532_v61 = vpop.f32.mrf.mxu0  ;;  %v3614_v58 = vunpack.c.0.s8 %v3613_v5 }
 0x230   : > { %v2576_v62 = vpop.f32.mrf.mxu1 }
 0x231   : > { %v2534_v63 = vpop.f32.mrf.mxu0  ;;  %v3617_v59 = vsub.s32 %v3614_v58, %v4681_v3 }
 0x232   : > { %v4086_v10 = vpop.f32.mrf.mxu1  ;;  %v2583_v22 = vcombine.low %v2532_v61, %v2534_v63 }
 0x233   : > { %v2536_v0 = vpop.f32.mrf.mxu0 }
 0x234   : > { %v2585_v30 = vadd.f32 %v2583_v22, %v2132_v56 }
 0x235   : > { %v2537_v1 = vpop.f32.mrf.mxu0 }
 0x236   : > { %v3033_v4 = vld [vmem:[#allocation3 + $0x8] sm:$0xf] }
 0x248   : > { %v3026_v2 = vpop.f32.mrf.mxu1 }
 0x249   : > { %v3039_v7 = vadd.f32 %v3033_v4, %v3026_v2 }
 0x24a   : > { %v4103_v9 = vpop.f32.mrf.mxu1 }
 0x24b   : > { %3041 = vst [vmem:[#allocation3 + $0x8] sm:$0xf] %v3039_v7  ;;  %v2985_v12 = vpop.f32.mrf.mxu0 }
 0x24c   : > { %v3029_v13 = vpop.f32.mrf.mxu1 }
 0x24d   : > { %v2987_v14 = vpop.f32.mrf.mxu0 }
 0x24e   : > { %v4104_v15 = vpop.f32.mrf.mxu1  ;;  %v3036_v26 = vcombine.low %v2985_v12, %v2987_v14 }
 0x24f   : > { %v2989_v16 = vpop.f32.mrf.mxu0 }
 0x250   : > { %v3038_v33 = vadd.f32 %v3036_v26, %v2585_v30 }
 0x251   : > { %v2990_v17 = vpop.f32.mrf.mxu0 }
 0x252   : > { %v3483_v25 = vld [vmem:[#allocation3 + $0x8] sm:$0xf] }
 0x264   : > { %v3476_v24 = vpop.f32.mrf.mxu1 }
 0x265   : > { %v3489_v46 = vadd.f32 %v3483_v25, %v3476_v24 }
 0x266   : > { %v4121_v27 = vpop.f32.mrf.mxu1 }
 0x267   : > { %3491 = vst [vmem:[#allocation3 + $0x8] sm:$0xf] %v3489_v46  ;;  %v3435_v6 = vpop.f32.mrf.mxu0 }
 0x268   : > { %v3479_v31 = vpop.f32.mrf.mxu1 }
 0x269   : > { %v3437_v11 = vpop.f32.mrf.mxu0 }
 0x26a   : > { %v3486_v34 = vcombine.low %v3435_v6, %v3437_v11  ;;  %v4122_v35 = vpop.f32.mrf.mxu1 }
 0x26b   : > { %v3439_v37 = vpop.f32.mrf.mxu0 }
 0x26c   : > { %v3488_v38 = vadd.f32 %v3486_v34, %v3038_v33 }
 0x26d   : > { %v3440_v40 = vpop.f32.mrf.mxu0 }
 0x26e   : > { %v3493_v41 = vld [vmem:[#allocation3 + $0x8] sm:$0xf]  ;;  %v3511_v42 = vmul.f32 %v3509_v36, %v3488_v38 }
 0x26f   : > { %v3512_v43 = vmul.f32 %v3507_v39, %v3493_v41 }
 0x270   : > { %v3514_v44 = vcombine.high %v3511_v42, %v3511_v42  ;;  %v3517_v19 = vsel %vm381_vm1, %v3511_v42, 0.0 }
 0x271   : > { %v3520_v47 = vsel %vm381_vm1, %v3512_v43, 0.0 }
 0x272   : > { %v3518_v45 = vsel %vm381_vm1, %v3514_v44, 0.0 }
 0x273   : > { %v3519_v8 = vadd.f32 %v3518_v45, %v3517_v19 }
 0x275   : > { %v3521_v23 = vadd.f32 %v3520_v47, %v3519_v8 }
 0x277   : > { %3522 = vadd.xlane.f32.xlu0 %v3521_v23 }
 0x300   : > { %v3523_v49 = vpop.xlane.xlu0 %3522 }
 0x301   : > { %4124 = vmatpush3.msk.msra.mxu0 %vm381_vm1, %v3523_v49 }
 0x302   : > { %4126 = vmatmul.mubr.msk.f32.vlgmr.msra.gmra.mxu0 %vm3525_vm0, %v3524_v48 }
 0x3c2   : > { %v3598_v50 = vpop.f32.mrf.mxu0 }
 0x3c3   : > { %v3602_v51 = vsub.f32 0.0, %v3598_v50 }
 0x3c4   : > { %v4127_v52 = vpop.f32.mrf.mxu0 }
 0x3c5   : > { %v3603_v53 = vmul.f32 1.442695, %v3602_v51 }
 0x3c7   : > { %4307 = vpow2.f32 %v3603_v53 }
 0x3d4   : > { %v4308_v54 = vpop.eup %4307 }
 0x3d5   : > { %v3605_v55 = vadd.f32 1.0, %v4308_v54 }
 0x3d7   : > { %4309 = vrcp.f32 %v3605_v55 }
 0x3e4   : > { %v4310_v56 = vpop.eup %4309 }
 0x3e5   : > { %3625 = vst.msk [vmem:[%s278_s9] sm:$0xf] %vm3624_vm2, %v4310_v56  ;;  %3610 = vperm.xlu1 %4252, %v4310_v56  }
 0x460   : > { %v3611_v60 = vpop.permute.xlu1 %3610 }
 0x461   : > { %v3618_v61 = vrot.slane %v3611_v60, %v3617_v59 }
 0x463   : > { %v3620_v62 = vmul.f32 %v3618_v61, %v3488_v38  ;;  %v3621_v63 = vmul.f32 %v3618_v61, %v3493_v41 }
 0x465   : > { %3622 = vst [vmem:[%s268_s7] sm:$0xff] %v3620_v62  ;;  %3623 = vst [vmem:[%s268_s7 + $0x8] sm:$0xf] %v3621_v63 }
 0x466   : > { %4406 = shalt.err (!%p4403_p13)
}
 0x467   : > { %s4407_s10 = scalar_lea.hbm %s5167_s28, 192  ;;  %s4411_s16 = scalar_lea.hbm %s5208_s4, 384 }
 0x468   : > { %p4408_p5 = scmp.ne.s32.totalorder %s5167_s28, %s4407_s10  ;;  %p4412_p4 = scmp.lt.s32.totalorder %s5167_s28, %s5208_s4 }
 0x469   : > { %p4413_p8 = scmp.lt.s32.totalorder %s4411_s16, %s4407_s10 }
 0x46a   : > { %p4409_p10 = pnand %p4408_p5, %p5225_p1 }
 0x46b   : > { %p4414_p3 = por %p4413_p8, %p4412_p4 }
 0x46c   : > { %p4410_p0 = pneg %p4409_p10 }
 0x46e   : > { %p4415_p11 = pnand %p4414_p3, %p4410_p0 }
 0x470   : > { %4418 = shalt.err (!%p4415_p11)
}
 0x471   : > { %4143 = dma.vmem_to_hbm [thread:$0]  (%p5225_p1), %s3646_s17, 192, %s5167_s28, %s3627_s8  }
 0x472 PF: > { %s3660_s12 = sand.u32 1, %s4449_s18   ;;  %p5226_p2 = scmp.ne.s32.totalorder %s5215_s25, 0 }
 0x473   : > { %p5227_p6 = scmp.ge.s32.totalorder %s4461_s21, 2  ;;  %s3661_s7 = scalar_lea.sflag [#allocation6], %s3660_s12 }
 0x475   : > { %p4157_p12 = pnand %p5227_p6, %p5226_p2 }
 0x477   : > { %p4158_p7 = pneg %p4157_p12 }
 0x479   : > { %4444 = dma.done.wait (%p4158_p7), %s3661_s7, 192  }
 0x47a   : > { %4446 = vsyncadd (%p4158_p7), %s3661_s7, 4294967104  ;;  %p20_p9 = scmp.ge.s32.totalorder %s4621_s15, 4   ;;  %s5228_s18 = smov %s4453_s19 }
 0x47b   : > { %s5229_s19 = smov %s4457_s20  ;;  %s5230_s20 = smov %s4637_s27 }
 0x47c   : > { %s5231_s21 = smov %s4621_s15  ;;  %22 = sbr.rel (!%p20_p9) target bundleno = 6 (0x6), region = 108 }
 0x481   :  { %3673 = vsyncpa [#allocation5], 1 }
 0x482   :  { %3675 = vsyncpa [#allocation5 + $0x1], 1 }
 0x483   :  { %3676 = vsyncpa [#allocation8], 1 }
 0x484   :  { %3677 = vsyncpa [#allocation6], 1 }
 0x485   :  { %3679 = vsyncpa [#allocation6 + $0x1], 1 }

// kernel: tpu_custom_call.1
= control target key start
LH: loop header
LB: loop body
LE: loop exit
PB: predicated region body
PF: predicated region fallthrough
CT: control target
= control target key end

     0   :  { %11 = vsyncpa [#allocation5], 0  ;;  %s5204_s0 = inlined_call_operand.hbm [shape: bf16[2,4,528], index: 0, kind: input, shape index: {}]   ;;  %s5205_s1 = inlined_call_operand.hbm [shape: bf16[7,4,112], index: 1, kind: input, shape index: {}]   ;;  %s5206_s2 = inlined_call_operand.hbm [shape: f32[4,4], index: 2, kind: input, shape index: {}]   ;;  %s5207_s3 = inlined_call_operand.vmem [shape: f32[1,384], index: 3, kind: input, shape index: {}]   ;;  %s5208_s4 = inlined_call_operand.hbm [shape: f32[2,4,384], index: 4, kind: output, shape index: {0}]   ;;  %s5209_s5 = inlined_call_operand.vmem [shape: f32[2,4,1], index: 5, kind: output, shape index: {1}]  }
   0x1   :  { %13 = vsyncpa [#allocation5 + $0x1], 0 }
   0x2   :  { %14 = vsyncpa [#allocation8], 0 }
   0x3   :  { %15 = vsyncpa [#allocation6], 0 }
   0x4   :  { %17 = vsyncpa [#allocation6 + $0x1], 0  ;;  %s4549_s18 = smov 0   ;;  %s4551_s19 = smov 0  }
   0x5   :  { %s4553_s20 = smov 0   ;;  %s4555_s21 = smov 0  }
   0x6 LB: > { %s4570_s22 = sadd.s32 4294967295, %s4461_s21   ;;  %s3761_s23 = sadd.s32 4294967294, %s4461_s21   ;;  %s4461_s21 = sphi %s4555_s21, %s5231_s21   ;;  %s4457_s20 = sphi %s4553_s20, %s5230_s20   ;;  %s4453_s19 = sphi %s4551_s19, %s5229_s19   ;;  %s4449_s18 = sphi %s4549_s18, %s5228_s18  }
   0x7   : > { %p43_p0 = scmp.ne.s32.totalorder %s4453_s19, %s4449_s18  ;;  %p5210_p1 = scmp.eq.s32.totalorder %s4570_s22, 0 }
   0x8   : > { %p136_p3 = scmp.eq.s32.totalorder %s3761_s23, 1  ;;  %p3762_p5 = scmp.ge.s32.totalorder %s4461_s21, 1 }
   0x9   : > { %p4579_p4 = por %p5210_p1, %p43_p0  ;;  %p169_p7 = scmp.lt.s32.totalorder %s4461_s21, 3 }
   0xa   : > { %p4584_p6 = por %p136_p3, %p43_p0  ;;  %s4463_s27 = smov [#allocation7]  }
   0xb   : > { %s5214_s24 = scalar_select %p4579_p4, 1, 0 }
   0xc   : > { %s5215_s25 = scalar_select %p4584_p6, 1, 0 }
   0xd   : > { %p4589_p8 = pnand %p3762_p5, %p169_p7  ;;  %s181_s28 = sshll.u32 %s4463_s27, 4  ;;  %s182_s28 = int_to_ptr.vmem [resolvable:$true] %s181_s28 }
   0xe   : > { %s4464_s30 = smov [#allocation9]   ;;  %s4324_s7 = scalar_lea.vmem %s182_s28, 224 }
   0xf   : > { %s5216_s26 = scalar_select %p4589_p8, 1, 0 }
  0x10   : > { %p4145_p9 = pneg %p4589_p8  ;;  %s195_s6 = sshll.u32 %s4464_s30, 4  ;;  %s196_s6 = int_to_ptr.vmem [resolvable:$true] %s195_s6 }
  0x11   : > { %p4325_p13 = scmp.ne.s32.totalorder %s182_s28, %s4324_s7  ;;  %p4332_p5 = scmp.lt.s32.totalorder %s182_s28, %s182_s28 }
  0x12   : > { %p4598_p11 = pnand %p4145_p9, %p5210_p1  ;;  %p4333_p7 = scmp.lt.s32.totalorder %s4324_s7, %s4324_s7 }
  0x14   : > { %p4315_p12 = pneg %p4598_p11  ;;  %p4334_p10 = por %p4333_p7, %p4332_p5 }
  0x16   : > { %p4327_p0 = pnand %p4325_p13, %p4315_p12 }
  0x18   : > { %p4328_p3 = pneg %p4327_p0 }
  0x1a   : > { %p4335_p9 = pnand %p4334_p10, %p4328_p3 }
  0x1c   : > { %4338 = shalt.err (!%p4335_p9)
}
  0x1d   : > { %s4465_s8 = smov 32   ;;  %s4466_s9 = smov 2  }
  0x1e   : > { %4148 = dma.hbm_to_vmem [thread:$0]  (!%p4598_p11), %s5205_s1, 224, %s182_s28, [#allocation8], %s4465_s8, %s4465_s8, %s4466_s9  }
  0x1f   : > { %s4350_s12 = scalar_lea.vmem %s196_s6, 64  ;;  %p4358_p2 = scmp.lt.s32.totalorder %s196_s6, %s196_s6 }
  0x20   : > { %p4351_p1 = scmp.ne.s32.totalorder %s196_s6, %s4350_s12  ;;  %p4359_p6 = scmp.lt.s32.totalorder %s4350_s12, %s4350_s12 }
  0x22   : > { %p4353_p13 = pnand %p4351_p1, %p4315_p12  ;;  %p4360_p5 = por %p4359_p6, %p4358_p2 }
  0x24   : > { %p4354_p0 = pneg %p4353_p13 }
  0x26   : > { %p4361_p10 = pnand %p4360_p5, %p4354_p0 }
  0x28   : > { %4364 = shalt.err (!%p4361_p10)
}
  0x29   : > { %4151 = dma.hbm_to_vmem [thread:$0]  (!%p4598_p11), %s5206_s2, 64, %s196_s6, [#allocation8]  }
  0x2a   : > { %s4621_s15 = sadd.s32 1, %s4461_s21   ;;  %s30_s16 = sadd.s32 1, %s4457_s20 }
  0x2b   : > { %s27_s17 = ssub.s32 %s4461_s21, %s4621_s15  ;;  %p37_p1 = scmp.ne.s32.totalorder %s4457_s20, %s4453_s19 }
  0x2c   : > { %p28_p2 = scmp.eq.s32.totalorder %s27_s17, 0  ;;  %p38_p6 = scmp.eq.s32.totalorder %s4461_s21, 0 }
  0x2d   : > { %p5218_p12 = scmp.eq.s32.totalorder %s4570_s22, 1  ;;  %p4162_p7 = scmp.lt.s32.totalorder %s4461_s21, 2 }
  0x2e   : > { %s4637_s27 = scalar_select %p28_p2, %s4457_s20, %s30_s16  }
  0x2f   : > { %p4631_p3 = por %p5218_p12, %p37_p1  ;;  %p39_p9 = por %p38_p6, %p37_p1 }
  0x30   : > { %s209_s28 = sand.u32 1, %s4457_s20   ;;  %s4129_s30 = smul.u32 160, %s4461_s21 }
  0x31   : > { %s5219_s23 = scalar_select %p4631_p3, 1, 0 }
  0x32   : > { %s4128_s29 = smul.u32 10, %s209_s28  ;;  %p4641_p11 = pnand %p4162_p7, %p39_p9 }
  0x33   : > { %s4648_s9 = scalar_lea.hbm %s5204_s0, %s4129_s30  ;;  %s210_s12 = scalar_lea.sflag [#allocation5], %s209_s28 }
  0x34   : > { %s213_s10 = scalar_lea.vmem [#allocation4], %s4128_s29  ;;  %s4365_s13 = scalar_lea.hbm %s4648_s9, 160 }
  0x35   : > { %s221_s11 = sshll.u32 %s213_s10, 4  ;;  %p4366_p13 = scmp.ne.s32.totalorder %s4648_s9, %s4365_s13  ;;  %s222_s11 = int_to_ptr.vmem [resolvable:$true] %s221_s11 }
  0x36   : > { %p4367_p0 = pneg %p4641_p11  ;;  %s4370_s17 = scalar_lea.hbm %s5204_s0, 320 }
  0x37   : > { %p4371_p1 = scmp.lt.s32.totalorder %s4648_s9, %s5204_s0  ;;  %p4372_p2 = scmp.lt.s32.totalorder %s4370_s17, %s4365_s13 }
  0x38   : > { %p4368_p5 = pnand %p4367_p0, %p4366_p13 }
  0x39   : > { %p4373_p6 = por %p4372_p2, %p4371_p1 }
  0x3a   : > { %p4369_p10 = pneg %p4368_p5 }
  0x3c   : > { %p4374_p12 = pnand %p4373_p6, %p4369_p10 }
  0x3e   : > { %4377 = shalt.err (!%p4374_p12)
}
  0x3f   : > { %s4378_s29 = scalar_lea.vmem %s222_s11, 160  ;;  %s4467_s28 = smov [#allocation4]  }
  0x40   : > { %p4379_p7 = scmp.ne.s32.totalorder %s222_s11, %s4378_s29  ;;  %s4383_s8 = sshll.u32 %s4467_s28, 4  ;;  %s4384_s8 = int_to_ptr.vmem [resolvable:$false] %s4383_s8 }
  0x41   : > { %s4385_s10 = scalar_lea.vmem %s4384_s8, 320  ;;  %p4386_p13 = scmp.lt.s32.totalorder %s222_s11, %s4384_s8 }
  0x42   : > { %p4381_p9 = pnand %p4379_p7, %p4367_p0  ;;  %p4387_p5 = scmp.lt.s32.totalorder %s4385_s10, %s4378_s29 }
  0x44   : > { %p4382_p3 = pneg %p4381_p9  ;;  %p4388_p4 = por %p4387_p5, %p4386_p13 }
  0x46   : > { %p4389_p8 = pnand %p4388_p4, %p4382_p3 }
  0x48   : > { %4392 = shalt.err (!%p4389_p8)
}
  0x49   : > { %4155 = dma.hbm_to_vmem [thread:$0]  (!%p4641_p11), %s4648_s9, 160, %s222_s11, %s210_s12  }
  0x4a   : > { %p5221_p10 = scmp.ne.s32.totalorder %s5216_s26, 0 }
  0x4b   : > { %s4667_s13 = sand.u32 (!%p5221_p10), 1, %s4453_s19   ;;  %p5222_p0 = scmp.ne.s32.totalorder (!%p5221_p10), %s5214_s24, 0 }
  0x4c   : > { %230 = sbr.rel (%p5221_p10) target bundleno = 1138 (0x472), region = 36  ;;  %s233_s16 = scalar_lea.sflag (!%p5221_p10), [#allocation5], %s4667_s13 }
  0x4d   : > { %s4130_s14 = smul.u32 (!%p5221_p10), 10, %s4667_s13 }
  0x4f   : > { %s4671_s17 = scalar_lea.vmem (!%p5221_p10), [#allocation4], %s4130_s14 }
  0x51   : > { %4436 = dma.done.wait (%p5222_p0), %s233_s16, 160  }
  0x52   : > { %4438 = vsyncadd (%p5222_p0), %s233_s16, 4294967136  ;;  %p5223_p4 = scmp.eq.s32.totalorder %s4570_s22, 0 }
  0x54   : > { %4440 = dma.done.wait (%p5223_p4), [#allocation8], 288   ;;  %p5224_p8 = pmov %p5223_p4 }
  0x55   : > { %v364_v0 = vlaneseq  ;;  %v4468_v1 = vmov 1983009808   ;;  %v4469_v5 = vmov 0   ;;  %v514_v7 = vld [vmem:[%s4671_s17] sm:$0xff]  ;;  %s4470_s24 = smov 122   ;;  %s4471_s26 = smov 123  }
  0x56   : > { %4442 = vsyncadd (%p5224_p8), [#allocation8], 4294967008  ;;  %v362_v2 = vunpack.c.l.s4 %v4468_v1  ;;  %305 = vst [vmem:[#allocation2 + $0x98] sm:$0xc] %v4469_v5  ;;  %722 = vmatprep.mubr.bf16.mxu0 %v4469_v5  ;;  %4252 = vset.pattern.permute.xlu1 %v4469_v5  ;;  %v516_v9 = vcombine.high %v514_v7, %v514_v7  ;;  %v4472_v11 = vmov 0.0   ;;  %s4473_s6 = smov 124  }
  0x57   : > { %v4681_v3 = vshrl.u32 %v364_v0, 7  ;;  %307 = vst [vmem:[#allocation2 + $0xa4] sm:$0xf] %v4469_v5  ;;  %280 = vst [vmem:[#allocation2] sm:$0xcc] %v4469_v5  ;;  %4253 = vset.pattern.permute.xlu0 %v4469_v5  ;;  %3997 = vmatprep.subr.bf16.mxu1 %v4472_v11  ;;  %s4474_s9 = smov 125  }
  0x58   : > { %v363_v4 = vunpack.c.0.s8 %v362_v2  ;;  %281 = vst [vmem:[#allocation2 + $0x8] sm:$0xc] %v4469_v5  ;;  %282 = vst [vmem:[#allocation2 + $0xc] sm:$0xff] %v4469_v5  ;;  %s4475_s11 = smov 126   ;;  %v337_v12 = vld [vmem:[%s4671_s17] sm:$0x3f] }
  0x59   : > { %283 = vst [vmem:[#allocation2 + $0x14] sm:$0xf] %v4469_v5  ;;  %284 = vst [vmem:[#allocation2 + $0x18] sm:$0xcc] %v4469_v5  ;;  %v339_v13 = vcombine.high %v337_v12, %v337_v12  ;;  %s4476_s12 = smov 127   ;;  %s4477_s7 = smov 100  }
  0x5a   : > { %285 = vst [vmem:[#allocation2 + $0x20] sm:$0xc] %v4469_v5  ;;  %287 = vst [vmem:[#allocation2 + $0x2c] sm:$0xf] %v4469_v5  ;;  %v4729_v6 = vsub.s32 %v363_v4, %v4681_v3  ;;  %s4478_s30 = smov 101   ;;  %vm4479_vm0 = vmmov 0  }
  0x5b   : > { %288 = vst [vmem:[#allocation2 + $0x30] sm:$0xcc] %v4469_v5  ;;  %289 = vst [vmem:[#allocation2 + $0x38] sm:$0xc] %v4469_v5  ;;  %4011 = vmatprep.mubr.msk.bf16.mxu1 %vm4479_vm0, %v4472_v11  ;;  %s4480_s29 = smov 102   ;;  %s4481_s28 = smov 103  }
  0x5c   : > { %291 = vst [vmem:[#allocation2 + $0x44] sm:$0xf] %v4469_v5  ;;  %292 = vst [vmem:[#allocation2 + $0x48] sm:$0xcc] %v4469_v5  ;;  %v4734_v8 = vrot.slane %v514_v7, %v4729_v6  ;;  %v4741_v10 = vrot.slane %v516_v9, %v4729_v6  ;;  %s4482_s8 = smov 104   ;;  %s4483_s10 = smov 105  }
  0x5d   : > { %293 = vst [vmem:[#allocation2 + $0x50] sm:$0xc] %v4469_v5  ;;  %295 = vst [vmem:[#allocation2 + $0x5c] sm:$0xf] %v4469_v5  ;;  %s4484_s14 = smov 106   ;;  %s4485_s16 = smov 78  }
  0x5e   : > { %296 = vst [vmem:[#allocation2 + $0x60] sm:$0xcc] %v4469_v5  ;;  %297 = vst [vmem:[#allocation2 + $0x68] sm:$0xc] %v4469_v5  ;;  %531 = vrot.lane.b32.xlu0 %v4734_v8, %s4470_s24  ;;  %500 = vrot.lane.b32.xlu1 %v4734_v8, %s4471_s26  ;;  %vm381_vm1 = vcmask 1043456   ;;  %vm538_vm2 = vcmask 998400  }
  0x5f   : > { %299 = vst [vmem:[#allocation2 + $0x74] sm:$0xf] %v4469_v5  ;;  %300 = vst [vmem:[#allocation2 + $0x78] sm:$0xcc] %v4469_v5  ;;  %vm507_vm3 = vcmask 1006592   ;;  %vm476_vm4 = vcmask 1014784  }
  0x60   : > { %301 = vst [vmem:[#allocation2 + $0x80] sm:$0xc] %v4469_v5  ;;  %303 = vst [vmem:[#allocation2 + $0x8c] sm:$0xf] %v4469_v5  ;;  %vm445_vm5 = vcmask 1022976   ;;  %vm414_vm6 = vcmask 1031168  }
  0x61   : > { %304 = vst [vmem:[#allocation2 + $0x90] sm:$0xcc] %v4469_v5  ;;  %309 = vst [vmem:[#allocation2 + $0xa8] sm:$0xcc] %v4469_v5  ;;  %vm383_vm7 = vcmask 1039360   ;;  %vm987_vm8 = vcmask 818176  }
  0x62   : > { %310 = vst [vmem:[#allocation2 + $0xb0] sm:$0xc] %v4469_v5  ;;  %312 = vst [vmem:[#allocation2 + $0xbc] sm:$0xf] %v4469_v5  ;;  %533 = vrot.lane.b32.xlu0 %v4741_v10, %s4470_s24  ;;  %502 = vrot.lane.b32.xlu1 %v4741_v10, %s4471_s26  ;;  %vm956_vm9 = vcmask 826368   ;;  %vm925_vm10 = vcmask 834560  }
  0x63   : > { %313 = vst [vmem:[#allocation2 + $0xc0] sm:$0xcc] %v4469_v5  ;;  %314 = vst [vmem:[#allocation2 + $0xc8] sm:$0xc] %v4469_v5  ;;  %vm894_vm11 = vcmask 842752   ;;  %vm863_vm12 = vcmask 850944  }
  0x64   : > { %316 = vst [vmem:[#allocation2 + $0xd4] sm:$0xf] %v4469_v5  ;;  %317 = vst [vmem:[#allocation2 + $0xd8] sm:$0xcc] %v4469_v5  ;;  %vm686_vm13 = vcmask 916480   ;;  %vm832_vm14 = vcmask 859136  }
  0x65   : > { %318 = vst [vmem:[#allocation2 + $0xe0] sm:$0xc] %v4469_v5  ;;  %320 = vst [vmem:[#allocation2 + $0xec] sm:$0xf] %v4469_v5  ;;  %vm801_vm15 = vcmask 867328   ;;  %p275_p3 = scmp.lt.s32.totalorder %s4570_s22, 1 }
  0x66   : > { %321 = vst [vmem:[#allocation2 + $0xf0] sm:$0xcc] %v4469_v5  ;;  %322 = vst [vmem:[#allocation2 + $0xf8] sm:$0xc] %v4469_v5  ;;  %469 = vrot.lane.b32.xlu0 %v4734_v8, %s4473_s6  ;;  %471 = vrot.lane.b32.xlu1 %v4741_v10, %s4473_s6  ;;  %p5225_p1 = scmp.ne.s32.totalorder %s5219_s23, 0 }
  0x67   : > { %324 = vst [vmem:[#allocation2 + $0x104] sm:$0xf] %v4469_v5  ;;  %325 = vst [vmem:[#allocation2 + $0x108] sm:$0xcc] %v4469_v5 }
  0x68   : > { %326 = vst [vmem:[#allocation2 + $0x110] sm:$0xc] %v4469_v5  ;;  %328 = vst [vmem:[#allocation2 + $0x11c] sm:$0xf] %v4469_v5 }
  0x69   : > { %329 = vst [vmem:[#allocation2 + $0x120] sm:$0xcc] %v4469_v5  ;;  %330 = vst [vmem:[#allocation2 + $0x128] sm:$0xc] %v4469_v5 }
  0x6a   : > { %332 = vst [vmem:[#allocation2 + $0x134] sm:$0xf] %v4469_v5  ;;  %333 = vst [vmem:[#allocation2 + $0x138] sm:$0xcc] %v4469_v5  ;;  %438 = vrot.lane.b32.xlu0 %v4734_v8, %s4474_s9  ;;  %440 = vrot.lane.b32.xlu1 %v4741_v10, %s4474_s9  ;;  %s4486_s9 = smov 79  }
  0x6b   : > { %334 = vst [vmem:[#allocation2 + $0x140] sm:$0xc] %v4469_v5  ;;  %336 = vst [vmem:[#allocation2 + $0x14c] sm:$0xf] %v4469_v5 }
  0x6c   : > { %3771 = vst.sshfl [vmem:[#allocation2] sm:$0xf pattern:$0x76325410] %v337_v12 }
  0x6d   : > { %3772 = vst.sshfl [vmem:[#allocation2 + $0x8] sm:$0x3 pattern:$0x76325410] %v339_v13 }
  0x6e   : > { %407 = vrot.lane.b32.xlu0 %v4734_v8, %s4475_s11  ;;  %409 = vrot.lane.b32.xlu1 %v4741_v10, %s4475_s11  ;;  %s4487_s11 = smov 80  }
  0x72   : > { %375 = vrot.lane.b32.xlu0 %v4734_v8, %s4476_s12  ;;  %377 = vrot.lane.b32.xlu1 %v4741_v10, %s4476_s12  ;;  %s4488_s12 = smov 81  }
  0x76   : > { %980 = vrot.lane.b32.xlu0 %v4734_v8, %s4477_s7  ;;  %982 = vrot.lane.b32.xlu1 %v4741_v10, %s4477_s7  ;;  %s4489_s7 = smov 82  }
  0x7a   : > { %949 = vrot.lane.b32.xlu0 %v4734_v8, %s4478_s30  ;;  %951 = vrot.lane.b32.xlu1 %v4741_v10, %s4478_s30  ;;  %s4490_s30 = smov 83  }
  0x7e   : > { %918 = vrot.lane.b32.xlu0 %v4734_v8, %s4480_s29  ;;  %920 = vrot.lane.b32.xlu1 %v4741_v10, %s4480_s29  ;;  %s4491_s29 = smov 84  }
  0x82   : > { %887 = vrot.lane.b32.xlu0 %v4734_v8, %s4481_s28  ;;  %889 = vrot.lane.b32.xlu1 %v4741_v10, %s4481_s28  ;;  %s4492_s28 = smov 56  }
  0x86   : > { %856 = vrot.lane.b32.xlu0 %v4734_v8, %s4482_s8  ;;  %858 = vrot.lane.b32.xlu1 %v4741_v10, %s4482_s8  ;;  %s4493_s8 = smov 57  }
  0x8a   : > { %825 = vrot.lane.b32.xlu0 %v4734_v8, %s4483_s10  ;;  %827 = vrot.lane.b32.xlu1 %v4741_v10, %s4483_s10  ;;  %s4494_s10 = smov 58  }
  0x8e   : > { %794 = vrot.lane.b32.xlu0 %v4734_v8, %s4484_s14  ;;  %796 = vrot.lane.b32.xlu1 %v4741_v10, %s4484_s14  ;;  %s4495_s14 = smov 59  }
  0x92   : > { %1433 = vrot.lane.b32.xlu0 %v4734_v8, %s4485_s16  ;;  %1435 = vrot.lane.b32.xlu1 %v4741_v10, %s4485_s16  ;;  %s4496_s16 = smov 60  }
  0x96   : > { %1402 = vrot.lane.b32.xlu0 %v4734_v8, %s4486_s9  ;;  %1404 = vrot.lane.b32.xlu1 %v4741_v10, %s4486_s9  ;;  %s4497_s9 = smov 61  }
  0x9a   : > { %1371 = vrot.lane.b32.xlu0 %v4734_v8, %s4487_s11  ;;  %1373 = vrot.lane.b32.xlu1 %v4741_v10, %s4487_s11  ;;  %s4498_s11 = smov 62  }
  0x9e   : > { %1340 = vrot.lane.b32.xlu0 %v4734_v8, %s4488_s12  ;;  %1342 = vrot.lane.b32.xlu1 %v4741_v10, %s4488_s12  ;;  %s4499_s12 = smov 34  }
  0xa2   : > { %1309 = vrot.lane.b32.xlu0 %v4734_v8, %s4489_s7  ;;  %1311 = vrot.lane.b32.xlu1 %v4741_v10, %s4489_s7  ;;  %s4500_s7 = smov 35  }
  0xa6   : > { %1278 = vrot.lane.b32.xlu0 %v4734_v8, %s4490_s30  ;;  %1280 = vrot.lane.b32.xlu1 %v4741_v10, %s4490_s30  ;;  %s4501_s30 = smov 36  }
  0xaa   : > { %1247 = vrot.lane.b32.xlu0 %v4734_v8, %s4491_s29  ;;  %1249 = vrot.lane.b32.xlu1 %v4741_v10, %s4491_s29  ;;  %s4502_s29 = smov 37  }
  0xae   : > { %1886 = vrot.lane.b32.xlu0 %v4734_v8, %s4492_s28  ;;  %1888 = vrot.lane.b32.xlu1 %v4741_v10, %s4492_s28  ;;  %s4503_s28 = smov 38  }
  0xb2   : > { %1855 = vrot.lane.b32.xlu0 %v4734_v8, %s4493_s8  ;;  %1857 = vrot.lane.b32.xlu1 %v4741_v10, %s4493_s8  ;;  %s4504_s8 = smov 39  }
  0xb6   : > { %1824 = vrot.lane.b32.xlu0 %v4734_v8, %s4494_s10  ;;  %1826 = vrot.lane.b32.xlu1 %v4741_v10, %s4494_s10  ;;  %s4505_s10 = smov 40  }
  0xba   : > { %1793 = vrot.lane.b32.xlu0 %v4734_v8, %s4495_s14  ;;  %1795 = vrot.lane.b32.xlu1 %v4741_v10, %s4495_s14  ;;  %s4506_s14 = smov 12  }
  0xbe   : > { %1762 = vrot.lane.b32.xlu0 %v4734_v8, %s4496_s16  ;;  %1764 = vrot.lane.b32.xlu1 %v4741_v10, %s4496_s16  ;;  %s4507_s16 = smov 13  }
  0xc2   : > { %1731 = vrot.lane.b32.xlu0 %v4734_v8, %s4497_s9  ;;  %1733 = vrot.lane.b32.xlu1 %v4741_v10, %s4497_s9  ;;  %s4508_s9 = smov 14  }
  0xc6   : > { %1700 = vrot.lane.b32.xlu0 %v4734_v8, %s4498_s11  ;;  %1702 = vrot.lane.b32.xlu1 %v4741_v10, %s4498_s11  ;;  %s4509_s11 = smov 15  }
  0xca   : > { %2339 = vrot.lane.b32.xlu0 %v4734_v8, %s4499_s12  ;;  %2341 = vrot.lane.b32.xlu1 %v4741_v10, %s4499_s12  ;;  %s4510_s12 = smov 16  }
  0xce   : > { %2308 = vrot.lane.b32.xlu0 %v4734_v8, %s4500_s7  ;;  %2310 = vrot.lane.b32.xlu1 %v4741_v10, %s4500_s7  ;;  %s4511_s7 = smov 17  }
  0xd0   : > { %v532_v14 = vpop.permute.xlu0 %531  ;;  %v501_v15 = vpop.permute.xlu1 %500 }
  0xd1   : > { %v504_v16 = vrot.slane %v501_v15, 4  ;;  %v535_v19 = vrot.slane %v532_v14, 4 }
  0xd2   : > { %2277 = vrot.lane.b32.xlu0 %v4734_v8, %s4501_s30  ;;  %2279 = vrot.lane.b32.xlu1 %v4741_v10, %s4501_s30  ;;  %s4513_s30 = smov 118  }
  0xd4   : > { %v534_v17 = vpop.permute.xlu0 %533  ;;  %v503_v18 = vpop.permute.xlu1 %502 }
  0xd5   : > { %v536_v20 = vrot.slane %v534_v17, 4  ;;  %v505_v21 = vrot.slane %v503_v18, 4 }
  0xd6   : > { %2246 = vrot.lane.b32.xlu0 %v4734_v8, %s4502_s29  ;;  %2248 = vrot.lane.b32.xlu1 %v4741_v10, %s4502_s29  ;;  %s4514_s29 = smov 119  }
  0xd7   : > { %v537_v22 = vsel %vm381_vm1, %v535_v19, %v536_v20  ;;  %v540_v23 = vsel %vm538_vm2, %v534_v17, %v536_v20  ;;  %v506_v24 = vsel %vm381_vm1, %v504_v16, %v505_v21  ;;  %v509_v25 = vsel %vm507_vm3, %v503_v18, %v505_v21 }
  0xd8   : > { %v539_v26 = vsel %vm538_vm2, %v532_v14, %v537_v22  ;;  %544 = vst [vmem:[#allocation2 + $0x98] sm:$0x3] %v540_v23  ;;  %v508_v27 = vsel %vm507_vm3, %v501_v15, %v506_v24  ;;  %513 = vst [vmem:[#allocation2 + $0x80] sm:$0x3] %v509_v25  ;;  %v470_v28 = vpop.permute.xlu0 %469  ;;  %v472_v29 = vpop.permute.xlu1 %471 }
  0xd9   : > { %543 = vst [vmem:[#allocation2 + $0x90] sm:$0x33] %v539_v26  ;;  %512 = vst [vmem:[#allocation2 + $0x78] sm:$0x33] %v508_v27  ;;  %v473_v30 = vrot.slane %v470_v28, 4  ;;  %v474_v31 = vrot.slane %v472_v29, 4 }
  0xda   : > { %2215 = vrot.lane.b32.xlu0 %v4734_v8, %s4503_s28  ;;  %2217 = vrot.lane.b32.xlu1 %v4741_v10, %s4503_s28  ;;  %s4515_s28 = smov 120  }
  0xdb   : > { %v475_v32 = vsel %vm381_vm1, %v473_v30, %v474_v31  ;;  %v478_v33 = vsel %vm476_vm4, %v472_v29, %v474_v31 }
  0xdc   : > { %v477_v34 = vsel %vm476_vm4, %v470_v28, %v475_v32  ;;  %482 = vst [vmem:[#allocation2 + $0x68] sm:$0x3] %v478_v33  ;;  %v439_v35 = vpop.permute.xlu0 %438  ;;  %v441_v36 = vpop.permute.xlu1 %440 }
  0xdd   : > { %481 = vst [vmem:[#allocation2 + $0x60] sm:$0x33] %v477_v34  ;;  %v442_v37 = vrot.slane %v439_v35, 4  ;;  %v443_v38 = vrot.slane %v441_v36, 4  ;;  %v2620_v34 = vld [vmem:[%s4671_s17] sm:$0xff] }
  0xde   : > { %2184 = vrot.lane.b32.xlu0 %v4734_v8, %s4504_s8  ;;  %2186 = vrot.lane.b32.xlu1 %v4741_v10, %s4504_s8  ;;  %s4516_s8 = smov 121  }
  0xdf   : > { %v444_v39 = vsel %vm381_vm1, %v442_v37, %v443_v38  ;;  %v447_v40 = vsel %vm445_vm5, %v441_v36, %v443_v38  ;;  %v4255_v41 = vld [vmem:[#allocation2 + $0x98] ss:$12 sps:$4 sm:$0xff]   ;;  %v4256_v54 = vld [vmem:[#allocation2 + $0x80] ss:$12 sps:$4 sm:$0xff]  }
  0xe0   : > { %v446_v42 = vsel %vm445_vm5, %v439_v35, %v444_v39  ;;  %451 = vst [vmem:[#allocation2 + $0x50] sm:$0x3] %v447_v40  ;;  %v408_v43 = vpop.permute.xlu0 %407  ;;  %v410_v44 = vpop.permute.xlu1 %409  ;;  %v570_v45 = vld [vmem:[#allocation2 + $0x90] sm:$0xff]  ;;  %v566_v46 = vld [vmem:[#allocation2 + $0x78] sm:$0xff]  ;;  %3998 = vmatpush3.bf16.msra.mxu1 %v4255_v41  ;;  %v546_v39 = vld [vmem:[#allocation2] sm:$0xff]  ;;  %vm1440_vm5 = vcmask 637952  }
  0xe1   : > { %450 = vst [vmem:[#allocation2 + $0x48] sm:$0x33] %v446_v42  ;;  %v411_v47 = vrot.slane %v408_v43, 4  ;;  %v412_v48 = vrot.slane %v410_v44, 4  ;;  %v3792_v49 = vcombine.high %v570_v45, %v4469_v5  ;;  %v3791_v50 = vcombine.low %v570_v45, %v4469_v5  ;;  %3999 = vmatprep.subr.bf16.mxu1 %v4472_v11 }
  0xe2   : > { %2153 = vrot.lane.b32.xlu0 %v4734_v8, %s4505_s10  ;;  %v3789_v53 = vcombine.high %v566_v46, %v4469_v5  ;;  %2155 = vrot.lane.b32.xlu1 %v4741_v10, %s4505_s10  ;;  %v3788_v62 = vcombine.low %v566_v46, %v4469_v5 }
  0xe3   : > { %v413_v51 = vsel %vm381_vm1, %v411_v47, %v412_v48  ;;  %v416_v52 = vsel %vm414_vm6, %v410_v44, %v412_v48  ;;  %692 = vmatprep.subr.bf16.mxu0 %v3792_v49  ;;  %v4257_v1 = vld [vmem:[#allocation2 + $0x68] ss:$12 sps:$4 sm:$0xff]  }
  0xe4   : > { %v415_v55 = vsel %vm414_vm6, %v408_v43, %v413_v51  ;;  %420 = vst [vmem:[#allocation2 + $0x38] sm:$0x3] %v416_v52  ;;  %693 = vmatpush1.bf16.msra.mxu0 %v3791_v50  ;;  %v376_v56 = vpop.permute.xlu0 %375  ;;  %v378_v57 = vpop.permute.xlu1 %377  ;;  %v562_v58 = vld [vmem:[#allocation2 + $0x60] sm:$0xff]  ;;  %4000 = vmatpush3.bf16.msra.mxu1 %v4256_v54  ;;  %v2622_v43 = vcombine.high %v2620_v34, %v2620_v34  ;;  %v4262_v49 = vld [vmem:[#allocation2 + $0x8] ss:$12 sps:$4 sm:$0xff]   ;;  %vm1409_vm6 = vcmask 646144  }
  0xe5   : > { %419 = vst [vmem:[#allocation2 + $0x30] sm:$0x33] %v415_v55  ;;  %v379_v59 = vrot.slane %v376_v56, 4  ;;  %v380_v60 = vrot.slane %v378_v57, 4  ;;  %694 = vmatprep.subr.bf16.mxu0 %v3789_v53  ;;  %v3786_v61 = vcombine.high %v562_v58, %v4469_v5  ;;  %4001 = vmatprep.subr.bf16.mxu1 %v4472_v11  ;;  %v3785_v15 = vcombine.low %v562_v58, %v4469_v5 }
  0xe6   : > { %2792 = vrot.lane.b32.xlu0 %v4734_v8, %s4506_s14  ;;  %2794 = vrot.lane.b32.xlu1 %v4741_v10, %s4506_s14  ;;  %v3774_v50 = vcombine.high %v546_v39, %v4469_v5  ;;  %v2629_v53 = vrot.slane %v2620_v34, %v4729_v6  ;;  %v3773_v58 = vcombine.low %v546_v39, %v4469_v5 }
  0xe7   : > { %v382_v63 = vsel %vm381_vm1, %v379_v59, %v380_v60  ;;  %v385_v0 = vsel %vm383_vm7, %v378_v57, %v380_v60  ;;  %v4258_v18 = vld [vmem:[#allocation2 + $0x50] ss:$12 sps:$4 sm:$0xff]  }
  0xe8   : > { %v384_v2 = vsel %vm383_vm7, %v376_v56, %v382_v63  ;;  %389 = vst [vmem:[#allocation2 + $0x20] sm:$0x3] %v385_v0  ;;  %695 = vmatpush1.bf16.msra.mxu0 %v3788_v62  ;;  %v981_v4 = vpop.permute.xlu0 %980  ;;  %v983_v7 = vpop.permute.xlu1 %982  ;;  %v558_v9 = vld [vmem:[#allocation2 + $0x48] sm:$0xff]  ;;  %4002 = vmatpush3.bf16.msra.mxu1 %v4257_v1  ;;  %v2636_v56 = vrot.slane %v2622_v43, %v4729_v6  ;;  %vm1378_vm7 = vcmask 654336  }
  0xe9   : > { %388 = vst [vmem:[#allocation2 + $0x18] sm:$0x33] %v384_v2  ;;  %696 = vmatprep.subr.bf16.mxu0 %v3786_v61  ;;  %v984_v12 = vrot.slane %v981_v4, 4  ;;  %v985_v13 = vrot.slane %v983_v7, 4  ;;  %v3783_v14 = vcombine.high %v558_v9, %v4469_v5  ;;  %4003 = vmatprep.subr.bf16.mxu1 %v4472_v11  ;;  %v3782_v26 = vcombine.low %v558_v9, %v4469_v5  ;;  %v3225_v60 = vld [vmem:[%s4671_s17 + $0x2] sm:$0xff]  ;;  %s4512_s17 = smov 18  }
  0xea   : > { %2761 = vrot.lane.b32.xlu0 %v4734_v8, %s4507_s16  ;;  %2763 = vrot.lane.b32.xlu1 %v4741_v10, %s4507_s16 }
  0xeb   : > { %v986_v16 = vsel %vm381_vm1, %v984_v12, %v985_v13  ;;  %v989_v17 = vsel %vm987_vm8, %v983_v7, %v985_v13  ;;  %v4259_v29 = vld [vmem:[#allocation2 + $0x38] ss:$12 sps:$4 sm:$0xff]   ;;  %v3227_v7 = vcombine.high %v3225_v60, %v3225_v60 }
  0xec   : > { %697 = vmatpush1.bf16.msra.mxu0 %v3785_v15  ;;  %v988_v19 = vsel %vm987_vm8, %v981_v4, %v986_v16  ;;  %993 = vst [vmem:[#allocation2 + $0x140] sm:$0x3] %v989_v17  ;;  %v950_v20 = vpop.permute.xlu0 %949  ;;  %v952_v21 = vpop.permute.xlu1 %951  ;;  %v554_v22 = vld [vmem:[#allocation2 + $0x30] sm:$0xff]  ;;  %4004 = vmatpush3.bf16.msra.mxu1 %v4258_v18  ;;  %vm1347_vm8 = vcmask 662528  }
  0xed   : > { %992 = vst [vmem:[#allocation2 + $0x138] sm:$0x33] %v988_v19  ;;  %698 = vmatprep.subr.bf16.mxu0 %v3783_v14  ;;  %v953_v23 = vrot.slane %v950_v20, 4  ;;  %v954_v24 = vrot.slane %v952_v21, 4  ;;  %v3780_v25 = vcombine.high %v554_v22, %v4469_v5  ;;  %4005 = vmatprep.subr.bf16.mxu1 %v4472_v11  ;;  %v3779_v38 = vcombine.low %v554_v22, %v4469_v5 }
  0xee   : > { %2730 = vrot.lane.b32.xlu0 %v4734_v8, %s4508_s9  ;;  %2732 = vrot.lane.b32.xlu1 %v4741_v10, %s4508_s9  ;;  %v4889_v19 = vrot.slane %v3225_v60, %v4729_v6 }
  0xef   : > { %v955_v27 = vsel %vm381_vm1, %v953_v23, %v954_v24  ;;  %v958_v28 = vsel %vm956_vm9, %v952_v21, %v954_v24  ;;  %v4260_v42 = vld [vmem:[#allocation2 + $0x20] ss:$12 sps:$4 sm:$0xff]   ;;  %v4895_v23 = vrot.slane %v3227_v7, %v4729_v6 }
  0xf0   : > { %699 = vmatpush1.bf16.msra.mxu0 %v3782_v26  ;;  %v957_v30 = vsel %vm956_vm9, %v950_v20, %v955_v27  ;;  %962 = vst [vmem:[#allocation2 + $0x128] sm:$0x3] %v958_v28  ;;  %v919_v31 = vpop.permute.xlu0 %918  ;;  %v921_v32 = vpop.permute.xlu1 %920  ;;  %v550_v33 = vld [vmem:[#allocation2 + $0x18] sm:$0xff]  ;;  %4006 = vmatpush3.bf16.msra.mxu1 %v4259_v29  ;;  %vm1316_vm9 = vcmask 670720  }
  0xf1   : > { %961 = vst [vmem:[#allocation2 + $0x120] sm:$0x33] %v957_v30  ;;  %700 = vmatprep.subr.bf16.mxu0 %v3780_v25  ;;  %v922_v35 = vrot.slane %v919_v31, 4  ;;  %v923_v36 = vrot.slane %v921_v32, 4  ;;  %v3777_v37 = vcombine.high %v550_v33, %v4469_v5  ;;  %4007 = vmatprep.subr.bf16.mxu1 %v4472_v11  ;;  %v3776_v51 = vcombine.low %v550_v33, %v4469_v5 }
  0xf2   : > { %2699 = vrot.lane.b32.xlu0 %v4734_v8, %s4509_s11  ;;  %2701 = vrot.lane.b32.xlu1 %v4741_v10, %s4509_s11  ;;  %s4131_s11 = smul.u32 12, %s4667_s13 }
  0xf3   : > { %v924_v40 = vsel %vm381_vm1, %v922_v35, %v923_v36  ;;  %v927_v41 = vsel %vm925_vm10, %v921_v32, %v923_v36  ;;  %v4263_v4 = vld [vmem:[#allocation2 + $0x140] ss:$12 sps:$4 sm:$0xff]  }
  0xf4   : > { %701 = vmatpush1.bf16.msra.mxu0 %v3779_v38  ;;  %v926_v44 = vsel %vm925_vm10, %v919_v31, %v924_v40  ;;  %931 = vst [vmem:[#allocation2 + $0x110] sm:$0x3] %v927_v41  ;;  %v888_v45 = vpop.permute.xlu0 %887  ;;  %v890_v46 = vpop.permute.xlu1 %889  ;;  %4008 = vmatpush3.bf16.msra.mxu1 %v4260_v42  ;;  %v1020_v52 = vld [vmem:[#allocation2 + $0x138] sm:$0xff]  ;;  %vm1285_vm10 = vcmask 678912  }
  0xf5   : > { %930 = vst [vmem:[#allocation2 + $0x108] sm:$0x33] %v926_v44  ;;  %702 = vmatprep.subr.bf16.mxu0 %v3777_v37  ;;  %v891_v47 = vrot.slane %v888_v45, 4  ;;  %v892_v48 = vrot.slane %v890_v46, 4  ;;  %4009 = vmatprep.subr.bf16.mxu1 %v4472_v11  ;;  %v3815_v63 = vcombine.high %v1020_v52, %v4469_v5  ;;  %v3814_v17 = vcombine.low %v1020_v52, %v4469_v5 }
  0xf6   : > { %2668 = vrot.lane.b32.xlu0 %v4734_v8, %s4510_s12  ;;  %2670 = vrot.lane.b32.xlu1 %v4741_v10, %s4510_s12  ;;  %v545_v10 = vld [vmem:[#allocation7] sm:$0x3]  ;;  %s4132_s12 = smul.u32 192, %s4570_s22 }
  0xf7   : > { %v893_v54 = vsel %vm381_vm1, %v891_v47, %v892_v48  ;;  %v896_v55 = vsel %vm894_vm11, %v890_v46, %v892_v48  ;;  %v4265_v22 = vld [vmem:[#allocation2 + $0x128] ss:$12 sps:$4 sm:$0xff]  }
  0xf8   : > { %703 = vmatpush1.bf16.msra.mxu0 %v3776_v51  ;;  %v895_v57 = vsel %vm894_vm11, %v888_v45, %v893_v54  ;;  %900 = vst [vmem:[#allocation2 + $0xf8] sm:$0x3] %v896_v55  ;;  %v857_v59 = vpop.permute.xlu0 %856  ;;  %v859_v8 = vpop.permute.xlu1 %858  ;;  %4010 = vmatpush3.bf16.msra.mxu1 %v4262_v49  ;;  %v1016_v0 = vld [vmem:[#allocation2 + $0x120] sm:$0xff]  ;;  %vm1254_vm11 = vcmask 687104  }
  0xf9   : > { %899 = vst [vmem:[#allocation2 + $0xf0] sm:$0x33] %v895_v57  ;;  %704 = vmatprep.subr.bf16.mxu0 %v3774_v50  ;;  %v860_v61 = vrot.slane %v857_v59, 4  ;;  %v861_v62 = vrot.slane %v859_v8, 4  ;;  %4015 = vmatprep.subr.bf16.mxu1 %v4472_v11  ;;  %v3812_v16 = vcombine.high %v1016_v0, %v4469_v5  ;;  %v3811_v6 = vcombine.low %v1016_v0, %v4469_v5 }
  0xfa   : > { %2637 = vrot.lane.b32.xlu0 %v2629_v53, %s4511_s7  ;;  %2639 = vrot.lane.b32.xlu1 %v2636_v56, %s4511_s7  ;;  %s268_s7 = scalar_lea.vmem [#allocation10], %s4131_s11 }
  0xfb   : > { %v862_v1 = vsel %vm381_vm1, %v860_v61, %v861_v62  ;;  %v865_v2 = vsel %vm863_vm12, %v859_v8, %v861_v62  ;;  %4012 = vmatmul.mubr.msk.bf16.vlgmr.msra.gmra.mxu1 %vm686_vm13, %v545_v10  ;;  %v4266_v33 = vld [vmem:[#allocation2 + $0x110] ss:$12 sps:$4 sm:$0xff]  }
  0xfc   : > { %705 = vmatpush1.bf16.msra.mxu0 %v3773_v58  ;;  %v864_v9 = vsel %vm863_vm12, %v857_v59, %v862_v1  ;;  %869 = vst [vmem:[#allocation2 + $0xe0] sm:$0x3] %v865_v2  ;;  %v826_v12 = vpop.permute.xlu0 %825  ;;  %v828_v13 = vpop.permute.xlu1 %827  ;;  %4016 = vmatpush3.bf16.msra.mxu1 %v4263_v4  ;;  %v1012_v18 = vld [vmem:[#allocation2 + $0x108] sm:$0xff]  ;;  %vm1893_vm12 = vcmask 457728  }
  0xfd   : > { %868 = vst [vmem:[#allocation2 + $0xd8] sm:$0x33] %v864_v9  ;;  %1141 = vmatprep.subr.bf16.mxu0 %v3815_v63  ;;  %v829_v14 = vrot.slane %v826_v12, 4  ;;  %v830_v15 = vrot.slane %v828_v13, 4  ;;  %4017 = vmatprep.subr.bf16.mxu1 %v4472_v11  ;;  %v3809_v29 = vcombine.high %v1012_v18, %v4469_v5  ;;  %v3808_v40 = vcombine.low %v1012_v18, %v4469_v5  ;;  %v4925_v8 = vld [vmem:[#allocation2 + $0xc] sm:$0xff] }
  0xfe   : > { %2606 = vrot.lane.b32.xlu0 %v2629_v53, %s4512_s17  ;;  %2608 = vrot.lane.b32.xlu1 %v2636_v56, %s4512_s17  ;;  %s3645_s17 = sshll.u32 %s268_s7, 4  ;;  %s3646_s17 = int_to_ptr.vmem [resolvable:$true] %s3645_s17 }
  0xff   : > { %3794 = vmatmul.mubr.msk.bf16.vlgmr.msra.gmra.mxu0 %vm686_vm13, %v545_v10  ;;  %v831_v20 = vsel %vm381_vm1, %v829_v14, %v830_v15  ;;  %v834_v21 = vsel %vm832_vm14, %v828_v13, %v830_v15  ;;  %4029 = vmatprep.mubr.msk.bf16.mxu1 %vm4479_vm0, %v4472_v11  ;;  %v4268_v44 = vld [vmem:[#allocation2 + $0xf8] ss:$12 sps:$4 sm:$0xff]  }
 0x100   : > { %1142 = vmatpush1.bf16.msra.mxu0 %v3814_v17  ;;  %v833_v24 = vsel %vm832_vm14, %v826_v12, %v831_v20  ;;  %838 = vst [vmem:[#allocation2 + $0xc8] sm:$0x3] %v834_v21  ;;  %v795_v25 = vpop.permute.xlu0 %794  ;;  %v797_v26 = vpop.permute.xlu1 %796  ;;  %4018 = vmatpush3.bf16.msra.mxu1 %v4265_v22  ;;  %v1008_v30 = vld [vmem:[#allocation2 + $0xf0] sm:$0xff]  ;;  %vm1862_vm14 = vcmask 465920  }
 0x101   : > { %837 = vst [vmem:[#allocation2 + $0xc0] sm:$0x33] %v833_v24  ;;  %1143 = vmatprep.subr.bf16.mxu0 %v3812_v16  ;;  %v798_v27 = vrot.slane %v795_v25, 4  ;;  %v799_v28 = vrot.slane %v797_v26, 4  ;;  %4019 = vmatprep.subr.bf16.mxu1 %v4472_v11  ;;  %v3806_v39 = vcombine.high %v1008_v30, %v4469_v5  ;;  %v3805_v51 = vcombine.low %v1008_v30, %v4469_v5 }
 0x102   : > { %3242 = vrot.lane.b32.xlu0 %v4889_v19, %s4513_s30  ;;  %3244 = vrot.lane.b32.xlu1 %v4895_v23, %s4513_s30 }
 0x103   : > { %v800_v31 = vsel %vm381_vm1, %v798_v27, %v799_v28  ;;  %v803_v32 = vsel %vm801_vm15, %v797_v26, %v799_v28  ;;  %1171 = vmatprep.mubr.bf16.mxu0 %v4469_v5  ;;  %v4269_v55 = vld [vmem:[#allocation2 + $0xe0] ss:$12 sps:$4 sm:$0xff]  }
 0x104   : > { %1144 = vmatpush1.bf16.msra.mxu0 %v3811_v6  ;;  %v802_v34 = vsel %vm801_vm15, %v795_v25, %v800_v31  ;;  %807 = vst [vmem:[#allocation2 + $0xb0] sm:$0x3] %v803_v32  ;;  %v1434_v35 = vpop.permute.xlu0 %1433  ;;  %v1436_v36 = vpop.permute.xlu1 %1435  ;;  %4020 = vmatpush3.bf16.msra.mxu1 %v4266_v33  ;;  %v1004_v41 = vld [vmem:[#allocation2 + $0xd8] sm:$0xff]  ;;  %v995_v25 = vld [vmem:[#allocation7 + $0x2] sm:$0x3]  ;;  %vm1831_vm15 = vcmask 474112  }
 0x105   : > { %806 = vst [vmem:[#allocation2 + $0xa8] sm:$0x33] %v802_v34  ;;  %1145 = vmatprep.subr.bf16.mxu0 %v3809_v29  ;;  %v1437_v37 = vrot.slane %v1434_v35, 4  ;;  %v1438_v38 = vrot.slane %v1436_v36, 4  ;;  %4021 = vmatprep.subr.bf16.mxu1 %v4472_v11  ;;  %v3803_v50 = vcombine.high %v1004_v41, %v4469_v5  ;;  %v3802_v61 = vcombine.low %v1004_v41, %v4925_v8 }
 0x106   : > { %3211 = vrot.lane.b32.xlu0 %v4889_v19, %s4514_s29  ;;  %3213 = vrot.lane.b32.xlu1 %v4895_v23, %s4514_s29 }
 0x107   : > { %v1439_v42 = vsel %vm381_vm1, %v1437_v37, %v1438_v38  ;;  %v1442_v43 = vsel %vm1440_vm5, %v1436_v36, %v1438_v38  ;;  %v4270_v0 = vld [vmem:[#allocation2 + $0xc8] ss:$12 sps:$4 sm:$0xff]  }
 0x108   : > { %1146 = vmatpush1.bf16.msra.mxu0 %v3808_v40  ;;  %v1441_v45 = vsel %vm1440_vm5, %v1434_v35, %v1439_v42  ;;  %1446 = vst [vmem:[#allocation2 + $0x98] sm:$0x3] %v1442_v43  ;;  %v1403_v46 = vpop.permute.xlu0 %1402  ;;  %v1405_v47 = vpop.permute.xlu1 %1404  ;;  %4022 = vmatpush3.bf16.msra.mxu1 %v4268_v44  ;;  %v1000_v52 = vld [vmem:[#allocation2 + $0xc0] sm:$0xff]  ;;  %vm1800_vm5 = vcmask 482304  }
 0x109   : > { %1445 = vst [vmem:[#allocation2 + $0x90] sm:$0x33] %v1441_v45  ;;  %1147 = vmatprep.subr.bf16.mxu0 %v3806_v39  ;;  %v1406_v48 = vrot.slane %v1403_v46, 4  ;;  %v1407_v49 = vrot.slane %v1405_v47, 4  ;;  %4023 = vmatprep.subr.bf16.mxu1 %v4472_v11  ;;  %v3800_v60 = vcombine.high %v1000_v52, %v4925_v8  ;;  %v3799_v13 = vcombine.low %v1000_v52, %v4925_v8 }
 0x10a   : > { %3180 = vrot.lane.b32.xlu0 %v4889_v19, %s4515_s28  ;;  %3182 = vrot.lane.b32.xlu1 %v4895_v23, %s4515_s28  ;;  %s5167_s28 = scalar_lea.hbm %s5208_s4, %s4132_s12 }
 0x10b   : > { %v1408_v53 = vsel %vm381_vm1, %v1406_v48, %v1407_v49  ;;  %v1411_v54 = vsel %vm1409_vm6, %v1405_v47, %v1407_v49  ;;  %v4271_v17 = vld [vmem:[#allocation2 + $0xb0] ss:$12 sps:$4 sm:$0xff]  }
 0x10c   : > { %1148 = vmatpush1.bf16.msra.mxu0 %v3805_v51  ;;  %v1410_v56 = vsel %vm1409_vm6, %v1403_v46, %v1408_v53  ;;  %1415 = vst [vmem:[#allocation2 + $0x80] sm:$0x3] %v1411_v54  ;;  %v1372_v57 = vpop.permute.xlu0 %1371  ;;  %v1374_v5 = vpop.permute.xlu1 %1373  ;;  %4024 = vmatpush3.bf16.msra.mxu1 %v4269_v55  ;;  %v996_v62 = vld [vmem:[#allocation2 + $0xa8] sm:$0xff]  ;;  %vm1769_vm6 = vcmask 490496  }
 0x10d   : > { %1414 = vst [vmem:[#allocation2 + $0x78] sm:$0x33] %v1410_v56  ;;  %1149 = vmatprep.subr.bf16.mxu0 %v3803_v50  ;;  %v1375_v58 = vrot.slane %v1372_v57, 4  ;;  %v1376_v59 = vrot.slane %v1374_v5, 4  ;;  %4025 = vmatprep.subr.bf16.mxu1 %v4472_v11  ;;  %v3797_v12 = vcombine.high %v996_v62, %v4925_v8  ;;  %v3796_v27 = vcombine.low %v996_v62, %v4925_v8 }
 0x10e   : > { %3149 = vrot.lane.b32.xlu0 %v4889_v19, %s4516_s8  ;;  %3151 = vrot.lane.b32.xlu1 %v4895_v23, %s4516_s8  ;;  %s3627_s8 = scalar_lea.sflag [#allocation6], %s4667_s13 }
 0x10f   : > { %v1377_v63 = vsel %vm381_vm1, %v1375_v58, %v1376_v59  ;;  %v1380_v10 = vsel %vm1378_vm7, %v1374_v5, %v1376_v59  ;;  %v4272_v30 = vld [vmem:[#allocation2 + $0x98] ss:$12 sps:$4 sm:$0xff]  }
 0x110   : > { %1150 = vmatpush1.bf16.msra.mxu0 %v3802_v61  ;;  %v1379_v1 = vsel %vm1378_vm7, %v1372_v57, %v1377_v63  ;;  %1384 = vst [vmem:[#allocation2 + $0x68] sm:$0x3] %v1380_v10  ;;  %v1341_v2 = vpop.permute.xlu0 %1340  ;;  %v1343_v4 = vpop.permute.xlu1 %1342  ;;  %4026 = vmatpush3.bf16.msra.mxu1 %v4270_v0  ;;  %v1473_v14 = vld [vmem:[#allocation2 + $0x90] sm:$0xff]  ;;  %vm1738_vm7 = vcmask 498688  }
 0x111   : > { %1383 = vst [vmem:[#allocation2 + $0x60] sm:$0x33] %v1379_v1  ;;  %1151 = vmatprep.subr.bf16.mxu0 %v3800_v60  ;;  %v1344_v7 = vrot.slane %v1341_v2, 4  ;;  %v1345_v9 = vrot.slane %v1343_v4, 4  ;;  %4027 = vmatprep.subr.bf16.mxu1 %v4472_v11  ;;  %v3838_v26 = vcombine.high %v1473_v14, %v4925_v8  ;;  %v3837_v37 = vcombine.low %v1473_v14, %v4925_v8 }
 0x112   : > { %3119 = vrot.lane.b32.xlu0 %v4889_v19, %s4470_s24  ;;  %3121 = vrot.lane.b32.xlu1 %v4895_v23, %s4470_s24  ;;  %s4393_s24 = scalar_lea.vmem %s3646_s17, 192 }
 0x113   : > { %v1346_v15 = vsel %vm381_vm1, %v1344_v7, %v1345_v9  ;;  %v1349_v16 = vsel %vm1347_vm8, %v1343_v4, %v1345_v9  ;;  %v4273_v41 = vld [vmem:[#allocation2 + $0x80] ss:$12 sps:$4 sm:$0xff]   ;;  %p4394_p11 = scmp.ne.s32.totalorder %s3646_s17, %s4393_s24 }
 0x114   : > { %1152 = vmatpush1.bf16.msra.mxu0 %v3799_v13  ;;  %v1348_v18 = vsel %vm1347_vm8, %v1341_v2, %v1346_v15  ;;  %1353 = vst [vmem:[#allocation2 + $0x50] sm:$0x3] %v1349_v16  ;;  %v1310_v20 = vpop.permute.xlu0 %1309  ;;  %v1312_v21 = vpop.permute.xlu1 %1311  ;;  %4028 = vmatpush3.bf16.msra.mxu1 %v4271_v17  ;;  %v1469_v28 = vld [vmem:[#allocation2 + $0x78] sm:$0xff]  ;;  %vm1707_vm8 = vcmask 506880  }
 0x115   : > { %1352 = vst [vmem:[#allocation2 + $0x48] sm:$0x33] %v1348_v18  ;;  %1153 = vmatprep.subr.bf16.mxu0 %v3797_v12  ;;  %v1313_v22 = vrot.slane %v1310_v20, 4  ;;  %v1314_v24 = vrot.slane %v1312_v21, 4  ;;  %4033 = vmatprep.subr.bf16.mxu1 %v4472_v11  ;;  %v3835_v36 = vcombine.high %v1469_v28, %v4925_v8  ;;  %v3834_v47 = vcombine.low %v1469_v28, %v4925_v8  ;;  %p4395_p2 = pnand %p4394_p11, %p5225_p1 }
 0x116   : > { %3089 = vrot.lane.b32.xlu0 %v4889_v19, %s4471_s26  ;;  %3091 = vrot.lane.b32.xlu1 %v4895_v23, %s4471_s26 }
 0x117   : > { %v1315_v29 = vsel %vm381_vm1, %v1313_v22, %v1314_v24  ;;  %v1318_v6 = vsel %vm1316_vm9, %v1312_v21, %v1314_v24  ;;  %4030 = vmatmul.mubr.msk.bf16.vlgmr.msra.gmra.mxu1 %vm686_vm13, %v995_v25  ;;  %v4274_v50 = vld [vmem:[#allocation2 + $0x68] ss:$12 sps:$4 sm:$0xff]   ;;  %p4396_p6 = pneg %p4395_p2 }
 0x118   : > { %1154 = vmatpush1.bf16.msra.mxu0 %v3796_v27  ;;  %v1317_v31 = vsel %vm1316_vm9, %v1310_v20, %v1315_v29  ;;  %1322 = vst [vmem:[#allocation2 + $0x38] sm:$0x3] %v1318_v6  ;;  %v1279_v32 = vpop.permute.xlu0 %1278  ;;  %v1281_v33 = vpop.permute.xlu1 %1280  ;;  %4034 = vmatpush3.bf16.msra.mxu1 %v4272_v30  ;;  %v1465_v38 = vld [vmem:[#allocation2 + $0x60] sm:$0xff]  ;;  %vm2346_vm9 = vcmask 277504  }
 0x119   : > { %1321 = vst [vmem:[#allocation2 + $0x30] sm:$0x33] %v1317_v31  ;;  %1594 = vmatprep.subr.bf16.mxu0 %v3838_v26  ;;  %v1282_v34 = vrot.slane %v1279_v32, 4  ;;  %v1283_v35 = vrot.slane %v1281_v33, 4  ;;  %4035 = vmatprep.subr.bf16.mxu1 %v4472_v11  ;;  %v3832_v46 = vcombine.high %v1465_v38, %v4925_v8  ;;  %v3831_v57 = vcombine.low %v1465_v38, %v4925_v8 }
 0x11a   : > { %3059 = vrot.lane.b32.xlu0 %v4889_v19, %s4473_s6  ;;  %3061 = vrot.lane.b32.xlu1 %v4895_v23, %s4473_s6  ;;  %s276_s6 = scalar_select %p275_p3, %s4570_s22, 1 }
 0x11b   : > { %3817 = vmatmul.mubr.msk.bf16.vlgmr.msra.gmra.mxu0 %vm686_vm13, %v995_v25  ;;  %v1284_v39 = vsel %vm381_vm1, %v1282_v34, %v1283_v35  ;;  %v1287_v40 = vsel %vm1285_vm10, %v1281_v33, %v1283_v35  ;;  %4047 = vmatprep.mubr.msk.bf16.mxu1 %vm4479_vm0, %v4472_v11  ;;  %v4275_v60 = vld [vmem:[#allocation2 + $0x50] ss:$12 sps:$4 sm:$0xff]   ;;  %s4518_s22 = smov [#allocation10]  }
 0x11c   : > { %1595 = vmatpush1.bf16.msra.mxu0 %v3837_v37  ;;  %v1286_v42 = vsel %vm1285_vm10, %v1279_v32, %v1284_v39  ;;  %1291 = vst [vmem:[#allocation2 + $0x20] sm:$0x3] %v1287_v40  ;;  %v1248_v43 = vpop.permute.xlu0 %1247  ;;  %v1250_v44 = vpop.permute.xlu1 %1249  ;;  %4036 = vmatpush3.bf16.msra.mxu1 %v4273_v41  ;;  %v1461_v23 = vld [vmem:[#allocation2 + $0x48] sm:$0xff]  ;;  %v1448_v41 = vld [vmem:[#allocation7 + $0x4] sm:$0x3]  ;;  %vm2315_vm10 = vcmask 285696  }
 0x11d   : > { %1290 = vst [vmem:[#allocation2 + $0x18] sm:$0x33] %v1286_v42  ;;  %1596 = vmatprep.subr.bf16.mxu0 %v3835_v36  ;;  %v1251_v19 = vrot.slane %v1248_v43, 4  ;;  %v1252_v45 = vrot.slane %v1250_v44, 4  ;;  %4037 = vmatprep.subr.bf16.mxu1 %v4472_v11  ;;  %v3829_v56 = vcombine.high %v1461_v23, %v4925_v8  ;;  %v3828_v2 = vcombine.low %v1461_v23, %v4925_v8  ;;  %s3770_s10 = sshll.u32 %s276_s6, 2  ;;  %s4397_s26 = sshll.u32 %s4518_s22, 4  ;;  %s4398_s26 = int_to_ptr.vmem [resolvable:$false] %s4397_s26 }
 0x11e   : > { %1624 = vmatprep.mubr.bf16.mxu0 %v4925_v8  ;;  %s278_s9 = scalar_lea.vmem %s5209_s5, %s3770_s10  ;;  %s4399_s6 = scalar_lea.vmem %s4398_s26, 384 }
 0x11f   : > { %v1253_v48 = vsel %vm381_vm1, %v1251_v19, %v1252_v45  ;;  %v1256_v49 = vsel %vm1254_vm11, %v1250_v44, %v1252_v45  ;;  %v4276_v12 = vld [vmem:[#allocation2 + $0x38] ss:$12 sps:$4 sm:$0xff]   ;;  %p4400_p12 = scmp.lt.s32.totalorder %s3646_s17, %s4398_s26  ;;  %p4401_p7 = scmp.lt.s32.totalorder %s4399_s6, %s4393_s24 }
 0x120   : > { %1597 = vmatpush1.bf16.msra.mxu0 %v3834_v47  ;;  %v1255_v51 = vsel %vm1254_vm11, %v1248_v43, %v1253_v48  ;;  %1260 = vst [vmem:[#allocation2 + $0x8] sm:$0x3] %v1256_v49  ;;  %v1887_v52 = vpop.permute.xlu0 %1886  ;;  %v1889_v53 = vpop.permute.xlu1 %1888  ;;  %4038 = vmatpush3.bf16.msra.mxu1 %v4274_v50  ;;  %v1457_v5 = vld [vmem:[#allocation2 + $0x30] sm:$0xff]  ;;  %vm2284_vm11 = vcmask 293888  }
 0x121   : > { %1259 = vst [vmem:[#allocation2] sm:$0x33] %v1255_v51  ;;  %1598 = vmatprep.subr.bf16.mxu0 %v3832_v46  ;;  %v1890_v54 = vrot.slane %v1887_v52, 4  ;;  %v1891_v55 = vrot.slane %v1889_v53, 4  ;;  %4039 = vmatprep.subr.bf16.mxu1 %v4472_v11  ;;  %v3826_v1 = vcombine.high %v1457_v5, %v4925_v8  ;;  %v3825_v20 = vcombine.low %v1457_v5, %v4925_v8  ;;  %p4402_p9 = por %p4401_p7, %p4400_p12 }
 0x123   : > { %v1892_v58 = vsel %vm381_vm1, %v1890_v54, %v1891_v55  ;;  %v1895_v59 = vsel %vm1893_vm12, %v1889_v53, %v1891_v55  ;;  %v4277_v25 = vld [vmem:[#allocation2 + $0x20] ss:$12 sps:$4 sm:$0xff]   ;;  %p4403_p13 = pnand %p4402_p9, %p4396_p6 }
 0x124   : > { %1599 = vmatpush1.bf16.msra.mxu0 %v3831_v57  ;;  %v1894_v61 = vsel %vm1893_vm12, %v1887_v52, %v1892_v58  ;;  %1899 = vst [vmem:[#allocation2 + $0x140] sm:$0x3] %v1895_v59  ;;  %v1856_v62 = vpop.permute.xlu0 %1855  ;;  %v1858_v63 = vpop.permute.xlu1 %1857  ;;  %4040 = vmatpush3.bf16.msra.mxu1 %v4275_v60  ;;  %v1453_v4 = vld [vmem:[#allocation2 + $0x18] sm:$0xff]  ;;  %vm2253_vm12 = vcmask 302080  }
 0x125   : > { %1898 = vst [vmem:[#allocation2 + $0x138] sm:$0x33] %v1894_v61  ;;  %1600 = vmatprep.subr.bf16.mxu0 %v3829_v56  ;;  %v1859_v10 = vrot.slane %v1856_v62, 4  ;;  %v1860_v0 = vrot.slane %v1858_v63, 4  ;;  %4041 = vmatprep.subr.bf16.mxu1 %v4472_v11  ;;  %v3823_v18 = vcombine.high %v1453_v4, %v4925_v8  ;;  %v3822_v31 = vcombine.low %v1453_v4, %v4925_v8 }
 0x127   : > { %v1861_v7 = vsel %vm381_vm1, %v1859_v10, %v1860_v0  ;;  %v1864_v9 = vsel %vm1862_vm14, %v1858_v63, %v1860_v0  ;;  %v4278_v35 = vld [vmem:[#allocation2 + $0x8] ss:$12 sps:$4 sm:$0xff]  }
 0x128   : > { %1601 = vmatpush1.bf16.msra.mxu0 %v3828_v2  ;;  %v1863_v13 = vsel %vm1862_vm14, %v1856_v62, %v1861_v7  ;;  %1868 = vst [vmem:[#allocation2 + $0x128] sm:$0x3] %v1864_v9  ;;  %v1825_v14 = vpop.permute.xlu0 %1824  ;;  %v1827_v15 = vpop.permute.xlu1 %1826  ;;  %4042 = vmatpush3.bf16.msra.mxu1 %v4276_v12  ;;  %v1449_v21 = vld [vmem:[#allocation2] sm:$0xff]  ;;  %vm2222_vm14 = vcmask 310272  }
 0x129   : > { %1867 = vst [vmem:[#allocation2 + $0x120] sm:$0x33] %v1863_v13  ;;  %1602 = vmatprep.subr.bf16.mxu0 %v3826_v1  ;;  %v1828_v16 = vrot.slane %v1825_v14, 4  ;;  %v1829_v17 = vrot.slane %v1827_v15, 4  ;;  %4043 = vmatprep.subr.bf16.mxu1 %v4472_v11  ;;  %v3820_v30 = vcombine.high %v1449_v21, %v4925_v8  ;;  %v3819_v43 = vcombine.low %v1449_v21, %v4925_v8 }
 0x12b   : > { %v1830_v22 = vsel %vm381_vm1, %v1828_v16, %v1829_v17  ;;  %v1833_v24 = vsel %vm1831_vm15, %v1827_v15, %v1829_v17  ;;  %v4279_v46 = vld [vmem:[#allocation2 + $0x140] ss:$12 sps:$4 sm:$0xff]  }
 0x12c   : > { %1603 = vmatpush1.bf16.msra.mxu0 %v3825_v20  ;;  %v1832_v26 = vsel %vm1831_vm15, %v1825_v14, %v1830_v22  ;;  %1837 = vst [vmem:[#allocation2 + $0x110] sm:$0x3] %v1833_v24  ;;  %v1794_v27 = vpop.permute.xlu0 %1793  ;;  %v1796_v28 = vpop.permute.xlu1 %1795  ;;  %4044 = vmatpush3.bf16.msra.mxu1 %v4277_v25  ;;  %v1926_v32 = vld [vmem:[#allocation2 + $0x138] sm:$0xff]  ;;  %vm2191_vm15 = vcmask 318464  }
 0x12d   : > { %1836 = vst [vmem:[#allocation2 + $0x108] sm:$0x33] %v1832_v26  ;;  %1604 = vmatprep.subr.bf16.mxu0 %v3823_v18  ;;  %v1797_v29 = vrot.slane %v1794_v27, 4  ;;  %v1798_v6 = vrot.slane %v1796_v28, 4  ;;  %4045 = vmatprep.subr.bf16.mxu1 %v4472_v11  ;;  %v3861_v42 = vcombine.high %v1926_v32, %v4925_v8  ;;  %v3860_v52 = vcombine.low %v1926_v32, %v4925_v8 }
 0x12f   : > { %v1799_v33 = vsel %vm381_vm1, %v1797_v29, %v1798_v6  ;;  %v1802_v34 = vsel %vm1800_vm5, %v1796_v28, %v1798_v6  ;;  %v4280_v56 = vld [vmem:[#allocation2 + $0x128] ss:$12 sps:$4 sm:$0xff]  }
 0x130   : > { %1605 = vmatpush1.bf16.msra.mxu0 %v3822_v31  ;;  %v1801_v36 = vsel %vm1800_vm5, %v1794_v27, %v1799_v33  ;;  %1806 = vst [vmem:[#allocation2 + $0xf8] sm:$0x3] %v1802_v34  ;;  %v1763_v37 = vpop.permute.xlu0 %1762  ;;  %v1765_v38 = vpop.permute.xlu1 %1764  ;;  %4046 = vmatpush3.bf16.msra.mxu1 %v4278_v35  ;;  %v1922_v44 = vld [vmem:[#allocation2 + $0x120] sm:$0xff]  ;;  %vm2160_vm5 = vcmask 326656  }
 0x131   : > { %1805 = vst [vmem:[#allocation2 + $0xf0] sm:$0x33] %v1801_v36  ;;  %1606 = vmatprep.subr.bf16.mxu0 %v3820_v30  ;;  %v1766_v39 = vrot.slane %v1763_v37, 4  ;;  %v1767_v40 = vrot.slane %v1765_v38, 4  ;;  %4051 = vmatprep.subr.bf16.mxu1 %v4472_v11  ;;  %v3858_v51 = vcombine.high %v1922_v44, %v4925_v8  ;;  %v3857_v62 = vcombine.low %v1922_v44, %v4925_v8 }
 0x133   : > { %v1768_v19 = vsel %vm381_vm1, %v1766_v39, %v1767_v40  ;;  %v1771_v45 = vsel %vm1769_vm6, %v1765_v38, %v1767_v40  ;;  %4048 = vmatmul.mubr.msk.bf16.vlgmr.msra.gmra.mxu1 %vm686_vm13, %v1448_v41  ;;  %v4281_v1 = vld [vmem:[#allocation2 + $0x110] ss:$12 sps:$4 sm:$0xff]  }
 0x134   : > { %1607 = vmatpush1.bf16.msra.mxu0 %v3819_v43  ;;  %v1770_v47 = vsel %vm1769_vm6, %v1763_v37, %v1768_v19  ;;  %1775 = vst [vmem:[#allocation2 + $0xe0] sm:$0x3] %v1771_v45  ;;  %v1732_v23 = vpop.permute.xlu0 %1731  ;;  %v1734_v48 = vpop.permute.xlu1 %1733  ;;  %4052 = vmatpush3.bf16.msra.mxu1 %v4279_v46  ;;  %v1918_v53 = vld [vmem:[#allocation2 + $0x108] sm:$0xff]  ;;  %vm2799_vm6 = vcmask 97280  }
 0x135   : > { %1774 = vst [vmem:[#allocation2 + $0xd8] sm:$0x33] %v1770_v47  ;;  %2047 = vmatprep.subr.bf16.mxu0 %v3861_v42  ;;  %v1735_v49 = vrot.slane %v1732_v23, 4  ;;  %v1736_v50 = vrot.slane %v1734_v48, 4  ;;  %4053 = vmatprep.subr.bf16.mxu1 %v4472_v11  ;;  %v3855_v61 = vcombine.high %v1918_v53, %v4925_v8  ;;  %v3854_v14 = vcombine.low %v1918_v53, %v4925_v8 }
 0x136   : > { %4065 = vmatprep.mubr.msk.bf16.mxu1 %vm4479_vm0, %v4472_v11 }
 0x137   : > { %3840 = vmatmul.mubr.msk.bf16.vlgmr.msra.gmra.mxu0 %vm686_vm13, %v1448_v41  ;;  %v1737_v54 = vsel %vm381_vm1, %v1735_v49, %v1736_v50  ;;  %v1740_v55 = vsel %vm1738_vm7, %v1734_v48, %v1736_v50  ;;  %v4282_v18 = vld [vmem:[#allocation2 + $0xf8] ss:$12 sps:$4 sm:$0xff]  }
 0x138   : > { %2048 = vmatpush1.bf16.msra.mxu0 %v3860_v52  ;;  %v1739_v57 = vsel %vm1738_vm7, %v1732_v23, %v1737_v54  ;;  %1744 = vst [vmem:[#allocation2 + $0xc8] sm:$0x3] %v1740_v55  ;;  %v1701_v5 = vpop.permute.xlu0 %1700  ;;  %v1703_v58 = vpop.permute.xlu1 %1702  ;;  %2077 = vmatprep.mubr.bf16.mxu0 %v4925_v8  ;;  %v1914_v63 = vld [vmem:[#allocation2 + $0xf0] sm:$0xff]  ;;  %vm2768_vm7 = vcmask 105472  }
 0x139   : > { %1743 = vst [vmem:[#allocation2 + $0xc0] sm:$0x33] %v1739_v57  ;;  %2049 = vmatprep.subr.bf16.mxu0 %v3858_v51  ;;  %4054 = vmatpush3.bf16.msra.mxu1 %v4280_v56  ;;  %v1704_v59 = vrot.slane %v1701_v5, 4  ;;  %v1705_v60 = vrot.slane %v1703_v58, 4  ;;  %v3852_v13 = vcombine.high %v1914_v63, %v4925_v8  ;;  %v3851_v27 = vcombine.low %v1914_v63, %v4925_v8  ;;  %v1901_v56 = vld [vmem:[#allocation7 + $0x6] sm:$0x3] }
 0x13a   : > { %4055 = vmatprep.subr.bf16.mxu1 %v4472_v11 }
 0x13b   : > { %v1706_v10 = vsel %vm381_vm1, %v1704_v59, %v1705_v60  ;;  %v1709_v0 = vsel %vm1707_vm8, %v1703_v58, %v1705_v60  ;;  %v4283_v30 = vld [vmem:[#allocation2 + $0xe0] ss:$12 sps:$4 sm:$0xff]  }
 0x13c   : > { %2050 = vmatpush1.bf16.msra.mxu0 %v3857_v62  ;;  %v1708_v2 = vsel %vm1707_vm8, %v1701_v5, %v1706_v10  ;;  %1713 = vst [vmem:[#allocation2 + $0xb0] sm:$0x3] %v1709_v0  ;;  %v2340_v4 = vpop.permute.xlu0 %2339  ;;  %v2342_v7 = vpop.permute.xlu1 %2341  ;;  %v1910_v15 = vld [vmem:[#allocation2 + $0xd8] sm:$0xff]  ;;  %vm2737_vm8 = vcmask 113664  }
 0x13d   : > { %1712 = vst [vmem:[#allocation2 + $0xa8] sm:$0x33] %v1708_v2  ;;  %2051 = vmatprep.subr.bf16.mxu0 %v3855_v61  ;;  %4056 = vmatpush3.bf16.msra.mxu1 %v4281_v1  ;;  %v2343_v9 = vrot.slane %v2340_v4, 4  ;;  %v2344_v12 = vrot.slane %v2342_v7, 4  ;;  %v3849_v26 = vcombine.high %v1910_v15, %v4925_v8  ;;  %v3848_v37 = vcombine.low %v1910_v15, %v4925_v8 }
 0x13e   : > { %4057 = vmatprep.subr.bf16.mxu1 %v4472_v11 }
 0x13f   : > { %v2345_v16 = vsel %vm381_vm1, %v2343_v9, %v2344_v12  ;;  %v2348_v17 = vsel %vm2346_vm9, %v2342_v7, %v2344_v12  ;;  %v4284_v41 = vld [vmem:[#allocation2 + $0xc8] ss:$12 sps:$4 sm:$0xff]  }
 0x140   : > { %2052 = vmatpush1.bf16.msra.mxu0 %v3854_v14  ;;  %v2347_v20 = vsel %vm2346_vm9, %v2340_v4, %v2345_v16  ;;  %2352 = vst [vmem:[#allocation2 + $0x98] sm:$0x3] %v2348_v17  ;;  %v2309_v21 = vpop.permute.xlu0 %2308  ;;  %v2311_v22 = vpop.permute.xlu1 %2310  ;;  %v1906_v28 = vld [vmem:[#allocation2 + $0xc0] sm:$0xff]  ;;  %vm2706_vm9 = vcmask 121856  }
 0x141   : > { %2351 = vst [vmem:[#allocation2 + $0x90] sm:$0x33] %v2347_v20  ;;  %2053 = vmatprep.subr.bf16.mxu0 %v3852_v13  ;;  %4058 = vmatpush3.bf16.msra.mxu1 %v4282_v18  ;;  %v2312_v24 = vrot.slane %v2309_v21, 4  ;;  %v2313_v25 = vrot.slane %v2311_v22, 4  ;;  %v3846_v36 = vcombine.high %v1906_v28, %v4925_v8  ;;  %v3845_v47 = vcombine.low %v1906_v28, %v4925_v8 }
 0x142   : > { %4059 = vmatprep.subr.bf16.mxu1 %v4472_v11 }
 0x143   : > { %v2314_v29 = vsel %vm381_vm1, %v2312_v24, %v2313_v25  ;;  %v2317_v6 = vsel %vm2315_vm10, %v2311_v22, %v2313_v25  ;;  %v4285_v50 = vld [vmem:[#allocation2 + $0xb0] ss:$12 sps:$4 sm:$0xff]  }
 0x144   : > { %2054 = vmatpush1.bf16.msra.mxu0 %v3851_v27  ;;  %v2316_v31 = vsel %vm2315_vm10, %v2309_v21, %v2314_v29  ;;  %2321 = vst [vmem:[#allocation2 + $0x80] sm:$0x3] %v2317_v6  ;;  %v2278_v32 = vpop.permute.xlu0 %2277  ;;  %v2280_v33 = vpop.permute.xlu1 %2279  ;;  %v1902_v38 = vld [vmem:[#allocation2 + $0xa8] sm:$0xff]  ;;  %vm2675_vm10 = vcmask 130048  }
 0x145   : > { %2320 = vst [vmem:[#allocation2 + $0x78] sm:$0x33] %v2316_v31  ;;  %2055 = vmatprep.subr.bf16.mxu0 %v3849_v26  ;;  %4060 = vmatpush3.bf16.msra.mxu1 %v4283_v30  ;;  %v2281_v34 = vrot.slane %v2278_v32, 4  ;;  %v2282_v35 = vrot.slane %v2280_v33, 4  ;;  %v3843_v46 = vcombine.high %v1902_v38, %v4925_v8  ;;  %v3842_v5 = vcombine.low %v1902_v38, %v4925_v8 }
 0x146   : > { %4061 = vmatprep.subr.bf16.mxu1 %v4472_v11 }
 0x147   : > { %v2283_v39 = vsel %vm381_vm1, %v2281_v34, %v2282_v35  ;;  %v2286_v40 = vsel %vm2284_vm11, %v2280_v33, %v2282_v35  ;;  %v4286_v61 = vld [vmem:[#allocation2 + $0x98] ss:$12 sps:$4 sm:$0xff]  }
 0x148   : > { %2056 = vmatpush1.bf16.msra.mxu0 %v3848_v37  ;;  %v2285_v42 = vsel %vm2284_vm11, %v2278_v32, %v2283_v39  ;;  %2290 = vst [vmem:[#allocation2 + $0x68] sm:$0x3] %v2286_v40  ;;  %v2247_v43 = vpop.permute.xlu0 %2246  ;;  %v2249_v44 = vpop.permute.xlu1 %2248  ;;  %v2379_v23 = vld [vmem:[#allocation2 + $0x90] sm:$0xff]  ;;  %vm2644_vm11 = vcmask 138240  }
 0x149   : > { %2289 = vst [vmem:[#allocation2 + $0x60] sm:$0x33] %v2285_v42  ;;  %2057 = vmatprep.subr.bf16.mxu0 %v3846_v36  ;;  %4062 = vmatpush3.bf16.msra.mxu1 %v4284_v41  ;;  %v2250_v19 = vrot.slane %v2247_v43, 4  ;;  %v2251_v45 = vrot.slane %v2249_v44, 4  ;;  %v3884_v57 = vcombine.high %v2379_v23, %v4925_v8  ;;  %v3883_v4 = vcombine.low %v2379_v23, %v4925_v8 }
 0x14a   : > { %4063 = vmatprep.subr.bf16.mxu1 %v4472_v11 }
 0x14b   : > { %v2252_v48 = vsel %vm381_vm1, %v2250_v19, %v2251_v45  ;;  %v2255_v49 = vsel %vm2253_vm12, %v2249_v44, %v2251_v45  ;;  %v4287_v13 = vld [vmem:[#allocation2 + $0x80] ss:$12 sps:$4 sm:$0xff]  }
 0x14c   : > { %2058 = vmatpush1.bf16.msra.mxu0 %v3845_v47  ;;  %v2254_v51 = vsel %vm2253_vm12, %v2247_v43, %v2252_v48  ;;  %2259 = vst [vmem:[#allocation2 + $0x50] sm:$0x3] %v2255_v49  ;;  %v2216_v52 = vpop.permute.xlu0 %2215  ;;  %v2218_v53 = vpop.permute.xlu1 %2217  ;;  %v2375_v58 = vld [vmem:[#allocation2 + $0x78] sm:$0xff]  ;;  %vm2613_vm12 = vcmask 146432  }
 0x14d   : > { %2258 = vst [vmem:[#allocation2 + $0x48] sm:$0x33] %v2254_v51  ;;  %2059 = vmatprep.subr.bf16.mxu0 %v3843_v46  ;;  %4064 = vmatpush3.bf16.msra.mxu1 %v4285_v50  ;;  %v2219_v54 = vrot.slane %v2216_v52, 4  ;;  %v2220_v55 = vrot.slane %v2218_v53, 4  ;;  %v3881_v2 = vcombine.high %v2375_v58, %v4925_v8  ;;  %v3880_v20 = vcombine.low %v2375_v58, %v4925_v8 }
 0x14e   : > { %4069 = vmatprep.subr.bf16.mxu1 %v4472_v11 }
 0x14f   : > { %v2221_v59 = vsel %vm381_vm1, %v2219_v54, %v2220_v55  ;;  %v2224_v60 = vsel %vm2222_vm14, %v2218_v53, %v2220_v55  ;;  %v4288_v24 = vld [vmem:[#allocation2 + $0x68] ss:$12 sps:$4 sm:$0xff]  }
 0x150   : > { %2060 = vmatpush1.bf16.msra.mxu0 %v3842_v5  ;;  %v2223_v62 = vsel %vm2222_vm14, %v2216_v52, %v2221_v59  ;;  %2228 = vst [vmem:[#allocation2 + $0x38] sm:$0x3] %v2224_v60  ;;  %4066 = vmatmul.mubr.msk.bf16.vlgmr.msra.gmra.mxu1 %vm686_vm13, %v1901_v56  ;;  %v2185_v63 = vpop.permute.xlu0 %2184  ;;  %v2187_v10 = vpop.permute.xlu1 %2186  ;;  %v2371_v7 = vld [vmem:[#allocation2 + $0x60] sm:$0xff]  ;;  %vm3249_vm14 = vcmask 965632  }
 0x151   : > { %2227 = vst [vmem:[#allocation2 + $0x30] sm:$0x33] %v2223_v62  ;;  %2500 = vmatprep.subr.bf16.mxu0 %v3884_v57  ;;  %4070 = vmatpush3.bf16.msra.mxu1 %v4286_v61  ;;  %v2188_v0 = vrot.slane %v2185_v63, 4  ;;  %v2189_v1 = vrot.slane %v2187_v10, 4  ;;  %v3878_v18 = vcombine.high %v2371_v7, %v4925_v8  ;;  %v3877_v31 = vcombine.low %v2371_v7, %v4925_v8 }
 0x152   : > { %4071 = vmatprep.subr.bf16.mxu1 %v4472_v11  ;;  %4083 = vmatprep.mubr.msk.bf16.mxu1 %vm4479_vm0, %v4472_v11 }
 0x153   : > { %3863 = vmatmul.mubr.msk.bf16.vlgmr.msra.gmra.mxu0 %vm686_vm13, %v1901_v56  ;;  %v2190_v9 = vsel %vm381_vm1, %v2188_v0, %v2189_v1  ;;  %v2193_v12 = vsel %vm2191_vm15, %v2187_v10, %v2189_v1  ;;  %v4289_v34 = vld [vmem:[#allocation2 + $0x50] ss:$12 sps:$4 sm:$0xff]  }
 0x154   : > { %2501 = vmatpush1.bf16.msra.mxu0 %v3883_v4  ;;  %v2192_v14 = vsel %vm2191_vm15, %v2185_v63, %v2190_v9  ;;  %2197 = vst [vmem:[#allocation2 + $0x20] sm:$0x3] %v2193_v12  ;;  %v2154_v15 = vpop.permute.xlu0 %2153  ;;  %2530 = vmatprep.mubr.bf16.mxu0 %v4925_v8  ;;  %v2156_v17 = vpop.permute.xlu1 %2155  ;;  %v2367_v22 = vld [vmem:[#allocation2 + $0x48] sm:$0xff]  ;;  %v2354_v12 = vld [vmem:[#allocation7 + $0x8] sm:$0x3]  ;;  %vm3218_vm15 = vcmask 973824  }
 0x155   : > { %2196 = vst [vmem:[#allocation2 + $0x18] sm:$0x33] %v2192_v14  ;;  %2502 = vmatprep.subr.bf16.mxu0 %v3881_v2  ;;  %4072 = vmatpush3.bf16.msra.mxu1 %v4287_v13  ;;  %v2157_v16 = vrot.slane %v2154_v15, 4  ;;  %v2158_v21 = vrot.slane %v2156_v17, 4  ;;  %v3875_v30 = vcombine.high %v2367_v22, %v4925_v8  ;;  %v3874_v42 = vcombine.low %v2367_v22, %v4925_v8 }
 0x156   : > { %4073 = vmatprep.subr.bf16.mxu1 %v4472_v11 }
 0x157   : > { %v2159_v25 = vsel %vm381_vm1, %v2157_v16, %v2158_v21  ;;  %v2162_v26 = vsel %vm2160_vm5, %v2156_v17, %v2158_v21  ;;  %v4290_v19 = vld [vmem:[#allocation2 + $0x38] ss:$12 sps:$4 sm:$0xff]  }
 0x158   : > { %2503 = vmatpush1.bf16.msra.mxu0 %v3880_v20  ;;  %v2793_v27 = vpop.permute.xlu0 %2792  ;;  %v2161_v28 = vsel %vm2160_vm5, %v2154_v15, %v2159_v25  ;;  %2166 = vst [vmem:[#allocation2 + $0x8] sm:$0x3] %v2162_v26  ;;  %v2795_v6 = vpop.permute.xlu1 %2794  ;;  %v2363_v33 = vld [vmem:[#allocation2 + $0x30] sm:$0xff]  ;;  %vm3187_vm5 = vcmask 982016  }
 0x159   : > { %2504 = vmatprep.subr.bf16.mxu0 %v3878_v18  ;;  %4074 = vmatpush3.bf16.msra.mxu1 %v4288_v24  ;;  %v2796_v29 = vrot.slane %v2793_v27, 4  ;;  %2165 = vst [vmem:[#allocation2] sm:$0x33] %v2161_v28  ;;  %v2797_v32 = vrot.slane %v2795_v6, 4  ;;  %v3872_v41 = vcombine.high %v2363_v33, %v4925_v8  ;;  %v3871_v51 = vcombine.low %v2363_v33, %v4925_v8 }
 0x15a   : > { %4075 = vmatprep.subr.bf16.mxu1 %v4472_v11 }
 0x15b   : > { %v2798_v35 = vsel %vm381_vm1, %v2796_v29, %v2797_v32  ;;  %v2801_v36 = vsel %vm2799_vm6, %v2795_v6, %v2797_v32  ;;  %v4291_v54 = vld [vmem:[#allocation2 + $0x20] ss:$12 sps:$4 sm:$0xff]  }
 0x15c   : > { %2505 = vmatpush1.bf16.msra.mxu0 %v3877_v31  ;;  %v2762_v37 = vpop.permute.xlu0 %2761  ;;  %v2800_v38 = vsel %vm2799_vm6, %v2793_v27, %v2798_v35  ;;  %2805 = vst [vmem:[#allocation2 + $0x140] sm:$0x3] %v2801_v36  ;;  %v2764_v40 = vpop.permute.xlu1 %2763  ;;  %v2359_v44 = vld [vmem:[#allocation2 + $0x18] sm:$0xff]  ;;  %vm3156_vm6 = vcmask 990208  }
 0x15d   : > { %2506 = vmatprep.subr.bf16.mxu0 %v3875_v30  ;;  %4076 = vmatpush3.bf16.msra.mxu1 %v4289_v34  ;;  %v2765_v39 = vrot.slane %v2762_v37, 4  ;;  %2804 = vst [vmem:[#allocation2 + $0x138] sm:$0x33] %v2800_v38  ;;  %v2766_v43 = vrot.slane %v2764_v40, 4  ;;  %v3869_v50 = vcombine.high %v2359_v44, %v4925_v8  ;;  %v3868_v61 = vcombine.low %v2359_v44, %v4925_v8 }
 0x15e   : > { %4077 = vmatprep.subr.bf16.mxu1 %v4472_v11 }
 0x15f   : > { %v2767_v45 = vsel %vm381_vm1, %v2765_v39, %v2766_v43  ;;  %v2770_v46 = vsel %vm2768_vm7, %v2764_v40, %v2766_v43  ;;  %v4292_v10 = vld [vmem:[#allocation2 + $0x8] ss:$12 sps:$4 sm:$0xff]  }
 0x160   : > { %2507 = vmatpush1.bf16.msra.mxu0 %v3874_v42  ;;  %v2731_v47 = vpop.permute.xlu0 %2730  ;;  %v2769_v23 = vsel %vm2768_vm7, %v2762_v37, %v2767_v45  ;;  %2774 = vst [vmem:[#allocation2 + $0x128] sm:$0x3] %v2770_v46  ;;  %v2733_v49 = vpop.permute.xlu1 %2732  ;;  %v2355_v53 = vld [vmem:[#allocation2] sm:$0xff]  ;;  %v5087_v46 = vld [vmem:[#allocation2 + $0xc] sm:$0xff] }
 0x161   : > { %2508 = vmatprep.subr.bf16.mxu0 %v3872_v41  ;;  %4078 = vmatpush3.bf16.msra.mxu1 %v4290_v19  ;;  %v2734_v48 = vrot.slane %v2731_v47, 4  ;;  %2773 = vst [vmem:[#allocation2 + $0x120] sm:$0x33] %v2769_v23  ;;  %v2735_v52 = vrot.slane %v2733_v49, 4  ;;  %v3866_v60 = vcombine.high %v2355_v53, %v4925_v8  ;;  %v3865_v14 = vcombine.low %v2355_v53, %v4925_v8 }
 0x162   : > { %4079 = vmatprep.subr.bf16.mxu1 %v4472_v11 }
 0x163   : > { %v2736_v55 = vsel %vm381_vm1, %v2734_v48, %v2735_v52  ;;  %v2739_v56 = vsel %vm2737_vm8, %v2733_v49, %v2735_v52  ;;  %v4293_v17 = vld [vmem:[#allocation2 + $0x140] ss:$12 sps:$4 sm:$0xff]  }
 0x164   : > { %2509 = vmatpush1.bf16.msra.mxu0 %v3871_v51  ;;  %v2700_v57 = vpop.permute.xlu0 %2699  ;;  %v2738_v5 = vsel %vm2737_vm8, %v2731_v47, %v2736_v55  ;;  %2743 = vst [vmem:[#allocation2 + $0x110] sm:$0x3] %v2739_v56  ;;  %v2702_v59 = vpop.permute.xlu1 %2701  ;;  %v2832_v63 = vld [vmem:[#allocation2 + $0x138] sm:$0xff] }
 0x165   : > { %2510 = vmatprep.subr.bf16.mxu0 %v3869_v50  ;;  %4080 = vmatpush3.bf16.msra.mxu1 %v4291_v54  ;;  %v2703_v58 = vrot.slane %v2700_v57, 4  ;;  %2742 = vst [vmem:[#allocation2 + $0x108] sm:$0x33] %v2738_v5  ;;  %v2704_v62 = vrot.slane %v2702_v59, 4  ;;  %v3907_v13 = vcombine.high %v2832_v63, %v4925_v8  ;;  %v3906_v27 = vcombine.low %v2832_v63, %v4925_v8 }
 0x166   : > { %4081 = vmatprep.subr.bf16.mxu1 %v4472_v11 }
 0x167   : > { %v2705_v0 = vsel %vm381_vm1, %v2703_v58, %v2704_v62  ;;  %v2708_v1 = vsel %vm2706_vm9, %v2702_v59, %v2704_v62  ;;  %v4294_v6 = vld [vmem:[#allocation2 + $0x128] ss:$12 sps:$4 sm:$0xff]  }
 0x168   : > { %2511 = vmatpush1.bf16.msra.mxu0 %v3868_v61  ;;  %v2669_v2 = vpop.permute.xlu0 %2668  ;;  %v2707_v4 = vsel %vm2706_vm9, %v2700_v57, %v2705_v0  ;;  %2712 = vst [vmem:[#allocation2 + $0xf8] sm:$0x3] %v2708_v1  ;;  %v2671_v9 = vpop.permute.xlu1 %2670  ;;  %v2828_v16 = vld [vmem:[#allocation2 + $0x120] sm:$0xff] }
 0x169   : > { %2512 = vmatprep.subr.bf16.mxu0 %v3866_v60  ;;  %4082 = vmatpush3.bf16.msra.mxu1 %v4292_v10  ;;  %v2672_v7 = vrot.slane %v2669_v2, 4  ;;  %2711 = vst [vmem:[#allocation2 + $0xf0] sm:$0x33] %v2707_v4  ;;  %v2673_v15 = vrot.slane %v2671_v9, 4  ;;  %v3904_v26 = vcombine.high %v2828_v16, %v4925_v8  ;;  %v3903_v37 = vcombine.low %v2828_v16, %v4925_v8 }
 0x16a   : > { %4087 = vmatprep.subr.bf16.mxu1 %v4472_v11 }
 0x16b   : > { %v2674_v18 = vsel %vm381_vm1, %v2672_v7, %v2673_v15  ;;  %v2677_v20 = vsel %vm2675_vm10, %v2671_v9, %v2673_v15  ;;  %v4295_v40 = vld [vmem:[#allocation2 + $0x110] ss:$12 sps:$4 sm:$0xff]  }
 0x16c   : > { %2513 = vmatpush1.bf16.msra.mxu0 %v3865_v14  ;;  %4084 = vmatmul.mubr.msk.bf16.vlgmr.msra.gmra.mxu1 %vm686_vm13, %v2354_v12  ;;  %v2638_v21 = vpop.permute.xlu0 %2637  ;;  %v2676_v22 = vsel %vm2675_vm10, %v2669_v2, %v2674_v18  ;;  %2681 = vst [vmem:[#allocation2 + $0xe0] sm:$0x3] %v2677_v20  ;;  %v2640_v25 = vpop.permute.xlu1 %2639  ;;  %v2824_v29 = vld [vmem:[#allocation2 + $0x108] sm:$0xff] }
 0x16d   : > { %2953 = vmatprep.subr.bf16.mxu0 %v3907_v13  ;;  %4088 = vmatpush3.bf16.msra.mxu1 %v4293_v17  ;;  %v2641_v24 = vrot.slane %v2638_v21, 4  ;;  %2680 = vst [vmem:[#allocation2 + $0xd8] sm:$0x33] %v2676_v22  ;;  %v2642_v28 = vrot.slane %v2640_v25, 4  ;;  %v3901_v36 = vcombine.high %v2824_v29, %v4925_v8  ;;  %v3900_v47 = vcombine.low %v2824_v29, %v5087_v46 }
 0x16e   : > { %4089 = vmatprep.subr.bf16.mxu1 %v4472_v11  ;;  %4101 = vmatprep.mubr.msk.bf16.mxu1 %vm4479_vm0, %v4472_v11 }
 0x16f   : > { %3886 = vmatmul.mubr.msk.bf16.vlgmr.msra.gmra.mxu0 %vm686_vm13, %v2354_v12  ;;  %v2643_v30 = vsel %vm381_vm1, %v2641_v24, %v2642_v28  ;;  %v2646_v31 = vsel %vm2644_vm11, %v2640_v25, %v2642_v28  ;;  %v4296_v49 = vld [vmem:[#allocation2 + $0xf8] ss:$12 sps:$4 sm:$0xff]  }
 0x170   : > { %2954 = vmatpush1.bf16.msra.mxu0 %v3906_v27  ;;  %v2607_v32 = vpop.permute.xlu0 %2606  ;;  %2983 = vmatprep.mubr.bf16.mxu0 %v4925_v8  ;;  %v2645_v33 = vsel %vm2644_vm11, %v2638_v21, %v2643_v30  ;;  %2650 = vst [vmem:[#allocation2 + $0xc8] sm:$0x3] %v2646_v31  ;;  %v2609_v35 = vpop.permute.xlu1 %2608  ;;  %v2820_v39 = vld [vmem:[#allocation2 + $0xf0] sm:$0xff]  ;;  %v2807_v30 = vld [vmem:[#allocation7 + $0xa] sm:$0x3] }
 0x171   : > { %2955 = vmatprep.subr.bf16.mxu0 %v3904_v26  ;;  %4090 = vmatpush3.bf16.msra.mxu1 %v4294_v6  ;;  %v2610_v34 = vrot.slane %v2607_v32, 4  ;;  %2649 = vst [vmem:[#allocation2 + $0xc0] sm:$0x33] %v2645_v33  ;;  %v2611_v38 = vrot.slane %v2609_v35, 4  ;;  %v3898_v8 = vcombine.high %v2820_v39, %v5087_v46  ;;  %v3897_v57 = vcombine.low %v2820_v39, %v5087_v46 }
 0x172   : > { %4091 = vmatprep.subr.bf16.mxu1 %v4472_v11 }
 0x173   : > { %v2612_v41 = vsel %vm381_vm1, %v2610_v34, %v2611_v38  ;;  %v2615_v42 = vsel %vm2613_vm12, %v2609_v35, %v2611_v38  ;;  %v4297_v59 = vld [vmem:[#allocation2 + $0xe0] ss:$12 sps:$4 sm:$0xff]  }
 0x174   : > { %2956 = vmatpush1.bf16.msra.mxu0 %v3903_v37  ;;  %v3243_v43 = vpop.permute.xlu0 %3242  ;;  %v2614_v44 = vsel %vm2613_vm12, %v2607_v32, %v2612_v41  ;;  %2619 = vst [vmem:[#allocation2 + $0xb0] sm:$0x3] %v2615_v42  ;;  %v3245_v45 = vpop.permute.xlu1 %3244  ;;  %v2816_v48 = vld [vmem:[#allocation2 + $0xd8] sm:$0xff] }
 0x175   : > { %2957 = vmatprep.subr.bf16.mxu0 %v3901_v36  ;;  %4092 = vmatpush3.bf16.msra.mxu1 %v4295_v40  ;;  %v3246_v19 = vrot.slane %v3243_v43, 4  ;;  %2618 = vst [vmem:[#allocation2 + $0xa8] sm:$0x33] %v2614_v44  ;;  %v3247_v23 = vrot.slane %v3245_v45, 4  ;;  %v3895_v56 = vcombine.high %v2816_v48, %v5087_v46  ;;  %v3894_v2 = vcombine.low %v2816_v48, %v5087_v46 }
 0x176   : > { %4093 = vmatprep.subr.bf16.mxu1 %v4472_v11 }
 0x177   : > { %v3248_v50 = vsel %vm381_vm1, %v3246_v19, %v3247_v23  ;;  %v3251_v51 = vsel %vm3249_vm14, %v3245_v45, %v3247_v23  ;;  %v4298_v9 = vld [vmem:[#allocation2 + $0xc8] ss:$12 sps:$4 sm:$0xff]  }
 0x178   : > { %2958 = vmatpush1.bf16.msra.mxu0 %v3900_v47  ;;  %v3212_v52 = vpop.permute.xlu0 %3211  ;;  %v3250_v53 = vsel %vm3249_vm14, %v3243_v43, %v3248_v50  ;;  %3255 = vst [vmem:[#allocation2 + $0x98] sm:$0x3] %v3251_v51  ;;  %v3214_v55 = vpop.permute.xlu1 %3213  ;;  %v2812_v58 = vld [vmem:[#allocation2 + $0xc0] sm:$0xff] }
 0x179   : > { %2959 = vmatprep.subr.bf16.mxu0 %v3898_v8  ;;  %4094 = vmatpush3.bf16.msra.mxu1 %v4296_v49  ;;  %v3215_v54 = vrot.slane %v3212_v52, 4  ;;  %3254 = vst [vmem:[#allocation2 + $0x90] sm:$0x33] %v3250_v53  ;;  %v3216_v5 = vrot.slane %v3214_v55, 4  ;;  %v3892_v1 = vcombine.high %v2812_v58, %v5087_v46  ;;  %v3891_v20 = vcombine.low %v2812_v58, %v5087_v46 }
 0x17a   : > { %4095 = vmatprep.subr.bf16.mxu1 %v4472_v11 }
 0x17b   : > { %v3217_v60 = vsel %vm381_vm1, %v3215_v54, %v3216_v5  ;;  %v3220_v61 = vsel %vm3218_vm15, %v3214_v55, %v3216_v5  ;;  %v4299_v24 = vld [vmem:[#allocation2 + $0xb0] ss:$12 sps:$4 sm:$0xff]  }
 0x17c   : > { %2960 = vmatpush1.bf16.msra.mxu0 %v3897_v57  ;;  %v3181_v62 = vpop.permute.xlu0 %3180  ;;  %v3219_v63 = vsel %vm3218_vm15, %v3212_v52, %v3217_v60  ;;  %3224 = vst [vmem:[#allocation2 + $0x80] sm:$0x3] %v3220_v61  ;;  %v3183_v0 = vpop.permute.xlu1 %3182  ;;  %v2808_v7 = vld [vmem:[#allocation2 + $0xa8] sm:$0xff] }
 0x17d   : > { %2961 = vmatprep.subr.bf16.mxu0 %v3895_v56  ;;  %4096 = vmatpush3.bf16.msra.mxu1 %v4297_v59  ;;  %v3184_v10 = vrot.slane %v3181_v62, 4  ;;  %3223 = vst [vmem:[#allocation2 + $0x78] sm:$0x33] %v3219_v63  ;;  %v3185_v4 = vrot.slane %v3183_v0, 4  ;;  %v3889_v18 = vcombine.high %v2808_v7, %v5087_v46  ;;  %v3888_v32 = vcombine.low %v2808_v7, %v5087_v46 }
 0x17e   : > { %4097 = vmatprep.subr.bf16.mxu1 %v4472_v11 }
 0x17f   : > { %v3186_v12 = vsel %vm381_vm1, %v3184_v10, %v3185_v4  ;;  %v3189_v13 = vsel %vm3187_vm5, %v3183_v0, %v3185_v4  ;;  %v4300_v35 = vld [vmem:[#allocation2 + $0x98] ss:$12 sps:$4 sm:$0xff]  }
 0x180   : > { %2962 = vmatpush1.bf16.msra.mxu0 %v3894_v2  ;;  %v3150_v14 = vpop.permute.xlu0 %3149  ;;  %v3188_v15 = vsel %vm3187_vm5, %v3181_v62, %v3186_v12  ;;  %3193 = vst [vmem:[#allocation2 + $0x68] sm:$0x3] %v3189_v13  ;;  %v3152_v17 = vpop.permute.xlu1 %3151  ;;  %v3282_v22 = vld [vmem:[#allocation2 + $0x90] sm:$0xff] }
 0x181   : > { %2963 = vmatprep.subr.bf16.mxu0 %v3892_v1  ;;  %4098 = vmatpush3.bf16.msra.mxu1 %v4298_v9  ;;  %v3153_v16 = vrot.slane %v3150_v14, 4  ;;  %3192 = vst [vmem:[#allocation2 + $0x60] sm:$0x33] %v3188_v15  ;;  %v3154_v21 = vrot.slane %v3152_v17, 4  ;;  %v3930_v31 = vcombine.high %v3282_v22, %v5087_v46  ;;  %v3929_v43 = vcombine.low %v3282_v22, %v5087_v46 }
 0x182   : > { %4099 = vmatprep.subr.bf16.mxu1 %v4472_v11 }
 0x183   : > { %v3155_v25 = vsel %vm381_vm1, %v3153_v16, %v3154_v21  ;;  %v3158_v26 = vsel %vm3156_vm6, %v3152_v17, %v3154_v21  ;;  %v4301_v45 = vld [vmem:[#allocation2 + $0x80] ss:$12 sps:$4 sm:$0xff]  }
 0x184   : > { %2964 = vmatpush1.bf16.msra.mxu0 %v3891_v20  ;;  %v3120_v27 = vpop.permute.xlu0 %3119  ;;  %v3157_v28 = vsel %vm3156_vm6, %v3150_v14, %v3155_v25  ;;  %3162 = vst [vmem:[#allocation2 + $0x50] sm:$0x3] %v3158_v26  ;;  %v3122_v6 = vpop.permute.xlu1 %3121  ;;  %v3278_v34 = vld [vmem:[#allocation2 + $0x78] sm:$0xff] }
 0x185   : > { %2965 = vmatprep.subr.bf16.mxu0 %v3889_v18  ;;  %4100 = vmatpush3.bf16.msra.mxu1 %v4299_v24  ;;  %v3123_v29 = vrot.slane %v3120_v27, 4  ;;  %3161 = vst [vmem:[#allocation2 + $0x48] sm:$0x33] %v3157_v28  ;;  %v3124_v33 = vrot.slane %v3122_v6, 4  ;;  %v3927_v42 = vcombine.high %v3278_v34, %v5087_v46  ;;  %v3926_v52 = vcombine.low %v3278_v34, %v5087_v46  ;;  %v3257_v14 = vld [vmem:[#allocation7 + $0xc] sm:$0x3] }
 0x186   : > { %4105 = vmatprep.subr.bf16.mxu1 %v4472_v11 }
 0x187   : > { %v3125_v36 = vsel %vm381_vm1, %v3123_v29, %v3124_v33  ;;  %v3127_v37 = vsel %vm538_vm2, %v3122_v6, %v3124_v33  ;;  %v4302_v55 = vld [vmem:[#allocation2 + $0x68] ss:$12 sps:$4 sm:$0xff]  }
 0x188   : > { %2966 = vmatpush1.bf16.msra.mxu0 %v3888_v32  ;;  %4102 = vmatmul.mubr.msk.bf16.vlgmr.msra.gmra.mxu1 %vm686_vm13, %v2807_v30  ;;  %v3090_v38 = vpop.permute.xlu0 %3089  ;;  %v3126_v39 = vsel %vm538_vm2, %v3120_v27, %v3125_v36  ;;  %3131 = vst [vmem:[#allocation2 + $0x38] sm:$0x3] %v3127_v37  ;;  %v3092_v41 = vpop.permute.xlu1 %3091  ;;  %v3274_v19 = vld [vmem:[#allocation2 + $0x60] sm:$0xff]  ;;  %vm3624_vm2 = vcmask 3072  }
 0x189   : > { %3403 = vmatprep.subr.bf16.mxu0 %v3930_v31  ;;  %4106 = vmatpush3.bf16.msra.mxu1 %v4300_v35  ;;  %v3093_v40 = vrot.slane %v3090_v38, 4  ;;  %3130 = vst [vmem:[#allocation2 + $0x30] sm:$0x33] %v3126_v39  ;;  %v3094_v44 = vrot.slane %v3092_v41, 4  ;;  %v3924_v51 = vcombine.high %v3274_v19, %v5087_v46  ;;  %v3923_v59 = vcombine.low %v3274_v19, %v5087_v46 }
 0x18a   : > { %4107 = vmatprep.subr.bf16.mxu1 %v4472_v11  ;;  %4119 = vmatprep.mubr.msk.bf16.mxu1 %vm4479_vm0, %v4472_v11 }
 0x18b   : > { %3909 = vmatmul.mubr.msk.bf16.vlgmr.msra.gmra.mxu0 %vm686_vm13, %v2807_v30  ;;  %v3095_v8 = vsel %vm381_vm1, %v3093_v40, %v3094_v44  ;;  %v3097_v47 = vsel %vm507_vm3, %v3092_v41, %v3094_v44  ;;  %v4303_v61 = vld [vmem:[#allocation2 + $0x50] ss:$12 sps:$4 sm:$0xff]  }
 0x18c   : > { %3404 = vmatpush1.bf16.msra.mxu0 %v3929_v43  ;;  %v3060_v23 = vpop.permute.xlu0 %3059  ;;  %3433 = vmatprep.mubr.bf16.mxu0 %v5087_v46  ;;  %v3096_v48 = vsel %vm507_vm3, %v3090_v38, %v3095_v8  ;;  %3101 = vst [vmem:[#allocation2 + $0x20] sm:$0x3] %v3097_v47  ;;  %v3062_v50 = vpop.permute.xlu1 %3061  ;;  %v3270_v54 = vld [vmem:[#allocation2 + $0x48] sm:$0xff] }
 0x18d   : > { %3405 = vmatprep.subr.bf16.mxu0 %v3927_v42  ;;  %4108 = vmatpush3.bf16.msra.mxu1 %v4301_v45  ;;  %v3063_v49 = vrot.slane %v3060_v23, 4  ;;  %3100 = vst [vmem:[#allocation2 + $0x18] sm:$0x33] %v3096_v48  ;;  %v3064_v53 = vrot.slane %v3062_v50, 4  ;;  %v3921_v58 = vcombine.high %v3270_v54, %v5087_v46  ;;  %v3920_v63 = vcombine.low %v3270_v54, %v5087_v46 }
 0x18e   : > { %4109 = vmatprep.subr.bf16.mxu1 %v4472_v11 }
 0x18f   : > { %v3065_v56 = vsel %vm381_vm1, %v3063_v49, %v3064_v53  ;;  %v3067_v57 = vsel %vm476_vm4, %v3062_v50, %v3064_v53  ;;  %v4304_v0 = vld [vmem:[#allocation2 + $0x38] ss:$12 sps:$4 sm:$0xff]  }
 0x190   : > { %3406 = vmatpush1.bf16.msra.mxu0 %v3926_v52  ;;  %v3066_v5 = vsel %vm476_vm4, %v3060_v23, %v3065_v56  ;;  %3071 = vst [vmem:[#allocation2 + $0x8] sm:$0x3] %v3067_v57  ;;  %v3266_v60 = vld [vmem:[#allocation2 + $0x30] sm:$0xff] }
 0x191   : > { %3407 = vmatprep.subr.bf16.mxu0 %v3924_v51  ;;  %4110 = vmatpush3.bf16.msra.mxu1 %v4302_v55  ;;  %3070 = vst [vmem:[#allocation2] sm:$0x33] %v3066_v5  ;;  %v3918_v62 = vcombine.high %v3266_v60, %v5087_v46  ;;  %v3917_v2 = vcombine.low %v3266_v60, %v5087_v46 }
 0x192   : > { %4111 = vmatprep.subr.bf16.mxu1 %v4472_v11 }
 0x193   : > { %v4305_v7 = vld [vmem:[#allocation2 + $0x20] ss:$12 sps:$4 sm:$0xff]  }
 0x194   : > { %3408 = vmatpush1.bf16.msra.mxu0 %v3923_v59  ;;  %v3262_v10 = vld [vmem:[#allocation2 + $0x18] sm:$0xff] }
 0x195   : > { %3409 = vmatprep.subr.bf16.mxu0 %v3921_v58  ;;  %4112 = vmatpush3.bf16.msra.mxu1 %v4303_v61  ;;  %v3915_v1 = vcombine.high %v3262_v10, %v5087_v46  ;;  %v3914_v12 = vcombine.low %v3262_v10, %v5087_v46 }
 0x196   : > { %4113 = vmatprep.subr.bf16.mxu1 %v4472_v11 }
 0x197   : > { %v4306_v13 = vld [vmem:[#allocation2 + $0x8] ss:$12 sps:$4 sm:$0xff]  }
 0x198   : > { %3410 = vmatpush1.bf16.msra.mxu0 %v3920_v63  ;;  %v3258_v4 = vld [vmem:[#allocation2] sm:$0xff] }
 0x199   : > { %3411 = vmatprep.subr.bf16.mxu0 %v3918_v62  ;;  %4114 = vmatpush3.bf16.msra.mxu1 %v4304_v0  ;;  %v3912_v9 = vcombine.high %v3258_v4, %v5087_v46  ;;  %v3911_v15 = vcombine.low %v3258_v4, %v5087_v46 }
 0x19a   : > { %4115 = vmatprep.subr.bf16.mxu1 %v4472_v11 }
 0x19c   : > { %3412 = vmatpush1.bf16.msra.mxu0 %v3917_v2 }
 0x19d   : > { %3413 = vmatprep.subr.bf16.mxu0 %v3915_v1  ;;  %4116 = vmatpush3.bf16.msra.mxu1 %v4305_v7 }
 0x19e   : > { %4117 = vmatprep.subr.bf16.mxu1 %v4472_v11 }
 0x1a0   : > { %3414 = vmatpush1.bf16.msra.mxu0 %v3914_v12 }
 0x1a1   : > { %3415 = vmatprep.subr.bf16.mxu0 %v3912_v9  ;;  %4118 = vmatpush3.bf16.msra.mxu1 %v4306_v13 }
 0x1a4   : > { %3416 = vmatpush1.bf16.msra.mxu0 %v3911_v15  ;;  %4120 = vmatmul.mubr.msk.bf16.vlgmr.msra.gmra.mxu1 %vm686_vm13, %v3257_v14 }
 0x1a5   : > { %4123 = vmatprep.subr.mxu0 %v4472_v11 }
 0x1a7   : > { %3932 = vmatmul.mubr.msk.bf16.vlgmr.msra.gmra.mxu0 %vm686_vm13, %v3257_v14 }
 0x1a8   : > { %4125 = vmatprep.mubr.msk.f32.mxu0 %vm4479_vm0, %v4472_v11  ;;  %vm3525_vm0 = vcmask 31744  }
 0x1bb   : > { %v765_v16 = vpop.f32.mrf.mxu1 }
 0x1bc   : > { %776 = vst [vmem:[#allocation3 + $0x8] sm:$0xf] %v765_v16 }
 0x1bd   : > { %v4013_v17 = vpop.f32.mrf.mxu1 }
 0x1bf   : > { %v724_v18 = vpop.f32.mrf.mxu0  ;;  %v768_v20 = vpop.f32.mrf.mxu1 }
 0x1c0   : > { %v3502_v20 = vsub.s32 1, %v4681_v3 }
 0x1c1   : > { %v726_v21 = vpop.f32.mrf.mxu0  ;;  %v4014_v24 = vpop.f32.mrf.mxu1 }
 0x1c2   : > { %v773_v22 = vcombine.low %v724_v18, %v726_v21  ;;  %v3498_v18 = vsub.s32 0, %v4681_v3  ;;  %v3494_v21 = vld [vmem:[%s5207_s3] sm:$0x7] }
 0x1c3   : > { %v728_v25 = vpop.f32.mrf.mxu0  ;;  %v1221_v27 = vld [vmem:[#allocation3 + $0x8] sm:$0xf] }
 0x1c5   : > { %v729_v46 = vpop.f32.mrf.mxu0 }
 0x1d7   : > { %v1214_v26 = vpop.f32.mrf.mxu1 }
 0x1d8   : > { %v1227_v28 = vadd.f32 %v1221_v27, %v1214_v26 }
 0x1d9   : > { %v4031_v29 = vpop.f32.mrf.mxu1 }
 0x1da   : > { %1229 = vst [vmem:[#allocation3 + $0x8] sm:$0xf] %v1227_v28  ;;  %v3499_v28 = vrot.slane %v3494_v21, %v3498_v18  ;;  %v3503_v29 = vrot.slane %v3494_v21, %v3502_v20 }
 0x1db   : > { %v1173_v6 = vpop.f32.mrf.mxu0  ;;  %v1217_v30 = vpop.f32.mrf.mxu1 }
 0x1dd   : > { %v1175_v31 = vpop.f32.mrf.mxu0  ;;  %v4032_v11 = vpop.f32.mrf.mxu1 }
 0x1de   : > { %v1224_v32 = vcombine.low %v1173_v6, %v1175_v31 }
 0x1df   : > { %v1177_v33 = vpop.f32.mrf.mxu0 }
 0x1e0   : > { %v1226_v34 = vadd.f32 %v1224_v32, %v773_v22  ;;  %v3506_v32 = vsub.s32 2, %v4681_v3 }
 0x1e1   : > { %v1178_v35 = vpop.f32.mrf.mxu0  ;;  %v1674_v37 = vld [vmem:[#allocation3 + $0x8] sm:$0xf] }
 0x1f3   : > { %v1667_v36 = vpop.f32.mrf.mxu1 }
 0x1f4   : > { %v1680_v38 = vadd.f32 %v1674_v37, %v1667_v36  ;;  %v3509_v36 = vcombine.low %v3499_v28, %v3503_v29 }
 0x1f5   : > { %v4049_v39 = vpop.f32.mrf.mxu1 }
 0x1f6   : > { %1682 = vst [vmem:[#allocation3 + $0x8] sm:$0xf] %v1680_v38  ;;  %v3507_v39 = vrot.slane %v3494_v21, %v3506_v32 }
 0x1f7   : > { %v1626_v40 = vpop.f32.mrf.mxu0  ;;  %v1670_v41 = vpop.f32.mrf.mxu1 }
 0x1f9   : > { %v1628_v42 = vpop.f32.mrf.mxu0  ;;  %v4050_v44 = vpop.f32.mrf.mxu1 }
 0x1fa   : > { %v1677_v43 = vcombine.low %v1626_v40, %v1628_v42 }
 0x1fb   : > { %v1630_v19 = vpop.f32.mrf.mxu0 }
 0x1fc   : > { %v1679_v45 = vadd.f32 %v1677_v43, %v1226_v34 }
 0x1fd   : > { %v1631_v8 = vpop.f32.mrf.mxu0  ;;  %v2127_v23 = vld [vmem:[#allocation3 + $0x8] sm:$0xf] }
 0x210   : > { %v2120_v47 = vpop.f32.mrf.mxu1 }
 0x211   : > { %v2133_v48 = vadd.f32 %v2127_v23, %v2120_v47 }
 0x212   : > { %v4067_v49 = vpop.f32.mrf.mxu1 }
 0x213   : > { %2135 = vst [vmem:[#allocation3 + $0x8] sm:$0xf] %v2133_v48  ;;  %v2079_v50 = vpop.f32.mrf.mxu0  ;;  %v3524_v48 = vld [vmem:[#allocation9] sm:$0xf] }
 0x214   : > { %v2123_v51 = vpop.f32.mrf.mxu1 }
 0x215   : > { %v2081_v52 = vpop.f32.mrf.mxu0 }
 0x216   : > { %v2130_v53 = vcombine.low %v2079_v50, %v2081_v52  ;;  %v4068_v54 = vpop.f32.mrf.mxu1 }
 0x217   : > { %v2083_v55 = vpop.f32.mrf.mxu0 }
 0x218   : > { %v2132_v56 = vadd.f32 %v2130_v53, %v1679_v45 }
 0x219   : > { %v2084_v57 = vpop.f32.mrf.mxu0 }
 0x21a   : > { %v2580_v58 = vld [vmem:[#allocation3 + $0x8] sm:$0xf]  ;;  %v4517_v57 = vmov 839922192  }
 0x22c   : > { %v2573_v5 = vpop.f32.mrf.mxu1 }
 0x22d   : > { %v2586_v59 = vadd.f32 %v2580_v58, %v2573_v5  ;;  %v3613_v5 = vunpack.c.l.s4 %v4517_v57 }
 0x22e   : > { %v4085_v60 = vpop.f32.mrf.mxu1 }
 0x22f   : > { %2588 = vst [vmem:[#allocation3 + $0x8] sm:$0xf] %v2586_v59  ;;  %v2532_v61 = vpop.f32.mrf.mxu0  ;;  %v3614_v58 = vunpack.c.0.s8 %v3613_v5 }
 0x230   : > { %v2576_v62 = vpop.f32.mrf.mxu1 }
 0x231   : > { %v2534_v63 = vpop.f32.mrf.mxu0  ;;  %v3617_v59 = vsub.s32 %v3614_v58, %v4681_v3 }
 0x232   : > { %v4086_v10 = vpop.f32.mrf.mxu1  ;;  %v2583_v22 = vcombine.low %v2532_v61, %v2534_v63 }
 0x233   : > { %v2536_v0 = vpop.f32.mrf.mxu0 }
 0x234   : > { %v2585_v30 = vadd.f32 %v2583_v22, %v2132_v56 }
 0x235   : > { %v2537_v1 = vpop.f32.mrf.mxu0 }
 0x236   : > { %v3033_v4 = vld [vmem:[#allocation3 + $0x8] sm:$0xf] }
 0x248   : > { %v3026_v2 = vpop.f32.mrf.mxu1 }
 0x249   : > { %v3039_v7 = vadd.f32 %v3033_v4, %v3026_v2 }
 0x24a   : > { %v4103_v9 = vpop.f32.mrf.mxu1 }
 0x24b   : > { %3041 = vst [vmem:[#allocation3 + $0x8] sm:$0xf] %v3039_v7  ;;  %v2985_v12 = vpop.f32.mrf.mxu0 }
 0x24c   : > { %v3029_v13 = vpop.f32.mrf.mxu1 }
 0x24d   : > { %v2987_v14 = vpop.f32.mrf.mxu0 }
 0x24e   : > { %v4104_v15 = vpop.f32.mrf.mxu1  ;;  %v3036_v26 = vcombine.low %v2985_v12, %v2987_v14 }
 0x24f   : > { %v2989_v16 = vpop.f32.mrf.mxu0 }
 0x250   : > { %v3038_v33 = vadd.f32 %v3036_v26, %v2585_v30 }
 0x251   : > { %v2990_v17 = vpop.f32.mrf.mxu0 }
 0x252   : > { %v3483_v25 = vld [vmem:[#allocation3 + $0x8] sm:$0xf] }
 0x264   : > { %v3476_v24 = vpop.f32.mrf.mxu1 }
 0x265   : > { %v3489_v46 = vadd.f32 %v3483_v25, %v3476_v24 }
 0x266   : > { %v4121_v27 = vpop.f32.mrf.mxu1 }
 0x267   : > { %3491 = vst [vmem:[#allocation3 + $0x8] sm:$0xf] %v3489_v46  ;;  %v3435_v6 = vpop.f32.mrf.mxu0 }
 0x268   : > { %v3479_v31 = vpop.f32.mrf.mxu1 }
 0x269   : > { %v3437_v11 = vpop.f32.mrf.mxu0 }
 0x26a   : > { %v3486_v34 = vcombine.low %v3435_v6, %v3437_v11  ;;  %v4122_v35 = vpop.f32.mrf.mxu1 }
 0x26b   : > { %v3439_v37 = vpop.f32.mrf.mxu0 }
 0x26c   : > { %v3488_v38 = vadd.f32 %v3486_v34, %v3038_v33 }
 0x26d   : > { %v3440_v40 = vpop.f32.mrf.mxu0 }
 0x26e   : > { %v3493_v41 = vld [vmem:[#allocation3 + $0x8] sm:$0xf]  ;;  %v3511_v42 = vmul.f32 %v3509_v36, %v3488_v38 }
 0x26f   : > { %v3512_v43 = vmul.f32 %v3507_v39, %v3493_v41 }
 0x270   : > { %v3514_v44 = vcombine.high %v3511_v42, %v3511_v42  ;;  %v3517_v19 = vsel %vm381_vm1, %v3511_v42, 0.0 }
 0x271   : > { %v3520_v47 = vsel %vm381_vm1, %v3512_v43, 0.0 }
 0x272   : > { %v3518_v45 = vsel %vm381_vm1, %v3514_v44, 0.0 }
 0x273   : > { %v3519_v8 = vadd.f32 %v3518_v45, %v3517_v19 }
 0x275   : > { %v3521_v23 = vadd.f32 %v3520_v47, %v3519_v8 }
 0x277   : > { %3522 = vadd.xlane.f32.xlu0 %v3521_v23 }
 0x300   : > { %v3523_v49 = vpop.xlane.xlu0 %3522 }
 0x301   : > { %4124 = vmatpush3.msk.msra.mxu0 %vm381_vm1, %v3523_v49 }
 0x302   : > { %4126 = vmatmul.mubr.msk.f32.vlgmr.msra.gmra.mxu0 %vm3525_vm0, %v3524_v48 }
 0x3c2   : > { %v3598_v50 = vpop.f32.mrf.mxu0 }
 0x3c3   : > { %v3602_v51 = vsub.f32 0.0, %v3598_v50 }
 0x3c4   : > { %v4127_v52 = vpop.f32.mrf.mxu0 }
 0x3c5   : > { %v3603_v53 = vmul.f32 1.442695, %v3602_v51 }
 0x3c7   : > { %4307 = vpow2.f32 %v3603_v53 }
 0x3d4   : > { %v4308_v54 = vpop.eup %4307 }
 0x3d5   : > { %v3605_v55 = vadd.f32 1.0, %v4308_v54 }
 0x3d7   : > { %4309 = vrcp.f32 %v3605_v55 }
 0x3e4   : > { %v4310_v56 = vpop.eup %4309 }
 0x3e5   : > { %3625 = vst.msk [vmem:[%s278_s9] sm:$0xf] %vm3624_vm2, %v4310_v56  ;;  %3610 = vperm.xlu1 %4252, %v4310_v56  }
 0x460   : > { %v3611_v60 = vpop.permute.xlu1 %3610 }
 0x461   : > { %v3618_v61 = vrot.slane %v3611_v60, %v3617_v59 }
 0x463   : > { %v3620_v62 = vmul.f32 %v3618_v61, %v3488_v38  ;;  %v3621_v63 = vmul.f32 %v3618_v61, %v3493_v41 }
 0x465   : > { %3622 = vst [vmem:[%s268_s7] sm:$0xff] %v3620_v62  ;;  %3623 = vst [vmem:[%s268_s7 + $0x8] sm:$0xf] %v3621_v63 }
 0x466   : > { %4406 = shalt.err (!%p4403_p13)
}
 0x467   : > { %s4407_s10 = scalar_lea.hbm %s5167_s28, 192  ;;  %s4411_s16 = scalar_lea.hbm %s5208_s4, 384 }
 0x468   : > { %p4408_p5 = scmp.ne.s32.totalorder %s5167_s28, %s4407_s10  ;;  %p4412_p4 = scmp.lt.s32.totalorder %s5167_s28, %s5208_s4 }
 0x469   : > { %p4413_p8 = scmp.lt.s32.totalorder %s4411_s16, %s4407_s10 }
 0x46a   : > { %p4409_p10 = pnand %p4408_p5, %p5225_p1 }
 0x46b   : > { %p4414_p3 = por %p4413_p8, %p4412_p4 }
 0x46c   : > { %p4410_p0 = pneg %p4409_p10 }
 0x46e   : > { %p4415_p11 = pnand %p4414_p3, %p4410_p0 }
 0x470   : > { %4418 = shalt.err (!%p4415_p11)
}
 0x471   : > { %4143 = dma.vmem_to_hbm [thread:$0]  (%p5225_p1), %s3646_s17, 192, %s5167_s28, %s3627_s8  }
 0x472 PF: > { %s3660_s12 = sand.u32 1, %s4449_s18   ;;  %p5226_p2 = scmp.ne.s32.totalorder %s5215_s25, 0 }
 0x473   : > { %p5227_p6 = scmp.ge.s32.totalorder %s4461_s21, 2  ;;  %s3661_s7 = scalar_lea.sflag [#allocation6], %s3660_s12 }
 0x475   : > { %p4157_p12 = pnand %p5227_p6, %p5226_p2 }
 0x477   : > { %p4158_p7 = pneg %p4157_p12 }
 0x479   : > { %4444 = dma.done.wait (%p4158_p7), %s3661_s7, 192  }
 0x47a   : > { %4446 = vsyncadd (%p4158_p7), %s3661_s7, 4294967104  ;;  %p20_p9 = scmp.ge.s32.totalorder %s4621_s15, 4   ;;  %s5228_s18 = smov %s4453_s19 }
 0x47b   : > { %s5229_s19 = smov %s4457_s20  ;;  %s5230_s20 = smov %s4637_s27 }
 0x47c   : > { %s5231_s21 = smov %s4621_s15  ;;  %22 = sbr.rel (!%p20_p9) target bundleno = 6 (0x6), region = 108 }
 0x481   :  { %3673 = vsyncpa [#allocation5], 1 }
 0x482   :  { %3675 = vsyncpa [#allocation5 + $0x1], 1 }
 0x483   :  { %3676 = vsyncpa [#allocation8], 1 }
 0x484   :  { %3677 = vsyncpa [#allocation6], 1 }
 0x485   :  { %3679 = vsyncpa [#allocation6 + $0x1], 1 }

</bundles_post_ra>
